<compile_context>
chip_gen: v7x
topology: tpu7x:2x2x1
jax: 0.10.0
libtpu: 0.0.40
codegen_flags: <defaults>
</compile_context>

<pallas_src>
import functools

import jax
import jax.numpy as jnp
from jax.experimental import pallas as pl
from jax.experimental.pallas import tpu as pltpu


HEAD_PAD = 128          # lane-dense padded width for the fused head output
ROW_TILE = 512          # row tile for 1x1-conv matmuls (fits v5e/v6e/v7x VMEM comfortably)
VMEM_LIMIT = 48 * 1024 * 1024   # safe on all generations (v7x physical VMEM is 64 MiB)


# ----------------------------- Pallas kernels ------------------------------

def _pw_conv_kernel(x_ref, w_ref, shift_ref, o_ref, *, relu6):
    """Pointwise conv as matmul: (TM, Cin) @ (Cin, Cout) + folded-BN shift, optional ReLU6."""
    y = jnp.dot(x_ref[...].astype(jnp.bfloat16), w_ref[...],
                preferred_element_type=jnp.float32)
    y = y + shift_ref[...]
    if relu6:
        y = jnp.clip(y, 0.0, 6.0)
    o_ref[...] = y.astype(o_ref.dtype)


def _pw_conv_res_kernel(x_ref, w_ref, shift_ref, res_ref, o_ref):
    """Projection (linear bottleneck) with the residual add fused in."""
    y = jnp.dot(x_ref[...].astype(jnp.bfloat16), w_ref[...],
                preferred_element_type=jnp.float32)
    y = y + shift_ref[...] + res_ref[...].astype(jnp.float32)
    o_ref[...] = y.astype(o_ref.dtype)


def _head_kernel(f_ref, wl_ref, sl_ref, w1_ref, b1_ref, w2_ref, b2_ref, o_ref):
    """Fused: last 1x1 conv (320->1280) + BN/ReLU6 + global max-pool + both FC heads.

    Heads are concatenated (w1: 1280x512) and block-diagonal (w2: 512x128 padded) so the final
    store is lane-dense; Dropout is identity in eval mode.
    """
    f = f_ref[...]                                           # (B, HW, 320) bf16
    b, hw, c = f.shape
    y = jnp.dot(f.reshape(b * hw, c).astype(jnp.bfloat16), wl_ref[...],
                preferred_element_type=jnp.float32)          # (B*HW, 1280)
    y = jnp.clip(y + sl_ref[...], 0.0, 6.0)
    x = jnp.max(y.reshape(b, hw, -1), axis=1)                # AdaptiveMaxPool2d((1,1)) -> (B, 1280)
    h = jnp.maximum(
        jnp.dot(x.astype(jnp.bfloat16), w1_ref[...],
                preferred_element_type=jnp.float32) + b1_ref[...], 0.0)   # (B, 512)
    o_ref[...] = (jnp.dot(h.astype(jnp.bfloat16), w2_ref[...],
                          preferred_element_type=jnp.float32) + b2_ref[...])  # (B, 128)


# --------------------------- Pallas call wrappers ---------------------------

def pw_conv_bn(x_nhwc, w, shift, *, relu6, residual=None, tm=ROW_TILE):
    """Row-tiled 1x1 conv + folded BN (+ ReLU6 / + fused residual) on an NHWC tensor."""
    B, H, W, Cin = x_nhwc.shape
    Cout = w.shape[1]
    rows = B * H * W
    x2d = x_nhwc.reshape(rows, Cin)

    TM = rows if rows <= tm else tm
    grid = (pl.cdiv(rows, TM),)

    in_specs = [
        pl.BlockSpec((TM, Cin), lambda i: (i, 0)),      # activation row tile
        pl.BlockSpec((Cin, Cout), lambda i: (0, 0)),    # full weight, resident
        pl.BlockSpec((1, Cout), lambda i: (0, 0)),      # folded-BN shift
    ]
    args = [x2d, w, shift.reshape(1, Cout)]
    if residual is not None:
        kernel = _pw_conv_res_kernel
        in_specs.append(pl.BlockSpec((TM, Cout), lambda i: (i, 0)))
        args.append(residual.reshape(rows, Cout))
    else:
        kernel = functools.partial(_pw_conv_kernel, relu6=relu6)

    flops = 2 * rows * Cin * Cout
    bytes_accessed = 2 * (rows * Cin + Cin * Cout + rows * Cout) + 4 * Cout

    y = pl.pallas_call(
        kernel,
        out_shape=jax.ShapeDtypeStruct((rows, Cout), jnp.bfloat16),
        grid=grid,
        in_specs=in_specs,
        out_specs=pl.BlockSpec((TM, Cout), lambda i: (i, 0)),
        compiler_params=pltpu.CompilerParams(
            dimension_semantics=("parallel",),          # megacore sharding on v7x
            vmem_limit_bytes=VMEM_LIMIT),
        cost_estimate=pl.CostEstimate(flops=flops, transcendentals=0,
                                      bytes_accessed=bytes_accessed),
    )(*args)
    return y.reshape(B, H, W, Cout)


def heads(feat_nhwc, p):
    """Fused last-conv + max-pool + two MLP heads -> lane-dense (B, 128) output."""
    B, H, W, C = feat_nhwc.shape
    feat = feat_nhwc.reshape(B, H * W, C)
    flops = 2 * (B * H * W * C * 1280 + B * 1280 * 512 + B * 512 * HEAD_PAD)
    bytes_accessed = 2 * (feat.size + p['last_w'].size + p['head_w1'].size
                          + p['head_w2'].size) + 4 * B * HEAD_PAD
    out = pl.pallas_call(
        _head_kernel,
        out_shape=jax.ShapeDtypeStruct((B, HEAD_PAD), jnp.float32),
        compiler_params=pltpu.CompilerParams(vmem_limit_bytes=VMEM_LIMIT),
        cost_estimate=pl.CostEstimate(flops=flops, transcendentals=0,
                                      bytes_accessed=bytes_accessed),
    )(feat, p['last_w'], p['last_shift'], p['head_w1'], p['head_b1'],
      p['head_w2'], p['head_b2'])
    return out


# ------------------------ plain-JAX glue (3x3 convs) ------------------------
# TODO(synk): 3x3 stem conv and depthwise 3x3 convs stay in lax.conv_general_dilated; a fully
#             fused expand+depthwise+project block kernel (pltpu.roll-based) is a future step.

def stem_conv(x, w, shift):
    y = jax.lax.conv_general_dilated(
        x, w, window_strides=(2, 2), padding=((1, 1), (1, 1)),
        dimension_numbers=('NHWC', 'HWIO', 'NHWC'))
    return jnp.clip(y + shift, 0.0, 6.0).astype(jnp.bfloat16)


def depthwise_conv_bn_relu6(x, w_hwc, shift, stride):
    C = x.shape[-1]
    y = jax.lax.conv_general_dilated(
        x, w_hwc.reshape(3, 3, 1, C), window_strides=(stride, stride),
        padding=((1, 1), (1, 1)), dimension_numbers=('NHWC', 'HWIO', 'NHWC'),
        feature_group_count=C, preferred_element_type=jnp.float32)
    return jnp.clip(y + shift, 0.0, 6.0).astype(jnp.bfloat16)


# ----------------------------- parameter setup ------------------------------

class _ParamGen:
    def __init__(self, key):
        self.key = key

    def w(self, shape, fan_in):
        self.key, sub = jax.random.split(self.key)
        return jnp.sqrt(2.0 / fan_in) * jax.random.normal(sub, shape, jnp.float32)

    def bn(self, c):
        self.key, s1 = jax.random.split(self.key)
        self.key, s2 = jax.random.split(self.key)
        scale = 1.0 + 0.1 * jax.random.normal(s1, (c,), jnp.float32)
        shift = 0.05 * jax.random.normal(s2, (c,), jnp.float32)
        return scale, shift

    def b(self, n):
        self.key, sub = jax.random.split(self.key)
        return 0.01 * jax.random.normal(sub, (1, n), jnp.float32)


_INVERTED_RESIDUAL_SETTING = [
    # t, c, n, s  (MobileNetV2)
    (1, 16, 1, 1),
    (6, 24, 2, 2),
    (6, 32, 3, 2),
    (6, 64, 4, 2),
    (6, 96, 3, 1),
    (6, 160, 3, 2),
    (6, 320, 1, 1),
]


def build_model(key, num_classes_gender=2, num_classes_age=8):
    """Returns (static_cfg, params).  static_cfg holds only Python ints/bools (kept out of the
    jitted pytree so strides / residual flags never become tracers)."""
    g = _ParamGen(key)
    params = {}
    block_cfg = []

    # stem: Conv2d(3, 32, 3, s=2, p=1) + BN + ReLU6 (BN scale folded into weight)
    stem_w = g.w((3, 3, 3, 32), fan_in=3 * 9)
    s, b = g.bn(32)
    params['stem_w'] = stem_w * s[None, None, None, :]
    params['stem_shift'] = b

    blocks = []
    in_c = 32
    for t, c, n, s0 in _INVERTED_RESIDUAL_SETTING:
        for i in range(n):
            stride = s0 if i == 0 else 1
            hidden = in_c * t
            block_cfg.append({'stride': stride,
                              'use_res': (stride == 1 and in_c == c),
                              'has_expand': (t != 1)})
            blk = {}
            if t != 1:
                ew = g.w((in_c, hidden), fan_in=in_c)
                es, eb = g.bn(hidden)
                blk['expand_w'] = (ew * es[None, :]).astype(jnp.bfloat16)
                blk['expand_shift'] = eb
            dw = g.w((3, 3, hidden), fan_in=9)
            ds_, db = g.bn(hidden)
            blk['dw_w'] = (dw * ds_[None, None, :]).astype(jnp.bfloat16)
            blk['dw_shift'] = db
            pw = g.w((hidden, c), fan_in=hidden)
            ps, pb = g.bn(c)
            blk['project_w'] = (pw * ps[None, :]).astype(jnp.bfloat16)
            blk['project_shift'] = pb
            blocks.append(blk)
            in_c = c
    params['blocks'] = blocks

    # final 1x1 conv 320 -> 1280 + BN + ReLU6 (fused into the head kernel)
    lw = g.w((in_c, 1280), fan_in=in_c)
    ls, lb = g.bn(1280)
    params['last_w'] = (lw * ls[None, :]).astype(jnp.bfloat16)
    params['last_shift'] = lb.reshape(1, 1280)

    # heads: Linear(1280,256)->ReLU->Dropout->Linear(256,nc), concatenated + block-diag padded
    w1g = g.w((1280, 256), fan_in=1280); b1g = g.b(256)
    w2g = g.w((256, num_classes_gender), fan_in=256); b2g = g.b(num_classes_gender)
    w1a = g.w((1280, 256), fan_in=1280); b1a = g.b(256)
    w2a = g.w((256, num_classes_age), fan_in=256); b2a = g.b(num_classes_age)

    params['head_w1'] = jnp.concatenate([w1g, w1a], axis=1).astype(jnp.bfloat16)  # (1280, 512)
    params['head_b1'] = jnp.concatenate([b1g, b1a], axis=1)                       # (1, 512)

    w2 = jnp.zeros((512, HEAD_PAD), jnp.float32)
    w2 = w2.at[:256, :num_classes_gender].set(w2g)
    w2 = w2.at[256:, num_classes_gender:num_classes_gender + num_classes_age].set(w2a)
    b2 = jnp.zeros((1, HEAD_PAD), jnp.float32)
    b2 = b2.at[:, :num_classes_gender].set(b2g)
    b2 = b2.at[:, num_classes_gender:num_classes_gender + num_classes_age].set(b2a)
    params['head_w2'] = w2.astype(jnp.bfloat16)
    params['head_b2'] = b2

    cfg = {'blocks': block_cfg,
           'num_gender': num_classes_gender,
           'num_age': num_classes_age}
    return cfg, params


# -------------------------------- forward -----------------------------------

def age_gender_forward(cfg, params, x_nchw):
    # layout: NCHW (PyTorch convention) -> NHWC for all kernel compute.
    x = jnp.transpose(x_nchw, (0, 2, 3, 1)).astype(jnp.float32)

    x = stem_conv(x, params['stem_w'], params['stem_shift'])

    for c, blk in zip(cfg['blocks'], params['blocks']):
        inp = x
        y = x
        if c['has_expand']:
            y = pw_conv_bn(y, blk['expand_w'], blk['expand_shift'], relu6=True)
        y = depthwise_conv_bn_relu6(y, blk['dw_w'], blk['dw_shift'], c['stride'])
        y = pw_conv_bn(y, blk['project_w'], blk['project_shift'], relu6=False,
                       residual=inp if c['use_res'] else None)
        x = y

    out = heads(x, params)                       # (B, 128) lane-dense, f32
    ng, na = cfg['num_gender'], cfg['num_age']
    gender = out[:, :ng]
    age = out[:, ng:ng + na]
    return gender, age


# --------------------------------- main --------------------------------------

if __name__ == "__main__":
    key = jax.random.PRNGKey(0)
    k_params, k_x = jax.random.split(key)

    cfg, params = build_model(k_params, num_classes_gender=2, num_classes_age=8)
    # Small input consistent with the module: batch=2, 3-channel image, 32x32 spatial
    # (MobileNetV2's stride-32 backbone reduces this to 1x1x1280 before the heads).
    x = jax.random.normal(k_x, (2, 3, 32, 32), jnp.float32)

    fwd = jax.jit(functools.partial(age_gender_forward, cfg))
    gender, age = fwd(params, x)
    jax.block_until_ready((gender, age))

    assert gender.shape == (2, 2) and age.shape == (2, 8)
    assert gender.dtype == jnp.float32 and age.dtype == jnp.float32
    print("KERNEL_OK")
</pallas_src>

<mosaic_0001>
module attributes {stable_mosaic.version = 11 : i64} {
  func.func @_pw_conv_kernel(%arg0: i32, %arg1: memref<512x32xbf16, #tpu.memory_space<vmem>>, %arg2: memref<32x16xbf16, #tpu.memory_space<vmem>>, %arg3: memref<1x16xf32, #tpu.memory_space<vmem>>, %arg4: memref<512x16xbf16, #tpu.memory_space<vmem>>) attributes {dimension_semantics = [#tpu.dimension_semantics<parallel>], iteration_bounds = array<i64: 1>, scalar_prefetch = 0 : i64, scratch_operands = 0 : i64, tpu.core_type = #tpu.core_type<tc>, window_params = [{transform_indices = @transform_0, window_bounds = array<i64: 512, 32>}, {pipeline_mode = #tpu.pipeline_mode<synchronous>, transform_indices = @transform_1, window_bounds = array<i64: 32, 16>}, {pipeline_mode = #tpu.pipeline_mode<synchronous>, transform_indices = @transform_2, window_bounds = array<i64: 1, 16>}, {transform_indices = @transform_3, window_bounds = array<i64: 512, 16>}]} {
    %c0 = arith.constant 0 : index
    %c0_0 = arith.constant 0 : index
    %0 = vector.load %arg1[%c0, %c0_0] : memref<512x32xbf16, #tpu.memory_space<vmem>>, vector<512x32xbf16>
    %c0_1 = arith.constant 0 : index
    %c0_2 = arith.constant 0 : index
    %1 = vector.load %arg2[%c0_1, %c0_2] : memref<32x16xbf16, #tpu.memory_space<vmem>>, vector<32x16xbf16>
    %cst = arith.constant dense<0.000000e+00> : vector<512x16xf32>
    %2 = tpu.matmul %0, %1, %cst {dimension_numbers = #tpu.dot_dimension_numbers<[1], [0], [0], [1], [0, 0, 1, 1], [], []>} : vector<512x32xbf16>, vector<32x16xbf16>, vector<512x16xf32> -> vector<512x16xf32>
    %c0_3 = arith.constant 0 : index
    %c0_4 = arith.constant 0 : index
    %3 = vector.load %arg3[%c0_3, %c0_4] : memref<1x16xf32, #tpu.memory_space<vmem>>, vector<1x16xf32>
    %4 = vector.broadcast %3 : vector<1x16xf32> to vector<512x16xf32>
    %5 = arith.addf %2, %4 : vector<512x16xf32>
    %6 = arith.truncf %5 : vector<512x16xf32> to vector<512x16xbf16>
    %c0_5 = arith.constant 0 : index
    %c0_6 = arith.constant 0 : index
    %7 = vector.load %arg4[%c0_5, %c0_6] : memref<512x16xbf16, #tpu.memory_space<vmem>>, vector<512x16xbf16>
    tpu.vector_store %arg4[%c0_5, %c0_6], %6 {strides = array<i32>} : memref<512x16xbf16, #tpu.memory_space<vmem>>, vector<512x16xbf16>,
    return
  }
  func.func @transform_0(%arg0: i32) -> (i32, i32) {
    %c0_i32 = arith.constant 0 : i32
    %c0_i32_0 = arith.constant 0 : i32
    return %arg0, %c0_i32 : i32, i32
  }
  func.func @transform_1(%arg0: i32) -> (i32, i32) {
    %c0_i32 = arith.constant 0 : i32
    %c0_i32_0 = arith.constant 0 : i32
    %c0_i32_1 = arith.constant 0 : i32
    return %c0_i32, %c0_i32_0 : i32, i32
  }
  func.func @transform_2(%arg0: i32) -> (i32, i32) {
    %c0_i32 = arith.constant 0 : i32
    %c0_i32_0 = arith.constant 0 : i32
    %c0_i32_1 = arith.constant 0 : i32
    return %c0_i32, %c0_i32_0 : i32, i32
  }
  func.func @transform_3(%arg0: i32) -> (i32, i32) {
    %c0_i32 = arith.constant 0 : i32
    %c0_i32_0 = arith.constant 0 : i32
    return %arg0, %c0_i32 : i32, i32
  }
}

module attributes {stable_mosaic.version = 11 : i64} {
  func.func @_pw_conv_kernel(%arg0: i32, %arg1: memref<512x16xbf16, #tpu.memory_space<vmem>>, %arg2: memref<16x96xbf16, #tpu.memory_space<vmem>>, %arg3: memref<1x96xf32, #tpu.memory_space<vmem>>, %arg4: memref<512x96xbf16, #tpu.memory_space<vmem>>) attributes {dimension_semantics = [#tpu.dimension_semantics<parallel>], iteration_bounds = array<i64: 1>, scalar_prefetch = 0 : i64, scratch_operands = 0 : i64, tpu.core_type = #tpu.core_type<tc>, window_params = [{transform_indices = @transform_0, window_bounds = array<i64: 512, 16>}, {pipeline_mode = #tpu.pipeline_mode<synchronous>, transform_indices = @transform_1, window_bounds = array<i64: 16, 96>}, {pipeline_mode = #tpu.pipeline_mode<synchronous>, transform_indices = @transform_2, window_bounds = array<i64: 1, 96>}, {transform_indices = @transform_3, window_bounds = array<i64: 512, 96>}]} {
    %c0 = arith.constant 0 : index
    %c0_0 = arith.constant 0 : index
    %0 = vector.load %arg1[%c0, %c0_0] : memref<512x16xbf16, #tpu.memory_space<vmem>>, vector<512x16xbf16>
    %c0_1 = arith.constant 0 : index
    %c0_2 = arith.constant 0 : index
    %1 = vector.load %arg2[%c0_1, %c0_2] : memref<16x96xbf16, #tpu.memory_space<vmem>>, vector<16x96xbf16>
    %cst = arith.constant dense<0.000000e+00> : vector<512x96xf32>
    %2 = tpu.matmul %0, %1, %cst {dimension_numbers = #tpu.dot_dimension_numbers<[1], [0], [0], [1], [0, 0, 1, 1], [], []>} : vector<512x16xbf16>, vector<16x96xbf16>, vector<512x96xf32> -> vector<512x96xf32>
    %c0_3 = arith.constant 0 : index
    %c0_4 = arith.constant 0 : index
    %3 = vector.load %arg3[%c0_3, %c0_4] : memref<1x96xf32, #tpu.memory_space<vmem>>, vector<1x96xf32>
    %4 = vector.broadcast %3 : vector<1x96xf32> to vector<512x96xf32>
    %5 = arith.addf %2, %4 : vector<512x96xf32>
    %cst_5 = arith.constant 0.000000e+00 : f32
    %cst_6 = arith.constant 6.000000e+00 : f32
    %6 = vector.broadcast %cst_5 : f32 to vector<512x96xf32>
    %7 = arith.maximumf %6, %5 : vector<512x96xf32>
    %8 = vector.broadcast %cst_6 : f32 to vector<512x96xf32>
    %9 = arith.minimumf %8, %7 : vector<512x96xf32>
    %10 = arith.truncf %9 : vector<512x96xf32> to vector<512x96xbf16>
    %c0_7 = arith.constant 0 : index
    %c0_8 = arith.constant 0 : index
    %11 = vector.load %arg4[%c0_7, %c0_8] : memref<512x96xbf16, #tpu.memory_space<vmem>>, vector<512x96xbf16>
    tpu.vector_store %arg4[%c0_7, %c0_8], %10 {strides = array<i32>} : memref<512x96xbf16, #tpu.memory_space<vmem>>, vector<512x96xbf16>,
    return
  }
  func.func @transform_0(%arg0: i32) -> (i32, i32) {
    %c0_i32 = arith.constant 0 : i32
    %c0_i32_0 = arith.constant 0 : i32
    return %arg0, %c0_i32 : i32, i32
  }
  func.func @transform_1(%arg0: i32) -> (i32, i32) {
    %c0_i32 = arith.constant 0 : i32
    %c0_i32_0 = arith.constant 0 : i32
    %c0_i32_1 = arith.constant 0 : i32
    return %c0_i32, %c0_i32_0 : i32, i32
  }
  func.func @transform_2(%arg0: i32) -> (i32, i32) {
    %c0_i32 = arith.constant 0 : i32
    %c0_i32_0 = arith.constant 0 : i32
    %c0_i32_1 = arith.constant 0 : i32
    return %c0_i32, %c0_i32_0 : i32, i32
  }
  func.func @transform_3(%arg0: i32) -> (i32, i32) {
    %c0_i32 = arith.constant 0 : i32
    %c0_i32_0 = arith.constant 0 : i32
    return %arg0, %c0_i32 : i32, i32
  }
}

module attributes {stable_mosaic.version = 11 : i64} {
  func.func @_pw_conv_kernel(%arg0: i32, %arg1: memref<128x96xbf16, #tpu.memory_space<vmem>>, %arg2: memref<96x24xbf16, #tpu.memory_space<vmem>>, %arg3: memref<1x24xf32, #tpu.memory_space<vmem>>, %arg4: memref<128x24xbf16, #tpu.memory_space<vmem>>) attributes {dimension_semantics = [#tpu.dimension_semantics<parallel>], iteration_bounds = array<i64: 1>, scalar_prefetch = 0 : i64, scratch_operands = 0 : i64, tpu.core_type = #tpu.core_type<tc>, window_params = [{transform_indices = @transform_0, window_bounds = array<i64: 128, 96>}, {pipeline_mode = #tpu.pipeline_mode<synchronous>, transform_indices = @transform_1, window_bounds = array<i64: 96, 24>}, {pipeline_mode = #tpu.pipeline_mode<synchronous>, transform_indices = @transform_2, window_bounds = array<i64: 1, 24>}, {transform_indices = @transform_3, window_bounds = array<i64: 128, 24>}]} {
    %c0 = arith.constant 0 : index
    %c0_0 = arith.constant 0 : index
    %0 = vector.load %arg1[%c0, %c0_0] : memref<128x96xbf16, #tpu.memory_space<vmem>>, vector<128x96xbf16>
    %c0_1 = arith.constant 0 : index
    %c0_2 = arith.constant 0 : index
    %1 = vector.load %arg2[%c0_1, %c0_2] : memref<96x24xbf16, #tpu.memory_space<vmem>>, vector<96x24xbf16>
    %cst = arith.constant dense<0.000000e+00> : vector<128x24xf32>
    %2 = tpu.matmul %0, %1, %cst {dimension_numbers = #tpu.dot_dimension_numbers<[1], [0], [0], [1], [0, 0, 1, 1], [], []>} : vector<128x96xbf16>, vector<96x24xbf16>, vector<128x24xf32> -> vector<128x24xf32>
    %c0_3 = arith.constant 0 : index
    %c0_4 = arith.constant 0 : index
    %3 = vector.load %arg3[%c0_3, %c0_4] : memref<1x24xf32, #tpu.memory_space<vmem>>, vector<1x24xf32>
    %4 = vector.broadcast %3 : vector<1x24xf32> to vector<128x24xf32>
    %5 = arith.addf %2, %4 : vector<128x24xf32>
    %6 = arith.truncf %5 : vector<128x24xf32> to vector<128x24xbf16>
    %c0_5 = arith.constant 0 : index
    %c0_6 = arith.constant 0 : index
    %7 = vector.load %arg4[%c0_5, %c0_6] : memref<128x24xbf16, #tpu.memory_space<vmem>>, vector<128x24xbf16>
    tpu.vector_store %arg4[%c0_5, %c0_6], %6 {strides = array<i32>} : memref<128x24xbf16, #tpu.memory_space<vmem>>, vector<128x24xbf16>,
    return
  }
  func.func @transform_0(%arg0: i32) -> (i32, i32) {
    %c0_i32 = arith.constant 0 : i32
    %c0_i32_0 = arith.constant 0 : i32
    return %arg0, %c0_i32 : i32, i32
  }
  func.func @transform_1(%arg0: i32) -> (i32, i32) {
    %c0_i32 = arith.constant 0 : i32
    %c0_i32_0 = arith.constant 0 : i32
    %c0_i32_1 = arith.constant 0 : i32
    return %c0_i32, %c0_i32_0 : i32, i32
  }
  func.func @transform_2(%arg0: i32) -> (i32, i32) {
    %c0_i32 = arith.constant 0 : i32
    %c0_i32_0 = arith.constant 0 : i32
    %c0_i32_1 = arith.constant 0 : i32
    return %c0_i32, %c0_i32_0 : i32, i32
  }
  func.func @transform_3(%arg0: i32) -> (i32, i32) {
    %c0_i32 = arith.constant 0 : i32
    %c0_i32_0 = arith.constant 0 : i32
    return %arg0, %c0_i32 : i32, i32
  }
}

module attributes {stable_mosaic.version = 11 : i64} {
  func.func @_pw_conv_kernel(%arg0: i32, %arg1: memref<128x24xbf16, #tpu.memory_space<vmem>>, %arg2: memref<24x144xbf16, #tpu.memory_space<vmem>>, %arg3: memref<1x144xf32, #tpu.memory_space<vmem>>, %arg4: memref<128x144xbf16, #tpu.memory_space<vmem>>) attributes {dimension_semantics = [#tpu.dimension_semantics<parallel>], iteration_bounds = array<i64: 1>, scalar_prefetch = 0 : i64, scratch_operands = 0 : i64, tpu.core_type = #tpu.core_type<tc>, window_params = [{transform_indices = @transform_0, window_bounds = array<i64: 128, 24>}, {pipeline_mode = #tpu.pipeline_mode<synchronous>, transform_indices = @transform_1, window_bounds = array<i64: 24, 144>}, {pipeline_mode = #tpu.pipeline_mode<synchronous>, transform_indices = @transform_2, window_bounds = array<i64: 1, 144>}, {transform_indices = @transform_3, window_bounds = array<i64: 128, 144>}]} {
    %c0 = arith.constant 0 : index
    %c0_0 = arith.constant 0 : index
    %0 = vector.load %arg1[%c0, %c0_0] : memref<128x24xbf16, #tpu.memory_space<vmem>>, vector<128x24xbf16>
    %c0_1 = arith.constant 0 : index
    %c0_2 = arith.constant 0 : index
    %1 = vector.load %arg2[%c0_1, %c0_2] : memref<24x144xbf16, #tpu.memory_space<vmem>>, vector<24x144xbf16>
    %cst = arith.constant dense<0.000000e+00> : vector<128x144xf32>
    %2 = tpu.matmul %0, %1, %cst {dimension_numbers = #tpu.dot_dimension_numbers<[1], [0], [0], [1], [0, 0, 1, 1], [], []>} : vector<128x24xbf16>, vector<24x144xbf16>, vector<128x144xf32> -> vector<128x144xf32>
    %c0_3 = arith.constant 0 : index
    %c0_4 = arith.constant 0 : index
    %3 = vector.load %arg3[%c0_3, %c0_4] : memref<1x144xf32, #tpu.memory_space<vmem>>, vector<1x144xf32>
    %4 = vector.broadcast %3 : vector<1x144xf32> to vector<128x144xf32>
    %5 = arith.addf %2, %4 : vector<128x144xf32>
    %cst_5 = arith.constant 0.000000e+00 : f32
    %cst_6 = arith.constant 6.000000e+00 : f32
    %6 = vector.broadcast %cst_5 : f32 to vector<128x144xf32>
    %7 = arith.maximumf %6, %5 : vector<128x144xf32>
    %8 = vector.broadcast %cst_6 : f32 to vector<128x144xf32>
    %9 = arith.minimumf %8, %7 : vector<128x144xf32>
    %10 = arith.truncf %9 : vector<128x144xf32> to vector<128x144xbf16>
    %c0_7 = arith.constant 0 : index
    %c0_8 = arith.constant 0 : index
    %11 = vector.load %arg4[%c0_7, %c0_8] : memref<128x144xbf16, #tpu.memory_space<vmem>>, vector<128x144xbf16>
    tpu.vector_store %arg4[%c0_7, %c0_8], %10 {strides = array<i32>} : memref<128x144xbf16, #tpu.memory_space<vmem>>, vector<128x144xbf16>,
    return
  }
  func.func @transform_0(%arg0: i32) -> (i32, i32) {
    %c0_i32 = arith.constant 0 : i32
    %c0_i32_0 = arith.constant 0 : i32
    return %arg0, %c0_i32 : i32, i32
  }
  func.func @transform_1(%arg0: i32) -> (i32, i32) {
    %c0_i32 = arith.constant 0 : i32
    %c0_i32_0 = arith.constant 0 : i32
    %c0_i32_1 = arith.constant 0 : i32
    return %c0_i32, %c0_i32_0 : i32, i32
  }
  func.func @transform_2(%arg0: i32) -> (i32, i32) {
    %c0_i32 = arith.constant 0 : i32
    %c0_i32_0 = arith.constant 0 : i32
    %c0_i32_1 = arith.constant 0 : i32
    return %c0_i32, %c0_i32_0 : i32, i32
  }
  func.func @transform_3(%arg0: i32) -> (i32, i32) {
    %c0_i32 = arith.constant 0 : i32
    %c0_i32_0 = arith.constant 0 : i32
    return %arg0, %c0_i32 : i32, i32
  }
}

module attributes {stable_mosaic.version = 11 : i64} {
  func.func @_pw_conv_res_kernel(%arg0: i32, %arg1: memref<128x144xbf16, #tpu.memory_space<vmem>>, %arg2: memref<144x24xbf16, #tpu.memory_space<vmem>>, %arg3: memref<1x24xf32, #tpu.memory_space<vmem>>, %arg4: memref<128x24xbf16, #tpu.memory_space<vmem>>, %arg5: memref<128x24xbf16, #tpu.memory_space<vmem>>) attributes {dimension_semantics = [#tpu.dimension_semantics<parallel>], iteration_bounds = array<i64: 1>, scalar_prefetch = 0 : i64, scratch_operands = 0 : i64, tpu.core_type = #tpu.core_type<tc>, window_params = [{transform_indices = @transform_0, window_bounds = array<i64: 128, 144>}, {pipeline_mode = #tpu.pipeline_mode<synchronous>, transform_indices = @transform_1, window_bounds = array<i64: 144, 24>}, {pipeline_mode = #tpu.pipeline_mode<synchronous>, transform_indices = @transform_2, window_bounds = array<i64: 1, 24>}, {transform_indices = @transform_3, window_bounds = array<i64: 128, 24>}, {transform_indices = @transform_4, window_bounds = array<i64: 128, 24>}]} {
    %c0 = arith.constant 0 : index
    %c0_0 = arith.constant 0 : index
    %0 = vector.load %arg1[%c0, %c0_0] : memref<128x144xbf16, #tpu.memory_space<vmem>>, vector<128x144xbf16>
    %c0_1 = arith.constant 0 : index
    %c0_2 = arith.constant 0 : index
    %1 = vector.load %arg2[%c0_1, %c0_2] : memref<144x24xbf16, #tpu.memory_space<vmem>>, vector<144x24xbf16>
    %cst = arith.constant dense<0.000000e+00> : vector<128x24xf32>
    %2 = tpu.matmul %0, %1, %cst {dimension_numbers = #tpu.dot_dimension_numbers<[1], [0], [0], [1], [0, 0, 1, 1], [], []>} : vector<128x144xbf16>, vector<144x24xbf16>, vector<128x24xf32> -> vector<128x24xf32>
    %c0_3 = arith.constant 0 : index
    %c0_4 = arith.constant 0 : index
    %3 = vector.load %arg3[%c0_3, %c0_4] : memref<1x24xf32, #tpu.memory_space<vmem>>, vector<1x24xf32>
    %4 = vector.broadcast %3 : vector<1x24xf32> to vector<128x24xf32>
    %5 = arith.addf %2, %4 : vector<128x24xf32>
    %c0_5 = arith.constant 0 : index
    %c0_6 = arith.constant 0 : index
    %6 = vector.load %arg4[%c0_5, %c0_6] : memref<128x24xbf16, #tpu.memory_space<vmem>>, vector<128x24xbf16>
    %7 = arith.extf %6 : vector<128x24xbf16> to vector<128x24xf32>
    %8 = arith.addf %5, %7 : vector<128x24xf32>
    %9 = arith.truncf %8 : vector<128x24xf32> to vector<128x24xbf16>
    %c0_7 = arith.constant 0 : index
    %c0_8 = arith.constant 0 : index
    %10 = vector.load %arg5[%c0_7, %c0_8] : memref<128x24xbf16, #tpu.memory_space<vmem>>, vector<128x24xbf16>
    tpu.vector_store %arg5[%c0_7, %c0_8], %9 {strides = array<i32>} : memref<128x24xbf16, #tpu.memory_space<vmem>>, vector<128x24xbf16>,
    return
  }
  func.func @transform_0(%arg0: i32) -> (i32, i32) {
    %c0_i32 = arith.constant 0 : i32
    %c0_i32_0 = arith.constant 0 : i32
    return %arg0, %c0_i32 : i32, i32
  }
  func.func @transform_1(%arg0: i32) -> (i32, i32) {
    %c0_i32 = arith.constant 0 : i32
    %c0_i32_0 = arith.constant 0 : i32
    %c0_i32_1 = arith.constant 0 : i32
    return %c0_i32, %c0_i32_0 : i32, i32
  }
  func.func @transform_2(%arg0: i32) -> (i32, i32) {
    %c0_i32 = arith.constant 0 : i32
    %c0_i32_0 = arith.constant 0 : i32
    %c0_i32_1 = arith.constant 0 : i32
    return %c0_i32, %c0_i32_0 : i32, i32
  }
  func.func @transform_3(%arg0: i32) -> (i32, i32) {
    %c0_i32 = arith.constant 0 : i32
    %c0_i32_0 = arith.constant 0 : i32
    return %arg0, %c0_i32 : i32, i32
  }
  func.func @transform_4(%arg0: i32) -> (i32, i32) {
    %c0_i32 = arith.constant 0 : i32
    %c0_i32_0 = arith.constant 0 : i32
    return %arg0, %c0_i32 : i32, i32
  }
}

module attributes {stable_mosaic.version = 11 : i64} {
  func.func @_pw_conv_kernel(%arg0: i32, %arg1: memref<32x32xbf16, #tpu.memory_space<vmem>>, %arg2: memref<32x192xbf16, #tpu.memory_space<vmem>>, %arg3: memref<1x192xf32, #tpu.memory_space<vmem>>, %arg4: memref<32x192xbf16, #tpu.memory_space<vmem>>) attributes {dimension_semantics = [#tpu.dimension_semantics<parallel>], iteration_bounds = array<i64: 1>, scalar_prefetch = 0 : i64, scratch_operands = 0 : i64, tpu.core_type = #tpu.core_type<tc>, window_params = [{transform_indices = @transform_0, window_bounds = array<i64: 32, 32>}, {pipeline_mode = #tpu.pipeline_mode<synchronous>, transform_indices = @transform_1, window_bounds = array<i64: 32, 192>}, {pipeline_mode = #tpu.pipeline_mode<synchronous>, transform_indices = @transform_2, window_bounds = array<i64: 1, 192>}, {transform_indices = @transform_3, window_bounds = array<i64: 32, 192>}]} {
    %c0 = arith.constant 0 : index
    %c0_0 = arith.constant 0 : index
    %0 = vector.load %arg1[%c0, %c0_0] : memref<32x32xbf16, #tpu.memory_space<vmem>>, vector<32x32xbf16>
    %c0_1 = arith.constant 0 : index
    %c0_2 = arith.constant 0 : index
    %1 = vector.load %arg2[%c0_1, %c0_2] : memref<32x192xbf16, #tpu.memory_space<vmem>>, vector<32x192xbf16>
    %cst = arith.constant dense<0.000000e+00> : vector<32x192xf32>
    %2 = tpu.matmul %0, %1, %cst {dimension_numbers = #tpu.dot_dimension_numbers<[1], [0], [0], [1], [0, 0, 1, 1], [], []>} : vector<32x32xbf16>, vector<32x192xbf16>, vector<32x192xf32> -> vector<32x192xf32>
    %c0_3 = arith.constant 0 : index
    %c0_4 = arith.constant 0 : index
    %3 = vector.load %arg3[%c0_3, %c0_4] : memref<1x192xf32, #tpu.memory_space<vmem>>, vector<1x192xf32>
    %4 = vector.broadcast %3 : vector<1x192xf32> to vector<32x192xf32>
    %5 = arith.addf %2, %4 : vector<32x192xf32>
    %cst_5 = arith.constant 0.000000e+00 : f32
    %cst_6 = arith.constant 6.000000e+00 : f32
    %6 = vector.broadcast %cst_5 : f32 to vector<32x192xf32>
    %7 = arith.maximumf %6, %5 : vector<32x192xf32>
    %8 = vector.broadcast %cst_6 : f32 to vector<32x192xf32>
    %9 = arith.minimumf %8, %7 : vector<32x192xf32>
    %10 = arith.truncf %9 : vector<32x192xf32> to vector<32x192xbf16>
    %c0_7 = arith.constant 0 : index
    %c0_8 = arith.constant 0 : index
    %11 = vector.load %arg4[%c0_7, %c0_8] : memref<32x192xbf16, #tpu.memory_space<vmem>>, vector<32x192xbf16>
    tpu.vector_store %arg4[%c0_7, %c0_8], %10 {strides = array<i32>} : memref<32x192xbf16, #tpu.memory_space<vmem>>, vector<32x192xbf16>,
    return
  }
  func.func @transform_0(%arg0: i32) -> (i32, i32) {
    %c0_i32 = arith.constant 0 : i32
    %c0_i32_0 = arith.constant 0 : i32
    return %arg0, %c0_i32 : i32, i32
  }
  func.func @transform_1(%arg0: i32) -> (i32, i32) {
    %c0_i32 = arith.constant 0 : i32
    %c0_i32_0 = arith.constant 0 : i32
    %c0_i32_1 = arith.constant 0 : i32
    return %c0_i32, %c0_i32_0 : i32, i32
  }
  func.func @transform_2(%arg0: i32) -> (i32, i32) {
    %c0_i32 = arith.constant 0 : i32
    %c0_i32_0 = arith.constant 0 : i32
    %c0_i32_1 = arith.constant 0 : i32
    return %c0_i32, %c0_i32_0 : i32, i32
  }
  func.func @transform_3(%arg0: i32) -> (i32, i32) {
    %c0_i32 = arith.constant 0 : i32
    %c0_i32_0 = arith.constant 0 : i32
    return %arg0, %c0_i32 : i32, i32
  }
}

module attributes {stable_mosaic.version = 11 : i64} {
  func.func @_pw_conv_kernel(%arg0: i32, %arg1: memref<32x144xbf16, #tpu.memory_space<vmem>>, %arg2: memref<144x32xbf16, #tpu.memory_space<vmem>>, %arg3: memref<1x32xf32, #tpu.memory_space<vmem>>, %arg4: memref<32x32xbf16, #tpu.memory_space<vmem>>) attributes {dimension_semantics = [#tpu.dimension_semantics<parallel>], iteration_bounds = array<i64: 1>, scalar_prefetch = 0 : i64, scratch_operands = 0 : i64, tpu.core_type = #tpu.core_type<tc>, window_params = [{transform_indices = @transform_0, window_bounds = array<i64: 32, 144>}, {pipeline_mode = #tpu.pipeline_mode<synchronous>, transform_indices = @transform_1, window_bounds = array<i64: 144, 32>}, {pipeline_mode = #tpu.pipeline_mode<synchronous>, transform_indices = @transform_2, window_bounds = array<i64: 1, 32>}, {transform_indices = @transform_3, window_bounds = array<i64: 32, 32>}]} {
    %c0 = arith.constant 0 : index
    %c0_0 = arith.constant 0 : index
    %0 = vector.load %arg1[%c0, %c0_0] : memref<32x144xbf16, #tpu.memory_space<vmem>>, vector<32x144xbf16>
    %c0_1 = arith.constant 0 : index
    %c0_2 = arith.constant 0 : index
    %1 = vector.load %arg2[%c0_1, %c0_2] : memref<144x32xbf16, #tpu.memory_space<vmem>>, vector<144x32xbf16>
    %cst = arith.constant dense<0.000000e+00> : vector<32x32xf32>
    %2 = tpu.matmul %0, %1, %cst {dimension_numbers = #tpu.dot_dimension_numbers<[1], [0], [0], [1], [0, 0, 1, 1], [], []>} : vector<32x144xbf16>, vector<144x32xbf16>, vector<32x32xf32> -> vector<32x32xf32>
    %c0_3 = arith.constant 0 : index
    %c0_4 = arith.constant 0 : index
    %3 = vector.load %arg3[%c0_3, %c0_4] : memref<1x32xf32, #tpu.memory_space<vmem>>, vector<1x32xf32>
    %4 = vector.broadcast %3 : vector<1x32xf32> to vector<32x32xf32>
    %5 = arith.addf %2, %4 : vector<32x32xf32>
    %6 = arith.truncf %5 : vector<32x32xf32> to vector<32x32xbf16>
    %c0_5 = arith.constant 0 : index
    %c0_6 = arith.constant 0 : index
    %7 = vector.load %arg4[%c0_5, %c0_6] : memref<32x32xbf16, #tpu.memory_space<vmem>>, vector<32x32xbf16>
    tpu.vector_store %arg4[%c0_5, %c0_6], %6 {strides = array<i32>} : memref<32x32xbf16, #tpu.memory_space<vmem>>, vector<32x32xbf16>,
    return
  }
  func.func @transform_0(%arg0: i32) -> (i32, i32) {
    %c0_i32 = arith.constant 0 : i32
    %c0_i32_0 = arith.constant 0 : i32
    return %arg0, %c0_i32 : i32, i32
  }
  func.func @transform_1(%arg0: i32) -> (i32, i32) {
    %c0_i32 = arith.constant 0 : i32
    %c0_i32_0 = arith.constant 0 : i32
    %c0_i32_1 = arith.constant 0 : i32
    return %c0_i32, %c0_i32_0 : i32, i32
  }
  func.func @transform_2(%arg0: i32) -> (i32, i32) {
    %c0_i32 = arith.constant 0 : i32
    %c0_i32_0 = arith.constant 0 : i32
    %c0_i32_1 = arith.constant 0 : i32
    return %c0_i32, %c0_i32_0 : i32, i32
  }
  func.func @transform_3(%arg0: i32) -> (i32, i32) {
    %c0_i32 = arith.constant 0 : i32
    %c0_i32_0 = arith.constant 0 : i32
    return %arg0, %c0_i32 : i32, i32
  }
}

module attributes {stable_mosaic.version = 11 : i64} {
  func.func @_pw_conv_res_kernel(%arg0: i32, %arg1: memref<32x192xbf16, #tpu.memory_space<vmem>>, %arg2: memref<192x32xbf16, #tpu.memory_space<vmem>>, %arg3: memref<1x32xf32, #tpu.memory_space<vmem>>, %arg4: memref<32x32xbf16, #tpu.memory_space<vmem>>, %arg5: memref<32x32xbf16, #tpu.memory_space<vmem>>) attributes {dimension_semantics = [#tpu.dimension_semantics<parallel>], iteration_bounds = array<i64: 1>, scalar_prefetch = 0 : i64, scratch_operands = 0 : i64, tpu.core_type = #tpu.core_type<tc>, window_params = [{transform_indices = @transform_0, window_bounds = array<i64: 32, 192>}, {pipeline_mode = #tpu.pipeline_mode<synchronous>, transform_indices = @transform_1, window_bounds = array<i64: 192, 32>}, {pipeline_mode = #tpu.pipeline_mode<synchronous>, transform_indices = @transform_2, window_bounds = array<i64: 1, 32>}, {transform_indices = @transform_3, window_bounds = array<i64: 32, 32>}, {transform_indices = @transform_4, window_bounds = array<i64: 32, 32>}]} {
    %c0 = arith.constant 0 : index
    %c0_0 = arith.constant 0 : index
    %0 = vector.load %arg1[%c0, %c0_0] : memref<32x192xbf16, #tpu.memory_space<vmem>>, vector<32x192xbf16>
    %c0_1 = arith.constant 0 : index
    %c0_2 = arith.constant 0 : index
    %1 = vector.load %arg2[%c0_1, %c0_2] : memref<192x32xbf16, #tpu.memory_space<vmem>>, vector<192x32xbf16>
    %cst = arith.constant dense<0.000000e+00> : vector<32x32xf32>
    %2 = tpu.matmul %0, %1, %cst {dimension_numbers = #tpu.dot_dimension_numbers<[1], [0], [0], [1], [0, 0, 1, 1], [], []>} : vector<32x192xbf16>, vector<192x32xbf16>, vector<32x32xf32> -> vector<32x32xf32>
    %c0_3 = arith.constant 0 : index
    %c0_4 = arith.constant 0 : index
    %3 = vector.load %arg3[%c0_3, %c0_4] : memref<1x32xf32, #tpu.memory_space<vmem>>, vector<1x32xf32>
    %4 = vector.broadcast %3 : vector<1x32xf32> to vector<32x32xf32>
    %5 = arith.addf %2, %4 : vector<32x32xf32>
    %c0_5 = arith.constant 0 : index
    %c0_6 = arith.constant 0 : index
    %6 = vector.load %arg4[%c0_5, %c0_6] : memref<32x32xbf16, #tpu.memory_space<vmem>>, vector<32x32xbf16>
    %7 = arith.extf %6 : vector<32x32xbf16> to vector<32x32xf32>
    %8 = arith.addf %5, %7 : vector<32x32xf32>
    %9 = arith.truncf %8 : vector<32x32xf32> to vector<32x32xbf16>
    %c0_7 = arith.constant 0 : index
    %c0_8 = arith.constant 0 : index
    %10 = vector.load %arg5[%c0_7, %c0_8] : memref<32x32xbf16, #tpu.memory_space<vmem>>, vector<32x32xbf16>
    tpu.vector_store %arg5[%c0_7, %c0_8], %9 {strides = array<i32>} : memref<32x32xbf16, #tpu.memory_space<vmem>>, vector<32x32xbf16>,
    return
  }
  func.func @transform_0(%arg0: i32) -> (i32, i32) {
    %c0_i32 = arith.constant 0 : i32
    %c0_i32_0 = arith.constant 0 : i32
    return %arg0, %c0_i32 : i32, i32
  }
  func.func @transform_1(%arg0: i32) -> (i32, i32) {
    %c0_i32 = arith.constant 0 : i32
    %c0_i32_0 = arith.constant 0 : i32
    %c0_i32_1 = arith.constant 0 : i32
    return %c0_i32, %c0_i32_0 : i32, i32
  }
  func.func @transform_2(%arg0: i32) -> (i32, i32) {
    %c0_i32 = arith.constant 0 : i32
    %c0_i32_0 = arith.constant 0 : i32
    %c0_i32_1 = arith.constant 0 : i32
    return %c0_i32, %c0_i32_0 : i32, i32
  }
  func.func @transform_3(%arg0: i32) -> (i32, i32) {
    %c0_i32 = arith.constant 0 : i32
    %c0_i32_0 = arith.constant 0 : i32
    return %arg0, %c0_i32 : i32, i32
  }
  func.func @transform_4(%arg0: i32) -> (i32, i32) {
    %c0_i32 = arith.constant 0 : i32
    %c0_i32_0 = arith.constant 0 : i32
    return %arg0, %c0_i32 : i32, i32
  }
}

module attributes {stable_mosaic.version = 11 : i64} {
  func.func @_pw_conv_kernel(%arg0: i32, %arg1: memref<8x64xbf16, #tpu.memory_space<vmem>>, %arg2: memref<64x384xbf16, #tpu.memory_space<vmem>>, %arg3: memref<1x384xf32, #tpu.memory_space<vmem>>, %arg4: memref<8x384xbf16, #tpu.memory_space<vmem>>) attributes {dimension_semantics = [#tpu.dimension_semantics<parallel>], iteration_bounds = array<i64: 1>, scalar_prefetch = 0 : i64, scratch_operands = 0 : i64, tpu.core_type = #tpu.core_type<tc>, window_params = [{transform_indices = @transform_0, window_bounds = array<i64: 8, 64>}, {pipeline_mode = #tpu.pipeline_mode<synchronous>, transform_indices = @transform_1, window_bounds = array<i64: 64, 384>}, {pipeline_mode = #tpu.pipeline_mode<synchronous>, transform_indices = @transform_2, window_bounds = array<i64: 1, 384>}, {transform_indices = @transform_3, window_bounds = array<i64: 8, 384>}]} {
    %c0 = arith.constant 0 : index
    %c0_0 = arith.constant 0 : index
    %0 = vector.load %arg1[%c0, %c0_0] : memref<8x64xbf16, #tpu.memory_space<vmem>>, vector<8x64xbf16>
    %c0_1 = arith.constant 0 : index
    %c0_2 = arith.constant 0 : index
    %1 = vector.load %arg2[%c0_1, %c0_2] : memref<64x384xbf16, #tpu.memory_space<vmem>>, vector<64x384xbf16>
    %cst = arith.constant dense<0.000000e+00> : vector<8x384xf32>
    %2 = tpu.matmul %0, %1, %cst {dimension_numbers = #tpu.dot_dimension_numbers<[1], [0], [0], [1], [0, 0, 1, 1], [], []>} : vector<8x64xbf16>, vector<64x384xbf16>, vector<8x384xf32> -> vector<8x384xf32>
    %c0_3 = arith.constant 0 : index
    %c0_4 = arith.constant 0 : index
    %3 = vector.load %arg3[%c0_3, %c0_4] : memref<1x384xf32, #tpu.memory_space<vmem>>, vector<1x384xf32>
    %4 = vector.broadcast %3 : vector<1x384xf32> to vector<8x384xf32>
    %5 = arith.addf %2, %4 : vector<8x384xf32>
    %cst_5 = arith.constant 0.000000e+00 : f32
    %cst_6 = arith.constant 6.000000e+00 : f32
    %6 = vector.broadcast %cst_5 : f32 to vector<8x384xf32>
    %7 = arith.maximumf %6, %5 : vector<8x384xf32>
    %8 = vector.broadcast %cst_6 : f32 to vector<8x384xf32>
    %9 = arith.minimumf %8, %7 : vector<8x384xf32>
    %10 = arith.truncf %9 : vector<8x384xf32> to vector<8x384xbf16>
    %c0_7 = arith.constant 0 : index
    %c0_8 = arith.constant 0 : index
    %11 = vector.load %arg4[%c0_7, %c0_8] : memref<8x384xbf16, #tpu.memory_space<vmem>>, vector<8x384xbf16>
    tpu.vector_store %arg4[%c0_7, %c0_8], %10 {strides = array<i32>} : memref<8x384xbf16, #tpu.memory_space<vmem>>, vector<8x384xbf16>,
    return
  }
  func.func @transform_0(%arg0: i32) -> (i32, i32) {
    %c0_i32 = arith.constant 0 : i32
    %c0_i32_0 = arith.constant 0 : i32
    return %arg0, %c0_i32 : i32, i32
  }
  func.func @transform_1(%arg0: i32) -> (i32, i32) {
    %c0_i32 = arith.constant 0 : i32
    %c0_i32_0 = arith.constant 0 : i32
    %c0_i32_1 = arith.constant 0 : i32
    return %c0_i32, %c0_i32_0 : i32, i32
  }
  func.func @transform_2(%arg0: i32) -> (i32, i32) {
    %c0_i32 = arith.constant 0 : i32
    %c0_i32_0 = arith.constant 0 : i32
    %c0_i32_1 = arith.constant 0 : i32
    return %c0_i32, %c0_i32_0 : i32, i32
  }
  func.func @transform_3(%arg0: i32) -> (i32, i32) {
    %c0_i32 = arith.constant 0 : i32
    %c0_i32_0 = arith.constant 0 : i32
    return %arg0, %c0_i32 : i32, i32
  }
}

module attributes {stable_mosaic.version = 11 : i64} {
  func.func @_pw_conv_kernel(%arg0: i32, %arg1: memref<8x192xbf16, #tpu.memory_space<vmem>>, %arg2: memref<192x64xbf16, #tpu.memory_space<vmem>>, %arg3: memref<1x64xf32, #tpu.memory_space<vmem>>, %arg4: memref<8x64xbf16, #tpu.memory_space<vmem>>) attributes {dimension_semantics = [#tpu.dimension_semantics<parallel>], iteration_bounds = array<i64: 1>, scalar_prefetch = 0 : i64, scratch_operands = 0 : i64, tpu.core_type = #tpu.core_type<tc>, window_params = [{transform_indices = @transform_0, window_bounds = array<i64: 8, 192>}, {pipeline_mode = #tpu.pipeline_mode<synchronous>, transform_indices = @transform_1, window_bounds = array<i64: 192, 64>}, {pipeline_mode = #tpu.pipeline_mode<synchronous>, transform_indices = @transform_2, window_bounds = array<i64: 1, 64>}, {transform_indices = @transform_3, window_bounds = array<i64: 8, 64>}]} {
    %c0 = arith.constant 0 : index
    %c0_0 = arith.constant 0 : index
    %0 = vector.load %arg1[%c0, %c0_0] : memref<8x192xbf16, #tpu.memory_space<vmem>>, vector<8x192xbf16>
    %c0_1 = arith.constant 0 : index
    %c0_2 = arith.constant 0 : index
    %1 = vector.load %arg2[%c0_1, %c0_2] : memref<192x64xbf16, #tpu.memory_space<vmem>>, vector<192x64xbf16>
    %cst = arith.constant dense<0.000000e+00> : vector<8x64xf32>
    %2 = tpu.matmul %0, %1, %cst {dimension_numbers = #tpu.dot_dimension_numbers<[1], [0], [0], [1], [0, 0, 1, 1], [], []>} : vector<8x192xbf16>, vector<192x64xbf16>, vector<8x64xf32> -> vector<8x64xf32>
    %c0_3 = arith.constant 0 : index
    %c0_4 = arith.constant 0 : index
    %3 = vector.load %arg3[%c0_3, %c0_4] : memref<1x64xf32, #tpu.memory_space<vmem>>, vector<1x64xf32>
    %4 = vector.broadcast %3 : vector<1x64xf32> to vector<8x64xf32>
    %5 = arith.addf %2, %4 : vector<8x64xf32>
    %6 = arith.truncf %5 : vector<8x64xf32> to vector<8x64xbf16>
    %c0_5 = arith.constant 0 : index
    %c0_6 = arith.constant 0 : index
    %7 = vector.load %arg4[%c0_5, %c0_6] : memref<8x64xbf16, #tpu.memory_space<vmem>>, vector<8x64xbf16>
    tpu.vector_store %arg4[%c0_5, %c0_6], %6 {strides = array<i32>} : memref<8x64xbf16, #tpu.memory_space<vmem>>, vector<8x64xbf16>,
    return
  }
  func.func @transform_0(%arg0: i32) -> (i32, i32) {
    %c0_i32 = arith.constant 0 : i32
    %c0_i32_0 = arith.constant 0 : i32
    return %arg0, %c0_i32 : i32, i32
  }
  func.func @transform_1(%arg0: i32) -> (i32, i32) {
    %c0_i32 = arith.constant 0 : i32
    %c0_i32_0 = arith.constant 0 : i32
    %c0_i32_1 = arith.constant 0 : i32
    return %c0_i32, %c0_i32_0 : i32, i32
  }
  func.func @transform_2(%arg0: i32) -> (i32, i32) {
    %c0_i32 = arith.constant 0 : i32
    %c0_i32_0 = arith.constant 0 : i32
    %c0_i32_1 = arith.constant 0 : i32
    return %c0_i32, %c0_i32_0 : i32, i32
  }
  func.func @transform_3(%arg0: i32) -> (i32, i32) {
    %c0_i32 = arith.constant 0 : i32
    %c0_i32_0 = arith.constant 0 : i32
    return %arg0, %c0_i32 : i32, i32
  }
}

module attributes {stable_mosaic.version = 11 : i64} {
  func.func @_pw_conv_res_kernel(%arg0: i32, %arg1: memref<8x384xbf16, #tpu.memory_space<vmem>>, %arg2: memref<384x64xbf16, #tpu.memory_space<vmem>>, %arg3: memref<1x64xf32, #tpu.memory_space<vmem>>, %arg4: memref<8x64xbf16, #tpu.memory_space<vmem>>, %arg5: memref<8x64xbf16, #tpu.memory_space<vmem>>) attributes {dimension_semantics = [#tpu.dimension_semantics<parallel>], iteration_bounds = array<i64: 1>, scalar_prefetch = 0 : i64, scratch_operands = 0 : i64, tpu.core_type = #tpu.core_type<tc>, window_params = [{transform_indices = @transform_0, window_bounds = array<i64: 8, 384>}, {pipeline_mode = #tpu.pipeline_mode<synchronous>, transform_indices = @transform_1, window_bounds = array<i64: 384, 64>}, {pipeline_mode = #tpu.pipeline_mode<synchronous>, transform_indices = @transform_2, window_bounds = array<i64: 1, 64>}, {transform_indices = @transform_3, window_bounds = array<i64: 8, 64>}, {transform_indices = @transform_4, window_bounds = array<i64: 8, 64>}]} {
    %c0 = arith.constant 0 : index
    %c0_0 = arith.constant 0 : index
    %0 = vector.load %arg1[%c0, %c0_0] : memref<8x384xbf16, #tpu.memory_space<vmem>>, vector<8x384xbf16>
    %c0_1 = arith.constant 0 : index
    %c0_2 = arith.constant 0 : index
    %1 = vector.load %arg2[%c0_1, %c0_2] : memref<384x64xbf16, #tpu.memory_space<vmem>>, vector<384x64xbf16>
    %cst = arith.constant dense<0.000000e+00> : vector<8x64xf32>
    %2 = tpu.matmul %0, %1, %cst {dimension_numbers = #tpu.dot_dimension_numbers<[1], [0], [0], [1], [0, 0, 1, 1], [], []>} : vector<8x384xbf16>, vector<384x64xbf16>, vector<8x64xf32> -> vector<8x64xf32>
    %c0_3 = arith.constant 0 : index
    %c0_4 = arith.constant 0 : index
    %3 = vector.load %arg3[%c0_3, %c0_4] : memref<1x64xf32, #tpu.memory_space<vmem>>, vector<1x64xf32>
    %4 = vector.broadcast %3 : vector<1x64xf32> to vector<8x64xf32>
    %5 = arith.addf %2, %4 : vector<8x64xf32>
    %c0_5 = arith.constant 0 : index
    %c0_6 = arith.constant 0 : index
    %6 = vector.load %arg4[%c0_5, %c0_6] : memref<8x64xbf16, #tpu.memory_space<vmem>>, vector<8x64xbf16>
    %7 = arith.extf %6 : vector<8x64xbf16> to vector<8x64xf32>
    %8 = arith.addf %5, %7 : vector<8x64xf32>
    %9 = arith.truncf %8 : vector<8x64xf32> to vector<8x64xbf16>
    %c0_7 = arith.constant 0 : index
    %c0_8 = arith.constant 0 : index
    %10 = vector.load %arg5[%c0_7, %c0_8] : memref<8x64xbf16, #tpu.memory_space<vmem>>, vector<8x64xbf16>
    tpu.vector_store %arg5[%c0_7, %c0_8], %9 {strides = array<i32>} : memref<8x64xbf16, #tpu.memory_space<vmem>>, vector<8x64xbf16>,
    return
  }
  func.func @transform_0(%arg0: i32) -> (i32, i32) {
    %c0_i32 = arith.constant 0 : i32
    %c0_i32_0 = arith.constant 0 : i32
    return %arg0, %c0_i32 : i32, i32
  }
  func.func @transform_1(%arg0: i32) -> (i32, i32) {
    %c0_i32 = arith.constant 0 : i32
    %c0_i32_0 = arith.constant 0 : i32
    %c0_i32_1 = arith.constant 0 : i32
    return %c0_i32, %c0_i32_0 : i32, i32
  }
  func.func @transform_2(%arg0: i32) -> (i32, i32) {
    %c0_i32 = arith.constant 0 : i32
    %c0_i32_0 = arith.constant 0 : i32
    %c0_i32_1 = arith.constant 0 : i32
    return %c0_i32, %c0_i32_0 : i32, i32
  }
  func.func @transform_3(%arg0: i32) -> (i32, i32) {
    %c0_i32 = arith.constant 0 : i32
    %c0_i32_0 = arith.constant 0 : i32
    return %arg0, %c0_i32 : i32, i32
  }
  func.func @transform_4(%arg0: i32) -> (i32, i32) {
    %c0_i32 = arith.constant 0 : i32
    %c0_i32_0 = arith.constant 0 : i32
    return %arg0, %c0_i32 : i32, i32
  }
}

module attributes {stable_mosaic.version = 11 : i64} {
  func.func @_pw_conv_kernel(%arg0: i32, %arg1: memref<8x384xbf16, #tpu.memory_space<vmem>>, %arg2: memref<384x96xbf16, #tpu.memory_space<vmem>>, %arg3: memref<1x96xf32, #tpu.memory_space<vmem>>, %arg4: memref<8x96xbf16, #tpu.memory_space<vmem>>) attributes {dimension_semantics = [#tpu.dimension_semantics<parallel>], iteration_bounds = array<i64: 1>, scalar_prefetch = 0 : i64, scratch_operands = 0 : i64, tpu.core_type = #tpu.core_type<tc>, window_params = [{transform_indices = @transform_0, window_bounds = array<i64: 8, 384>}, {pipeline_mode = #tpu.pipeline_mode<synchronous>, transform_indices = @transform_1, window_bounds = array<i64: 384, 96>}, {pipeline_mode = #tpu.pipeline_mode<synchronous>, transform_indices = @transform_2, window_bounds = array<i64: 1, 96>}, {transform_indices = @transform_3, window_bounds = array<i64: 8, 96>}]} {
    %c0 = arith.constant 0 : index
    %c0_0 = arith.constant 0 : index
    %0 = vector.load %arg1[%c0, %c0_0] : memref<8x384xbf16, #tpu.memory_space<vmem>>, vector<8x384xbf16>
    %c0_1 = arith.constant 0 : index
    %c0_2 = arith.constant 0 : index
    %1 = vector.load %arg2[%c0_1, %c0_2] : memref<384x96xbf16, #tpu.memory_space<vmem>>, vector<384x96xbf16>
    %cst = arith.constant dense<0.000000e+00> : vector<8x96xf32>
    %2 = tpu.matmul %0, %1, %cst {dimension_numbers = #tpu.dot_dimension_numbers<[1], [0], [0], [1], [0, 0, 1, 1], [], []>} : vector<8x384xbf16>, vector<384x96xbf16>, vector<8x96xf32> -> vector<8x96xf32>
    %c0_3 = arith.constant 0 : index
    %c0_4 = arith.constant 0 : index
    %3 = vector.load %arg3[%c0_3, %c0_4] : memref<1x96xf32, #tpu.memory_space<vmem>>, vector<1x96xf32>
    %4 = vector.broadcast %3 : vector<1x96xf32> to vector<8x96xf32>
    %5 = arith.addf %2, %4 : vector<8x96xf32>
    %6 = arith.truncf %5 : vector<8x96xf32> to vector<8x96xbf16>
    %c0_5 = arith.constant 0 : index
    %c0_6 = arith.constant 0 : index
    %7 = vector.load %arg4[%c0_5, %c0_6] : memref<8x96xbf16, #tpu.memory_space<vmem>>, vector<8x96xbf16>
    tpu.vector_store %arg4[%c0_5, %c0_6], %6 {strides = array<i32>} : memref<8x96xbf16, #tpu.memory_space<vmem>>, vector<8x96xbf16>,
    return
  }
  func.func @transform_0(%arg0: i32) -> (i32, i32) {
    %c0_i32 = arith.constant 0 : i32
    %c0_i32_0 = arith.constant 0 : i32
    return %arg0, %c0_i32 : i32, i32
  }
  func.func @transform_1(%arg0: i32) -> (i32, i32) {
    %c0_i32 = arith.constant 0 : i32
    %c0_i32_0 = arith.constant 0 : i32
    %c0_i32_1 = arith.constant 0 : i32
    return %c0_i32, %c0_i32_0 : i32, i32
  }
  func.func @transform_2(%arg0: i32) -> (i32, i32) {
    %c0_i32 = arith.constant 0 : i32
    %c0_i32_0 = arith.constant 0 : i32
    %c0_i32_1 = arith.constant 0 : i32
    return %c0_i32, %c0_i32_0 : i32, i32
  }
  func.func @transform_3(%arg0: i32) -> (i32, i32) {
    %c0_i32 = arith.constant 0 : i32
    %c0_i32_0 = arith.constant 0 : i32
    return %arg0, %c0_i32 : i32, i32
  }
}

module attributes {stable_mosaic.version = 11 : i64} {
  func.func @_pw_conv_kernel(%arg0: i32, %arg1: memref<8x96xbf16, #tpu.memory_space<vmem>>, %arg2: memref<96x576xbf16, #tpu.memory_space<vmem>>, %arg3: memref<1x576xf32, #tpu.memory_space<vmem>>, %arg4: memref<8x576xbf16, #tpu.memory_space<vmem>>) attributes {dimension_semantics = [#tpu.dimension_semantics<parallel>], iteration_bounds = array<i64: 1>, scalar_prefetch = 0 : i64, scratch_operands = 0 : i64, tpu.core_type = #tpu.core_type<tc>, window_params = [{transform_indices = @transform_0, window_bounds = array<i64: 8, 96>}, {pipeline_mode = #tpu.pipeline_mode<synchronous>, transform_indices = @transform_1, window_bounds = array<i64: 96, 576>}, {pipeline_mode = #tpu.pipeline_mode<synchronous>, transform_indices = @transform_2, window_bounds = array<i64: 1, 576>}, {transform_indices = @transform_3, window_bounds = array<i64: 8, 576>}]} {
    %c0 = arith.constant 0 : index
    %c0_0 = arith.constant 0 : index
    %0 = vector.load %arg1[%c0, %c0_0] : memref<8x96xbf16, #tpu.memory_space<vmem>>, vector<8x96xbf16>
    %c0_1 = arith.constant 0 : index
    %c0_2 = arith.constant 0 : index
    %1 = vector.load %arg2[%c0_1, %c0_2] : memref<96x576xbf16, #tpu.memory_space<vmem>>, vector<96x576xbf16>
    %cst = arith.constant dense<0.000000e+00> : vector<8x576xf32>
    %2 = tpu.matmul %0, %1, %cst {dimension_numbers = #tpu.dot_dimension_numbers<[1], [0], [0], [1], [0, 0, 1, 1], [], []>} : vector<8x96xbf16>, vector<96x576xbf16>, vector<8x576xf32> -> vector<8x576xf32>
    %c0_3 = arith.constant 0 : index
    %c0_4 = arith.constant 0 : index
    %3 = vector.load %arg3[%c0_3, %c0_4] : memref<1x576xf32, #tpu.memory_space<vmem>>, vector<1x576xf32>
    %4 = vector.broadcast %3 : vector<1x576xf32> to vector<8x576xf32>
    %5 = arith.addf %2, %4 : vector<8x576xf32>
    %cst_5 = arith.constant 0.000000e+00 : f32
    %cst_6 = arith.constant 6.000000e+00 : f32
    %6 = vector.broadcast %cst_5 : f32 to vector<8x576xf32>
    %7 = arith.maximumf %6, %5 : vector<8x576xf32>
    %8 = vector.broadcast %cst_6 : f32 to vector<8x576xf32>
    %9 = arith.minimumf %8, %7 : vector<8x576xf32>
    %10 = arith.truncf %9 : vector<8x576xf32> to vector<8x576xbf16>
    %c0_7 = arith.constant 0 : index
    %c0_8 = arith.constant 0 : index
    %11 = vector.load %arg4[%c0_7, %c0_8] : memref<8x576xbf16, #tpu.memory_space<vmem>>, vector<8x576xbf16>
    tpu.vector_store %arg4[%c0_7, %c0_8], %10 {strides = array<i32>} : memref<8x576xbf16, #tpu.memory_space<vmem>>, vector<8x576xbf16>,
    return
  }
  func.func @transform_0(%arg0: i32) -> (i32, i32) {
    %c0_i32 = arith.constant 0 : i32
    %c0_i32_0 = arith.constant 0 : i32
    return %arg0, %c0_i32 : i32, i32
  }
  func.func @transform_1(%arg0: i32) -> (i32, i32) {
    %c0_i32 = arith.constant 0 : i32
    %c0_i32_0 = arith.constant 0 : i32
    %c0_i32_1 = arith.constant 0 : i32
    return %c0_i32, %c0_i32_0 : i32, i32
  }
  func.func @transform_2(%arg0: i32) -> (i32, i32) {
    %c0_i32 = arith.constant 0 : i32
    %c0_i32_0 = arith.constant 0 : i32
    %c0_i32_1 = arith.constant 0 : i32
    return %c0_i32, %c0_i32_0 : i32, i32
  }
  func.func @transform_3(%arg0: i32) -> (i32, i32) {
    %c0_i32 = arith.constant 0 : i32
    %c0_i32_0 = arith.constant 0 : i32
    return %arg0, %c0_i32 : i32, i32
  }
}

module attributes {stable_mosaic.version = 11 : i64} {
  func.func @_pw_conv_res_kernel(%arg0: i32, %arg1: memref<8x576xbf16, #tpu.memory_space<vmem>>, %arg2: memref<576x96xbf16, #tpu.memory_space<vmem>>, %arg3: memref<1x96xf32, #tpu.memory_space<vmem>>, %arg4: memref<8x96xbf16, #tpu.memory_space<vmem>>, %arg5: memref<8x96xbf16, #tpu.memory_space<vmem>>) attributes {dimension_semantics = [#tpu.dimension_semantics<parallel>], iteration_bounds = array<i64: 1>, scalar_prefetch = 0 : i64, scratch_operands = 0 : i64, tpu.core_type = #tpu.core_type<tc>, window_params = [{transform_indices = @transform_0, window_bounds = array<i64: 8, 576>}, {pipeline_mode = #tpu.pipeline_mode<synchronous>, transform_indices = @transform_1, window_bounds = array<i64: 576, 96>}, {pipeline_mode = #tpu.pipeline_mode<synchronous>, transform_indices = @transform_2, window_bounds = array<i64: 1, 96>}, {transform_indices = @transform_3, window_bounds = array<i64: 8, 96>}, {transform_indices = @transform_4, window_bounds = array<i64: 8, 96>}]} {
    %c0 = arith.constant 0 : index
    %c0_0 = arith.constant 0 : index
    %0 = vector.load %arg1[%c0, %c0_0] : memref<8x576xbf16, #tpu.memory_space<vmem>>, vector<8x576xbf16>
    %c0_1 = arith.constant 0 : index
    %c0_2 = arith.constant 0 : index
    %1 = vector.load %arg2[%c0_1, %c0_2] : memref<576x96xbf16, #tpu.memory_space<vmem>>, vector<576x96xbf16>
    %cst = arith.constant dense<0.000000e+00> : vector<8x96xf32>
    %2 = tpu.matmul %0, %1, %cst {dimension_numbers = #tpu.dot_dimension_numbers<[1], [0], [0], [1], [0, 0, 1, 1], [], []>} : vector<8x576xbf16>, vector<576x96xbf16>, vector<8x96xf32> -> vector<8x96xf32>
    %c0_3 = arith.constant 0 : index
    %c0_4 = arith.constant 0 : index
    %3 = vector.load %arg3[%c0_3, %c0_4] : memref<1x96xf32, #tpu.memory_space<vmem>>, vector<1x96xf32>
    %4 = vector.broadcast %3 : vector<1x96xf32> to vector<8x96xf32>
    %5 = arith.addf %2, %4 : vector<8x96xf32>
    %c0_5 = arith.constant 0 : index
    %c0_6 = arith.constant 0 : index
    %6 = vector.load %arg4[%c0_5, %c0_6] : memref<8x96xbf16, #tpu.memory_space<vmem>>, vector<8x96xbf16>
    %7 = arith.extf %6 : vector<8x96xbf16> to vector<8x96xf32>
    %8 = arith.addf %5, %7 : vector<8x96xf32>
    %9 = arith.truncf %8 : vector<8x96xf32> to vector<8x96xbf16>
    %c0_7 = arith.constant 0 : index
    %c0_8 = arith.constant 0 : index
    %10 = vector.load %arg5[%c0_7, %c0_8] : memref<8x96xbf16, #tpu.memory_space<vmem>>, vector<8x96xbf16>
    tpu.vector_store %arg5[%c0_7, %c0_8], %9 {strides = array<i32>} : memref<8x96xbf16, #tpu.memory_space<vmem>>, vector<8x96xbf16>,
    return
  }
  func.func @transform_0(%arg0: i32) -> (i32, i32) {
    %c0_i32 = arith.constant 0 : i32
    %c0_i32_0 = arith.constant 0 : i32
    return %arg0, %c0_i32 : i32, i32
  }
  func.func @transform_1(%arg0: i32) -> (i32, i32) {
    %c0_i32 = arith.constant 0 : i32
    %c0_i32_0 = arith.constant 0 : i32
    %c0_i32_1 = arith.constant 0 : i32
    return %c0_i32, %c0_i32_0 : i32, i32
  }
  func.func @transform_2(%arg0: i32) -> (i32, i32) {
    %c0_i32 = arith.constant 0 : i32
    %c0_i32_0 = arith.constant 0 : i32
    %c0_i32_1 = arith.constant 0 : i32
    return %c0_i32, %c0_i32_0 : i32, i32
  }
  func.func @transform_3(%arg0: i32) -> (i32, i32) {
    %c0_i32 = arith.constant 0 : i32
    %c0_i32_0 = arith.constant 0 : i32
    return %arg0, %c0_i32 : i32, i32
  }
  func.func @transform_4(%arg0: i32) -> (i32, i32) {
    %c0_i32 = arith.constant 0 : i32
    %c0_i32_0 = arith.constant 0 : i32
    return %arg0, %c0_i32 : i32, i32
  }
}

module attributes {stable_mosaic.version = 11 : i64} {
  func.func @_pw_conv_kernel(%arg0: i32, %arg1: memref<2x576xbf16, #tpu.memory_space<vmem>>, %arg2: memref<576x160xbf16, #tpu.memory_space<vmem>>, %arg3: memref<1x160xf32, #tpu.memory_space<vmem>>, %arg4: memref<2x160xbf16, #tpu.memory_space<vmem>>) attributes {dimension_semantics = [#tpu.dimension_semantics<parallel>], iteration_bounds = array<i64: 1>, scalar_prefetch = 0 : i64, scratch_operands = 0 : i64, tpu.core_type = #tpu.core_type<tc>, window_params = [{transform_indices = @transform_0, window_bounds = array<i64: 2, 576>}, {pipeline_mode = #tpu.pipeline_mode<synchronous>, transform_indices = @transform_1, window_bounds = array<i64: 576, 160>}, {pipeline_mode = #tpu.pipeline_mode<synchronous>, transform_indices = @transform_2, window_bounds = array<i64: 1, 160>}, {transform_indices = @transform_3, window_bounds = array<i64: 2, 160>}]} {
    %c0 = arith.constant 0 : index
    %c0_0 = arith.constant 0 : index
    %0 = vector.load %arg1[%c0, %c0_0] : memref<2x576xbf16, #tpu.memory_space<vmem>>, vector<2x576xbf16>
    %c0_1 = arith.constant 0 : index
    %c0_2 = arith.constant 0 : index
    %1 = vector.load %arg2[%c0_1, %c0_2] : memref<576x160xbf16, #tpu.memory_space<vmem>>, vector<576x160xbf16>
    %cst = arith.constant dense<0.000000e+00> : vector<2x160xf32>
    %2 = tpu.matmul %0, %1, %cst {dimension_numbers = #tpu.dot_dimension_numbers<[1], [0], [0], [1], [0, 0, 1, 1], [], []>} : vector<2x576xbf16>, vector<576x160xbf16>, vector<2x160xf32> -> vector<2x160xf32>
    %c0_3 = arith.constant 0 : index
    %c0_4 = arith.constant 0 : index
    %3 = vector.load %arg3[%c0_3, %c0_4] : memref<1x160xf32, #tpu.memory_space<vmem>>, vector<1x160xf32>
    %4 = vector.broadcast %3 : vector<1x160xf32> to vector<2x160xf32>
    %5 = arith.addf %2, %4 : vector<2x160xf32>
    %6 = arith.truncf %5 : vector<2x160xf32> to vector<2x160xbf16>
    %c0_5 = arith.constant 0 : index
    %c0_6 = arith.constant 0 : index
    %7 = vector.load %arg4[%c0_5, %c0_6] : memref<2x160xbf16, #tpu.memory_space<vmem>>, vector<2x160xbf16>
    tpu.vector_store %arg4[%c0_5, %c0_6], %6 {strides = array<i32>} : memref<2x160xbf16, #tpu.memory_space<vmem>>, vector<2x160xbf16>,
    return
  }
  func.func @transform_0(%arg0: i32) -> (i32, i32) {
    %c0_i32 = arith.constant 0 : i32
    %c0_i32_0 = arith.constant 0 : i32
    return %arg0, %c0_i32 : i32, i32
  }
  func.func @transform_1(%arg0: i32) -> (i32, i32) {
    %c0_i32 = arith.constant 0 : i32
    %c0_i32_0 = arith.constant 0 : i32
    %c0_i32_1 = arith.constant 0 : i32
    return %c0_i32, %c0_i32_0 : i32, i32
  }
  func.func @transform_2(%arg0: i32) -> (i32, i32) {
    %c0_i32 = arith.constant 0 : i32
    %c0_i32_0 = arith.constant 0 : i32
    %c0_i32_1 = arith.constant 0 : i32
    return %c0_i32, %c0_i32_0 : i32, i32
  }
  func.func @transform_3(%arg0: i32) -> (i32, i32) {
    %c0_i32 = arith.constant 0 : i32
    %c0_i32_0 = arith.constant 0 : i32
    return %arg0, %c0_i32 : i32, i32
  }
}

module attributes {stable_mosaic.version = 11 : i64} {
  func.func @_pw_conv_kernel(%arg0: i32, %arg1: memref<2x160xbf16, #tpu.memory_space<vmem>>, %arg2: memref<160x960xbf16, #tpu.memory_space<vmem>>, %arg3: memref<1x960xf32, #tpu.memory_space<vmem>>, %arg4: memref<2x960xbf16, #tpu.memory_space<vmem>>) attributes {dimension_semantics = [#tpu.dimension_semantics<parallel>], iteration_bounds = array<i64: 1>, scalar_prefetch = 0 : i64, scratch_operands = 0 : i64, tpu.core_type = #tpu.core_type<tc>, window_params = [{transform_indices = @transform_0, window_bounds = array<i64: 2, 160>}, {pipeline_mode = #tpu.pipeline_mode<synchronous>, transform_indices = @transform_1, window_bounds = array<i64: 160, 960>}, {pipeline_mode = #tpu.pipeline_mode<synchronous>, transform_indices = @transform_2, window_bounds = array<i64: 1, 960>}, {transform_indices = @transform_3, window_bounds = array<i64: 2, 960>}]} {
    %c0 = arith.constant 0 : index
    %c0_0 = arith.constant 0 : index
    %0 = vector.load %arg1[%c0, %c0_0] : memref<2x160xbf16, #tpu.memory_space<vmem>>, vector<2x160xbf16>
    %c0_1 = arith.constant 0 : index
    %c0_2 = arith.constant 0 : index
    %1 = vector.load %arg2[%c0_1, %c0_2] : memref<160x960xbf16, #tpu.memory_space<vmem>>, vector<160x960xbf16>
    %cst = arith.constant dense<0.000000e+00> : vector<2x960xf32>
    %2 = tpu.matmul %0, %1, %cst {dimension_numbers = #tpu.dot_dimension_numbers<[1], [0], [0], [1], [0, 0, 1, 1], [], []>} : vector<2x160xbf16>, vector<160x960xbf16>, vector<2x960xf32> -> vector<2x960xf32>
    %c0_3 = arith.constant 0 : index
    %c0_4 = arith.constant 0 : index
    %3 = vector.load %arg3[%c0_3, %c0_4] : memref<1x960xf32, #tpu.memory_space<vmem>>, vector<1x960xf32>
    %4 = vector.broadcast %3 : vector<1x960xf32> to vector<2x960xf32>
    %5 = arith.addf %2, %4 : vector<2x960xf32>
    %cst_5 = arith.constant 0.000000e+00 : f32
    %cst_6 = arith.constant 6.000000e+00 : f32
    %6 = vector.broadcast %cst_5 : f32 to vector<2x960xf32>
    %7 = arith.maximumf %6, %5 : vector<2x960xf32>
    %8 = vector.broadcast %cst_6 : f32 to vector<2x960xf32>
    %9 = arith.minimumf %8, %7 : vector<2x960xf32>
    %10 = arith.truncf %9 : vector<2x960xf32> to vector<2x960xbf16>
    %c0_7 = arith.constant 0 : index
    %c0_8 = arith.constant 0 : index
    %11 = vector.load %arg4[%c0_7, %c0_8] : memref<2x960xbf16, #tpu.memory_space<vmem>>, vector<2x960xbf16>
    tpu.vector_store %arg4[%c0_7, %c0_8], %10 {strides = array<i32>} : memref<2x960xbf16, #tpu.memory_space<vmem>>, vector<2x960xbf16>,
    return
  }
  func.func @transform_0(%arg0: i32) -> (i32, i32) {
    %c0_i32 = arith.constant 0 : i32
    %c0_i32_0 = arith.constant 0 : i32
    return %arg0, %c0_i32 : i32, i32
  }
  func.func @transform_1(%arg0: i32) -> (i32, i32) {
    %c0_i32 = arith.constant 0 : i32
    %c0_i32_0 = arith.constant 0 : i32
    %c0_i32_1 = arith.constant 0 : i32
    return %c0_i32, %c0_i32_0 : i32, i32
  }
  func.func @transform_2(%arg0: i32) -> (i32, i32) {
    %c0_i32 = arith.constant 0 : i32
    %c0_i32_0 = arith.constant 0 : i32
    %c0_i32_1 = arith.constant 0 : i32
    return %c0_i32, %c0_i32_0 : i32, i32
  }
  func.func @transform_3(%arg0: i32) -> (i32, i32) {
    %c0_i32 = arith.constant 0 : i32
    %c0_i32_0 = arith.constant 0 : i32
    return %arg0, %c0_i32 : i32, i32
  }
}

module attributes {stable_mosaic.version = 11 : i64} {
  func.func @_pw_conv_res_kernel(%arg0: i32, %arg1: memref<2x960xbf16, #tpu.memory_space<vmem>>, %arg2: memref<960x160xbf16, #tpu.memory_space<vmem>>, %arg3: memref<1x160xf32, #tpu.memory_space<vmem>>, %arg4: memref<2x160xbf16, #tpu.memory_space<vmem>>, %arg5: memref<2x160xbf16, #tpu.memory_space<vmem>>) attributes {dimension_semantics = [#tpu.dimension_semantics<parallel>], iteration_bounds = array<i64: 1>, scalar_prefetch = 0 : i64, scratch_operands = 0 : i64, tpu.core_type = #tpu.core_type<tc>, window_params = [{transform_indices = @transform_0, window_bounds = array<i64: 2, 960>}, {pipeline_mode = #tpu.pipeline_mode<synchronous>, transform_indices = @transform_1, window_bounds = array<i64: 960, 160>}, {pipeline_mode = #tpu.pipeline_mode<synchronous>, transform_indices = @transform_2, window_bounds = array<i64: 1, 160>}, {transform_indices = @transform_3, window_bounds = array<i64: 2, 160>}, {transform_indices = @transform_4, window_bounds = array<i64: 2, 160>}]} {
    %c0 = arith.constant 0 : index
    %c0_0 = arith.constant 0 : index
    %0 = vector.load %arg1[%c0, %c0_0] : memref<2x960xbf16, #tpu.memory_space<vmem>>, vector<2x960xbf16>
    %c0_1 = arith.constant 0 : index
    %c0_2 = arith.constant 0 : index
    %1 = vector.load %arg2[%c0_1, %c0_2] : memref<960x160xbf16, #tpu.memory_space<vmem>>, vector<960x160xbf16>
    %cst = arith.constant dense<0.000000e+00> : vector<2x160xf32>
    %2 = tpu.matmul %0, %1, %cst {dimension_numbers = #tpu.dot_dimension_numbers<[1], [0], [0], [1], [0, 0, 1, 1], [], []>} : vector<2x960xbf16>, vector<960x160xbf16>, vector<2x160xf32> -> vector<2x160xf32>
    %c0_3 = arith.constant 0 : index
    %c0_4 = arith.constant 0 : index
    %3 = vector.load %arg3[%c0_3, %c0_4] : memref<1x160xf32, #tpu.memory_space<vmem>>, vector<1x160xf32>
    %4 = vector.broadcast %3 : vector<1x160xf32> to vector<2x160xf32>
    %5 = arith.addf %2, %4 : vector<2x160xf32>
    %c0_5 = arith.constant 0 : index
    %c0_6 = arith.constant 0 : index
    %6 = vector.load %arg4[%c0_5, %c0_6] : memref<2x160xbf16, #tpu.memory_space<vmem>>, vector<2x160xbf16>
    %7 = arith.extf %6 : vector<2x160xbf16> to vector<2x160xf32>
    %8 = arith.addf %5, %7 : vector<2x160xf32>
    %9 = arith.truncf %8 : vector<2x160xf32> to vector<2x160xbf16>
    %c0_7 = arith.constant 0 : index
    %c0_8 = arith.constant 0 : index
    %10 = vector.load %arg5[%c0_7, %c0_8] : memref<2x160xbf16, #tpu.memory_space<vmem>>, vector<2x160xbf16>
    tpu.vector_store %arg5[%c0_7, %c0_8], %9 {strides = array<i32>} : memref<2x160xbf16, #tpu.memory_space<vmem>>, vector<2x160xbf16>,
    return
  }
  func.func @transform_0(%arg0: i32) -> (i32, i32) {
    %c0_i32 = arith.constant 0 : i32
    %c0_i32_0 = arith.constant 0 : i32
    return %arg0, %c0_i32 : i32, i32
  }
  func.func @transform_1(%arg0: i32) -> (i32, i32) {
    %c0_i32 = arith.constant 0 : i32
    %c0_i32_0 = arith.constant 0 : i32
    %c0_i32_1 = arith.constant 0 : i32
    return %c0_i32, %c0_i32_0 : i32, i32
  }
  func.func @transform_2(%arg0: i32) -> (i32, i32) {
    %c0_i32 = arith.constant 0 : i32
    %c0_i32_0 = arith.constant 0 : i32
    %c0_i32_1 = arith.constant 0 : i32
    return %c0_i32, %c0_i32_0 : i32, i32
  }
  func.func @transform_3(%arg0: i32) -> (i32, i32) {
    %c0_i32 = arith.constant 0 : i32
    %c0_i32_0 = arith.constant 0 : i32
    return %arg0, %c0_i32 : i32, i32
  }
  func.func @transform_4(%arg0: i32) -> (i32, i32) {
    %c0_i32 = arith.constant 0 : i32
    %c0_i32_0 = arith.constant 0 : i32
    return %arg0, %c0_i32 : i32, i32
  }
}

module attributes {stable_mosaic.version = 11 : i64} {
  func.func @_pw_conv_kernel(%arg0: i32, %arg1: memref<2x960xbf16, #tpu.memory_space<vmem>>, %arg2: memref<960x320xbf16, #tpu.memory_space<vmem>>, %arg3: memref<1x320xf32, #tpu.memory_space<vmem>>, %arg4: memref<2x320xbf16, #tpu.memory_space<vmem>>) attributes {dimension_semantics = [#tpu.dimension_semantics<parallel>], iteration_bounds = array<i64: 1>, scalar_prefetch = 0 : i64, scratch_operands = 0 : i64, tpu.core_type = #tpu.core_type<tc>, window_params = [{transform_indices = @transform_0, window_bounds = array<i64: 2, 960>}, {pipeline_mode = #tpu.pipeline_mode<synchronous>, transform_indices = @transform_1, window_bounds = array<i64: 960, 320>}, {pipeline_mode = #tpu.pipeline_mode<synchronous>, transform_indices = @transform_2, window_bounds = array<i64: 1, 320>}, {transform_indices = @transform_3, window_bounds = array<i64: 2, 320>}]} {
    %c0 = arith.constant 0 : index
    %c0_0 = arith.constant 0 : index
    %0 = vector.load %arg1[%c0, %c0_0] : memref<2x960xbf16, #tpu.memory_space<vmem>>, vector<2x960xbf16>
    %c0_1 = arith.constant 0 : index
    %c0_2 = arith.constant 0 : index
    %1 = vector.load %arg2[%c0_1, %c0_2] : memref<960x320xbf16, #tpu.memory_space<vmem>>, vector<960x320xbf16>
    %cst = arith.constant dense<0.000000e+00> : vector<2x320xf32>
    %2 = tpu.matmul %0, %1, %cst {dimension_numbers = #tpu.dot_dimension_numbers<[1], [0], [0], [1], [0, 0, 1, 1], [], []>} : vector<2x960xbf16>, vector<960x320xbf16>, vector<2x320xf32> -> vector<2x320xf32>
    %c0_3 = arith.constant 0 : index
    %c0_4 = arith.constant 0 : index
    %3 = vector.load %arg3[%c0_3, %c0_4] : memref<1x320xf32, #tpu.memory_space<vmem>>, vector<1x320xf32>
    %4 = vector.broadcast %3 : vector<1x320xf32> to vector<2x320xf32>
    %5 = arith.addf %2, %4 : vector<2x320xf32>
    %6 = arith.truncf %5 : vector<2x320xf32> to vector<2x320xbf16>
    %c0_5 = arith.constant 0 : index
    %c0_6 = arith.constant 0 : index
    %7 = vector.load %arg4[%c0_5, %c0_6] : memref<2x320xbf16, #tpu.memory_space<vmem>>, vector<2x320xbf16>
    tpu.vector_store %arg4[%c0_5, %c0_6], %6 {strides = array<i32>} : memref<2x320xbf16, #tpu.memory_space<vmem>>, vector<2x320xbf16>,
    return
  }
  func.func @transform_0(%arg0: i32) -> (i32, i32) {
    %c0_i32 = arith.constant 0 : i32
    %c0_i32_0 = arith.constant 0 : i32
    return %arg0, %c0_i32 : i32, i32
  }
  func.func @transform_1(%arg0: i32) -> (i32, i32) {
    %c0_i32 = arith.constant 0 : i32
    %c0_i32_0 = arith.constant 0 : i32
    %c0_i32_1 = arith.constant 0 : i32
    return %c0_i32, %c0_i32_0 : i32, i32
  }
  func.func @transform_2(%arg0: i32) -> (i32, i32) {
    %c0_i32 = arith.constant 0 : i32
    %c0_i32_0 = arith.constant 0 : i32
    %c0_i32_1 = arith.constant 0 : i32
    return %c0_i32, %c0_i32_0 : i32, i32
  }
  func.func @transform_3(%arg0: i32) -> (i32, i32) {
    %c0_i32 = arith.constant 0 : i32
    %c0_i32_0 = arith.constant 0 : i32
    return %arg0, %c0_i32 : i32, i32
  }
}

module attributes {stable_mosaic.version = 11 : i64} {
  func.func @_head_kernel(%arg0: memref<2x1x320xbf16, #tpu.memory_space<vmem>>, %arg1: memref<320x1280xbf16, #tpu.memory_space<vmem>>, %arg2: memref<1x1280xf32, #tpu.memory_space<vmem>>, %arg3: memref<1280x512xbf16, #tpu.memory_space<vmem>>, %arg4: memref<1x512xf32, #tpu.memory_space<vmem>>, %arg5: memref<512x128xbf16, #tpu.memory_space<vmem>>, %arg6: memref<1x128xf32, #tpu.memory_space<vmem>>, %arg7: memref<2x128xf32, #tpu.memory_space<vmem>>) attributes {dimension_semantics = [], scalar_prefetch = 0 : i64, scratch_operands = 0 : i64, tpu.core_type = #tpu.core_type<tc>} {
    %c0 = arith.constant 0 : index
    %c0_0 = arith.constant 0 : index
    %c0_1 = arith.constant 0 : index
    %0 = vector.load %arg0[%c0, %c0_0, %c0_1] : memref<2x1x320xbf16, #tpu.memory_space<vmem>>, vector<2x1x320xbf16>
    %1 = vector.shape_cast %0 : vector<2x1x320xbf16> to vector<2x320xbf16>
    %c0_2 = arith.constant 0 : index
    %c0_3 = arith.constant 0 : index
    %2 = vector.load %arg1[%c0_2, %c0_3] : memref<320x1280xbf16, #tpu.memory_space<vmem>>, vector<320x1280xbf16>
    %cst = arith.constant dense<0.000000e+00> : vector<2x1280xf32>
    %3 = tpu.matmul %1, %2, %cst {dimension_numbers = #tpu.dot_dimension_numbers<[1], [0], [0], [1], [0, 0, 1, 1], [], []>} : vector<2x320xbf16>, vector<320x1280xbf16>, vector<2x1280xf32> -> vector<2x1280xf32>
    %c0_4 = arith.constant 0 : index
    %c0_5 = arith.constant 0 : index
    %4 = vector.load %arg2[%c0_4, %c0_5] : memref<1x1280xf32, #tpu.memory_space<vmem>>, vector<1x1280xf32>
    %5 = vector.broadcast %4 : vector<1x1280xf32> to vector<2x1280xf32>
    %6 = arith.addf %3, %5 : vector<2x1280xf32>
    %cst_6 = arith.constant 0.000000e+00 : f32
    %cst_7 = arith.constant 6.000000e+00 : f32
    %7 = vector.broadcast %cst_6 : f32 to vector<2x1280xf32>
    %8 = arith.maximumf %7, %6 : vector<2x1280xf32>
    %9 = vector.broadcast %cst_7 : f32 to vector<2x1280xf32>
    %10 = arith.minimumf %9, %8 : vector<2x1280xf32>
    %11 = vector.shape_cast %10 : vector<2x1280xf32> to vector<2x1x1280xf32>
    %cst_8 = arith.constant dense<0xFF800000> : vector<2x1280xf32>
    %12 = vector.multi_reduction <maximumf>, %11, %cst_8 [1] : vector<2x1x1280xf32> to vector<2x1280xf32>
    %13 = arith.truncf %12 : vector<2x1280xf32> to vector<2x1280xbf16>
    %c0_9 = arith.constant 0 : index
    %c0_10 = arith.constant 0 : index
    %14 = vector.load %arg3[%c0_9, %c0_10] : memref<1280x512xbf16, #tpu.memory_space<vmem>>, vector<1280x512xbf16>
    %cst_11 = arith.constant dense<0.000000e+00> : vector<2x512xf32>
    %15 = tpu.matmul %13, %14, %cst_11 {dimension_numbers = #tpu.dot_dimension_numbers<[1], [0], [0], [1], [0, 0, 1, 1], [], []>} : vector<2x1280xbf16>, vector<1280x512xbf16>, vector<2x512xf32> -> vector<2x512xf32>
    %c0_12 = arith.constant 0 : index
    %c0_13 = arith.constant 0 : index
    %16 = vector.load %arg4[%c0_12, %c0_13] : memref<1x512xf32, #tpu.memory_space<vmem>>, vector<1x512xf32>
    %17 = vector.broadcast %16 : vector<1x512xf32> to vector<2x512xf32>
    %18 = arith.addf %15, %17 : vector<2x512xf32>
    %cst_14 = arith.constant 0.000000e+00 : f32
    %19 = vector.broadcast %cst_14 : f32 to vector<2x512xf32>
    %20 = arith.maximumf %18, %19 : vector<2x512xf32>
    %21 = arith.truncf %20 : vector<2x512xf32> to vector<2x512xbf16>
    %c0_15 = arith.constant 0 : index
    %c0_16 = arith.constant 0 : index
    %22 = vector.load %arg5[%c0_15, %c0_16] : memref<512x128xbf16, #tpu.memory_space<vmem>>, vector<512x128xbf16>
    %cst_17 = arith.constant dense<0.000000e+00> : vector<2x128xf32>
    %23 = tpu.matmul %21, %22, %cst_17 {dimension_numbers = #tpu.dot_dimension_numbers<[1], [0], [0], [1], [0, 0, 1, 1], [], []>} : vector<2x512xbf16>, vector<512x128xbf16>, vector<2x128xf32> -> vector<2x128xf32>
    %c0_18 = arith.constant 0 : index
    %c0_19 = arith.constant 0 : index
    %24 = vector.load %arg6[%c0_18, %c0_19] : memref<1x128xf32, #tpu.memory_space<vmem>>, vector<1x128xf32>
    %25 = vector.broadcast %24 : vector<1x128xf32> to vector<2x128xf32>
    %26 = arith.addf %23, %25 : vector<2x128xf32>
    %c0_20 = arith.constant 0 : index
    %c0_21 = arith.constant 0 : index
    %27 = vector.load %arg7[%c0_20, %c0_21] : memref<2x128xf32, #tpu.memory_space<vmem>>, vector<2x128xf32>
    tpu.vector_store %arg7[%c0_20, %c0_21], %26 {strides = array<i32>} : memref<2x128xf32, #tpu.memory_space<vmem>>, vector<2x128xf32>,
    return
  }
}

</mosaic_0001>

<bundles_post_ra>
// kernel: age_gender_forward.34
= control target key start
LH: loop header
LB: loop body
LE: loop exit
PB: predicated region body
PF: predicated region fallthrough
CT: control target
= control target key end

     0   :  { %vm262_vm0 = vcmask 261120   ;;  %vm904_vm1 = vcmask 125952   ;;  %s1787_s1 = inlined_call_operand.vmem [shape: bf16[32,16], index: 1, kind: input, shape index: {}]   ;;  %s1788_s0 = inlined_call_operand.vmem [shape: bf16[512,32], index: 0, kind: input, shape index: {}]   ;;  %s1789_s2 = inlined_call_operand.vmem [shape: f32[1,16], index: 2, kind: input, shape index: {}]   ;;  %s1790_s3 = inlined_call_operand.vmem [shape: bf16[512,16], index: 3, kind: output, shape index: {}]  }
   0x1   :  { %v1274_v0 = vld [vmem:[%s1787_s1] sm:$0xff]   ;;  %v1275_v1 = vld [vmem:[%s1787_s1 + $0x8] sm:$0xff]   ;;  %v1280_v6 = vld [vmem:[%s1788_s0 + $0x10] sm:$0xff]  }
   0x2   :  { %1202 = vmatprep.subr.bf16.mxu0 %v1274_v0  ;;  %1270 = vmatprep.subr.bf16.mxu1 %v1274_v0  ;;  %v1276_v2 = vld [vmem:[%s1788_s0] sm:$0xff]   ;;  %v1278_v4 = vld [vmem:[%s1788_s0 + $0x8] sm:$0xff]   ;;  %v1281_v7 = vld [vmem:[%s1788_s0 + $0x90] sm:$0xff]  }
   0x3   :  { %1203 = vmatpush3.bf16.msra.mxu0 %v1274_v0  ;;  %1272 = vmatpush3.bf16.msra.mxu1 %v1274_v0  ;;  %v1277_v3 = vld [vmem:[%s1788_s0 + $0x80] sm:$0xff]   ;;  %v1279_v5 = vld [vmem:[%s1788_s0 + $0x88] sm:$0xff]   ;;  %v1282_v8 = vld [vmem:[%s1788_s0 + $0x18] sm:$0xff]  }
   0x4   :  { %1204 = vmatprep.subr.bf16.mxu0 %v1275_v1  ;;  %1271 = vmatprep.subr.bf16.mxu1 %v1275_v1  ;;  %v1283_v9 = vld [vmem:[%s1788_s0 + $0x98] sm:$0xff]   ;;  %v1284_v10 = vld [vmem:[%s1788_s0 + $0x20] sm:$0xff]   ;;  %v1286_v12 = vld [vmem:[%s1788_s0 + $0x28] sm:$0xff]  }
   0x5   :  { %1206 = vmatprep.mubr.msk.bf16.mxu0 %vm262_vm0, %v1276_v2  ;;  %1238 = vmatprep.mubr.msk.bf16.mxu1 %vm262_vm0, %v1277_v3  ;;  %v1285_v11 = vld [vmem:[%s1788_s0 + $0xa0] sm:$0xff]   ;;  %v1287_v13 = vld [vmem:[%s1788_s0 + $0xa8] sm:$0xff]   ;;  %v1288_v14 = vld [vmem:[%s1788_s0 + $0x30] sm:$0xff]  }
   0x6   :  { %v1289_v15 = vld [vmem:[%s1788_s0 + $0xb0] sm:$0xff]   ;;  %v1290_v16 = vld [vmem:[%s1788_s0 + $0x38] sm:$0xff]   ;;  %v1292_v18 = vld [vmem:[%s1788_s0 + $0x40] sm:$0xff]  }
   0x7   :  { %1205 = vmatpush3.bf16.msra.mxu0 %v1275_v1  ;;  %1273 = vmatpush3.bf16.msra.mxu1 %v1275_v1  ;;  %v1291_v17 = vld [vmem:[%s1788_s0 + $0xb8] sm:$0xff]   ;;  %v1293_v19 = vld [vmem:[%s1788_s0 + $0xc0] sm:$0xff]   ;;  %v1294_v20 = vld [vmem:[%s1788_s0 + $0x48] sm:$0xff]  }
   0x8   :  { %v1295_v21 = vld [vmem:[%s1788_s0 + $0xc8] sm:$0xff]   ;;  %v1296_v22 = vld [vmem:[%s1788_s0 + $0x50] sm:$0xff]   ;;  %v1298_v24 = vld [vmem:[%s1788_s0 + $0x58] sm:$0xff]  }
   0x9   :  { %v1297_v23 = vld [vmem:[%s1788_s0 + $0xd0] sm:$0xff]   ;;  %v1299_v25 = vld [vmem:[%s1788_s0 + $0xd8] sm:$0xff]   ;;  %v1300_v26 = vld [vmem:[%s1788_s0 + $0x60] sm:$0xff]  }
   0xa   :  { %1207 = vmatmul.mubr.msk.bf16.vlgmr.msra.gmra.mrb[0].mxu0 %vm262_vm0, %v1278_v4  ;;  %1239 = vmatmul.mubr.msk.bf16.vlgmr.msra.gmra.mrb[0].mxu1 %vm262_vm0, %v1279_v5  ;;  %v1301_v27 = vld [vmem:[%s1788_s0 + $0xe0] sm:$0xff]   ;;  %v1302_v28 = vld [vmem:[%s1788_s0 + $0x68] sm:$0xff]   ;;  %v1304_v30 = vld [vmem:[%s1788_s0 + $0x70] sm:$0xff]  }
   0xb   :  { %1210 = vmatprep.mubr.msk.bf16.mxu0 %vm262_vm0, %v1280_v6  ;;  %1242 = vmatprep.mubr.msk.bf16.mxu1 %vm262_vm0, %v1281_v7  ;;  %v1303_v29 = vld [vmem:[%s1788_s0 + $0xe8] sm:$0xff]   ;;  %v1305_v31 = vld [vmem:[%s1788_s0 + $0xf0] sm:$0xff]   ;;  %v1306_v32 = vld [vmem:[%s1788_s0 + $0x78] sm:$0xff]  }
   0xc   :  { %v1307_v33 = vld [vmem:[%s1788_s0 + $0xf8] sm:$0xff]   ;;  %v1465_v34 = vld [vmem:[%s1789_s2] ss:$0 sm:$0xff] }
  0x12   :  { %1211 = vmatmul.mubr.msk.bf16.gmra.mrb[4].mxu0 %vm262_vm0, %v1282_v8  ;;  %1243 = vmatmul.mubr.msk.bf16.gmra.mrb[4].mxu1 %vm262_vm0, %v1283_v9 }
  0x13   :  { %1214 = vmatprep.mubr.msk.bf16.mxu0 %vm262_vm0, %v1284_v10  ;;  %1246 = vmatprep.mubr.msk.bf16.mxu1 %vm262_vm0, %v1285_v11 }
  0x1a   :  { %1215 = vmatmul.mubr.msk.bf16.gmra.mrb[8].mxu0 %vm262_vm0, %v1286_v12  ;;  %1247 = vmatmul.mubr.msk.bf16.gmra.mrb[8].mxu1 %vm262_vm0, %v1287_v13 }
  0x1b   :  { %1218 = vmatprep.mubr.msk.bf16.mxu0 %vm262_vm0, %v1288_v14  ;;  %1250 = vmatprep.mubr.msk.bf16.mxu1 %vm262_vm0, %v1289_v15 }
  0x22   :  { %1219 = vmatmul.mubr.msk.bf16.gmra.mrb[12].mxu0 %vm262_vm0, %v1290_v16  ;;  %1251 = vmatmul.mubr.msk.bf16.gmra.mrb[12].mxu1 %vm262_vm0, %v1291_v17 }
  0x23   :  { %1222 = vmatprep.mubr.msk.bf16.mxu0 %vm262_vm0, %v1292_v18  ;;  %1254 = vmatprep.mubr.msk.bf16.mxu1 %vm262_vm0, %v1293_v19 }
  0x2a   :  { %1223 = vmatmul.mubr.msk.bf16.gmra.mrb[16].mxu0 %vm262_vm0, %v1294_v20  ;;  %1255 = vmatmul.mubr.msk.bf16.gmra.mrb[16].mxu1 %vm262_vm0, %v1295_v21 }
  0x2b   :  { %1226 = vmatprep.mubr.msk.bf16.mxu0 %vm262_vm0, %v1296_v22  ;;  %1258 = vmatprep.mubr.msk.bf16.mxu1 %vm262_vm0, %v1297_v23 }
  0x32   :  { %1227 = vmatmul.mubr.msk.bf16.gmra.mrb[20].mxu0 %vm262_vm0, %v1298_v24  ;;  %1259 = vmatmul.mubr.msk.bf16.gmra.mrb[20].mxu1 %vm262_vm0, %v1299_v25 }
  0x33   :  { %1230 = vmatprep.mubr.msk.bf16.mxu0 %vm262_vm0, %v1300_v26  ;;  %1262 = vmatprep.mubr.msk.bf16.mxu1 %vm262_vm0, %v1301_v27 }
  0x3a   :  { %1231 = vmatmul.mubr.msk.bf16.gmra.mrb[24].mxu0 %vm262_vm0, %v1302_v28  ;;  %1263 = vmatmul.mubr.msk.bf16.gmra.mrb[24].mxu1 %vm262_vm0, %v1303_v29 }
  0x3b   :  { %1234 = vmatprep.mubr.msk.bf16.mxu0 %vm262_vm0, %v1304_v30  ;;  %1266 = vmatprep.mubr.msk.bf16.mxu1 %vm262_vm0, %v1305_v31 }
  0x42   :  { %1235 = vmatmul.mubr.msk.bf16.gmra.mrb[28].mxu0 %vm262_vm0, %v1306_v32  ;;  %1267 = vmatmul.mubr.msk.bf16.gmra.mrb[28].mxu1 %vm262_vm0, %v1307_v33 }
  0xdd   :  { %v1208_v35 = vpop.f32.mrb[0].mxu0  ;;  %v1240_v36 = vpop.f32.mrb[0].mxu1 }
  0xde   :  { %v402_v37 = vadd.f32 %v1208_v35, %v1465_v34  ;;  %v530_v38 = vadd.f32 %v1240_v36, %v1465_v34  ;;  %v393_v39 = vpop.f32.mrb[1].mxu0  ;;  %v521_v40 = vpop.f32.mrb[1].mxu1 }
  0xdf   :  { %v394_v41 = vadd.f32 %v1465_v34, %v393_v39  ;;  %v522_v42 = vadd.f32 %v1465_v34, %v521_v40  ;;  %v1209_v43 = vpop.f32.mrb[2].mxu0  ;;  %v1241_v44 = vpop.f32.mrb[2].mxu1 }
  0xe0   :  { %v1106_v45 = vpack.c.bf16 %v402_v37, %v402_v37  ;;  %v1138_v46 = vpack.c.bf16 %v530_v38, %v530_v38  ;;  %v405_v47 = vadd.f32 %v1209_v43, %v1465_v34  ;;  %v533_v48 = vadd.f32 %v1241_v44, %v1465_v34  ;;  %v396_v49 = vpop.f32.mrb[3].mxu0  ;;  %v524_v50 = vpop.f32.mrb[3].mxu1 }
  0xe1   :  { %v1104_v51 = vpack.c.bf16 %v394_v41, %v394_v41  ;;  %v1136_v52 = vpack.c.bf16 %v522_v42, %v522_v42  ;;  %v397_v53 = vadd.f32 %v1465_v34, %v396_v49  ;;  %v525_v54 = vadd.f32 %v1465_v34, %v524_v50 }
  0xe2   :  { %907 = vst.msk [vmem:[%s1790_s3 + $0x8] sm:$0xf] %vm904_vm1, %v1106_v45  ;;  %939 = vst.msk [vmem:[%s1790_s3 + $0x88] sm:$0xf] %vm904_vm1, %v1138_v46  ;;  %v1107_v55 = vpack.c.bf16 %v405_v47, %v405_v47  ;;  %v1139_v56 = vpack.c.bf16 %v533_v48, %v533_v48 }
  0xe3   :  { %905 = vst.msk [vmem:[%s1790_s3] sm:$0xf] %vm904_vm1, %v1104_v51  ;;  %937 = vst.msk [vmem:[%s1790_s3 + $0x80] sm:$0xf] %vm904_vm1, %v1136_v52  ;;  %v1105_v57 = vpack.c.bf16 %v397_v53, %v397_v53  ;;  %v1137_v58 = vpack.c.bf16 %v525_v54, %v525_v54 }
  0xe4   :  { %908 = vst.msk [vmem:[%s1790_s3 + $0xc] sm:$0xf] %vm904_vm1, %v1107_v55  ;;  %940 = vst.msk [vmem:[%s1790_s3 + $0x8c] sm:$0xf] %vm904_vm1, %v1139_v56 }
  0xe5   :  { %906 = vst.msk [vmem:[%s1790_s3 + $0x4] sm:$0xf] %vm904_vm1, %v1105_v57  ;;  %938 = vst.msk [vmem:[%s1790_s3 + $0x84] sm:$0xf] %vm904_vm1, %v1137_v58  ;;  %v1212_v59 = vpop.f32.mrb[4].mxu0  ;;  %v1244_v60 = vpop.f32.mrb[4].mxu1 }
  0xe6   :  { %v418_v61 = vadd.f32 %v1212_v59, %v1465_v34  ;;  %v546_v62 = vadd.f32 %v1244_v60, %v1465_v34  ;;  %v409_v63 = vpop.f32.mrb[5].mxu0  ;;  %v537_v0 = vpop.f32.mrb[5].mxu1 }
  0xe7   :  { %v410_v1 = vadd.f32 %v1465_v34, %v409_v63  ;;  %v538_v2 = vadd.f32 %v1465_v34, %v537_v0  ;;  %v1213_v3 = vpop.f32.mrb[6].mxu0  ;;  %v1245_v4 = vpop.f32.mrb[6].mxu1 }
  0xe8   :  { %v1110_v5 = vpack.c.bf16 %v418_v61, %v418_v61  ;;  %v1142_v6 = vpack.c.bf16 %v546_v62, %v546_v62  ;;  %v421_v7 = vadd.f32 %v1213_v3, %v1465_v34  ;;  %v549_v8 = vadd.f32 %v1245_v4, %v1465_v34  ;;  %v412_v9 = vpop.f32.mrb[7].mxu0  ;;  %v540_v10 = vpop.f32.mrb[7].mxu1 }
  0xe9   :  { %v1108_v11 = vpack.c.bf16 %v410_v1, %v410_v1  ;;  %v1140_v12 = vpack.c.bf16 %v538_v2, %v538_v2  ;;  %v413_v13 = vadd.f32 %v1465_v34, %v412_v9  ;;  %v541_v14 = vadd.f32 %v1465_v34, %v540_v10 }
  0xea   :  { %911 = vst.msk [vmem:[%s1790_s3 + $0x18] sm:$0xf] %vm904_vm1, %v1110_v5  ;;  %943 = vst.msk [vmem:[%s1790_s3 + $0x98] sm:$0xf] %vm904_vm1, %v1142_v6  ;;  %v1111_v15 = vpack.c.bf16 %v421_v7, %v421_v7  ;;  %v1143_v16 = vpack.c.bf16 %v549_v8, %v549_v8 }
  0xeb   :  { %909 = vst.msk [vmem:[%s1790_s3 + $0x10] sm:$0xf] %vm904_vm1, %v1108_v11  ;;  %941 = vst.msk [vmem:[%s1790_s3 + $0x90] sm:$0xf] %vm904_vm1, %v1140_v12  ;;  %v1109_v17 = vpack.c.bf16 %v413_v13, %v413_v13  ;;  %v1141_v18 = vpack.c.bf16 %v541_v14, %v541_v14 }
  0xec   :  { %912 = vst.msk [vmem:[%s1790_s3 + $0x1c] sm:$0xf] %vm904_vm1, %v1111_v15  ;;  %944 = vst.msk [vmem:[%s1790_s3 + $0x9c] sm:$0xf] %vm904_vm1, %v1143_v16 }
  0xed   :  { %910 = vst.msk [vmem:[%s1790_s3 + $0x14] sm:$0xf] %vm904_vm1, %v1109_v17  ;;  %942 = vst.msk [vmem:[%s1790_s3 + $0x94] sm:$0xf] %vm904_vm1, %v1141_v18  ;;  %v1216_v19 = vpop.f32.mrb[8].mxu0  ;;  %v1248_v20 = vpop.f32.mrb[8].mxu1 }
  0xee   :  { %v434_v21 = vadd.f32 %v1216_v19, %v1465_v34  ;;  %v562_v22 = vadd.f32 %v1248_v20, %v1465_v34  ;;  %v425_v23 = vpop.f32.mrb[9].mxu0  ;;  %v553_v24 = vpop.f32.mrb[9].mxu1 }
  0xef   :  { %v426_v25 = vadd.f32 %v1465_v34, %v425_v23  ;;  %v554_v26 = vadd.f32 %v1465_v34, %v553_v24  ;;  %v1217_v27 = vpop.f32.mrb[10].mxu0  ;;  %v1249_v28 = vpop.f32.mrb[10].mxu1 }
  0xf0   :  { %v1114_v29 = vpack.c.bf16 %v434_v21, %v434_v21  ;;  %v1146_v30 = vpack.c.bf16 %v562_v22, %v562_v22  ;;  %v437_v31 = vadd.f32 %v1217_v27, %v1465_v34  ;;  %v565_v32 = vadd.f32 %v1249_v28, %v1465_v34  ;;  %v428_v33 = vpop.f32.mrb[11].mxu0  ;;  %v556_v35 = vpop.f32.mrb[11].mxu1 }
  0xf1   :  { %v1112_v36 = vpack.c.bf16 %v426_v25, %v426_v25  ;;  %v1144_v37 = vpack.c.bf16 %v554_v26, %v554_v26  ;;  %v429_v38 = vadd.f32 %v1465_v34, %v428_v33  ;;  %v557_v39 = vadd.f32 %v1465_v34, %v556_v35 }
  0xf2   :  { %915 = vst.msk [vmem:[%s1790_s3 + $0x28] sm:$0xf] %vm904_vm1, %v1114_v29  ;;  %947 = vst.msk [vmem:[%s1790_s3 + $0xa8] sm:$0xf] %vm904_vm1, %v1146_v30  ;;  %v1115_v40 = vpack.c.bf16 %v437_v31, %v437_v31  ;;  %v1147_v41 = vpack.c.bf16 %v565_v32, %v565_v32 }
  0xf3   :  { %913 = vst.msk [vmem:[%s1790_s3 + $0x20] sm:$0xf] %vm904_vm1, %v1112_v36  ;;  %945 = vst.msk [vmem:[%s1790_s3 + $0xa0] sm:$0xf] %vm904_vm1, %v1144_v37  ;;  %v1113_v42 = vpack.c.bf16 %v429_v38, %v429_v38  ;;  %v1145_v43 = vpack.c.bf16 %v557_v39, %v557_v39 }
  0xf4   :  { %916 = vst.msk [vmem:[%s1790_s3 + $0x2c] sm:$0xf] %vm904_vm1, %v1115_v40  ;;  %948 = vst.msk [vmem:[%s1790_s3 + $0xac] sm:$0xf] %vm904_vm1, %v1147_v41 }
  0xf5   :  { %914 = vst.msk [vmem:[%s1790_s3 + $0x24] sm:$0xf] %vm904_vm1, %v1113_v42  ;;  %946 = vst.msk [vmem:[%s1790_s3 + $0xa4] sm:$0xf] %vm904_vm1, %v1145_v43  ;;  %v1220_v44 = vpop.f32.mrb[12].mxu0  ;;  %v1252_v45 = vpop.f32.mrb[12].mxu1 }
  0xf6   :  { %v450_v46 = vadd.f32 %v1220_v44, %v1465_v34  ;;  %v578_v47 = vadd.f32 %v1252_v45, %v1465_v34  ;;  %v441_v48 = vpop.f32.mrb[13].mxu0  ;;  %v569_v49 = vpop.f32.mrb[13].mxu1 }
  0xf7   :  { %v442_v50 = vadd.f32 %v1465_v34, %v441_v48  ;;  %v570_v51 = vadd.f32 %v1465_v34, %v569_v49  ;;  %v1221_v52 = vpop.f32.mrb[14].mxu0  ;;  %v1253_v53 = vpop.f32.mrb[14].mxu1 }
  0xf8   :  { %v1118_v54 = vpack.c.bf16 %v450_v46, %v450_v46  ;;  %v1150_v55 = vpack.c.bf16 %v578_v47, %v578_v47  ;;  %v453_v56 = vadd.f32 %v1221_v52, %v1465_v34  ;;  %v581_v57 = vadd.f32 %v1253_v53, %v1465_v34  ;;  %v444_v58 = vpop.f32.mrb[15].mxu0  ;;  %v572_v59 = vpop.f32.mrb[15].mxu1 }
  0xf9   :  { %v1116_v60 = vpack.c.bf16 %v442_v50, %v442_v50  ;;  %v1148_v61 = vpack.c.bf16 %v570_v51, %v570_v51  ;;  %v445_v62 = vadd.f32 %v1465_v34, %v444_v58  ;;  %v573_v63 = vadd.f32 %v1465_v34, %v572_v59 }
  0xfa   :  { %919 = vst.msk [vmem:[%s1790_s3 + $0x38] sm:$0xf] %vm904_vm1, %v1118_v54  ;;  %951 = vst.msk [vmem:[%s1790_s3 + $0xb8] sm:$0xf] %vm904_vm1, %v1150_v55  ;;  %v1119_v0 = vpack.c.bf16 %v453_v56, %v453_v56  ;;  %v1151_v1 = vpack.c.bf16 %v581_v57, %v581_v57 }
  0xfb   :  { %917 = vst.msk [vmem:[%s1790_s3 + $0x30] sm:$0xf] %vm904_vm1, %v1116_v60  ;;  %949 = vst.msk [vmem:[%s1790_s3 + $0xb0] sm:$0xf] %vm904_vm1, %v1148_v61  ;;  %v1117_v2 = vpack.c.bf16 %v445_v62, %v445_v62  ;;  %v1149_v3 = vpack.c.bf16 %v573_v63, %v573_v63 }
  0xfc   :  { %920 = vst.msk [vmem:[%s1790_s3 + $0x3c] sm:$0xf] %vm904_vm1, %v1119_v0  ;;  %952 = vst.msk [vmem:[%s1790_s3 + $0xbc] sm:$0xf] %vm904_vm1, %v1151_v1 }
  0xfd   :  { %918 = vst.msk [vmem:[%s1790_s3 + $0x34] sm:$0xf] %vm904_vm1, %v1117_v2  ;;  %950 = vst.msk [vmem:[%s1790_s3 + $0xb4] sm:$0xf] %vm904_vm1, %v1149_v3  ;;  %v1224_v4 = vpop.f32.mrb[16].mxu0  ;;  %v1256_v5 = vpop.f32.mrb[16].mxu1 }
  0xfe   :  { %v466_v6 = vadd.f32 %v1224_v4, %v1465_v34  ;;  %v594_v7 = vadd.f32 %v1256_v5, %v1465_v34  ;;  %v457_v8 = vpop.f32.mrb[17].mxu0  ;;  %v585_v9 = vpop.f32.mrb[17].mxu1 }
  0xff   :  { %v458_v10 = vadd.f32 %v1465_v34, %v457_v8  ;;  %v586_v11 = vadd.f32 %v1465_v34, %v585_v9  ;;  %v1225_v12 = vpop.f32.mrb[18].mxu0  ;;  %v1257_v13 = vpop.f32.mrb[18].mxu1 }
 0x100   :  { %v1122_v14 = vpack.c.bf16 %v466_v6, %v466_v6  ;;  %v1154_v15 = vpack.c.bf16 %v594_v7, %v594_v7  ;;  %v469_v16 = vadd.f32 %v1225_v12, %v1465_v34  ;;  %v597_v17 = vadd.f32 %v1257_v13, %v1465_v34  ;;  %v460_v18 = vpop.f32.mrb[19].mxu0  ;;  %v588_v19 = vpop.f32.mrb[19].mxu1 }
 0x101   :  { %v1120_v20 = vpack.c.bf16 %v458_v10, %v458_v10  ;;  %v1152_v21 = vpack.c.bf16 %v586_v11, %v586_v11  ;;  %v461_v22 = vadd.f32 %v1465_v34, %v460_v18  ;;  %v589_v23 = vadd.f32 %v1465_v34, %v588_v19 }
 0x102   :  { %923 = vst.msk [vmem:[%s1790_s3 + $0x48] sm:$0xf] %vm904_vm1, %v1122_v14  ;;  %955 = vst.msk [vmem:[%s1790_s3 + $0xc8] sm:$0xf] %vm904_vm1, %v1154_v15  ;;  %v1123_v24 = vpack.c.bf16 %v469_v16, %v469_v16  ;;  %v1155_v25 = vpack.c.bf16 %v597_v17, %v597_v17 }
 0x103   :  { %921 = vst.msk [vmem:[%s1790_s3 + $0x40] sm:$0xf] %vm904_vm1, %v1120_v20  ;;  %953 = vst.msk [vmem:[%s1790_s3 + $0xc0] sm:$0xf] %vm904_vm1, %v1152_v21  ;;  %v1121_v26 = vpack.c.bf16 %v461_v22, %v461_v22  ;;  %v1153_v27 = vpack.c.bf16 %v589_v23, %v589_v23 }
 0x104   :  { %924 = vst.msk [vmem:[%s1790_s3 + $0x4c] sm:$0xf] %vm904_vm1, %v1123_v24  ;;  %956 = vst.msk [vmem:[%s1790_s3 + $0xcc] sm:$0xf] %vm904_vm1, %v1155_v25 }
 0x105   :  { %922 = vst.msk [vmem:[%s1790_s3 + $0x44] sm:$0xf] %vm904_vm1, %v1121_v26  ;;  %954 = vst.msk [vmem:[%s1790_s3 + $0xc4] sm:$0xf] %vm904_vm1, %v1153_v27  ;;  %v1228_v28 = vpop.f32.mrb[20].mxu0  ;;  %v1260_v29 = vpop.f32.mrb[20].mxu1 }
 0x106   :  { %v482_v30 = vadd.f32 %v1228_v28, %v1465_v34  ;;  %v610_v31 = vadd.f32 %v1260_v29, %v1465_v34  ;;  %v473_v32 = vpop.f32.mrb[21].mxu0  ;;  %v601_v33 = vpop.f32.mrb[21].mxu1 }
 0x107   :  { %v474_v35 = vadd.f32 %v1465_v34, %v473_v32  ;;  %v602_v36 = vadd.f32 %v1465_v34, %v601_v33  ;;  %v1229_v37 = vpop.f32.mrb[22].mxu0  ;;  %v1261_v38 = vpop.f32.mrb[22].mxu1 }
 0x108   :  { %v1126_v39 = vpack.c.bf16 %v482_v30, %v482_v30  ;;  %v1158_v40 = vpack.c.bf16 %v610_v31, %v610_v31  ;;  %v485_v41 = vadd.f32 %v1229_v37, %v1465_v34  ;;  %v613_v42 = vadd.f32 %v1261_v38, %v1465_v34  ;;  %v476_v43 = vpop.f32.mrb[23].mxu0  ;;  %v604_v44 = vpop.f32.mrb[23].mxu1 }
 0x109   :  { %v1124_v45 = vpack.c.bf16 %v474_v35, %v474_v35  ;;  %v1156_v46 = vpack.c.bf16 %v602_v36, %v602_v36  ;;  %v477_v47 = vadd.f32 %v1465_v34, %v476_v43  ;;  %v605_v48 = vadd.f32 %v1465_v34, %v604_v44 }
 0x10a   :  { %927 = vst.msk [vmem:[%s1790_s3 + $0x58] sm:$0xf] %vm904_vm1, %v1126_v39  ;;  %959 = vst.msk [vmem:[%s1790_s3 + $0xd8] sm:$0xf] %vm904_vm1, %v1158_v40  ;;  %v1127_v49 = vpack.c.bf16 %v485_v41, %v485_v41  ;;  %v1159_v50 = vpack.c.bf16 %v613_v42, %v613_v42 }
 0x10b   :  { %925 = vst.msk [vmem:[%s1790_s3 + $0x50] sm:$0xf] %vm904_vm1, %v1124_v45  ;;  %957 = vst.msk [vmem:[%s1790_s3 + $0xd0] sm:$0xf] %vm904_vm1, %v1156_v46  ;;  %v1125_v51 = vpack.c.bf16 %v477_v47, %v477_v47  ;;  %v1157_v52 = vpack.c.bf16 %v605_v48, %v605_v48 }
 0x10c   :  { %928 = vst.msk [vmem:[%s1790_s3 + $0x5c] sm:$0xf] %vm904_vm1, %v1127_v49  ;;  %960 = vst.msk [vmem:[%s1790_s3 + $0xdc] sm:$0xf] %vm904_vm1, %v1159_v50 }
 0x10d   :  { %926 = vst.msk [vmem:[%s1790_s3 + $0x54] sm:$0xf] %vm904_vm1, %v1125_v51  ;;  %958 = vst.msk [vmem:[%s1790_s3 + $0xd4] sm:$0xf] %vm904_vm1, %v1157_v52  ;;  %v1232_v53 = vpop.f32.mrb[24].mxu0  ;;  %v1264_v54 = vpop.f32.mrb[24].mxu1 }
 0x10e   :  { %v498_v55 = vadd.f32 %v1232_v53, %v1465_v34  ;;  %v626_v56 = vadd.f32 %v1264_v54, %v1465_v34  ;;  %v489_v57 = vpop.f32.mrb[25].mxu0  ;;  %v617_v58 = vpop.f32.mrb[25].mxu1 }
 0x10f   :  { %v490_v59 = vadd.f32 %v1465_v34, %v489_v57  ;;  %v618_v60 = vadd.f32 %v1465_v34, %v617_v58  ;;  %v1233_v61 = vpop.f32.mrb[26].mxu0  ;;  %v1265_v62 = vpop.f32.mrb[26].mxu1 }
 0x110   :  { %v1130_v63 = vpack.c.bf16 %v498_v55, %v498_v55  ;;  %v1162_v0 = vpack.c.bf16 %v626_v56, %v626_v56  ;;  %v501_v1 = vadd.f32 %v1233_v61, %v1465_v34  ;;  %v629_v2 = vadd.f32 %v1265_v62, %v1465_v34  ;;  %v492_v3 = vpop.f32.mrb[27].mxu0  ;;  %v620_v4 = vpop.f32.mrb[27].mxu1 }
 0x111   :  { %v1128_v5 = vpack.c.bf16 %v490_v59, %v490_v59  ;;  %v1160_v6 = vpack.c.bf16 %v618_v60, %v618_v60  ;;  %v493_v7 = vadd.f32 %v1465_v34, %v492_v3  ;;  %v621_v8 = vadd.f32 %v1465_v34, %v620_v4 }
 0x112   :  { %931 = vst.msk [vmem:[%s1790_s3 + $0x68] sm:$0xf] %vm904_vm1, %v1130_v63  ;;  %963 = vst.msk [vmem:[%s1790_s3 + $0xe8] sm:$0xf] %vm904_vm1, %v1162_v0  ;;  %v1131_v9 = vpack.c.bf16 %v501_v1, %v501_v1  ;;  %v1163_v10 = vpack.c.bf16 %v629_v2, %v629_v2 }
 0x113   :  { %929 = vst.msk [vmem:[%s1790_s3 + $0x60] sm:$0xf] %vm904_vm1, %v1128_v5  ;;  %961 = vst.msk [vmem:[%s1790_s3 + $0xe0] sm:$0xf] %vm904_vm1, %v1160_v6  ;;  %v1129_v11 = vpack.c.bf16 %v493_v7, %v493_v7  ;;  %v1161_v12 = vpack.c.bf16 %v621_v8, %v621_v8 }
 0x114   :  { %932 = vst.msk [vmem:[%s1790_s3 + $0x6c] sm:$0xf] %vm904_vm1, %v1131_v9  ;;  %964 = vst.msk [vmem:[%s1790_s3 + $0xec] sm:$0xf] %vm904_vm1, %v1163_v10 }
 0x115   :  { %930 = vst.msk [vmem:[%s1790_s3 + $0x64] sm:$0xf] %vm904_vm1, %v1129_v11  ;;  %962 = vst.msk [vmem:[%s1790_s3 + $0xe4] sm:$0xf] %vm904_vm1, %v1161_v12  ;;  %v1236_v13 = vpop.f32.mrb[28].mxu0  ;;  %v1268_v14 = vpop.f32.mrb[28].mxu1 }
 0x116   :  { %v514_v15 = vadd.f32 %v1236_v13, %v1465_v34  ;;  %v642_v16 = vadd.f32 %v1268_v14, %v1465_v34  ;;  %v505_v17 = vpop.f32.mrb[29].mxu0  ;;  %v633_v18 = vpop.f32.mrb[29].mxu1 }
 0x117   :  { %v506_v19 = vadd.f32 %v1465_v34, %v505_v17  ;;  %v634_v20 = vadd.f32 %v1465_v34, %v633_v18  ;;  %v1237_v21 = vpop.f32.mrb[30].mxu0  ;;  %v1269_v22 = vpop.f32.mrb[30].mxu1 }
 0x118   :  { %v1134_v23 = vpack.c.bf16 %v514_v15, %v514_v15  ;;  %v1166_v24 = vpack.c.bf16 %v642_v16, %v642_v16  ;;  %v517_v25 = vadd.f32 %v1237_v21, %v1465_v34  ;;  %v645_v26 = vadd.f32 %v1269_v22, %v1465_v34  ;;  %v508_v27 = vpop.f32.mrb[31].mxu0  ;;  %v636_v28 = vpop.f32.mrb[31].mxu1 }
 0x119   :  { %v1132_v29 = vpack.c.bf16 %v506_v19, %v506_v19  ;;  %v1164_v30 = vpack.c.bf16 %v634_v20, %v634_v20  ;;  %v509_v31 = vadd.f32 %v1465_v34, %v508_v27  ;;  %v637_v32 = vadd.f32 %v1465_v34, %v636_v28 }
 0x11a   :  { %935 = vst.msk [vmem:[%s1790_s3 + $0x78] sm:$0xf] %vm904_vm1, %v1134_v23  ;;  %967 = vst.msk [vmem:[%s1790_s3 + $0xf8] sm:$0xf] %vm904_vm1, %v1166_v24  ;;  %v1135_v33 = vpack.c.bf16 %v517_v25, %v517_v25  ;;  %v1167_v35 = vpack.c.bf16 %v645_v26, %v645_v26 }
 0x11b   :  { %933 = vst.msk [vmem:[%s1790_s3 + $0x70] sm:$0xf] %vm904_vm1, %v1132_v29  ;;  %965 = vst.msk [vmem:[%s1790_s3 + $0xf0] sm:$0xf] %vm904_vm1, %v1164_v30  ;;  %v1133_v34 = vpack.c.bf16 %v509_v31, %v509_v31  ;;  %v1165_v36 = vpack.c.bf16 %v637_v32, %v637_v32 }
 0x11c   :  { %936 = vst.msk [vmem:[%s1790_s3 + $0x7c] sm:$0xf] %vm904_vm1, %v1135_v33  ;;  %968 = vst.msk [vmem:[%s1790_s3 + $0xfc] sm:$0xf] %vm904_vm1, %v1167_v35 }
 0x11d   :  { %934 = vst.msk [vmem:[%s1790_s3 + $0x74] sm:$0xf] %vm904_vm1, %v1133_v34  ;;  %966 = vst.msk [vmem:[%s1790_s3 + $0xf4] sm:$0xf] %vm904_vm1, %v1165_v36 }

// kernel: age_gender_forward.35
= control target key start
LH: loop header
LB: loop body
LE: loop exit
PB: predicated region body
PF: predicated region fallthrough
CT: control target
= control target key end

     0   :  { %vm254_vm0 = vcmask 130048   ;;  %vm1024_vm1 = vcmask 781312   ;;  %s1897_s1 = inlined_call_operand.vmem [shape: bf16[16,96], index: 1, kind: input, shape index: {}]   ;;  %s1898_s0 = inlined_call_operand.vmem [shape: bf16[512,16], index: 0, kind: input, shape index: {}]   ;;  %s1899_s2 = inlined_call_operand.vmem [shape: f32[1,96], index: 2, kind: input, shape index: {}]   ;;  %s1900_s3 = inlined_call_operand.vmem [shape: bf16[512,96], index: 3, kind: output, shape index: {}]  }
   0x1   :  { %v1388_v0 = vld [vmem:[%s1897_s1] sm:$0xff]   ;;  %v1391_v3 = vld [vmem:[%s1898_s0 + $0x8] sm:$0xff]   ;;  %v1393_v5 = vld [vmem:[%s1898_s0 + $0x10] sm:$0xff]  }
   0x2   :  { %v1389_v1 = vld [vmem:[%s1898_s0] sm:$0xff]   ;;  %1320 = vmatprep.subr.bf16.mxu0 %v1388_v0  ;;  %1386 = vmatprep.subr.bf16.mxu1 %v1388_v0  ;;  %v1392_v4 = vld [vmem:[%s1898_s0 + $0x88] sm:$0xff]   ;;  %v1394_v6 = vld [vmem:[%s1898_s0 + $0x90] sm:$0xff]  }
   0x3   :  { %v1390_v2 = vld [vmem:[%s1898_s0 + $0x80] sm:$0xff]   ;;  %1321 = vmatpush3.bf16.msra.mxu0 %v1388_v0  ;;  %1387 = vmatpush3.bf16.msra.mxu1 %v1388_v0  ;;  %v1395_v7 = vld [vmem:[%s1898_s0 + $0x18] sm:$0xff]   ;;  %v1399_v11 = vld [vmem:[%s1898_s0 + $0x28] sm:$0xff]  }
   0x4   :  { %1322 = vmatprep.mubr.msk.bf16.mxu0 %vm254_vm0, %v1389_v1  ;;  %1354 = vmatprep.mubr.msk.bf16.mxu1 %vm254_vm0, %v1390_v2  ;;  %v1396_v8 = vld [vmem:[%s1898_s0 + $0x98] sm:$0xff]   ;;  %v1397_v9 = vld [vmem:[%s1898_s0 + $0x20] sm:$0xff]   ;;  %v1400_v12 = vld [vmem:[%s1898_s0 + $0xa8] sm:$0xff]  }
   0x5   :  { %v1398_v10 = vld [vmem:[%s1898_s0 + $0xa0] sm:$0xff]   ;;  %v1401_v13 = vld [vmem:[%s1898_s0 + $0x30] sm:$0xff]   ;;  %v1403_v15 = vld [vmem:[%s1898_s0 + $0x38] sm:$0xff]  }
   0x6   :  { %1323 = vmatmul.mubr.msk.bf16.vlgmr.msra.gmra.mrb[0].mxu0 %vm254_vm0, %v1391_v3  ;;  %1355 = vmatmul.mubr.msk.bf16.vlgmr.msra.gmra.mrb[0].mxu1 %vm254_vm0, %v1392_v4  ;;  %v1402_v14 = vld [vmem:[%s1898_s0 + $0xb0] sm:$0xff]   ;;  %v1404_v16 = vld [vmem:[%s1898_s0 + $0xb8] sm:$0xff]   ;;  %v1405_v17 = vld [vmem:[%s1898_s0 + $0x40] sm:$0xff]  }
   0x7   :  { %1326 = vmatprep.mubr.msk.bf16.mxu0 %vm254_vm0, %v1393_v5  ;;  %1358 = vmatprep.mubr.msk.bf16.mxu1 %vm254_vm0, %v1394_v6  ;;  %v1406_v18 = vld [vmem:[%s1898_s0 + $0xc0] sm:$0xff]   ;;  %v1407_v19 = vld [vmem:[%s1898_s0 + $0x48] sm:$0xff]   ;;  %v1409_v21 = vld [vmem:[%s1898_s0 + $0x50] sm:$0xff]  }
   0x8   :  { %v1408_v20 = vld [vmem:[%s1898_s0 + $0xc8] sm:$0xff]   ;;  %v1410_v22 = vld [vmem:[%s1898_s0 + $0xd0] sm:$0xff]   ;;  %v1411_v23 = vld [vmem:[%s1898_s0 + $0x58] sm:$0xff]  }
   0x9   :  { %v1412_v24 = vld [vmem:[%s1898_s0 + $0xd8] sm:$0xff]   ;;  %v1413_v25 = vld [vmem:[%s1898_s0 + $0x60] sm:$0xff]   ;;  %v1415_v27 = vld [vmem:[%s1898_s0 + $0x68] sm:$0xff]  }
   0xa   :  { %v1414_v26 = vld [vmem:[%s1898_s0 + $0xe0] sm:$0xff]   ;;  %v1416_v28 = vld [vmem:[%s1898_s0 + $0xe8] sm:$0xff]   ;;  %v1417_v29 = vld [vmem:[%s1898_s0 + $0x70] sm:$0xff]  }
   0xb   :  { %v1418_v30 = vld [vmem:[%s1898_s0 + $0xf0] sm:$0xff]   ;;  %v1419_v31 = vld [vmem:[%s1898_s0 + $0x78] sm:$0xff]   ;;  %v1575_v33 = vld [vmem:[%s1899_s2] ss:$0 sm:$0xff] }
   0xc   :  { %v1420_v32 = vld [vmem:[%s1898_s0 + $0xf8] sm:$0xff]  }
   0xe   :  { %1327 = vmatmul.mubr.msk.bf16.gmra.mrb[4].mxu0 %vm254_vm0, %v1395_v7  ;;  %1359 = vmatmul.mubr.msk.bf16.gmra.mrb[4].mxu1 %vm254_vm0, %v1396_v8 }
   0xf   :  { %1330 = vmatprep.mubr.msk.bf16.mxu0 %vm254_vm0, %v1397_v9  ;;  %1362 = vmatprep.mubr.msk.bf16.mxu1 %vm254_vm0, %v1398_v10 }
  0x16   :  { %1331 = vmatmul.mubr.msk.bf16.gmra.mrb[8].mxu0 %vm254_vm0, %v1399_v11  ;;  %1363 = vmatmul.mubr.msk.bf16.gmra.mrb[8].mxu1 %vm254_vm0, %v1400_v12 }
  0x17   :  { %1334 = vmatprep.mubr.msk.bf16.mxu0 %vm254_vm0, %v1401_v13  ;;  %1366 = vmatprep.mubr.msk.bf16.mxu1 %vm254_vm0, %v1402_v14 }
  0x1e   :  { %1335 = vmatmul.mubr.msk.bf16.gmra.mrb[12].mxu0 %vm254_vm0, %v1403_v15  ;;  %1367 = vmatmul.mubr.msk.bf16.gmra.mrb[12].mxu1 %vm254_vm0, %v1404_v16 }
  0x1f   :  { %1338 = vmatprep.mubr.msk.bf16.mxu0 %vm254_vm0, %v1405_v17  ;;  %1370 = vmatprep.mubr.msk.bf16.mxu1 %vm254_vm0, %v1406_v18 }
  0x26   :  { %1339 = vmatmul.mubr.msk.bf16.gmra.mrb[16].mxu0 %vm254_vm0, %v1407_v19  ;;  %1371 = vmatmul.mubr.msk.bf16.gmra.mrb[16].mxu1 %vm254_vm0, %v1408_v20 }
  0x27   :  { %1342 = vmatprep.mubr.msk.bf16.mxu0 %vm254_vm0, %v1409_v21  ;;  %1374 = vmatprep.mubr.msk.bf16.mxu1 %vm254_vm0, %v1410_v22 }
  0x2e   :  { %1343 = vmatmul.mubr.msk.bf16.gmra.mrb[20].mxu0 %vm254_vm0, %v1411_v23  ;;  %1375 = vmatmul.mubr.msk.bf16.gmra.mrb[20].mxu1 %vm254_vm0, %v1412_v24 }
  0x2f   :  { %1346 = vmatprep.mubr.msk.bf16.mxu0 %vm254_vm0, %v1413_v25  ;;  %1378 = vmatprep.mubr.msk.bf16.mxu1 %vm254_vm0, %v1414_v26 }
  0x36   :  { %1347 = vmatmul.mubr.msk.bf16.gmra.mrb[24].mxu0 %vm254_vm0, %v1415_v27  ;;  %1379 = vmatmul.mubr.msk.bf16.gmra.mrb[24].mxu1 %vm254_vm0, %v1416_v28 }
  0x37   :  { %1350 = vmatprep.mubr.msk.bf16.mxu0 %vm254_vm0, %v1417_v29  ;;  %1382 = vmatprep.mubr.msk.bf16.mxu1 %vm254_vm0, %v1418_v30 }
  0x3e   :  { %1351 = vmatmul.mubr.msk.bf16.gmra.mrb[28].mxu0 %vm254_vm0, %v1419_v31  ;;  %1383 = vmatmul.mubr.msk.bf16.gmra.mrb[28].mxu1 %vm254_vm0, %v1420_v32 }
  0xd9   :  { %v1324_v34 = vpop.f32.mrb[0].mxu0  ;;  %v1356_v35 = vpop.f32.mrb[0].mxu1 }
  0xda   :  { %v394_v36 = vadd.f32 %v1324_v34, %v1575_v33  ;;  %v522_v37 = vadd.f32 %v1356_v35, %v1575_v33  ;;  %v385_v38 = vpop.f32.mrb[1].mxu0  ;;  %v513_v39 = vpop.f32.mrb[1].mxu1 }
  0xdb   :  { %v386_v40 = vadd.f32 %v1575_v33, %v385_v38  ;;  %v514_v41 = vadd.f32 %v1575_v33, %v513_v39  ;;  %v1325_v42 = vpop.f32.mrb[2].mxu0  ;;  %v1357_v43 = vpop.f32.mrb[2].mxu1 }
  0xdc   :  { %v642_v44 = vmax.f32 %v394_v36, 0.0  ;;  %v674_v45 = vmax.f32 %v522_v37, 0.0  ;;  %v397_v46 = vadd.f32 %v1325_v42, %v1575_v33  ;;  %v525_v47 = vadd.f32 %v1357_v43, %v1575_v33  ;;  %v388_v48 = vpop.f32.mrb[3].mxu0  ;;  %v516_v49 = vpop.f32.mrb[3].mxu1 }
  0xdd   :  { %v640_v50 = vmax.f32 %v386_v40, 0.0  ;;  %v672_v51 = vmax.f32 %v514_v41, 0.0  ;;  %v389_v52 = vadd.f32 %v1575_v33, %v388_v48  ;;  %v517_v53 = vadd.f32 %v1575_v33, %v516_v49 }
  0xde   :  { %v706_v54 = vmin.f32 %v642_v44, 6.0  ;;  %v738_v55 = vmin.f32 %v674_v45, 6.0  ;;  %v643_v56 = vmax.f32 %v397_v46, 0.0  ;;  %v675_v57 = vmax.f32 %v525_v47, 0.0 }
  0xdf   :  { %v704_v58 = vmin.f32 %v640_v50, 6.0  ;;  %v736_v59 = vmin.f32 %v672_v51, 6.0  ;;  %v641_v60 = vmax.f32 %v389_v52, 0.0  ;;  %v673_v61 = vmax.f32 %v517_v53, 0.0 }
  0xe0   :  { %v1225_v62 = vpack.c.bf16 %v706_v54, %v706_v54  ;;  %v1257_v63 = vpack.c.bf16 %v738_v55, %v738_v55  ;;  %v707_v0 = vmin.f32 %v643_v56, 6.0  ;;  %v739_v1 = vmin.f32 %v675_v57, 6.0 }
  0xe1   :  { %v1223_v2 = vpack.c.bf16 %v704_v58, %v704_v58  ;;  %v1255_v3 = vpack.c.bf16 %v736_v59, %v736_v59  ;;  %v705_v4 = vmin.f32 %v641_v60, 6.0  ;;  %v737_v5 = vmin.f32 %v673_v61, 6.0  ;;  %v1328_v6 = vpop.f32.mrb[4].mxu0  ;;  %v1360_v7 = vpop.f32.mrb[4].mxu1 }
  0xe2   :  { %1027 = vst.msk [vmem:[%s1900_s3 + $0x8] sm:$0xf] %vm1024_vm1, %v1225_v62  ;;  %1059 = vst.msk [vmem:[%s1900_s3 + $0x88] sm:$0xf] %vm1024_vm1, %v1257_v63  ;;  %v1226_v8 = vpack.c.bf16 %v707_v0, %v707_v0  ;;  %v1258_v9 = vpack.c.bf16 %v739_v1, %v739_v1  ;;  %v410_v10 = vadd.f32 %v1328_v6, %v1575_v33  ;;  %v401_v12 = vpop.f32.mrb[5].mxu0  ;;  %v529_v13 = vpop.f32.mrb[5].mxu1 }
  0xe3   :  { %v538_v11 = vadd.f32 %v1360_v7, %v1575_v33  ;;  %1025 = vst.msk [vmem:[%s1900_s3] sm:$0xf] %vm1024_vm1, %v1223_v2  ;;  %1057 = vst.msk [vmem:[%s1900_s3 + $0x80] sm:$0xf] %vm1024_vm1, %v1255_v3  ;;  %v1224_v14 = vpack.c.bf16 %v705_v4, %v705_v4  ;;  %v1256_v15 = vpack.c.bf16 %v737_v5, %v737_v5  ;;  %v1329_v18 = vpop.f32.mrb[6].mxu0  ;;  %v1361_v19 = vpop.f32.mrb[6].mxu1 }
  0xe4   :  { %v402_v16 = vadd.f32 %v1575_v33, %v401_v12  ;;  %v530_v17 = vadd.f32 %v1575_v33, %v529_v13  ;;  %1028 = vst.msk [vmem:[%s1900_s3 + $0xc] sm:$0xf] %vm1024_vm1, %v1226_v8  ;;  %1060 = vst.msk [vmem:[%s1900_s3 + $0x8c] sm:$0xf] %vm1024_vm1, %v1258_v9  ;;  %v646_v20 = vmax.f32 %v410_v10, 0.0  ;;  %v413_v22 = vadd.f32 %v1329_v18, %v1575_v33  ;;  %v404_v24 = vpop.f32.mrb[7].mxu0 }
  0xe5   :  { %v678_v21 = vmax.f32 %v538_v11, 0.0  ;;  %v541_v23 = vadd.f32 %v1361_v19, %v1575_v33  ;;  %v532_v25 = vpop.f32.mrb[7].mxu1  ;;  %1026 = vst.msk [vmem:[%s1900_s3 + $0x4] sm:$0xf] %vm1024_vm1, %v1224_v14  ;;  %1058 = vst.msk [vmem:[%s1900_s3 + $0x84] sm:$0xf] %vm1024_vm1, %v1256_v15  ;;  %v405_v28 = vadd.f32 %v1575_v33, %v404_v24 }
  0xe6   :  { %v644_v26 = vmax.f32 %v402_v16, 0.0  ;;  %v676_v27 = vmax.f32 %v530_v17, 0.0  ;;  %v533_v29 = vadd.f32 %v1575_v33, %v532_v25  ;;  %v710_v30 = vmin.f32 %v646_v20, 6.0 }
  0xe7   :  { %v742_v31 = vmin.f32 %v678_v21, 6.0  ;;  %v647_v32 = vmax.f32 %v413_v22, 0.0  ;;  %v679_v34 = vmax.f32 %v541_v23, 0.0  ;;  %v645_v37 = vmax.f32 %v405_v28, 0.0 }
  0xe8   :  { %v708_v35 = vmin.f32 %v644_v26, 6.0  ;;  %v740_v36 = vmin.f32 %v676_v27, 6.0  ;;  %v677_v38 = vmax.f32 %v533_v29, 0.0  ;;  %v1229_v39 = vpack.c.bf16 %v710_v30, %v710_v30 }
  0xe9   :  { %v1261_v40 = vpack.c.bf16 %v742_v31, %v742_v31  ;;  %v711_v41 = vmin.f32 %v647_v32, 6.0  ;;  %v743_v42 = vmin.f32 %v679_v34, 6.0  ;;  %v709_v45 = vmin.f32 %v645_v37, 6.0  ;;  %v1332_v47 = vpop.f32.mrb[8].mxu0  ;;  %v1364_v48 = vpop.f32.mrb[8].mxu1 }
  0xea   :  { %v1227_v43 = vpack.c.bf16 %v708_v35, %v708_v35  ;;  %v1259_v44 = vpack.c.bf16 %v740_v36, %v740_v36  ;;  %v741_v46 = vmin.f32 %v677_v38, 6.0  ;;  %1031 = vst.msk [vmem:[%s1900_s3 + $0x18] sm:$0xf] %vm1024_vm1, %v1229_v39  ;;  %v426_v51 = vadd.f32 %v1332_v47, %v1575_v33  ;;  %v417_v53 = vpop.f32.mrb[9].mxu0  ;;  %v545_v54 = vpop.f32.mrb[9].mxu1 }
  0xeb   :  { %1063 = vst.msk [vmem:[%s1900_s3 + $0x98] sm:$0xf] %vm1024_vm1, %v1261_v40  ;;  %v1230_v49 = vpack.c.bf16 %v711_v41, %v711_v41  ;;  %v1262_v50 = vpack.c.bf16 %v743_v42, %v743_v42  ;;  %v554_v52 = vadd.f32 %v1364_v48, %v1575_v33  ;;  %v1228_v55 = vpack.c.bf16 %v709_v45, %v709_v45  ;;  %v1333_v59 = vpop.f32.mrb[10].mxu0  ;;  %v1365_v60 = vpop.f32.mrb[10].mxu1 }
  0xec   :  { %1029 = vst.msk [vmem:[%s1900_s3 + $0x10] sm:$0xf] %vm1024_vm1, %v1227_v43  ;;  %1061 = vst.msk [vmem:[%s1900_s3 + $0x90] sm:$0xf] %vm1024_vm1, %v1259_v44  ;;  %v1260_v56 = vpack.c.bf16 %v741_v46, %v741_v46  ;;  %v418_v57 = vadd.f32 %v1575_v33, %v417_v53  ;;  %v546_v58 = vadd.f32 %v1575_v33, %v545_v54  ;;  %v650_v61 = vmax.f32 %v426_v51, 0.0  ;;  %v420_v1 = vpop.f32.mrb[11].mxu0 }
  0xed   :  { %1032 = vst.msk [vmem:[%s1900_s3 + $0x1c] sm:$0xf] %vm1024_vm1, %v1230_v49  ;;  %1064 = vst.msk [vmem:[%s1900_s3 + $0x9c] sm:$0xf] %vm1024_vm1, %v1262_v50  ;;  %v682_v62 = vmax.f32 %v554_v52, 0.0  ;;  %v429_v63 = vadd.f32 %v1333_v59, %v1575_v33  ;;  %v557_v0 = vadd.f32 %v1365_v60, %v1575_v33  ;;  %v548_v2 = vpop.f32.mrb[11].mxu1  ;;  %v421_v5 = vadd.f32 %v1575_v33, %v420_v1 }
  0xee   :  { %1030 = vst.msk [vmem:[%s1900_s3 + $0x14] sm:$0xf] %vm1024_vm1, %v1228_v55  ;;  %1062 = vst.msk [vmem:[%s1900_s3 + $0x94] sm:$0xf] %vm1024_vm1, %v1260_v56  ;;  %v648_v3 = vmax.f32 %v418_v57, 0.0  ;;  %v680_v4 = vmax.f32 %v546_v58, 0.0  ;;  %v549_v6 = vadd.f32 %v1575_v33, %v548_v2 }
  0xef   :  { %v714_v7 = vmin.f32 %v650_v61, 6.0  ;;  %v746_v8 = vmin.f32 %v682_v62, 6.0  ;;  %v651_v9 = vmax.f32 %v429_v63, 0.0  ;;  %v683_v10 = vmax.f32 %v557_v0, 0.0 }
  0xf0   :  { %v712_v11 = vmin.f32 %v648_v3, 6.0  ;;  %v744_v12 = vmin.f32 %v680_v4, 6.0  ;;  %v649_v13 = vmax.f32 %v421_v5, 0.0  ;;  %v681_v14 = vmax.f32 %v549_v6, 0.0 }
  0xf1   :  { %v1233_v15 = vpack.c.bf16 %v714_v7, %v714_v7  ;;  %v1265_v16 = vpack.c.bf16 %v746_v8, %v746_v8  ;;  %v715_v17 = vmin.f32 %v651_v9, 6.0  ;;  %v747_v18 = vmin.f32 %v683_v10, 6.0  ;;  %v1336_v23 = vpop.f32.mrb[12].mxu0  ;;  %v1368_v24 = vpop.f32.mrb[12].mxu1 }
  0xf2   :  { %v1231_v19 = vpack.c.bf16 %v712_v11, %v712_v11  ;;  %v1263_v20 = vpack.c.bf16 %v744_v12, %v744_v12  ;;  %v713_v21 = vmin.f32 %v649_v13, 6.0  ;;  %v745_v22 = vmin.f32 %v681_v14, 6.0  ;;  %v433_v29 = vpop.f32.mrb[13].mxu0  ;;  %v561_v30 = vpop.f32.mrb[13].mxu1 }
  0xf3   :  { %1035 = vst.msk [vmem:[%s1900_s3 + $0x28] sm:$0xf] %vm1024_vm1, %v1233_v15  ;;  %1067 = vst.msk [vmem:[%s1900_s3 + $0xa8] sm:$0xf] %vm1024_vm1, %v1265_v16  ;;  %v1234_v25 = vpack.c.bf16 %v715_v17, %v715_v17  ;;  %v1266_v26 = vpack.c.bf16 %v747_v18, %v747_v18  ;;  %v442_v27 = vadd.f32 %v1336_v23, %v1575_v33  ;;  %v1337_v36 = vpop.f32.mrb[14].mxu0  ;;  %v1369_v37 = vpop.f32.mrb[14].mxu1 }
  0xf4   :  { %v570_v28 = vadd.f32 %v1368_v24, %v1575_v33  ;;  %1033 = vst.msk [vmem:[%s1900_s3 + $0x20] sm:$0xf] %vm1024_vm1, %v1231_v19  ;;  %1065 = vst.msk [vmem:[%s1900_s3 + $0xa0] sm:$0xf] %vm1024_vm1, %v1263_v20  ;;  %v1232_v31 = vpack.c.bf16 %v713_v21, %v713_v21  ;;  %v1264_v32 = vpack.c.bf16 %v745_v22, %v745_v22  ;;  %v436_v42 = vpop.f32.mrb[15].mxu0  ;;  %v564_v43 = vpop.f32.mrb[15].mxu1 }
  0xf5   :  { %v434_v34 = vadd.f32 %v1575_v33, %v433_v29  ;;  %v562_v35 = vadd.f32 %v1575_v33, %v561_v30  ;;  %1036 = vst.msk [vmem:[%s1900_s3 + $0x2c] sm:$0xf] %vm1024_vm1, %v1234_v25  ;;  %1068 = vst.msk [vmem:[%s1900_s3 + $0xac] sm:$0xf] %vm1024_vm1, %v1266_v26  ;;  %v654_v38 = vmax.f32 %v442_v27, 0.0  ;;  %v445_v40 = vadd.f32 %v1337_v36, %v1575_v33 }
  0xf6   :  { %v686_v39 = vmax.f32 %v570_v28, 0.0  ;;  %v573_v41 = vadd.f32 %v1369_v37, %v1575_v33  ;;  %1034 = vst.msk [vmem:[%s1900_s3 + $0x24] sm:$0xf] %vm1024_vm1, %v1232_v31  ;;  %1066 = vst.msk [vmem:[%s1900_s3 + $0xa4] sm:$0xf] %vm1024_vm1, %v1264_v32  ;;  %v437_v46 = vadd.f32 %v1575_v33, %v436_v42  ;;  %v565_v47 = vadd.f32 %v1575_v33, %v564_v43 }
  0xf7   :  { %v652_v44 = vmax.f32 %v434_v34, 0.0  ;;  %v684_v45 = vmax.f32 %v562_v35, 0.0  ;;  %v718_v48 = vmin.f32 %v654_v38, 6.0  ;;  %v655_v50 = vmax.f32 %v445_v40, 0.0 }
  0xf8   :  { %v750_v49 = vmin.f32 %v686_v39, 6.0  ;;  %v687_v51 = vmax.f32 %v573_v41, 0.0  ;;  %v653_v54 = vmax.f32 %v437_v46, 0.0  ;;  %v685_v55 = vmax.f32 %v565_v47, 0.0 }
  0xf9   :  { %v716_v52 = vmin.f32 %v652_v44, 6.0  ;;  %v748_v53 = vmin.f32 %v684_v45, 6.0  ;;  %v1237_v56 = vpack.c.bf16 %v718_v48, %v718_v48  ;;  %v719_v58 = vmin.f32 %v655_v50, 6.0  ;;  %v1340_v0 = vpop.f32.mrb[16].mxu0  ;;  %v1372_v1 = vpop.f32.mrb[16].mxu1 }
  0xfa   :  { %v1269_v57 = vpack.c.bf16 %v750_v49, %v750_v49  ;;  %v751_v59 = vmin.f32 %v687_v51, 6.0  ;;  %v717_v62 = vmin.f32 %v653_v54, 6.0  ;;  %v749_v63 = vmin.f32 %v685_v55, 6.0  ;;  %v449_v6 = vpop.f32.mrb[17].mxu0  ;;  %v577_v7 = vpop.f32.mrb[17].mxu1 }
  0xfb   :  { %v1235_v60 = vpack.c.bf16 %v716_v52, %v716_v52  ;;  %v1267_v61 = vpack.c.bf16 %v748_v53, %v748_v53  ;;  %1039 = vst.msk [vmem:[%s1900_s3 + $0x38] sm:$0xf] %vm1024_vm1, %v1237_v56  ;;  %v1238_v2 = vpack.c.bf16 %v719_v58, %v719_v58  ;;  %v458_v4 = vadd.f32 %v1340_v0, %v1575_v33  ;;  %v1341_v12 = vpop.f32.mrb[18].mxu0  ;;  %v1373_v13 = vpop.f32.mrb[18].mxu1 }
  0xfc   :  { %1071 = vst.msk [vmem:[%s1900_s3 + $0xb8] sm:$0xf] %vm1024_vm1, %v1269_v57  ;;  %v1270_v3 = vpack.c.bf16 %v751_v59, %v751_v59  ;;  %v586_v5 = vadd.f32 %v1372_v1, %v1575_v33  ;;  %v1236_v8 = vpack.c.bf16 %v717_v62, %v717_v62  ;;  %v1268_v9 = vpack.c.bf16 %v749_v63, %v749_v63  ;;  %v452_v18 = vpop.f32.mrb[19].mxu0  ;;  %v580_v19 = vpop.f32.mrb[19].mxu1 }
  0xfd   :  { %1037 = vst.msk [vmem:[%s1900_s3 + $0x30] sm:$0xf] %vm1024_vm1, %v1235_v60  ;;  %1069 = vst.msk [vmem:[%s1900_s3 + $0xb0] sm:$0xf] %vm1024_vm1, %v1267_v61  ;;  %v450_v10 = vadd.f32 %v1575_v33, %v449_v6  ;;  %v578_v11 = vadd.f32 %v1575_v33, %v577_v7  ;;  %v658_v14 = vmax.f32 %v458_v4, 0.0  ;;  %v461_v16 = vadd.f32 %v1341_v12, %v1575_v33 }
  0xfe   :  { %1040 = vst.msk [vmem:[%s1900_s3 + $0x3c] sm:$0xf] %vm1024_vm1, %v1238_v2  ;;  %1072 = vst.msk [vmem:[%s1900_s3 + $0xbc] sm:$0xf] %vm1024_vm1, %v1270_v3  ;;  %v690_v15 = vmax.f32 %v586_v5, 0.0  ;;  %v589_v17 = vadd.f32 %v1373_v13, %v1575_v33  ;;  %v453_v22 = vadd.f32 %v1575_v33, %v452_v18  ;;  %v581_v23 = vadd.f32 %v1575_v33, %v580_v19 }
  0xff   :  { %1038 = vst.msk [vmem:[%s1900_s3 + $0x34] sm:$0xf] %vm1024_vm1, %v1236_v8  ;;  %1070 = vst.msk [vmem:[%s1900_s3 + $0xb4] sm:$0xf] %vm1024_vm1, %v1268_v9  ;;  %v656_v20 = vmax.f32 %v450_v10, 0.0  ;;  %v688_v21 = vmax.f32 %v578_v11, 0.0 }
 0x100   :  { %v722_v24 = vmin.f32 %v658_v14, 6.0  ;;  %v754_v25 = vmin.f32 %v690_v15, 6.0  ;;  %v659_v26 = vmax.f32 %v461_v16, 0.0  ;;  %v691_v27 = vmax.f32 %v589_v17, 0.0 }
 0x101   :  { %v720_v28 = vmin.f32 %v656_v20, 6.0  ;;  %v752_v29 = vmin.f32 %v688_v21, 6.0  ;;  %v657_v30 = vmax.f32 %v453_v22, 0.0  ;;  %v689_v31 = vmax.f32 %v581_v23, 0.0  ;;  %v1344_v41 = vpop.f32.mrb[20].mxu0  ;;  %v1376_v42 = vpop.f32.mrb[20].mxu1 }
 0x102   :  { %v1241_v32 = vpack.c.bf16 %v722_v24, %v722_v24  ;;  %v1273_v34 = vpack.c.bf16 %v754_v25, %v754_v25  ;;  %v723_v35 = vmin.f32 %v659_v26, 6.0  ;;  %v755_v36 = vmin.f32 %v691_v27, 6.0  ;;  %v465_v47 = vpop.f32.mrb[21].mxu0  ;;  %v593_v48 = vpop.f32.mrb[21].mxu1 }
 0x103   :  { %v1239_v37 = vpack.c.bf16 %v720_v28, %v720_v28  ;;  %v1271_v38 = vpack.c.bf16 %v752_v29, %v752_v29  ;;  %v721_v39 = vmin.f32 %v657_v30, 6.0  ;;  %v753_v40 = vmin.f32 %v689_v31, 6.0  ;;  %v1345_v53 = vpop.f32.mrb[22].mxu0  ;;  %v1377_v54 = vpop.f32.mrb[22].mxu1 }
 0x104   :  { %1043 = vst.msk [vmem:[%s1900_s3 + $0x48] sm:$0xf] %vm1024_vm1, %v1241_v32  ;;  %1075 = vst.msk [vmem:[%s1900_s3 + $0xc8] sm:$0xf] %vm1024_vm1, %v1273_v34  ;;  %v1242_v43 = vpack.c.bf16 %v723_v35, %v723_v35  ;;  %v1274_v44 = vpack.c.bf16 %v755_v36, %v755_v36  ;;  %v474_v45 = vadd.f32 %v1344_v41, %v1575_v33  ;;  %v468_v59 = vpop.f32.mrb[23].mxu0  ;;  %v596_v60 = vpop.f32.mrb[23].mxu1 }
 0x105   :  { %v602_v46 = vadd.f32 %v1376_v42, %v1575_v33  ;;  %1041 = vst.msk [vmem:[%s1900_s3 + $0x40] sm:$0xf] %vm1024_vm1, %v1239_v37  ;;  %1073 = vst.msk [vmem:[%s1900_s3 + $0xc0] sm:$0xf] %vm1024_vm1, %v1271_v38  ;;  %v1240_v49 = vpack.c.bf16 %v721_v39, %v721_v39  ;;  %v1272_v50 = vpack.c.bf16 %v753_v40, %v753_v40 }
 0x106   :  { %v466_v51 = vadd.f32 %v1575_v33, %v465_v47  ;;  %v594_v52 = vadd.f32 %v1575_v33, %v593_v48  ;;  %1044 = vst.msk [vmem:[%s1900_s3 + $0x4c] sm:$0xf] %vm1024_vm1, %v1242_v43  ;;  %1076 = vst.msk [vmem:[%s1900_s3 + $0xcc] sm:$0xf] %vm1024_vm1, %v1274_v44  ;;  %v662_v55 = vmax.f32 %v474_v45, 0.0  ;;  %v477_v57 = vadd.f32 %v1345_v53, %v1575_v33 }
 0x107   :  { %v694_v56 = vmax.f32 %v602_v46, 0.0  ;;  %v605_v58 = vadd.f32 %v1377_v54, %v1575_v33  ;;  %1042 = vst.msk [vmem:[%s1900_s3 + $0x44] sm:$0xf] %vm1024_vm1, %v1240_v49  ;;  %1074 = vst.msk [vmem:[%s1900_s3 + $0xc4] sm:$0xf] %vm1024_vm1, %v1272_v50  ;;  %v469_v63 = vadd.f32 %v1575_v33, %v468_v59  ;;  %v597_v0 = vadd.f32 %v1575_v33, %v596_v60 }
 0x108   :  { %v660_v61 = vmax.f32 %v466_v51, 0.0  ;;  %v692_v62 = vmax.f32 %v594_v52, 0.0  ;;  %v726_v1 = vmin.f32 %v662_v55, 6.0  ;;  %v663_v3 = vmax.f32 %v477_v57, 0.0 }
 0x109   :  { %v758_v2 = vmin.f32 %v694_v56, 6.0  ;;  %v695_v4 = vmax.f32 %v605_v58, 0.0  ;;  %v661_v7 = vmax.f32 %v469_v63, 0.0  ;;  %v693_v8 = vmax.f32 %v597_v0, 0.0  ;;  %v1348_v17 = vpop.f32.mrb[24].mxu0  ;;  %v1380_v18 = vpop.f32.mrb[24].mxu1 }
 0x10a   :  { %v724_v5 = vmin.f32 %v660_v61, 6.0  ;;  %v756_v6 = vmin.f32 %v692_v62, 6.0  ;;  %v1245_v9 = vpack.c.bf16 %v726_v1, %v726_v1  ;;  %v727_v11 = vmin.f32 %v663_v3, 6.0  ;;  %v481_v23 = vpop.f32.mrb[25].mxu0  ;;  %v609_v24 = vpop.f32.mrb[25].mxu1 }
 0x10b   :  { %v1277_v10 = vpack.c.bf16 %v758_v2, %v758_v2  ;;  %v759_v12 = vmin.f32 %v695_v4, 6.0  ;;  %v725_v15 = vmin.f32 %v661_v7, 6.0  ;;  %v757_v16 = vmin.f32 %v693_v8, 6.0  ;;  %v1349_v29 = vpop.f32.mrb[26].mxu0  ;;  %v1381_v30 = vpop.f32.mrb[26].mxu1 }
 0x10c   :  { %v1243_v13 = vpack.c.bf16 %v724_v5, %v724_v5  ;;  %v1275_v14 = vpack.c.bf16 %v756_v6, %v756_v6  ;;  %1047 = vst.msk [vmem:[%s1900_s3 + $0x58] sm:$0xf] %vm1024_vm1, %v1245_v9  ;;  %v1246_v19 = vpack.c.bf16 %v727_v11, %v727_v11  ;;  %v490_v21 = vadd.f32 %v1348_v17, %v1575_v33  ;;  %v484_v36 = vpop.f32.mrb[27].mxu0  ;;  %v612_v37 = vpop.f32.mrb[27].mxu1 }
 0x10d   :  { %1079 = vst.msk [vmem:[%s1900_s3 + $0xd8] sm:$0xf] %vm1024_vm1, %v1277_v10  ;;  %v1278_v20 = vpack.c.bf16 %v759_v12, %v759_v12  ;;  %v618_v22 = vadd.f32 %v1380_v18, %v1575_v33  ;;  %v1244_v25 = vpack.c.bf16 %v725_v15, %v725_v15  ;;  %v1276_v26 = vpack.c.bf16 %v757_v16, %v757_v16 }
 0x10e   :  { %1045 = vst.msk [vmem:[%s1900_s3 + $0x50] sm:$0xf] %vm1024_vm1, %v1243_v13  ;;  %1077 = vst.msk [vmem:[%s1900_s3 + $0xd0] sm:$0xf] %vm1024_vm1, %v1275_v14  ;;  %v482_v27 = vadd.f32 %v1575_v33, %v481_v23  ;;  %v610_v28 = vadd.f32 %v1575_v33, %v609_v24  ;;  %v666_v31 = vmax.f32 %v490_v21, 0.0  ;;  %v493_v34 = vadd.f32 %v1349_v29, %v1575_v33 }
 0x10f   :  { %1048 = vst.msk [vmem:[%s1900_s3 + $0x5c] sm:$0xf] %vm1024_vm1, %v1246_v19  ;;  %1080 = vst.msk [vmem:[%s1900_s3 + $0xdc] sm:$0xf] %vm1024_vm1, %v1278_v20  ;;  %v698_v32 = vmax.f32 %v618_v22, 0.0  ;;  %v621_v35 = vadd.f32 %v1381_v30, %v1575_v33  ;;  %v485_v40 = vadd.f32 %v1575_v33, %v484_v36  ;;  %v613_v41 = vadd.f32 %v1575_v33, %v612_v37 }
 0x110   :  { %1046 = vst.msk [vmem:[%s1900_s3 + $0x54] sm:$0xf] %vm1024_vm1, %v1244_v25  ;;  %1078 = vst.msk [vmem:[%s1900_s3 + $0xd4] sm:$0xf] %vm1024_vm1, %v1276_v26  ;;  %v664_v38 = vmax.f32 %v482_v27, 0.0  ;;  %v696_v39 = vmax.f32 %v610_v28, 0.0 }
 0x111   :  { %v730_v42 = vmin.f32 %v666_v31, 6.0  ;;  %v762_v43 = vmin.f32 %v698_v32, 6.0  ;;  %v667_v44 = vmax.f32 %v493_v34, 0.0  ;;  %v699_v45 = vmax.f32 %v621_v35, 0.0  ;;  %v1352_v58 = vpop.f32.mrb[28].mxu0  ;;  %v1384_v59 = vpop.f32.mrb[28].mxu1 }
 0x112   :  { %v728_v46 = vmin.f32 %v664_v38, 6.0  ;;  %v760_v47 = vmin.f32 %v696_v39, 6.0  ;;  %v665_v48 = vmax.f32 %v485_v40, 0.0  ;;  %v697_v49 = vmax.f32 %v613_v41, 0.0  ;;  %v497_v0 = vpop.f32.mrb[29].mxu0  ;;  %v625_v1 = vpop.f32.mrb[29].mxu1 }
 0x113   :  { %v1249_v50 = vpack.c.bf16 %v730_v42, %v730_v42  ;;  %v1281_v51 = vpack.c.bf16 %v762_v43, %v762_v43  ;;  %v731_v52 = vmin.f32 %v667_v44, 6.0  ;;  %v763_v53 = vmin.f32 %v699_v45, 6.0  ;;  %v1353_v6 = vpop.f32.mrb[30].mxu0  ;;  %v1385_v7 = vpop.f32.mrb[30].mxu1 }
 0x114   :  { %v1247_v54 = vpack.c.bf16 %v728_v46, %v728_v46  ;;  %v1279_v55 = vpack.c.bf16 %v760_v47, %v760_v47  ;;  %v729_v56 = vmin.f32 %v665_v48, 6.0  ;;  %v761_v57 = vmin.f32 %v697_v49, 6.0  ;;  %v500_v12 = vpop.f32.mrb[31].mxu0  ;;  %v628_v13 = vpop.f32.mrb[31].mxu1 }
 0x115   :  { %1051 = vst.msk [vmem:[%s1900_s3 + $0x68] sm:$0xf] %vm1024_vm1, %v1249_v50  ;;  %1083 = vst.msk [vmem:[%s1900_s3 + $0xe8] sm:$0xf] %vm1024_vm1, %v1281_v51  ;;  %v1250_v60 = vpack.c.bf16 %v731_v52, %v731_v52  ;;  %v1282_v61 = vpack.c.bf16 %v763_v53, %v763_v53  ;;  %v506_v62 = vadd.f32 %v1352_v58, %v1575_v33 }
 0x116   :  { %v634_v63 = vadd.f32 %v1384_v59, %v1575_v33  ;;  %1049 = vst.msk [vmem:[%s1900_s3 + $0x60] sm:$0xf] %vm1024_vm1, %v1247_v54  ;;  %1081 = vst.msk [vmem:[%s1900_s3 + $0xe0] sm:$0xf] %vm1024_vm1, %v1279_v55  ;;  %v1248_v2 = vpack.c.bf16 %v729_v56, %v729_v56  ;;  %v1280_v3 = vpack.c.bf16 %v761_v57, %v761_v57 }
 0x117   :  { %v498_v4 = vadd.f32 %v1575_v33, %v497_v0  ;;  %v626_v5 = vadd.f32 %v1575_v33, %v625_v1  ;;  %1052 = vst.msk [vmem:[%s1900_s3 + $0x6c] sm:$0xf] %vm1024_vm1, %v1250_v60  ;;  %1084 = vst.msk [vmem:[%s1900_s3 + $0xec] sm:$0xf] %vm1024_vm1, %v1282_v61  ;;  %v670_v8 = vmax.f32 %v506_v62, 0.0  ;;  %v509_v10 = vadd.f32 %v1353_v6, %v1575_v33 }
 0x118   :  { %v702_v9 = vmax.f32 %v634_v63, 0.0  ;;  %v637_v11 = vadd.f32 %v1385_v7, %v1575_v33  ;;  %1050 = vst.msk [vmem:[%s1900_s3 + $0x64] sm:$0xf] %vm1024_vm1, %v1248_v2  ;;  %1082 = vst.msk [vmem:[%s1900_s3 + $0xe4] sm:$0xf] %vm1024_vm1, %v1280_v3  ;;  %v501_v16 = vadd.f32 %v1575_v33, %v500_v12  ;;  %v629_v17 = vadd.f32 %v1575_v33, %v628_v13 }
 0x119   :  { %v668_v14 = vmax.f32 %v498_v4, 0.0  ;;  %v700_v15 = vmax.f32 %v626_v5, 0.0  ;;  %v734_v18 = vmin.f32 %v670_v8, 6.0  ;;  %v671_v20 = vmax.f32 %v509_v10, 0.0 }
 0x11a   :  { %v766_v19 = vmin.f32 %v702_v9, 6.0  ;;  %v703_v21 = vmax.f32 %v637_v11, 0.0  ;;  %v669_v24 = vmax.f32 %v501_v16, 0.0  ;;  %v701_v25 = vmax.f32 %v629_v17, 0.0 }
 0x11b   :  { %v732_v22 = vmin.f32 %v668_v14, 6.0  ;;  %v764_v23 = vmin.f32 %v700_v15, 6.0  ;;  %v1253_v26 = vpack.c.bf16 %v734_v18, %v734_v18  ;;  %v735_v28 = vmin.f32 %v671_v20, 6.0 }
 0x11c   :  { %v1285_v27 = vpack.c.bf16 %v766_v19, %v766_v19  ;;  %v767_v29 = vmin.f32 %v703_v21, 6.0  ;;  %v733_v32 = vmin.f32 %v669_v24, 6.0  ;;  %v765_v34 = vmin.f32 %v701_v25, 6.0 }
 0x11d   :  { %v1251_v30 = vpack.c.bf16 %v732_v22, %v732_v22  ;;  %v1283_v31 = vpack.c.bf16 %v764_v23, %v764_v23  ;;  %1055 = vst.msk [vmem:[%s1900_s3 + $0x78] sm:$0xf] %vm1024_vm1, %v1253_v26  ;;  %v1254_v33 = vpack.c.bf16 %v735_v28, %v735_v28 }
 0x11e   :  { %1087 = vst.msk [vmem:[%s1900_s3 + $0xf8] sm:$0xf] %vm1024_vm1, %v1285_v27  ;;  %v1286_v35 = vpack.c.bf16 %v767_v29, %v767_v29  ;;  %v1252_v36 = vpack.c.bf16 %v733_v32, %v733_v32  ;;  %v1284_v37 = vpack.c.bf16 %v765_v34, %v765_v34 }
 0x11f   :  { %1053 = vst.msk [vmem:[%s1900_s3 + $0x70] sm:$0xf] %vm1024_vm1, %v1251_v30  ;;  %1085 = vst.msk [vmem:[%s1900_s3 + $0xf0] sm:$0xf] %vm1024_vm1, %v1283_v31 }
 0x120   :  { %1056 = vst.msk [vmem:[%s1900_s3 + $0x7c] sm:$0xf] %vm1024_vm1, %v1254_v33  ;;  %1088 = vst.msk [vmem:[%s1900_s3 + $0xfc] sm:$0xf] %vm1024_vm1, %v1286_v35 }
 0x121   :  { %1054 = vst.msk [vmem:[%s1900_s3 + $0x74] sm:$0xf] %vm1024_vm1, %v1252_v36  ;;  %1086 = vst.msk [vmem:[%s1900_s3 + $0xf4] sm:$0xf] %vm1024_vm1, %v1284_v37 }

// kernel: age_gender_forward.36
= control target key start
LH: loop header
LB: loop body
LE: loop exit
PB: predicated region body
PF: predicated region fallthrough
CT: control target
= control target key end

     0   :  { %vm126_vm0 = vcmask 785408   ;;  %vm312_vm1 = vcmask 191488   ;;  %s593_s1 = inlined_call_operand.vmem [shape: bf16[96,24], index: 1, kind: input, shape index: {}]   ;;  %s594_s0 = inlined_call_operand.vmem [shape: bf16[128,96], index: 0, kind: input, shape index: {}]   ;;  %s595_s2 = inlined_call_operand.vmem [shape: f32[1,24], index: 2, kind: input, shape index: {}]   ;;  %s596_s3 = inlined_call_operand.vmem [shape: bf16[128,24], index: 3, kind: output, shape index: {}]  }
   0x1   :  { %v442_v0 = vld [vmem:[%s593_s1] sm:$0xff]   ;;  %v443_v1 = vld [vmem:[%s593_s1 + $0x8] sm:$0xff]   ;;  %v444_v2 = vld [vmem:[%s593_s1 + $0x10] sm:$0xff]  }
   0x2   :  { %402 = vmatprep.subr.bf16.mxu0 %v442_v0  ;;  %430 = vmatprep.subr.bf16.mxu1 %v442_v0  ;;  %v448_v3 = vld [vmem:[%s594_s0] sm:$0xff]   ;;  %v445_v5 = vld [vmem:[%s593_s1 + $0x18] sm:$0xff]   ;;  %v447_v7 = vld [vmem:[%s593_s1 + $0x28] sm:$0xff]  }
   0x3   :  { %403 = vmatpush3.bf16.msra.mxu0 %v442_v0  ;;  %436 = vmatpush3.bf16.msra.mxu1 %v442_v0  ;;  %v449_v4 = vld [vmem:[%s594_s0 + $0x20] sm:$0xff]   ;;  %v450_v8 = vld [vmem:[%s594_s0 + $0x8] sm:$0xff]   ;;  %v452_v10 = vld [vmem:[%s594_s0 + $0x10] sm:$0xff]  }
   0x4   :  { %404 = vmatprep.subr.bf16.mxu0 %v443_v1  ;;  %431 = vmatprep.subr.bf16.mxu1 %v443_v1  ;;  %v446_v6 = vld [vmem:[%s593_s1 + $0x20] sm:$0xff]   ;;  %v451_v9 = vld [vmem:[%s594_s0 + $0x28] sm:$0xff]   ;;  %v453_v11 = vld [vmem:[%s594_s0 + $0x30] sm:$0xff]  }
   0x5   :  { %414 = vmatprep.mubr.msk.bf16.mxu0 %vm126_vm0, %v448_v3  ;;  %422 = vmatprep.mubr.msk.bf16.mxu1 %vm126_vm0, %v449_v4  ;;  %v454_v12 = vld [vmem:[%s594_s0 + $0x18] sm:$0xff]   ;;  %v333_v14 = vld [vmem:[%s595_s2] ss:$0 sm:$0xff] }
   0x6   :  { %v455_v13 = vld [vmem:[%s594_s0 + $0x38] sm:$0xff]  }
   0x7   :  { %405 = vmatpush3.bf16.msra.mxu0 %v443_v1  ;;  %437 = vmatpush3.bf16.msra.mxu1 %v443_v1 }
   0x8   :  { %406 = vmatprep.subr.bf16.mxu0 %v444_v2  ;;  %432 = vmatprep.subr.bf16.mxu1 %v444_v2 }
   0xb   :  { %407 = vmatpush3.bf16.msra.mxu0 %v444_v2  ;;  %438 = vmatpush3.bf16.msra.mxu1 %v444_v2 }
   0xc   :  { %408 = vmatprep.subr.bf16.mxu0 %v445_v5  ;;  %433 = vmatprep.subr.bf16.mxu1 %v445_v5 }
   0xf   :  { %409 = vmatpush3.bf16.msra.mxu0 %v445_v5  ;;  %439 = vmatpush3.bf16.msra.mxu1 %v445_v5 }
  0x10   :  { %410 = vmatprep.subr.bf16.mxu0 %v446_v6  ;;  %434 = vmatprep.subr.bf16.mxu1 %v446_v6 }
  0x13   :  { %411 = vmatpush3.bf16.msra.mxu0 %v446_v6  ;;  %440 = vmatpush3.bf16.msra.mxu1 %v446_v6 }
  0x14   :  { %412 = vmatprep.subr.bf16.mxu0 %v447_v7  ;;  %435 = vmatprep.subr.bf16.mxu1 %v447_v7 }
  0x17   :  { %413 = vmatpush3.bf16.msra.mxu0 %v447_v7  ;;  %441 = vmatpush3.bf16.msra.mxu1 %v447_v7 }
  0x1a   :  { %415 = vmatmul.mubr.msk.bf16.vlgmr.msra.gmra.mrb[0].mxu0 %vm126_vm0, %v450_v8  ;;  %423 = vmatmul.mubr.msk.bf16.vlgmr.msra.gmra.mrb[0].mxu1 %vm126_vm0, %v451_v9 }
  0x1b   :  { %418 = vmatprep.mubr.msk.bf16.mxu0 %vm126_vm0, %v452_v10  ;;  %426 = vmatprep.mubr.msk.bf16.mxu1 %vm126_vm0, %v453_v11 }
  0x22   :  { %419 = vmatmul.mubr.msk.bf16.gmra.mrb[4].mxu0 %vm126_vm0, %v454_v12  ;;  %427 = vmatmul.mubr.msk.bf16.gmra.mrb[4].mxu1 %vm126_vm0, %v455_v13 }
  0xed   :  { %v416_v15 = vpop.f32.mrb[0].mxu0  ;;  %v424_v16 = vpop.f32.mrb[0].mxu1 }
  0xee   :  { %v194_v17 = vadd.f32 %v416_v15, %v333_v14  ;;  %v226_v18 = vadd.f32 %v424_v16, %v333_v14  ;;  %v185_v19 = vpop.f32.mrb[1].mxu0  ;;  %v217_v20 = vpop.f32.mrb[1].mxu1 }
  0xef   :  { %v186_v21 = vadd.f32 %v333_v14, %v185_v19  ;;  %v218_v22 = vadd.f32 %v333_v14, %v217_v20  ;;  %v417_v23 = vpop.f32.mrb[2].mxu0  ;;  %v425_v24 = vpop.f32.mrb[2].mxu1 }
  0xf0   :  { %v374_v25 = vpack.c.bf16 %v194_v17, %v194_v17  ;;  %v382_v26 = vpack.c.bf16 %v226_v18, %v226_v18  ;;  %v197_v27 = vadd.f32 %v417_v23, %v333_v14  ;;  %v229_v28 = vadd.f32 %v425_v24, %v333_v14  ;;  %v188_v29 = vpop.f32.mrb[3].mxu0  ;;  %v220_v30 = vpop.f32.mrb[3].mxu1 }
  0xf1   :  { %v372_v31 = vpack.c.bf16 %v186_v21, %v186_v21  ;;  %v380_v32 = vpack.c.bf16 %v218_v22, %v218_v22  ;;  %v189_v33 = vadd.f32 %v333_v14, %v188_v29  ;;  %v221_v34 = vadd.f32 %v333_v14, %v220_v30 }
  0xf2   :  { %315 = vst.msk [vmem:[%s596_s3 + $0x8] sm:$0xf] %vm312_vm1, %v374_v25  ;;  %323 = vst.msk [vmem:[%s596_s3 + $0x28] sm:$0xf] %vm312_vm1, %v382_v26  ;;  %v375_v35 = vpack.c.bf16 %v197_v27, %v197_v27  ;;  %v383_v36 = vpack.c.bf16 %v229_v28, %v229_v28 }
  0xf3   :  { %313 = vst.msk [vmem:[%s596_s3] sm:$0xf] %vm312_vm1, %v372_v31  ;;  %321 = vst.msk [vmem:[%s596_s3 + $0x20] sm:$0xf] %vm312_vm1, %v380_v32  ;;  %v373_v37 = vpack.c.bf16 %v189_v33, %v189_v33  ;;  %v381_v38 = vpack.c.bf16 %v221_v34, %v221_v34 }
  0xf4   :  { %316 = vst.msk [vmem:[%s596_s3 + $0xc] sm:$0xf] %vm312_vm1, %v375_v35  ;;  %324 = vst.msk [vmem:[%s596_s3 + $0x2c] sm:$0xf] %vm312_vm1, %v383_v36 }
  0xf5   :  { %314 = vst.msk [vmem:[%s596_s3 + $0x4] sm:$0xf] %vm312_vm1, %v373_v37  ;;  %322 = vst.msk [vmem:[%s596_s3 + $0x24] sm:$0xf] %vm312_vm1, %v381_v38  ;;  %v420_v39 = vpop.f32.mrb[4].mxu0  ;;  %v428_v40 = vpop.f32.mrb[4].mxu1 }
  0xf6   :  { %v210_v41 = vadd.f32 %v420_v39, %v333_v14  ;;  %v242_v42 = vadd.f32 %v428_v40, %v333_v14  ;;  %v201_v43 = vpop.f32.mrb[5].mxu0  ;;  %v233_v44 = vpop.f32.mrb[5].mxu1 }
  0xf7   :  { %v202_v45 = vadd.f32 %v333_v14, %v201_v43  ;;  %v234_v46 = vadd.f32 %v333_v14, %v233_v44  ;;  %v421_v47 = vpop.f32.mrb[6].mxu0  ;;  %v429_v48 = vpop.f32.mrb[6].mxu1 }
  0xf8   :  { %v378_v49 = vpack.c.bf16 %v210_v41, %v210_v41  ;;  %v386_v50 = vpack.c.bf16 %v242_v42, %v242_v42  ;;  %v213_v51 = vadd.f32 %v421_v47, %v333_v14  ;;  %v245_v52 = vadd.f32 %v429_v48, %v333_v14  ;;  %v204_v53 = vpop.f32.mrb[7].mxu0  ;;  %v236_v54 = vpop.f32.mrb[7].mxu1 }
  0xf9   :  { %v376_v55 = vpack.c.bf16 %v202_v45, %v202_v45  ;;  %v384_v56 = vpack.c.bf16 %v234_v46, %v234_v46  ;;  %v205_v57 = vadd.f32 %v333_v14, %v204_v53  ;;  %v237_v58 = vadd.f32 %v333_v14, %v236_v54 }
  0xfa   :  { %319 = vst.msk [vmem:[%s596_s3 + $0x18] sm:$0xf] %vm312_vm1, %v378_v49  ;;  %327 = vst.msk [vmem:[%s596_s3 + $0x38] sm:$0xf] %vm312_vm1, %v386_v50  ;;  %v379_v59 = vpack.c.bf16 %v213_v51, %v213_v51  ;;  %v387_v60 = vpack.c.bf16 %v245_v52, %v245_v52 }
  0xfb   :  { %317 = vst.msk [vmem:[%s596_s3 + $0x10] sm:$0xf] %vm312_vm1, %v376_v55  ;;  %325 = vst.msk [vmem:[%s596_s3 + $0x30] sm:$0xf] %vm312_vm1, %v384_v56  ;;  %v377_v61 = vpack.c.bf16 %v205_v57, %v205_v57  ;;  %v385_v62 = vpack.c.bf16 %v237_v58, %v237_v58 }
  0xfc   :  { %320 = vst.msk [vmem:[%s596_s3 + $0x1c] sm:$0xf] %vm312_vm1, %v379_v59  ;;  %328 = vst.msk [vmem:[%s596_s3 + $0x3c] sm:$0xf] %vm312_vm1, %v387_v60 }
  0xfd   :  { %318 = vst.msk [vmem:[%s596_s3 + $0x14] sm:$0xf] %vm312_vm1, %v377_v61  ;;  %326 = vst.msk [vmem:[%s596_s3 + $0x34] sm:$0xf] %vm312_vm1, %v385_v62 }

// kernel: age_gender_forward.37
= control target key start
LH: loop header
LB: loop body
LE: loop exit
PB: predicated region body
PF: predicated region fallthrough
CT: control target
= control target key end

     0   :  { %v499_v1 = vmov 0   ;;  %vm126_vm0 = vcmask 1043456   ;;  %vm101_vm1 = vcmask 195584   ;;  %v36_v15 = vlaneseq  ;;  %s689_s1 = inlined_call_operand.vmem [shape: bf16[24,144], index: 1, kind: input, shape index: {}]   ;;  %s690_s0 = inlined_call_operand.vmem [shape: bf16[128,24], index: 0, kind: input, shape index: {}]   ;;  %s691_s2 = inlined_call_operand.vmem [shape: f32[1,144], index: 2, kind: input, shape index: {}]   ;;  %s692_s3 = inlined_call_operand.vmem [shape: bf16[128,144], index: 3, kind: output, shape index: {}]  }
   0x1   :  { %v33_v0 = vld [vmem:[%s689_s1 + $0x10] sm:$0xff]  ;;  %165 = vmatprep.mubr.bf16.mxu0 %v499_v1  ;;  %205 = vmatprep.mubr.bf16.mxu1 %v499_v1  ;;  %v486_v2 = vld [vmem:[%s689_s1 + $0x4] ss:$8 sps:$4 sm:$0xff]   ;;  %v488_v3 = vld [vmem:[%s689_s1] ss:$8 sps:$4 sm:$0xff]   ;;  %vm406_vm2 = vcmask 130052  }
   0x2   :  { %v439_v4 = vcombine.high %v33_v0, %v33_v0  ;;  %v438_v5 = vcombine.low %v33_v0, %v33_v0  ;;  %133 = vmatprep.subr.bf16.mxu0 %v486_v2  ;;  %481 = vmatprep.subr.bf16.mxu1 %v486_v2  ;;  %v491_v7 = vld [vmem:[%s690_s0] sm:$0xff]   ;;  %v493_v9 = vld [vmem:[%s690_s0 + $0x8] sm:$0xff]   ;;  %v495_v11 = vld [vmem:[%s690_s0 + $0x10] sm:$0xff]   ;;  %v37_v16 = vshrl.u32 %v36_v15, 7 }
   0x3   :  { %134 = vmatpush1.bf16.msra.mxu0 %v488_v3  ;;  %483 = vmatpush1.bf16.msra.mxu1 %v488_v3  ;;  %v492_v8 = vld [vmem:[%s690_s0 + $0x20] sm:$0xff]   ;;  %v494_v10 = vld [vmem:[%s690_s0 + $0x28] sm:$0xff]   ;;  %v496_v12 = vld [vmem:[%s690_s0 + $0x30] sm:$0xff]  }
   0x4   :  { %440 = vmatprep.subr.msk.bf16.mxu0 %vm126_vm0, %v439_v4  ;;  %482 = vmatprep.subr.msk.bf16.mxu1 %vm126_vm0, %v439_v4  ;;  %v128_v6 = vsel %vm126_vm0, %v438_v5, 0  ;;  %v497_v13 = vld [vmem:[%s690_s0 + $0x18] sm:$0xff]   ;;  %v38_v17 = vsub.s32 0, %v37_v16  ;;  %v34_v18 = vld [vmem:[%s691_s2] sm:$0x3]  ;;  %v42_v19 = vsub.s32 1, %v37_v16  ;;  %vm581_vm3 = vmor %vm406_vm2, %vm126_vm0 }
   0x5   :  { %v498_v14 = vld [vmem:[%s690_s0 + $0x38] sm:$0xff]  }
   0x6   :  { %v567_v20 = vrot.slane %v34_v18, %v38_v17  ;;  %v569_v21 = vrot.slane %v34_v18, %v42_v19 }
   0x7   :  { %136 = vmatpush1.bf16.msra.mxu0 %v128_v6  ;;  %484 = vmatpush1.bf16.msra.mxu1 %v128_v6 }
   0xa   :  { %441 = vmatmul.mubr.msk.bf16.vlgmr.msra.gmra.mrb[0].mxu0 %vm101_vm1, %v491_v7  ;;  %445 = vmatmul.mubr.msk.bf16.vlgmr.msra.gmra.mrb[0].mxu1 %vm101_vm1, %v492_v8 }
   0xb   :  { %175 = vmatprep.mubr.bf16.mxu0 %v499_v1  ;;  %215 = vmatprep.mubr.bf16.mxu1 %v499_v1 }
  0x12   :  { %442 = vmatmul.mubr.msk.bf16.gmra.mrb[4].mxu0 %vm101_vm1, %v493_v9  ;;  %446 = vmatmul.mubr.msk.bf16.gmra.mrb[4].mxu1 %vm101_vm1, %v494_v10 }
  0x13   :  { %185 = vmatprep.mubr.bf16.mxu0 %v499_v1  ;;  %225 = vmatprep.mubr.bf16.mxu1 %v499_v1 }
  0x1a   :  { %443 = vmatmul.mubr.msk.bf16.gmra.mrb[8].mxu0 %vm101_vm1, %v495_v11  ;;  %447 = vmatmul.mubr.msk.bf16.gmra.mrb[8].mxu1 %vm101_vm1, %v496_v12 }
  0x1b   :  { %195 = vmatprep.mubr.bf16.mxu0 %v499_v1  ;;  %235 = vmatprep.mubr.bf16.mxu1 %v499_v1 }
  0x22   :  { %444 = vmatmul.mubr.msk.bf16.gmra.mrb[12].mxu0 %vm101_vm1, %v497_v13  ;;  %448 = vmatmul.mubr.msk.bf16.gmra.mrb[12].mxu1 %vm101_vm1, %v498_v14 }
  0xdd   :  { %v167_v22 = vpop.f32.mrb[0].mxu0  ;;  %v207_v23 = vpop.f32.mrb[0].mxu1 }
  0xde   :  { %v168_v24 = vadd.f32 %v167_v22, %v567_v20  ;;  %v208_v25 = vadd.f32 %v207_v23, %v567_v20  ;;  %v169_v26 = vpop.f32.mrb[1].mxu0  ;;  %v209_v27 = vpop.f32.mrb[1].mxu1 }
  0xdf   :  { %v170_v28 = vadd.f32 %v169_v26, %v569_v21  ;;  %v210_v29 = vadd.f32 %v209_v27, %v569_v21  ;;  %v171_v30 = vpop.f32.mrb[2].mxu0  ;;  %v211_v31 = vpop.f32.mrb[2].mxu1 }
  0xe0   :  { %v246_v32 = vmax.f32 %v168_v24, 0.0  ;;  %v262_v33 = vmax.f32 %v208_v25, 0.0  ;;  %v172_v34 = vadd.f32 %v171_v30, %v567_v20  ;;  %v212_v35 = vadd.f32 %v211_v31, %v567_v20  ;;  %v173_v36 = vpop.f32.mrb[3].mxu0  ;;  %v213_v37 = vpop.f32.mrb[3].mxu1 }
  0xe1   :  { %v247_v38 = vmax.f32 %v170_v28, 0.0  ;;  %v263_v39 = vmax.f32 %v210_v29, 0.0  ;;  %v174_v40 = vadd.f32 %v173_v36, %v569_v21  ;;  %v214_v41 = vadd.f32 %v213_v37, %v569_v21 }
  0xe2   :  { %v278_v42 = vmin.f32 %v246_v32, 6.0  ;;  %v294_v43 = vmin.f32 %v262_v33, 6.0  ;;  %v248_v44 = vmax.f32 %v172_v34, 0.0  ;;  %v264_v45 = vmax.f32 %v212_v35, 0.0 }
  0xe3   :  { %v279_v46 = vmin.f32 %v247_v38, 6.0  ;;  %v295_v47 = vmin.f32 %v263_v39, 6.0  ;;  %v249_v48 = vmax.f32 %v174_v40, 0.0  ;;  %v265_v49 = vmax.f32 %v214_v41, 0.0 }
  0xe4   :  { %v280_v51 = vmin.f32 %v248_v44, 6.0  ;;  %v296_v52 = vmin.f32 %v264_v45, 6.0 }
  0xe5   :  { %v465_v53 = vpack.c.bf16 %v279_v46, %v278_v42  ;;  %v473_v54 = vpack.c.bf16 %v295_v47, %v294_v43  ;;  %v281_v55 = vmin.f32 %v249_v48, 6.0  ;;  %v297_v56 = vmin.f32 %v265_v49, 6.0  ;;  %v177_v57 = vpop.f32.mrb[4].mxu0  ;;  %v217_v58 = vpop.f32.mrb[4].mxu1 }
  0xe6   :  { %v178_v59 = vadd.f32 %v177_v57, %v567_v20  ;;  %v218_v60 = vadd.f32 %v217_v58, %v567_v20  ;;  %v179_v61 = vpop.f32.mrb[5].mxu0  ;;  %v219_v62 = vpop.f32.mrb[5].mxu1 }
  0xe7   :  { %408 = vst.msk [vmem:[%s692_s3] sm:$0xff] %vm581_vm3, %v465_v53  ;;  %416 = vst.msk [vmem:[%s692_s3 + $0x40] sm:$0xff] %vm581_vm3, %v473_v54  ;;  %v466_v63 = vpack.c.bf16 %v281_v55, %v280_v51  ;;  %v474_v0 = vpack.c.bf16 %v297_v56, %v296_v52  ;;  %v180_v1 = vadd.f32 %v179_v61, %v569_v21  ;;  %v181_v3 = vpop.f32.mrb[6].mxu0  ;;  %v221_v4 = vpop.f32.mrb[6].mxu1 }
  0xe8   :  { %v220_v2 = vadd.f32 %v219_v62, %v569_v21  ;;  %v250_v5 = vmax.f32 %v178_v59, 0.0  ;;  %v266_v6 = vmax.f32 %v218_v60, 0.0  ;;  %v182_v7 = vadd.f32 %v181_v3, %v567_v20  ;;  %v183_v9 = vpop.f32.mrb[7].mxu0  ;;  %v223_v10 = vpop.f32.mrb[7].mxu1 }
  0xe9   :  { %v222_v8 = vadd.f32 %v221_v4, %v567_v20  ;;  %409 = vst.msk [vmem:[%s692_s3 + $0x8] sm:$0xff] %vm581_vm3, %v466_v63  ;;  %417 = vst.msk [vmem:[%s692_s3 + $0x48] sm:$0xff] %vm581_vm3, %v474_v0  ;;  %v251_v11 = vmax.f32 %v180_v1, 0.0  ;;  %v184_v13 = vadd.f32 %v183_v9, %v569_v21  ;;  %v224_v14 = vadd.f32 %v223_v10, %v569_v21 }
  0xea   :  { %v267_v12 = vmax.f32 %v220_v2, 0.0  ;;  %v282_v15 = vmin.f32 %v250_v5, 6.0  ;;  %v298_v16 = vmin.f32 %v266_v6, 6.0  ;;  %v252_v17 = vmax.f32 %v182_v7, 0.0 }
  0xeb   :  { %v268_v18 = vmax.f32 %v222_v8, 0.0  ;;  %v283_v19 = vmin.f32 %v251_v11, 6.0  ;;  %v253_v23 = vmax.f32 %v184_v13, 0.0  ;;  %v269_v24 = vmax.f32 %v224_v14, 0.0 }
  0xec   :  { %v299_v22 = vmin.f32 %v267_v12, 6.0  ;;  %v284_v25 = vmin.f32 %v252_v17, 6.0 }
  0xed   :  { %v300_v26 = vmin.f32 %v268_v18, 6.0  ;;  %v467_v27 = vpack.c.bf16 %v283_v19, %v282_v15  ;;  %v285_v29 = vmin.f32 %v253_v23, 6.0  ;;  %v301_v30 = vmin.f32 %v269_v24, 6.0  ;;  %v187_v31 = vpop.f32.mrb[8].mxu0  ;;  %v227_v32 = vpop.f32.mrb[8].mxu1 }
  0xee   :  { %v475_v28 = vpack.c.bf16 %v299_v22, %v298_v16  ;;  %v188_v33 = vadd.f32 %v187_v31, %v567_v20  ;;  %v228_v34 = vadd.f32 %v227_v32, %v567_v20  ;;  %v189_v35 = vpop.f32.mrb[9].mxu0  ;;  %v229_v36 = vpop.f32.mrb[9].mxu1 }
  0xef   :  { %410 = vst.msk [vmem:[%s692_s3 + $0x10] sm:$0xff] %vm581_vm3, %v467_v27  ;;  %v468_v37 = vpack.c.bf16 %v285_v29, %v284_v25  ;;  %v476_v38 = vpack.c.bf16 %v301_v30, %v300_v26  ;;  %v190_v39 = vadd.f32 %v189_v35, %v569_v21  ;;  %v230_v40 = vadd.f32 %v229_v36, %v569_v21  ;;  %v191_v41 = vpop.f32.mrb[10].mxu0  ;;  %v231_v42 = vpop.f32.mrb[10].mxu1 }
  0xf0   :  { %418 = vst.msk [vmem:[%s692_s3 + $0x50] sm:$0xff] %vm581_vm3, %v475_v28  ;;  %v254_v43 = vmax.f32 %v188_v33, 0.0  ;;  %v270_v44 = vmax.f32 %v228_v34, 0.0  ;;  %v192_v45 = vadd.f32 %v191_v41, %v567_v20  ;;  %v232_v46 = vadd.f32 %v231_v42, %v567_v20  ;;  %v193_v47 = vpop.f32.mrb[11].mxu0  ;;  %v233_v48 = vpop.f32.mrb[11].mxu1 }
  0xf1   :  { %411 = vst.msk [vmem:[%s692_s3 + $0x18] sm:$0xff] %vm581_vm3, %v468_v37  ;;  %419 = vst.msk [vmem:[%s692_s3 + $0x58] sm:$0xff] %vm581_vm3, %v476_v38  ;;  %v255_v49 = vmax.f32 %v190_v39, 0.0  ;;  %v271_v51 = vmax.f32 %v230_v40, 0.0  ;;  %v194_v52 = vadd.f32 %v193_v47, %v569_v21  ;;  %v234_v53 = vadd.f32 %v233_v48, %v569_v21 }
  0xf2   :  { %v286_v54 = vmin.f32 %v254_v43, 6.0  ;;  %v302_v55 = vmin.f32 %v270_v44, 6.0  ;;  %v256_v56 = vmax.f32 %v192_v45, 0.0  ;;  %v272_v57 = vmax.f32 %v232_v46, 0.0 }
  0xf3   :  { %v287_v58 = vmin.f32 %v255_v49, 6.0  ;;  %v303_v59 = vmin.f32 %v271_v51, 6.0  ;;  %v257_v60 = vmax.f32 %v194_v52, 0.0  ;;  %v273_v61 = vmax.f32 %v234_v53, 0.0 }
  0xf4   :  { %v288_v62 = vmin.f32 %v256_v56, 6.0  ;;  %v304_v63 = vmin.f32 %v272_v57, 6.0 }
  0xf5   :  { %v469_v0 = vpack.c.bf16 %v287_v58, %v286_v54  ;;  %v477_v1 = vpack.c.bf16 %v303_v59, %v302_v55  ;;  %v289_v2 = vmin.f32 %v257_v60, 6.0  ;;  %v305_v3 = vmin.f32 %v273_v61, 6.0  ;;  %v197_v4 = vpop.f32.mrb[12].mxu0  ;;  %v237_v5 = vpop.f32.mrb[12].mxu1 }
  0xf6   :  { %v198_v6 = vadd.f32 %v197_v4, %v567_v20  ;;  %v238_v7 = vadd.f32 %v237_v5, %v567_v20  ;;  %v199_v8 = vpop.f32.mrb[13].mxu0  ;;  %v239_v9 = vpop.f32.mrb[13].mxu1 }
  0xf7   :  { %412 = vst.msk [vmem:[%s692_s3 + $0x20] sm:$0xff] %vm581_vm3, %v469_v0  ;;  %420 = vst.msk [vmem:[%s692_s3 + $0x60] sm:$0xff] %vm581_vm3, %v477_v1  ;;  %v470_v10 = vpack.c.bf16 %v289_v2, %v288_v62  ;;  %v478_v11 = vpack.c.bf16 %v305_v3, %v304_v63  ;;  %v200_v12 = vadd.f32 %v199_v8, %v569_v21  ;;  %v201_v14 = vpop.f32.mrb[14].mxu0  ;;  %v241_v15 = vpop.f32.mrb[14].mxu1 }
  0xf8   :  { %v240_v13 = vadd.f32 %v239_v9, %v569_v21  ;;  %v258_v16 = vmax.f32 %v198_v6, 0.0  ;;  %v274_v17 = vmax.f32 %v238_v7, 0.0  ;;  %v202_v18 = vadd.f32 %v201_v14, %v567_v20  ;;  %v203_v22 = vpop.f32.mrb[15].mxu0  ;;  %v243_v23 = vpop.f32.mrb[15].mxu1 }
  0xf9   :  { %v242_v19 = vadd.f32 %v241_v15, %v567_v20  ;;  %413 = vst.msk [vmem:[%s692_s3 + $0x28] sm:$0xff] %vm581_vm3, %v470_v10  ;;  %421 = vst.msk [vmem:[%s692_s3 + $0x68] sm:$0xff] %vm581_vm3, %v478_v11  ;;  %v259_v24 = vmax.f32 %v200_v12, 0.0  ;;  %v204_v26 = vadd.f32 %v203_v22, %v569_v21  ;;  %v244_v20 = vadd.f32 %v243_v23, %v569_v21 }
  0xfa   :  { %v275_v25 = vmax.f32 %v240_v13, 0.0  ;;  %v290_v27 = vmin.f32 %v258_v16, 6.0  ;;  %v306_v28 = vmin.f32 %v274_v17, 6.0  ;;  %v260_v29 = vmax.f32 %v202_v18, 0.0 }
  0xfb   :  { %v276_v30 = vmax.f32 %v242_v19, 0.0  ;;  %v291_v31 = vmin.f32 %v259_v24, 6.0  ;;  %v261_v33 = vmax.f32 %v204_v26, 0.0  ;;  %v277_v34 = vmax.f32 %v244_v20, 0.0 }
  0xfc   :  { %v307_v32 = vmin.f32 %v275_v25, 6.0  ;;  %v292_v35 = vmin.f32 %v260_v29, 6.0 }
  0xfd   :  { %v308_v36 = vmin.f32 %v276_v30, 6.0  ;;  %v471_v37 = vpack.c.bf16 %v291_v31, %v290_v27  ;;  %v293_v39 = vmin.f32 %v261_v33, 6.0  ;;  %v309_v40 = vmin.f32 %v277_v34, 6.0 }
  0xfe   :  { %v479_v38 = vpack.c.bf16 %v307_v32, %v306_v28 }
  0xff   :  { %414 = vst.msk [vmem:[%s692_s3 + $0x30] sm:$0xff] %vm581_vm3, %v471_v37  ;;  %v472_v21 = vpack.c.bf16 %v293_v39, %v292_v35  ;;  %v480_v41 = vpack.c.bf16 %v309_v40, %v308_v36 }
 0x100   :  { %422 = vst.msk [vmem:[%s692_s3 + $0x70] sm:$0xff] %vm581_vm3, %v479_v38 }
 0x101   :  { %415 = vst.msk [vmem:[%s692_s3 + $0x38] sm:$0xff] %vm581_vm3, %v472_v21  ;;  %423 = vst.msk [vmem:[%s692_s3 + $0x78] sm:$0xff] %vm581_vm3, %v480_v41 }

// kernel: age_gender_forward.38
= control target key start
LH: loop header
LB: loop body
LE: loop exit
PB: predicated region body
PF: predicated region fallthrough
CT: control target
= control target key end

     0   :  { %v597_v0 = vmov 0   ;;  %vm185_vm0 = vcmask 130048   ;;  %vm419_vm1 = vcmask 191488   ;;  %s815_s1 = inlined_call_operand.vmem [shape: bf16[144,24], index: 1, kind: input, shape index: {}]   ;;  %s816_s0 = inlined_call_operand.vmem [shape: bf16[128,144], index: 0, kind: input, shape index: {}]   ;;  %s817_s3 = inlined_call_operand.vmem [shape: bf16[128,24], index: 3, kind: input, shape index: {}]   ;;  %s818_s2 = inlined_call_operand.vmem [shape: f32[1,24], index: 2, kind: input, shape index: {}]   ;;  %s819_s4 = inlined_call_operand.vmem [shape: bf16[128,24], index: 4, kind: output, shape index: {}]  }
   0x1   :  { %210 = vmatprep.subr.bf16.mxu0 %v597_v0  ;;  %545 = vmatprep.subr.bf16.mxu1 %v597_v0  ;;  %v564_v1 = vld [vmem:[%s815_s1] sm:$0xff]   ;;  %v565_v2 = vld [vmem:[%s815_s1 + $0x8] sm:$0xff]   ;;  %v566_v3 = vld [vmem:[%s815_s1 + $0x10] sm:$0xff]  }
   0x2   :  { %211 = vmatpush1.bf16.msra.mxu0 %v564_v1  ;;  %554 = vmatpush1.bf16.msra.mxu1 %v564_v1  ;;  %v567_v4 = vld [vmem:[%s815_s1 + $0x18] sm:$0xff]   ;;  %v575_v5 = vld [vmem:[%s816_s0 + $0x4] ss:$8 sps:$4 sm:$0xff]   ;;  %v570_v9 = vld [vmem:[%s815_s1 + $0x30] sm:$0xff]  }
   0x3   :  { %212 = vmatprep.subr.bf16.mxu0 %v597_v0  ;;  %546 = vmatprep.subr.bf16.mxu1 %v597_v0  ;;  %v578_v6 = vld [vmem:[%s816_s0 + $0x44] ss:$8 sps:$4 sm:$0xff]   ;;  %v571_v10 = vld [vmem:[%s815_s1 + $0x38] sm:$0xff]   ;;  %v573_v12 = vld [vmem:[%s816_s0] ss:$8 sps:$4 sm:$0xff]  }
   0x4   :  { %466 = vmatprep.mubr.msk.bf16.mxu0 %vm185_vm0, %v575_v5  ;;  %470 = vmatprep.mubr.msk.bf16.mxu1 %vm185_vm0, %v578_v6  ;;  %v568_v7 = vld [vmem:[%s815_s1 + $0x20] sm:$0xff]   ;;  %v569_v8 = vld [vmem:[%s815_s1 + $0x28] sm:$0xff]   ;;  %v579_v14 = vld [vmem:[%s816_s0 + $0x14] ss:$8 sps:$4 sm:$0xff]  }
   0x5   :  { %v572_v11 = vld [vmem:[%s815_s1 + $0x40] sm:$0xff]   ;;  %v581_v15 = vld [vmem:[%s816_s0 + $0x54] ss:$8 sps:$4 sm:$0xff]   ;;  %v583_v16 = vld [vmem:[%s816_s0 + $0x10] ss:$8 sps:$4 sm:$0xff]  }
   0x6   :  { %213 = vmatpush1.bf16.msra.mxu0 %v565_v2  ;;  %555 = vmatpush1.bf16.msra.mxu1 %v565_v2  ;;  %v576_v13 = vld [vmem:[%s816_s0 + $0x40] ss:$8 sps:$4 sm:$0xff]   ;;  %v584_v17 = vld [vmem:[%s816_s0 + $0x50] ss:$8 sps:$4 sm:$0xff]   ;;  %v585_v18 = vld [vmem:[%s816_s0 + $0x24] ss:$8 sps:$4 sm:$0xff]  }
   0x7   :  { %214 = vmatprep.subr.bf16.mxu0 %v597_v0  ;;  %547 = vmatprep.subr.bf16.mxu1 %v597_v0  ;;  %v587_v19 = vld [vmem:[%s816_s0 + $0x64] ss:$8 sps:$4 sm:$0xff]   ;;  %v589_v20 = vld [vmem:[%s816_s0 + $0x20] ss:$8 sps:$4 sm:$0xff]   ;;  %v591_v22 = vld [vmem:[%s816_s0 + $0x34] ss:$8 sps:$4 sm:$0xff]  }
   0x8   :  { %v590_v21 = vld [vmem:[%s816_s0 + $0x60] ss:$8 sps:$4 sm:$0xff]   ;;  %v593_v23 = vld [vmem:[%s816_s0 + $0x74] ss:$8 sps:$4 sm:$0xff]   ;;  %v595_v24 = vld [vmem:[%s816_s0 + $0x30] ss:$8 sps:$4 sm:$0xff]  }
   0x9   :  { %v596_v25 = vld [vmem:[%s816_s0 + $0x70] ss:$8 sps:$4 sm:$0xff]   ;;  %v507_v26 = vld [vmem:[%s817_s3] sm:$0xff]   ;;  %v538_v47 = vld [vmem:[%s817_s3 + $0x8] sm:$0xff]  }
   0xa   :  { %215 = vmatpush1.bf16.msra.mxu0 %v566_v3  ;;  %556 = vmatpush1.bf16.msra.mxu1 %v566_v3  ;;  %v541_v27 = vld [vmem:[%s817_s3 + $0x20] sm:$0xff]   ;;  %v508_v29 = vunpack.c.l.bf16 %v507_v26  ;;  %v509_v37 = vunpack.c.h.bf16 %v507_v26  ;;  %v542_v48 = vld [vmem:[%s817_s3 + $0x28] sm:$0xff]   ;;  %v512_v55 = vunpack.c.l.bf16 %v538_v47  ;;  %v513_v63 = vunpack.c.h.bf16 %v538_v47 }
   0xb   :  { %216 = vmatprep.subr.bf16.mxu0 %v597_v0  ;;  %548 = vmatprep.subr.bf16.mxu1 %v597_v0  ;;  %v715_v28 = vld [vmem:[%s818_s2] ss:$0 sm:$0xff]  ;;  %v524_v30 = vunpack.c.l.bf16 %v541_v27  ;;  %v525_v38 = vunpack.c.h.bf16 %v541_v27  ;;  %v528_v56 = vunpack.c.l.bf16 %v542_v48 }
   0xe   :  { %217 = vmatpush1.bf16.msra.mxu0 %v567_v4  ;;  %557 = vmatpush1.bf16.msra.mxu1 %v567_v4 }
   0xf   :  { %218 = vmatprep.subr.bf16.mxu0 %v597_v0  ;;  %549 = vmatprep.subr.bf16.mxu1 %v597_v0 }
  0x12   :  { %219 = vmatpush1.bf16.msra.mxu0 %v568_v7  ;;  %558 = vmatpush1.bf16.msra.mxu1 %v568_v7 }
  0x13   :  { %220 = vmatprep.subr.bf16.mxu0 %v597_v0  ;;  %550 = vmatprep.subr.bf16.mxu1 %v597_v0 }
  0x16   :  { %221 = vmatpush1.bf16.msra.mxu0 %v569_v8  ;;  %559 = vmatpush1.bf16.msra.mxu1 %v569_v8 }
  0x17   :  { %222 = vmatprep.subr.bf16.mxu0 %v597_v0  ;;  %551 = vmatprep.subr.bf16.mxu1 %v597_v0 }
  0x1a   :  { %223 = vmatpush1.bf16.msra.mxu0 %v570_v9  ;;  %560 = vmatpush1.bf16.msra.mxu1 %v570_v9  ;;  %v539_v9 = vld [vmem:[%s817_s3 + $0x10] sm:$0xff]  }
  0x1b   :  { %224 = vmatprep.subr.bf16.mxu0 %v597_v0  ;;  %552 = vmatprep.subr.bf16.mxu1 %v597_v0 }
  0x1e   :  { %225 = vmatpush1.bf16.msra.mxu0 %v571_v10  ;;  %561 = vmatpush1.bf16.msra.mxu1 %v571_v10  ;;  %v543_v10 = vld [vmem:[%s817_s3 + $0x30] sm:$0xff]  }
  0x1f   :  { %226 = vmatprep.subr.bf16.mxu0 %v597_v0  ;;  %553 = vmatprep.subr.bf16.mxu1 %v597_v0  ;;  %v529_v0 = vunpack.c.h.bf16 %v542_v48  ;;  %v533_v26 = vunpack.c.h.bf16 %v543_v10 }
  0x22   :  { %227 = vmatpush1.bf16.msra.mxu0 %v572_v11  ;;  %562 = vmatpush1.bf16.msra.mxu1 %v572_v11 }
  0x25   :  { %243 = vmatmul.mubr.bf16.vlgmr.msra.gmra.mrb[0].mxu0 %v573_v12  ;;  %275 = vmatmul.mubr.bf16.vlgmr.msra.gmra.mrb[0].mxu1 %v576_v13 }
  0x26   :  { %467 = vmatprep.mubr.msk.bf16.mxu0 %vm185_vm0, %v579_v14  ;;  %471 = vmatprep.mubr.msk.bf16.mxu1 %vm185_vm0, %v581_v15 }
  0x2d   :  { %251 = vmatmul.mubr.bf16.gmra.mrb[4].mxu0 %v583_v16  ;;  %283 = vmatmul.mubr.bf16.gmra.mrb[4].mxu1 %v584_v17  ;;  %v516_v17 = vunpack.c.l.bf16 %v539_v9 }
  0x2e   :  { %468 = vmatprep.mubr.msk.bf16.mxu0 %vm185_vm0, %v585_v18  ;;  %472 = vmatprep.mubr.msk.bf16.mxu1 %vm185_vm0, %v587_v19  ;;  %v532_v18 = vunpack.c.l.bf16 %v543_v10 }
  0x35   :  { %259 = vmatmul.mubr.bf16.gmra.mrb[8].mxu0 %v589_v20  ;;  %291 = vmatmul.mubr.bf16.gmra.mrb[8].mxu1 %v590_v21 }
  0x36   :  { %469 = vmatprep.mubr.msk.bf16.mxu0 %vm185_vm0, %v591_v22  ;;  %473 = vmatprep.mubr.msk.bf16.mxu1 %vm185_vm0, %v593_v23 }
  0x3d   :  { %267 = vmatmul.mubr.bf16.gmra.mrb[12].mxu0 %v595_v24  ;;  %299 = vmatmul.mubr.bf16.gmra.mrb[12].mxu1 %v596_v25  ;;  %v517_v25 = vunpack.c.h.bf16 %v539_v9 }
  0xf8   :  { %v244_v31 = vpop.f32.mrb[0].mxu0  ;;  %v276_v32 = vpop.f32.mrb[0].mxu1 }
  0xf9   :  { %v245_v33 = vadd.f32 %v715_v28, %v244_v31  ;;  %v277_v34 = vadd.f32 %v715_v28, %v276_v32  ;;  %v246_v35 = vpop.f32.mrb[1].mxu0  ;;  %v278_v36 = vpop.f32.mrb[1].mxu1 }
  0xfa   :  { %v247_v39 = vpop.f32.mrb[2].mxu0  ;;  %v279_v40 = vpop.f32.mrb[2].mxu1  ;;  %v540_v36 = vld [vmem:[%s817_s3 + $0x18] sm:$0xff]  }
  0xfb   :  { %v339_v41 = vadd.f32 %v508_v29, %v245_v33  ;;  %v347_v42 = vadd.f32 %v524_v30, %v277_v34  ;;  %v248_v43 = vadd.f32 %v715_v28, %v247_v39  ;;  %v280_v44 = vadd.f32 %v715_v28, %v279_v40  ;;  %v249_v45 = vpop.f32.mrb[3].mxu0  ;;  %v281_v46 = vpop.f32.mrb[3].mxu1 }
  0xfd   :  { %v490_v49 = vpack.c.bf16 %v339_v41, %v339_v41  ;;  %v498_v50 = vpack.c.bf16 %v347_v42, %v347_v42  ;;  %v340_v51 = vadd.f32 %v509_v37, %v248_v43  ;;  %v348_v52 = vadd.f32 %v525_v38, %v280_v44  ;;  %v544_v37 = vld [vmem:[%s817_s3 + $0x38] sm:$0xff]  }
  0xfe   :  { %v520_v44 = vunpack.c.l.bf16 %v540_v36  ;;  %v536_v45 = vunpack.c.l.bf16 %v544_v37 }
  0xff   :  { %420 = vst.msk [vmem:[%s819_s4] sm:$0xf] %vm419_vm1, %v490_v49  ;;  %428 = vst.msk [vmem:[%s819_s4 + $0x20] sm:$0xf] %vm419_vm1, %v498_v50  ;;  %v491_v53 = vpack.c.bf16 %v340_v51, %v340_v51  ;;  %v499_v54 = vpack.c.bf16 %v348_v52, %v348_v52  ;;  %v521_v52 = vunpack.c.h.bf16 %v540_v36 }
 0x100   :  { %v252_v57 = vpop.f32.mrb[4].mxu0  ;;  %v284_v58 = vpop.f32.mrb[4].mxu1 }
 0x101   :  { %421 = vst.msk [vmem:[%s819_s4 + $0x4] sm:$0xf] %vm419_vm1, %v491_v53  ;;  %429 = vst.msk [vmem:[%s819_s4 + $0x24] sm:$0xf] %vm419_vm1, %v499_v54  ;;  %v253_v59 = vadd.f32 %v715_v28, %v252_v57  ;;  %v285_v60 = vadd.f32 %v715_v28, %v284_v58  ;;  %v254_v61 = vpop.f32.mrb[5].mxu0  ;;  %v286_v62 = vpop.f32.mrb[5].mxu1  ;;  %v537_v53 = vunpack.c.h.bf16 %v544_v37 }
 0x102   :  { %v255_v1 = vpop.f32.mrb[6].mxu0  ;;  %v287_v2 = vpop.f32.mrb[6].mxu1 }
 0x103   :  { %v341_v3 = vadd.f32 %v512_v55, %v253_v59  ;;  %v349_v4 = vadd.f32 %v528_v56, %v285_v60  ;;  %v256_v5 = vadd.f32 %v715_v28, %v255_v1  ;;  %v288_v6 = vadd.f32 %v715_v28, %v287_v2  ;;  %v257_v7 = vpop.f32.mrb[7].mxu0  ;;  %v289_v8 = vpop.f32.mrb[7].mxu1 }
 0x105   :  { %v492_v11 = vpack.c.bf16 %v341_v3, %v341_v3  ;;  %v500_v12 = vpack.c.bf16 %v349_v4, %v349_v4  ;;  %v342_v13 = vadd.f32 %v513_v63, %v256_v5  ;;  %v350_v14 = vadd.f32 %v529_v0, %v288_v6 }
 0x107   :  { %422 = vst.msk [vmem:[%s819_s4 + $0x8] sm:$0xf] %vm419_vm1, %v492_v11  ;;  %430 = vst.msk [vmem:[%s819_s4 + $0x28] sm:$0xf] %vm419_vm1, %v500_v12  ;;  %v493_v15 = vpack.c.bf16 %v342_v13, %v342_v13  ;;  %v501_v16 = vpack.c.bf16 %v350_v14, %v350_v14 }
 0x108   :  { %v260_v19 = vpop.f32.mrb[8].mxu0  ;;  %v292_v20 = vpop.f32.mrb[8].mxu1 }
 0x109   :  { %423 = vst.msk [vmem:[%s819_s4 + $0xc] sm:$0xf] %vm419_vm1, %v493_v15  ;;  %431 = vst.msk [vmem:[%s819_s4 + $0x2c] sm:$0xf] %vm419_vm1, %v501_v16  ;;  %v261_v21 = vadd.f32 %v715_v28, %v260_v19  ;;  %v293_v22 = vadd.f32 %v715_v28, %v292_v20  ;;  %v262_v23 = vpop.f32.mrb[9].mxu0  ;;  %v294_v24 = vpop.f32.mrb[9].mxu1 }
 0x10a   :  { %v263_v27 = vpop.f32.mrb[10].mxu0  ;;  %v295_v29 = vpop.f32.mrb[10].mxu1 }
 0x10b   :  { %v343_v30 = vadd.f32 %v516_v17, %v261_v21  ;;  %v351_v31 = vadd.f32 %v532_v18, %v293_v22  ;;  %v264_v32 = vadd.f32 %v715_v28, %v263_v27  ;;  %v296_v33 = vadd.f32 %v715_v28, %v295_v29  ;;  %v265_v34 = vpop.f32.mrb[11].mxu0  ;;  %v297_v35 = vpop.f32.mrb[11].mxu1 }
 0x10d   :  { %v494_v38 = vpack.c.bf16 %v343_v30, %v343_v30  ;;  %v502_v39 = vpack.c.bf16 %v351_v31, %v351_v31  ;;  %v344_v40 = vadd.f32 %v517_v25, %v264_v32  ;;  %v352_v41 = vadd.f32 %v533_v26, %v296_v33 }
 0x10f   :  { %424 = vst.msk [vmem:[%s819_s4 + $0x10] sm:$0xf] %vm419_vm1, %v494_v38  ;;  %432 = vst.msk [vmem:[%s819_s4 + $0x30] sm:$0xf] %vm419_vm1, %v502_v39  ;;  %v495_v42 = vpack.c.bf16 %v344_v40, %v344_v40  ;;  %v503_v43 = vpack.c.bf16 %v352_v41, %v352_v41 }
 0x110   :  { %v268_v46 = vpop.f32.mrb[12].mxu0  ;;  %v300_v47 = vpop.f32.mrb[12].mxu1 }
 0x111   :  { %425 = vst.msk [vmem:[%s819_s4 + $0x14] sm:$0xf] %vm419_vm1, %v495_v42  ;;  %433 = vst.msk [vmem:[%s819_s4 + $0x34] sm:$0xf] %vm419_vm1, %v503_v43  ;;  %v269_v48 = vadd.f32 %v715_v28, %v268_v46  ;;  %v301_v49 = vadd.f32 %v715_v28, %v300_v47  ;;  %v270_v50 = vpop.f32.mrb[13].mxu0  ;;  %v302_v51 = vpop.f32.mrb[13].mxu1 }
 0x112   :  { %v271_v54 = vpop.f32.mrb[14].mxu0  ;;  %v303_v55 = vpop.f32.mrb[14].mxu1 }
 0x113   :  { %v345_v56 = vadd.f32 %v520_v44, %v269_v48  ;;  %v353_v57 = vadd.f32 %v536_v45, %v301_v49  ;;  %v272_v58 = vadd.f32 %v715_v28, %v271_v54  ;;  %v304_v59 = vadd.f32 %v715_v28, %v303_v55  ;;  %v273_v60 = vpop.f32.mrb[15].mxu0  ;;  %v305_v61 = vpop.f32.mrb[15].mxu1 }
 0x115   :  { %v496_v62 = vpack.c.bf16 %v345_v56, %v345_v56  ;;  %v504_v63 = vpack.c.bf16 %v353_v57, %v353_v57  ;;  %v346_v0 = vadd.f32 %v521_v52, %v272_v58  ;;  %v354_v1 = vadd.f32 %v537_v53, %v304_v59 }
 0x117   :  { %426 = vst.msk [vmem:[%s819_s4 + $0x18] sm:$0xf] %vm419_vm1, %v496_v62  ;;  %434 = vst.msk [vmem:[%s819_s4 + $0x38] sm:$0xf] %vm419_vm1, %v504_v63  ;;  %v497_v2 = vpack.c.bf16 %v346_v0, %v346_v0  ;;  %v505_v3 = vpack.c.bf16 %v354_v1, %v354_v1 }
 0x119   :  { %427 = vst.msk [vmem:[%s819_s4 + $0x1c] sm:$0xf] %vm419_vm1, %v497_v2  ;;  %435 = vst.msk [vmem:[%s819_s4 + $0x3c] sm:$0xf] %vm419_vm1, %v505_v3 }

// kernel: age_gender_forward.41
= control target key start
LH: loop header
LB: loop body
LE: loop exit
PB: predicated region body
PF: predicated region fallthrough
CT: control target
= control target key end

     0   :  { %v205_v1 = vmov 0   ;;  %vm65_vm0 = vcmask 261120   ;;  %v25_v7 = vlaneseq  ;;  %vm165_vm1 = vcmask 1043456   ;;  %s261_s1 = inlined_call_operand.vmem [shape: bf16[32,192], index: 1, kind: input, shape index: {}]   ;;  %s262_s0 = inlined_call_operand.vmem [shape: bf16[32,32], index: 0, kind: input, shape index: {}]   ;;  %s263_s2 = inlined_call_operand.vmem [shape: f32[1,192], index: 2, kind: input, shape index: {}]   ;;  %s264_s3 = inlined_call_operand.vmem [shape: bf16[32,192], index: 3, kind: output, shape index: {}]  }
   0x1   :  { %v197_v0 = vld [vmem:[%s261_s1 + $0x4] ss:$8 sps:$4 sm:$0xff]   ;;  %104 = vmatprep.mubr.bf16.mxu0 %v205_v1  ;;  %114 = vmatprep.mubr.bf16.mxu1 %v205_v1  ;;  %v199_v2 = vld [vmem:[%s261_s1] ss:$8 sps:$4 sm:$0xff]   ;;  %v200_v3 = vld [vmem:[%s261_s1 + $0x14] ss:$8 sps:$4 sm:$0xff]  }
   0x2   :  { %72 = vmatprep.subr.bf16.mxu0 %v197_v0  ;;  %192 = vmatprep.subr.bf16.mxu1 %v197_v0  ;;  %v202_v4 = vld [vmem:[%s261_s1 + $0x10] ss:$8 sps:$4 sm:$0xff]   ;;  %v203_v5 = vld [vmem:[%s262_s0] sm:$0xff]   ;;  %v204_v6 = vld [vmem:[%s262_s0 + $0x8] sm:$0xff]   ;;  %v26_v8 = vshrl.u32 %v25_v7, 7  ;;  %vm166_vm2 = vcmask 523268  }
   0x3   :  { %73 = vmatpush1.bf16.msra.mxu0 %v199_v2  ;;  %194 = vmatpush1.bf16.msra.mxu1 %v199_v2  ;;  %v23_v10 = vld [vmem:[%s263_s2] sm:$0x3]  ;;  %vm167_vm3 = vmor %vm166_vm2, %vm165_vm1 }
   0x4   :  { %74 = vmatprep.subr.bf16.mxu0 %v200_v3  ;;  %193 = vmatprep.subr.bf16.mxu1 %v200_v3  ;;  %v27_v9 = vsub.s32 0, %v26_v8  ;;  %v31_v11 = vsub.s32 1, %v26_v8 }
   0x6   :  { %v28_v12 = vrot.slane %v23_v10, %v27_v9  ;;  %v32_v13 = vrot.slane %v23_v10, %v31_v11 }
   0x7   :  { %75 = vmatpush1.bf16.msra.mxu0 %v202_v4  ;;  %195 = vmatpush1.bf16.msra.mxu1 %v202_v4 }
   0xa   :  { %182 = vmatmul.mubr.msk.bf16.vlgmr.msra.gmra.mrb[0].mxu0 %vm65_vm0, %v203_v5  ;;  %183 = vmatmul.mubr.msk.bf16.vlgmr.msra.gmra.mrb[0].mxu1 %vm65_vm0, %v204_v6 }
  0xdd   :  { %v106_v14 = vpop.f32.mrb[0].mxu0  ;;  %v116_v15 = vpop.f32.mrb[0].mxu1 }
  0xde   :  { %v107_v16 = vadd.f32 %v106_v14, %v28_v12  ;;  %v117_v17 = vadd.f32 %v116_v15, %v28_v12  ;;  %v108_v18 = vpop.f32.mrb[1].mxu0  ;;  %v118_v19 = vpop.f32.mrb[1].mxu1 }
  0xdf   :  { %v109_v20 = vadd.f32 %v108_v18, %v32_v13  ;;  %v119_v21 = vadd.f32 %v118_v19, %v32_v13  ;;  %v110_v22 = vpop.f32.mrb[2].mxu0  ;;  %v120_v23 = vpop.f32.mrb[2].mxu1 }
  0xe0   :  { %v125_v24 = vmax.f32 %v107_v16, 0.0  ;;  %v129_v25 = vmax.f32 %v117_v17, 0.0  ;;  %v111_v26 = vadd.f32 %v110_v22, %v28_v12  ;;  %v121_v27 = vadd.f32 %v120_v23, %v28_v12  ;;  %v112_v28 = vpop.f32.mrb[3].mxu0  ;;  %v122_v29 = vpop.f32.mrb[3].mxu1 }
  0xe1   :  { %v126_v30 = vmax.f32 %v109_v20, 0.0  ;;  %v130_v31 = vmax.f32 %v119_v21, 0.0  ;;  %v113_v32 = vadd.f32 %v112_v28, %v32_v13  ;;  %v123_v33 = vadd.f32 %v122_v29, %v32_v13 }
  0xe2   :  { %v133_v34 = vmin.f32 %v125_v24, 6.0  ;;  %v137_v35 = vmin.f32 %v129_v25, 6.0  ;;  %v127_v36 = vmax.f32 %v111_v26, 0.0  ;;  %v131_v37 = vmax.f32 %v121_v27, 0.0 }
  0xe3   :  { %v134_v38 = vmin.f32 %v126_v30, 6.0  ;;  %v138_v39 = vmin.f32 %v130_v31, 6.0  ;;  %v128_v40 = vmax.f32 %v113_v32, 0.0  ;;  %v132_v41 = vmax.f32 %v123_v33, 0.0 }
  0xe4   :  { %v135_v42 = vmin.f32 %v127_v36, 6.0  ;;  %v139_v43 = vmin.f32 %v131_v37, 6.0 }
  0xe5   :  { %v188_v44 = vpack.c.bf16 %v134_v38, %v133_v34  ;;  %v190_v45 = vpack.c.bf16 %v138_v39, %v137_v35  ;;  %v136_v46 = vmin.f32 %v128_v40, 6.0  ;;  %v140_v47 = vmin.f32 %v132_v41, 6.0 }
  0xe7   :  { %168 = vst.msk [vmem:[%s264_s3] sm:$0xff] %vm167_vm3, %v188_v44  ;;  %170 = vst.msk [vmem:[%s264_s3 + $0x10] sm:$0xff] %vm167_vm3, %v190_v45  ;;  %v189_v48 = vpack.c.bf16 %v136_v46, %v135_v42  ;;  %v191_v49 = vpack.c.bf16 %v140_v47, %v139_v43 }
  0xe9   :  { %169 = vst.msk [vmem:[%s264_s3 + $0x8] sm:$0xff] %vm167_vm3, %v189_v48  ;;  %171 = vst.msk [vmem:[%s264_s3 + $0x18] sm:$0xff] %vm167_vm3, %v191_v49 }

// kernel: age_gender_forward.40
= control target key start
LH: loop header
LB: loop body
LE: loop exit
PB: predicated region body
PF: predicated region fallthrough
CT: control target
= control target key end

     0   :  { %v255_v0 = vmov 0   ;;  %vm116_vm0 = vcmask 130048   ;;  %vm188_vm1 = vcmask 257024   ;;  %s330_s1 = inlined_call_operand.vmem [shape: bf16[144,32], index: 1, kind: input, shape index: {}]   ;;  %s331_s0 = inlined_call_operand.vmem [shape: bf16[32,144], index: 0, kind: input, shape index: {}]   ;;  %s332_s2 = inlined_call_operand.vmem [shape: f32[1,32], index: 2, kind: input, shape index: {}]   ;;  %s333_s3 = inlined_call_operand.vmem [shape: bf16[32,32], index: 3, kind: output, shape index: {}]  }
   0x1   :  { %123 = vmatprep.subr.bf16.mxu0 %v255_v0  ;;  %221 = vmatprep.subr.bf16.mxu1 %v255_v0  ;;  %v240_v1 = vld [vmem:[%s330_s1] sm:$0xff]   ;;  %v241_v2 = vld [vmem:[%s330_s1 + $0x8] sm:$0xff]   ;;  %v242_v3 = vld [vmem:[%s330_s1 + $0x10] sm:$0xff]  }
   0x2   :  { %124 = vmatpush1.bf16.msra.mxu0 %v240_v1  ;;  %230 = vmatpush1.bf16.msra.mxu1 %v240_v1  ;;  %v243_v4 = vld [vmem:[%s330_s1 + $0x18] sm:$0xff]   ;;  %v251_v5 = vld [vmem:[%s331_s0 + $0x4] ss:$8 sps:$4 sm:$0xff]   ;;  %v246_v9 = vld [vmem:[%s330_s1 + $0x30] sm:$0xff]  }
   0x3   :  { %125 = vmatprep.subr.bf16.mxu0 %v255_v0  ;;  %222 = vmatprep.subr.bf16.mxu1 %v255_v0  ;;  %v254_v6 = vld [vmem:[%s331_s0 + $0x14] ss:$8 sps:$4 sm:$0xff]   ;;  %v244_v7 = vld [vmem:[%s330_s1 + $0x20] sm:$0xff]   ;;  %v245_v8 = vld [vmem:[%s330_s1 + $0x28] sm:$0xff]  }
   0x4   :  { %211 = vmatprep.mubr.msk.bf16.mxu0 %vm116_vm0, %v251_v5  ;;  %212 = vmatprep.mubr.msk.bf16.mxu1 %vm116_vm0, %v254_v6  ;;  %v247_v10 = vld [vmem:[%s330_s1 + $0x38] sm:$0xff]   ;;  %v248_v11 = vld [vmem:[%s330_s1 + $0x40] sm:$0xff]  }
   0x5   :  { %v249_v12 = vld [vmem:[%s331_s0] ss:$8 sps:$4 sm:$0xff]   ;;  %v252_v13 = vld [vmem:[%s331_s0 + $0x10] ss:$8 sps:$4 sm:$0xff]  }
   0x6   :  { %126 = vmatpush1.bf16.msra.mxu0 %v241_v2  ;;  %231 = vmatpush1.bf16.msra.mxu1 %v241_v2  ;;  %v197_v14 = vld [vmem:[%s332_s2] ss:$0 sm:$0xff] }
   0x7   :  { %127 = vmatprep.subr.bf16.mxu0 %v255_v0  ;;  %223 = vmatprep.subr.bf16.mxu1 %v255_v0 }
   0xa   :  { %128 = vmatpush1.bf16.msra.mxu0 %v242_v3  ;;  %232 = vmatpush1.bf16.msra.mxu1 %v242_v3 }
   0xb   :  { %129 = vmatprep.subr.bf16.mxu0 %v255_v0  ;;  %224 = vmatprep.subr.bf16.mxu1 %v255_v0 }
   0xe   :  { %130 = vmatpush1.bf16.msra.mxu0 %v243_v4  ;;  %233 = vmatpush1.bf16.msra.mxu1 %v243_v4 }
   0xf   :  { %131 = vmatprep.subr.bf16.mxu0 %v255_v0  ;;  %225 = vmatprep.subr.bf16.mxu1 %v255_v0 }
  0x12   :  { %132 = vmatpush1.bf16.msra.mxu0 %v244_v7  ;;  %234 = vmatpush1.bf16.msra.mxu1 %v244_v7 }
  0x13   :  { %133 = vmatprep.subr.bf16.mxu0 %v255_v0  ;;  %226 = vmatprep.subr.bf16.mxu1 %v255_v0 }
  0x16   :  { %134 = vmatpush1.bf16.msra.mxu0 %v245_v8  ;;  %235 = vmatpush1.bf16.msra.mxu1 %v245_v8 }
  0x17   :  { %135 = vmatprep.subr.bf16.mxu0 %v255_v0  ;;  %227 = vmatprep.subr.bf16.mxu1 %v255_v0 }
  0x1a   :  { %136 = vmatpush1.bf16.msra.mxu0 %v246_v9  ;;  %236 = vmatpush1.bf16.msra.mxu1 %v246_v9 }
  0x1b   :  { %137 = vmatprep.subr.bf16.mxu0 %v255_v0  ;;  %228 = vmatprep.subr.bf16.mxu1 %v255_v0 }
  0x1e   :  { %138 = vmatpush1.bf16.msra.mxu0 %v247_v10  ;;  %237 = vmatpush1.bf16.msra.mxu1 %v247_v10 }
  0x1f   :  { %139 = vmatprep.subr.bf16.mxu0 %v255_v0  ;;  %229 = vmatprep.subr.bf16.mxu1 %v255_v0 }
  0x22   :  { %140 = vmatpush1.bf16.msra.mxu0 %v248_v11  ;;  %238 = vmatpush1.bf16.msra.mxu1 %v248_v11 }
  0x25   :  { %156 = vmatmul.mubr.bf16.vlgmr.msra.gmra.mrb[0].mxu0 %v249_v12  ;;  %164 = vmatmul.mubr.bf16.vlgmr.msra.gmra.mrb[0].mxu1 %v252_v13 }
  0xf8   :  { %v157_v15 = vpop.f32.mrb[0].mxu0  ;;  %v165_v16 = vpop.f32.mrb[0].mxu1 }
  0xf9   :  { %v158_v17 = vadd.f32 %v197_v14, %v157_v15  ;;  %v166_v18 = vadd.f32 %v197_v14, %v165_v16  ;;  %v159_v19 = vpop.f32.mrb[1].mxu0  ;;  %v167_v20 = vpop.f32.mrb[1].mxu1 }
  0xfa   :  { %v160_v21 = vpop.f32.mrb[2].mxu0  ;;  %v168_v22 = vpop.f32.mrb[2].mxu1 }
  0xfb   :  { %v217_v23 = vpack.c.bf16 %v158_v17, %v158_v17  ;;  %v219_v24 = vpack.c.bf16 %v166_v18, %v166_v18  ;;  %v161_v25 = vadd.f32 %v197_v14, %v160_v21  ;;  %v169_v26 = vadd.f32 %v197_v14, %v168_v22  ;;  %v162_v27 = vpop.f32.mrb[3].mxu0  ;;  %v170_v28 = vpop.f32.mrb[3].mxu1 }
  0xfd   :  { %189 = vst.msk [vmem:[%s333_s3] sm:$0xf] %vm188_vm1, %v217_v23  ;;  %191 = vst.msk [vmem:[%s333_s3 + $0x8] sm:$0xf] %vm188_vm1, %v219_v24  ;;  %v218_v29 = vpack.c.bf16 %v161_v25, %v161_v25  ;;  %v220_v30 = vpack.c.bf16 %v169_v26, %v169_v26 }
  0xff   :  { %190 = vst.msk [vmem:[%s333_s3 + $0x4] sm:$0xf] %vm188_vm1, %v218_v29  ;;  %192 = vst.msk [vmem:[%s333_s3 + $0xc] sm:$0xf] %vm188_vm1, %v220_v30 }

// kernel: age_gender_forward.42
= control target key start
LH: loop header
LB: loop body
LE: loop exit
PB: predicated region body
PF: predicated region fallthrough
CT: control target
= control target key end

     0   :  { %v315_v0 = vmov 0   ;;  %vm143_vm0 = vcmask 523264   ;;  %vm227_vm1 = vcmask 257024   ;;  %s434_s1 = inlined_call_operand.vmem [shape: bf16[192,32], index: 1, kind: input, shape index: {}]   ;;  %s435_s0 = inlined_call_operand.vmem [shape: bf16[32,192], index: 0, kind: input, shape index: {}]   ;;  %s436_s3 = inlined_call_operand.vmem [shape: bf16[32,32], index: 3, kind: input, shape index: {}]   ;;  %s437_s2 = inlined_call_operand.vmem [shape: f32[1,32], index: 2, kind: input, shape index: {}]   ;;  %s438_s4 = inlined_call_operand.vmem [shape: bf16[32,32], index: 4, kind: output, shape index: {}]  }
   0x1   :  { %150 = vmatprep.subr.bf16.mxu0 %v315_v0  ;;  %272 = vmatprep.subr.bf16.mxu1 %v315_v0  ;;  %v297_v1 = vld [vmem:[%s434_s1] sm:$0xff]   ;;  %v298_v2 = vld [vmem:[%s434_s1 + $0x8] sm:$0xff]   ;;  %v299_v3 = vld [vmem:[%s434_s1 + $0x10] sm:$0xff]  }
   0x2   :  { %151 = vmatpush1.bf16.msra.mxu0 %v297_v1  ;;  %284 = vmatpush1.bf16.msra.mxu1 %v297_v1  ;;  %v300_v4 = vld [vmem:[%s434_s1 + $0x18] sm:$0xff]   ;;  %v311_v5 = vld [vmem:[%s435_s0 + $0x4] ss:$8 sps:$4 sm:$0xff]   ;;  %v303_v9 = vld [vmem:[%s434_s1 + $0x30] sm:$0xff]  }
   0x3   :  { %152 = vmatprep.subr.bf16.mxu0 %v315_v0  ;;  %273 = vmatprep.subr.bf16.mxu1 %v315_v0  ;;  %v301_v6 = vld [vmem:[%s434_s1 + $0x20] sm:$0xff]   ;;  %v314_v7 = vld [vmem:[%s435_s0 + $0x14] ss:$8 sps:$4 sm:$0xff]   ;;  %v302_v8 = vld [vmem:[%s434_s1 + $0x28] sm:$0xff]  }
   0x4   :  { %253 = vmatprep.mubr.msk.bf16.mxu0 %vm143_vm0, %v311_v5  ;;  %254 = vmatprep.mubr.msk.bf16.mxu1 %vm143_vm0, %v314_v7  ;;  %v304_v10 = vld [vmem:[%s434_s1 + $0x38] sm:$0xff]   ;;  %v305_v11 = vld [vmem:[%s434_s1 + $0x40] sm:$0xff]   ;;  %v306_v12 = vld [vmem:[%s434_s1 + $0x48] sm:$0xff]  }
   0x5   :  { %v307_v13 = vld [vmem:[%s434_s1 + $0x50] sm:$0xff]   ;;  %v308_v14 = vld [vmem:[%s434_s1 + $0x58] sm:$0xff]   ;;  %v309_v15 = vld [vmem:[%s435_s0] ss:$8 sps:$4 sm:$0xff]  }
   0x6   :  { %153 = vmatpush1.bf16.msra.mxu0 %v298_v2  ;;  %285 = vmatpush1.bf16.msra.mxu1 %v298_v2  ;;  %v312_v16 = vld [vmem:[%s435_s0 + $0x10] ss:$8 sps:$4 sm:$0xff]   ;;  %v264_v17 = vld [vmem:[%s436_s3] sm:$0xff]   ;;  %v271_v18 = vld [vmem:[%s436_s3 + $0x8] sm:$0xff]  }
   0x7   :  { %154 = vmatprep.subr.bf16.mxu0 %v315_v0  ;;  %274 = vmatprep.subr.bf16.mxu1 %v315_v0  ;;  %v236_v19 = vld [vmem:[%s437_s2] ss:$0 sm:$0xff]  ;;  %v265_v20 = vunpack.c.l.bf16 %v264_v17  ;;  %v269_v21 = vunpack.c.l.bf16 %v271_v18  ;;  %v266_v28 = vunpack.c.h.bf16 %v264_v17  ;;  %v270_v29 = vunpack.c.h.bf16 %v271_v18 }
   0xa   :  { %155 = vmatpush1.bf16.msra.mxu0 %v299_v3  ;;  %286 = vmatpush1.bf16.msra.mxu1 %v299_v3 }
   0xb   :  { %156 = vmatprep.subr.bf16.mxu0 %v315_v0  ;;  %275 = vmatprep.subr.bf16.mxu1 %v315_v0 }
   0xe   :  { %157 = vmatpush1.bf16.msra.mxu0 %v300_v4  ;;  %287 = vmatpush1.bf16.msra.mxu1 %v300_v4 }
   0xf   :  { %158 = vmatprep.subr.bf16.mxu0 %v315_v0  ;;  %276 = vmatprep.subr.bf16.mxu1 %v315_v0 }
  0x12   :  { %159 = vmatpush1.bf16.msra.mxu0 %v301_v6  ;;  %288 = vmatpush1.bf16.msra.mxu1 %v301_v6 }
  0x13   :  { %160 = vmatprep.subr.bf16.mxu0 %v315_v0  ;;  %277 = vmatprep.subr.bf16.mxu1 %v315_v0 }
  0x16   :  { %161 = vmatpush1.bf16.msra.mxu0 %v302_v8  ;;  %289 = vmatpush1.bf16.msra.mxu1 %v302_v8 }
  0x17   :  { %162 = vmatprep.subr.bf16.mxu0 %v315_v0  ;;  %278 = vmatprep.subr.bf16.mxu1 %v315_v0 }
  0x1a   :  { %163 = vmatpush1.bf16.msra.mxu0 %v303_v9  ;;  %290 = vmatpush1.bf16.msra.mxu1 %v303_v9 }
  0x1b   :  { %164 = vmatprep.subr.bf16.mxu0 %v315_v0  ;;  %279 = vmatprep.subr.bf16.mxu1 %v315_v0 }
  0x1e   :  { %165 = vmatpush1.bf16.msra.mxu0 %v304_v10  ;;  %291 = vmatpush1.bf16.msra.mxu1 %v304_v10 }
  0x1f   :  { %166 = vmatprep.subr.bf16.mxu0 %v315_v0  ;;  %280 = vmatprep.subr.bf16.mxu1 %v315_v0 }
  0x22   :  { %167 = vmatpush1.bf16.msra.mxu0 %v305_v11  ;;  %292 = vmatpush1.bf16.msra.mxu1 %v305_v11 }
  0x23   :  { %168 = vmatprep.subr.bf16.mxu0 %v315_v0  ;;  %281 = vmatprep.subr.bf16.mxu1 %v315_v0 }
  0x26   :  { %169 = vmatpush1.bf16.msra.mxu0 %v306_v12  ;;  %293 = vmatpush1.bf16.msra.mxu1 %v306_v12 }
  0x27   :  { %170 = vmatprep.subr.bf16.mxu0 %v315_v0  ;;  %282 = vmatprep.subr.bf16.mxu1 %v315_v0 }
  0x2a   :  { %171 = vmatpush1.bf16.msra.mxu0 %v307_v13  ;;  %294 = vmatpush1.bf16.msra.mxu1 %v307_v13 }
  0x2b   :  { %172 = vmatprep.subr.bf16.mxu0 %v315_v0  ;;  %283 = vmatprep.subr.bf16.mxu1 %v315_v0 }
  0x2e   :  { %173 = vmatpush1.bf16.msra.mxu0 %v308_v14  ;;  %295 = vmatpush1.bf16.msra.mxu1 %v308_v14 }
  0x31   :  { %183 = vmatmul.mubr.bf16.vlgmr.msra.gmra.mrb[0].mxu0 %v309_v15  ;;  %191 = vmatmul.mubr.bf16.vlgmr.msra.gmra.mrb[0].mxu1 %v312_v16 }
 0x104   :  { %v184_v22 = vpop.f32.mrb[0].mxu0  ;;  %v192_v23 = vpop.f32.mrb[0].mxu1 }
 0x105   :  { %v185_v24 = vadd.f32 %v236_v19, %v184_v22  ;;  %v193_v25 = vadd.f32 %v236_v19, %v192_v23  ;;  %v186_v26 = vpop.f32.mrb[1].mxu0  ;;  %v194_v27 = vpop.f32.mrb[1].mxu1 }
 0x106   :  { %v187_v30 = vpop.f32.mrb[2].mxu0  ;;  %v195_v31 = vpop.f32.mrb[2].mxu1 }
 0x107   :  { %v207_v32 = vadd.f32 %v265_v20, %v185_v24  ;;  %v209_v33 = vadd.f32 %v269_v21, %v193_v25  ;;  %v188_v34 = vadd.f32 %v236_v19, %v187_v30  ;;  %v196_v35 = vadd.f32 %v236_v19, %v195_v31  ;;  %v189_v36 = vpop.f32.mrb[3].mxu0  ;;  %v197_v37 = vpop.f32.mrb[3].mxu1 }
 0x109   :  { %v259_v38 = vpack.c.bf16 %v207_v32, %v207_v32  ;;  %v261_v39 = vpack.c.bf16 %v209_v33, %v209_v33  ;;  %v208_v40 = vadd.f32 %v266_v28, %v188_v34  ;;  %v210_v41 = vadd.f32 %v270_v29, %v196_v35 }
 0x10b   :  { %228 = vst.msk [vmem:[%s438_s4] sm:$0xf] %vm227_vm1, %v259_v38  ;;  %230 = vst.msk [vmem:[%s438_s4 + $0x8] sm:$0xf] %vm227_vm1, %v261_v39  ;;  %v260_v42 = vpack.c.bf16 %v208_v40, %v208_v40  ;;  %v262_v43 = vpack.c.bf16 %v210_v41, %v210_v41 }
 0x10d   :  { %229 = vst.msk [vmem:[%s438_s4 + $0x4] sm:$0xf] %vm227_vm1, %v260_v42  ;;  %231 = vst.msk [vmem:[%s438_s4 + $0xc] sm:$0xf] %vm227_vm1, %v262_v43 }

// kernel: age_gender_forward.47
= control target key start
LH: loop header
LB: loop body
LE: loop exit
PB: predicated region body
PF: predicated region fallthrough
CT: control target
= control target key end

     0   :  { %v277_v0 = vmov 0.0   ;;  %vm278_vm0 = vmmov 0   ;;  %v279_v3 = vmov 0   ;;  %vm113_vm1 = vcmask 523264   ;;  %s348_s1 = inlined_call_operand.vmem [shape: bf16[64,384], index: 1, kind: input, shape index: {}]   ;;  %s349_s0 = inlined_call_operand.vmem [shape: bf16[8,64], index: 0, kind: input, shape index: {}]   ;;  %s350_s2 = inlined_call_operand.vmem [shape: f32[1,384], index: 2, kind: input, shape index: {}]   ;;  %s351_s3 = inlined_call_operand.vmem [shape: bf16[8,384], index: 3, kind: output, shape index: {}]  }
   0x1   :  { %246 = vmatprep.subr.bf16.mxu1 %v277_v0  ;;  %v261_v1 = vld [vmem:[%s348_s1 + $0x4] ss:$12 sps:$4 sm:$0xff]   ;;  %254 = vmatprep.mubr.msk.bf16.mxu1 %vm278_vm0, %v277_v0  ;;  %v263_v2 = vld [vmem:[%s348_s1 + $0x8] ss:$12 sps:$4 sm:$0xff]   ;;  %v264_v4 = vld [vmem:[%s348_s1] ss:$12 sps:$4 sm:$0xff]   ;;  %v34_v15 = vlaneseq }
   0x2   :  { %149 = vmatprep.mubr.bf16.mxu0 %v279_v3  ;;  %117 = vmatprep.subr.bf16.mxu0 %v261_v1  ;;  %v265_v5 = vld [vmem:[%s348_s1 + $0x1c] ss:$12 sps:$4 sm:$0xff]   ;;  %v267_v6 = vld [vmem:[%s348_s1 + $0x20] ss:$12 sps:$4 sm:$0xff]   ;;  %v268_v7 = vld [vmem:[%s348_s1 + $0x18] ss:$12 sps:$4 sm:$0xff]  }
   0x3   :  { %247 = vmatpush3.bf16.msra.mxu1 %v263_v2  ;;  %118 = vmatpush1.bf16.msra.mxu0 %v264_v4  ;;  %v269_v8 = vld [vmem:[%s348_s1 + $0x34] ss:$12 sps:$4 sm:$0xff]   ;;  %v271_v9 = vld [vmem:[%s348_s1 + $0x38] ss:$12 sps:$4 sm:$0xff]   ;;  %v272_v10 = vld [vmem:[%s348_s1 + $0x30] ss:$12 sps:$4 sm:$0xff]  }
   0x4   :  { %248 = vmatprep.subr.bf16.mxu1 %v277_v0  ;;  %119 = vmatprep.subr.bf16.mxu0 %v265_v5  ;;  %v273_v11 = vld [vmem:[%s348_s1 + $0x4c] ss:$12 sps:$4 sm:$0xff]   ;;  %v275_v12 = vld [vmem:[%s348_s1 + $0x50] ss:$12 sps:$4 sm:$0xff]   ;;  %v276_v13 = vld [vmem:[%s348_s1 + $0x48] ss:$12 sps:$4 sm:$0xff]  }
   0x5   :  { %v15_v14 = vld [vmem:[%s349_s0] sm:$0xf]  ;;  %v35_v16 = vshrl.u32 %v34_v15, 7 }
   0x6   :  { %v32_v18 = vld [vmem:[%s350_s2] sm:$0x7] }
   0x7   :  { %249 = vmatpush3.bf16.msra.mxu1 %v267_v6  ;;  %120 = vmatpush1.bf16.msra.mxu0 %v268_v7  ;;  %v44_v17 = vsub.s32 2, %v35_v16  ;;  %v36_v19 = vsub.s32 0, %v35_v16  ;;  %v40_v20 = vsub.s32 1, %v35_v16 }
   0x8   :  { %250 = vmatprep.subr.bf16.mxu1 %v277_v0  ;;  %121 = vmatprep.subr.bf16.mxu0 %v269_v8 }
   0x9   :  { %v45_v21 = vrot.slane %v32_v18, %v44_v17  ;;  %v37_v22 = vrot.slane %v32_v18, %v36_v19  ;;  %v41_v23 = vrot.slane %v32_v18, %v40_v20 }
   0xb   :  { %251 = vmatpush3.bf16.msra.mxu1 %v271_v9  ;;  %122 = vmatpush1.bf16.msra.mxu0 %v272_v10 }
   0xc   :  { %252 = vmatprep.subr.bf16.mxu1 %v277_v0  ;;  %123 = vmatprep.subr.bf16.mxu0 %v273_v11 }
   0xf   :  { %253 = vmatpush3.bf16.msra.mxu1 %v275_v12  ;;  %124 = vmatpush1.bf16.msra.mxu0 %v276_v13 }
  0x12   :  { %255 = vmatmul.mubr.msk.bf16.vlgmr.msra.gmra.mrb[0].mxu1 %vm113_vm1, %v15_v14  ;;  %235 = vmatmul.mubr.msk.bf16.vlgmr.msra.gmra.mrb[0].mxu0 %vm113_vm1, %v15_v14 }
  0xe5   :  { %v192_v24 = vpop.f32.mrb[0].mxu1  ;;  %v151_v26 = vpop.f32.mrb[0].mxu0 }
  0xe6   :  { %v193_v25 = vadd.f32 %v192_v24, %v45_v21  ;;  %v256_v27 = vpop.f32.mrb[1].mxu1  ;;  %v152_v28 = vadd.f32 %v151_v26, %v37_v22  ;;  %v153_v29 = vpop.f32.mrb[1].mxu0 }
  0xe7   :  { %v195_v30 = vpop.f32.mrb[2].mxu1  ;;  %v154_v32 = vadd.f32 %v153_v29, %v41_v23  ;;  %v155_v33 = vpop.f32.mrb[2].mxu0 }
  0xe8   :  { %v200_v31 = vmax.f32 %v193_v25, 0.0  ;;  %v257_v34 = vpop.f32.mrb[3].mxu1  ;;  %v198_v35 = vmax.f32 %v152_v28, 0.0  ;;  %v156_v36 = vpop.f32.mrb[3].mxu0 }
  0xe9   :  { %v199_v38 = vmax.f32 %v154_v32, 0.0 }
  0xea   :  { %v203_v37 = vmin.f32 %v200_v31, 6.0  ;;  %v201_v39 = vmin.f32 %v198_v35, 6.0 }
  0xeb   :  { %v202_v41 = vmin.f32 %v199_v38, 6.0 }
  0xec   :  { %v240_v40 = vpack.c.bf16 %v203_v37, %v203_v37 }
  0xed   :  { %v239_v42 = vpack.c.bf16 %v202_v41, %v201_v39 }
  0xee   :  { %218 = vst [vmem:[%s351_s3 + $0x8] sm:$0xf] %v240_v40 }
  0xef   :  { %217 = vst [vmem:[%s351_s3] sm:$0xff] %v239_v42 }

// kernel: age_gender_forward.46
= control target key start
LH: loop header
LB: loop body
LE: loop exit
PB: predicated region body
PF: predicated region fallthrough
CT: control target
= control target key end

     0   :  { %v207_v0 = vmov 0   ;;  %vm125_vm0 = vcmask 523264   ;;  %vm170_vm1 = vcmask 519168   ;;  %s273_s1 = inlined_call_operand.vmem [shape: bf16[192,64], index: 1, kind: input, shape index: {}]   ;;  %s274_s0 = inlined_call_operand.vmem [shape: bf16[8,192], index: 0, kind: input, shape index: {}]   ;;  %s275_s2 = inlined_call_operand.vmem [shape: f32[1,64], index: 2, kind: input, shape index: {}]   ;;  %s276_s3 = inlined_call_operand.vmem [shape: bf16[8,64], index: 3, kind: output, shape index: {}]  }
   0x1   :  { %129 = vmatprep.subr.bf16.mxu0 %v207_v0  ;;  %v193_v1 = vld [vmem:[%s273_s1] sm:$0xff]   ;;  %v194_v2 = vld [vmem:[%s273_s1 + $0x8] sm:$0xff]   ;;  %v195_v3 = vld [vmem:[%s273_s1 + $0x10] sm:$0xff]  }
   0x2   :  { %130 = vmatpush1.bf16.msra.mxu0 %v193_v1  ;;  %v196_v4 = vld [vmem:[%s273_s1 + $0x18] sm:$0xff]   ;;  %v15_v5 = vld [vmem:[%s274_s0] sm:$0xff]  ;;  %v198_v8 = vld [vmem:[%s273_s1 + $0x28] sm:$0xff]  }
   0x3   :  { %131 = vmatprep.subr.bf16.mxu0 %v207_v0  ;;  %v178_v6 = vcombine.high %v15_v5, %v15_v5  ;;  %v197_v7 = vld [vmem:[%s273_s1 + $0x20] sm:$0xff]   ;;  %v199_v9 = vld [vmem:[%s273_s1 + $0x30] sm:$0xff]   ;;  %v200_v10 = vld [vmem:[%s273_s1 + $0x38] sm:$0xff]   ;;  %v177_v15 = vcombine.low %v15_v5, %v15_v5 }
   0x4   :  { %v201_v11 = vld [vmem:[%s273_s1 + $0x40] sm:$0xff]   ;;  %v202_v12 = vld [vmem:[%s273_s1 + $0x48] sm:$0xff]   ;;  %v203_v13 = vld [vmem:[%s273_s1 + $0x50] sm:$0xff]  }
   0x5   :  { %191 = vmatprep.mubr.msk.bf16.mxu0 %vm125_vm0, %v178_v6  ;;  %v204_v14 = vld [vmem:[%s273_s1 + $0x58] sm:$0xff]   ;;  %v176_v16 = vld [vmem:[%s275_s2] ss:$0 sm:$0xff] }
   0x6   :  { %132 = vmatpush1.bf16.msra.mxu0 %v194_v2 }
   0x7   :  { %133 = vmatprep.subr.bf16.mxu0 %v207_v0 }
   0xa   :  { %134 = vmatpush1.bf16.msra.mxu0 %v195_v3 }
   0xb   :  { %135 = vmatprep.subr.bf16.mxu0 %v207_v0 }
   0xe   :  { %136 = vmatpush1.bf16.msra.mxu0 %v196_v4 }
   0xf   :  { %137 = vmatprep.subr.bf16.mxu0 %v207_v0 }
  0x12   :  { %138 = vmatpush1.bf16.msra.mxu0 %v197_v7 }
  0x13   :  { %139 = vmatprep.subr.bf16.mxu0 %v207_v0 }
  0x16   :  { %140 = vmatpush1.bf16.msra.mxu0 %v198_v8 }
  0x17   :  { %141 = vmatprep.subr.bf16.mxu0 %v207_v0 }
  0x1a   :  { %142 = vmatpush1.bf16.msra.mxu0 %v199_v9 }
  0x1b   :  { %143 = vmatprep.subr.bf16.mxu0 %v207_v0 }
  0x1e   :  { %144 = vmatpush1.bf16.msra.mxu0 %v200_v10 }
  0x1f   :  { %145 = vmatprep.subr.bf16.mxu0 %v207_v0 }
  0x22   :  { %146 = vmatpush1.bf16.msra.mxu0 %v201_v11 }
  0x23   :  { %147 = vmatprep.subr.bf16.mxu0 %v207_v0 }
  0x26   :  { %148 = vmatpush1.bf16.msra.mxu0 %v202_v12 }
  0x27   :  { %149 = vmatprep.subr.bf16.mxu0 %v207_v0 }
  0x2a   :  { %150 = vmatpush1.bf16.msra.mxu0 %v203_v13 }
  0x2b   :  { %151 = vmatprep.subr.bf16.mxu0 %v207_v0 }
  0x2e   :  { %152 = vmatpush1.bf16.msra.mxu0 %v204_v14 }
  0x31   :  { %162 = vmatmul.mubr.bf16.vlgmr.msra.gmra.mrb[0].mxu0 %v177_v15 }
 0x104   :  { %v163_v17 = vpop.f32.mrb[0].mxu0 }
 0x105   :  { %v164_v18 = vadd.f32 %v176_v16, %v163_v17  ;;  %v165_v19 = vpop.f32.mrb[1].mxu0 }
 0x106   :  { %v166_v20 = vpop.f32.mrb[2].mxu0 }
 0x107   :  { %v169_v21 = vpack.c.bf16 %v164_v18, %v164_v18  ;;  %v167_v22 = vpop.f32.mrb[3].mxu0 }
 0x109   :  { %171 = vst.msk [vmem:[%s276_s3] sm:$0xf] %vm170_vm1, %v169_v21 }

// kernel: age_gender_forward.48
= control target key start
LH: loop header
LB: loop body
LE: loop exit
PB: predicated region body
PF: predicated region fallthrough
CT: control target
= control target key end

     0   :  { %v428_v1 = vmov 0.0   ;;  %vm429_vm0 = vmmov 0   ;;  %vm314_vm1 = vcmask 519168   ;;  %s542_s1 = inlined_call_operand.vmem [shape: bf16[384,64], index: 1, kind: input, shape index: {}]   ;;  %s543_s0 = inlined_call_operand.vmem [shape: bf16[8,384], index: 0, kind: input, shape index: {}]   ;;  %s544_s2 = inlined_call_operand.vmem [shape: f32[1,64], index: 2, kind: input, shape index: {}]   ;;  %s545_s3 = inlined_call_operand.vmem [shape: bf16[8,64], index: 3, kind: input, shape index: {}]   ;;  %s546_s4 = inlined_call_operand.vmem [shape: bf16[8,64], index: 4, kind: output, shape index: {}]  }
   0x1   :  { %v401_v0 = vld [vmem:[%s542_s1 + $0x40] sm:$0xff]   ;;  %379 = vmatprep.subr.bf16.mxu1 %v428_v1  ;;  %395 = vmatprep.mubr.msk.bf16.mxu1 %vm429_vm0, %v428_v1  ;;  %v404_v4 = vld [vmem:[%s542_s1 + $0x48] sm:$0xff]   ;;  %v407_v7 = vld [vmem:[%s542_s1 + $0x50] sm:$0xff]  }
   0x2   :  { %v402_v2 = vld [vmem:[%s542_s1] sm:$0xff]   ;;  %348 = vmatprep.subr.bf16.mxu0 %v401_v0  ;;  %v405_v5 = vld [vmem:[%s542_s1 + $0x8] sm:$0xff]   ;;  %v408_v8 = vld [vmem:[%s542_s1 + $0x10] sm:$0xff]  }
   0x3   :  { %v403_v3 = vld [vmem:[%s542_s1 + $0x80] sm:$0xff]   ;;  %349 = vmatpush3.bf16.msra.mxu0 %v402_v2  ;;  %v406_v6 = vld [vmem:[%s542_s1 + $0x88] sm:$0xff]   ;;  %v409_v9 = vld [vmem:[%s542_s1 + $0x90] sm:$0xff]  }
   0x4   :  { %380 = vmatpush3.bf16.msra.mxu1 %v403_v3  ;;  %350 = vmatprep.subr.bf16.mxu0 %v404_v4  ;;  %v410_v10 = vld [vmem:[%s542_s1 + $0x58] sm:$0xff]   ;;  %v413_v13 = vld [vmem:[%s542_s1 + $0x60] sm:$0xff]   ;;  %v416_v16 = vld [vmem:[%s542_s1 + $0x68] sm:$0xff]  }
   0x5   :  { %381 = vmatprep.subr.bf16.mxu1 %v428_v1  ;;  %v411_v11 = vld [vmem:[%s542_s1 + $0x18] sm:$0xff]   ;;  %v414_v14 = vld [vmem:[%s542_s1 + $0x20] sm:$0xff]   ;;  %v417_v17 = vld [vmem:[%s542_s1 + $0x28] sm:$0xff]  }
   0x6   :  { %v412_v12 = vld [vmem:[%s542_s1 + $0x98] sm:$0xff]   ;;  %v415_v15 = vld [vmem:[%s542_s1 + $0xa0] sm:$0xff]   ;;  %v418_v18 = vld [vmem:[%s542_s1 + $0xa8] sm:$0xff]  }
   0x7   :  { %351 = vmatpush3.bf16.msra.mxu0 %v405_v5  ;;  %v419_v19 = vld [vmem:[%s542_s1 + $0x70] sm:$0xff]   ;;  %v18_v22 = vld [vmem:[%s543_s0] sm:$0xff]  ;;  %v422_v23 = vld [vmem:[%s542_s1 + $0x78] sm:$0xff]  }
   0x8   :  { %382 = vmatpush3.bf16.msra.mxu1 %v406_v6  ;;  %352 = vmatprep.subr.bf16.mxu0 %v407_v7  ;;  %v420_v20 = vld [vmem:[%s542_s1 + $0x30] sm:$0xff]   ;;  %v322_v24 = vcombine.high %v18_v22, %v18_v22  ;;  %v423_v25 = vld [vmem:[%s542_s1 + $0x38] sm:$0xff]   ;;  %v321_v27 = vcombine.low %v18_v22, %v18_v22  ;;  %v426_v28 = vld [vmem:[%s543_s0 + $0x8] ss:$0 sps:$4 sm:$0xff]  }
   0x9   :  { %383 = vmatprep.subr.bf16.mxu1 %v428_v1  ;;  %v421_v21 = vld [vmem:[%s542_s1 + $0xb0] sm:$0xff]   ;;  %v427_v26 = vld [vmem:[%s542_s1 + $0xb8] sm:$0xff]   ;;  %v320_v31 = vld [vmem:[%s544_s2] ss:$0 sm:$0xff] }
   0xa   :  { %262 = vmatprep.mubr.bf16.mxu0 %v322_v24  ;;  %v310_v33 = vld [vmem:[%s545_s3] sm:$0xf] }
   0xb   :  { %353 = vmatpush3.bf16.msra.mxu0 %v408_v8  ;;  %v311_v40 = vunpack.c.l.bf16 %v310_v33 }
   0xc   :  { %384 = vmatpush3.bf16.msra.mxu1 %v409_v9  ;;  %354 = vmatprep.subr.bf16.mxu0 %v410_v10 }
   0xd   :  { %385 = vmatprep.subr.bf16.mxu1 %v428_v1 }
   0xf   :  { %355 = vmatpush3.bf16.msra.mxu0 %v411_v11 }
  0x10   :  { %386 = vmatpush3.bf16.msra.mxu1 %v412_v12  ;;  %356 = vmatprep.subr.bf16.mxu0 %v413_v13 }
  0x11   :  { %387 = vmatprep.subr.bf16.mxu1 %v428_v1 }
  0x13   :  { %357 = vmatpush3.bf16.msra.mxu0 %v414_v14 }
  0x14   :  { %388 = vmatpush3.bf16.msra.mxu1 %v415_v15  ;;  %358 = vmatprep.subr.bf16.mxu0 %v416_v16 }
  0x15   :  { %389 = vmatprep.subr.bf16.mxu1 %v428_v1 }
  0x17   :  { %359 = vmatpush3.bf16.msra.mxu0 %v417_v17 }
  0x18   :  { %390 = vmatpush3.bf16.msra.mxu1 %v418_v18  ;;  %360 = vmatprep.subr.bf16.mxu0 %v419_v19 }
  0x19   :  { %391 = vmatprep.subr.bf16.mxu1 %v428_v1 }
  0x1b   :  { %361 = vmatpush3.bf16.msra.mxu0 %v420_v20 }
  0x1c   :  { %392 = vmatpush3.bf16.msra.mxu1 %v421_v21  ;;  %362 = vmatprep.subr.bf16.mxu0 %v422_v23 }
  0x1d   :  { %393 = vmatprep.subr.bf16.mxu1 %v428_v1 }
  0x1f   :  { %363 = vmatpush3.bf16.msra.mxu0 %v423_v25 }
  0x20   :  { %394 = vmatpush3.bf16.msra.mxu1 %v427_v26 }
  0x22   :  { %263 = vmatmul.mubr.bf16.vlgmr.msra.gmra.mrb[0].mxu0 %v321_v27 }
  0x23   :  { %396 = vmatmul.mubr.bf16.vlgmr.msra.gmra.mrb[0].mxu1 %v426_v28 }
  0xf5   :  { %v364_v29 = vpop.f32.mrb[0].mxu0 }
  0xf6   :  { %v365_v30 = vpop.f32.mrb[1].mxu0  ;;  %v304_v32 = vpop.f32.mrb[0].mxu1 }
  0xf7   :  { %v366_v34 = vadd.f32 %v365_v30, %v364_v29  ;;  %v367_v35 = vpop.f32.mrb[2].mxu0  ;;  %v397_v36 = vpop.f32.mrb[1].mxu1 }
  0xf8   :  { %v368_v37 = vpop.f32.mrb[3].mxu0  ;;  %v307_v38 = vpop.f32.mrb[2].mxu1 }
  0xf9   :  { %v265_v39 = vadd.f32 %v366_v34, %v320_v31  ;;  %v398_v41 = vpop.f32.mrb[3].mxu1 }
  0xfb   :  { %v305_v42 = vadd.f32 %v304_v32, %v265_v39 }
  0xfd   :  { %v312_v43 = vadd.f32 %v311_v40, %v305_v42 }
  0xff   :  { %v313_v44 = vpack.c.bf16 %v312_v43, %v312_v43 }
 0x101   :  { %315 = vst.msk [vmem:[%s546_s4] sm:$0xf] %vm314_vm1, %v313_v44 }

// kernel: age_gender_forward.55
= control target key start
LH: loop header
LB: loop body
LE: loop exit
PB: predicated region body
PF: predicated region fallthrough
CT: control target
= control target key end

     0   :  { %v507_v1 = vmov 0   ;;  %vm235_vm0 = vcmask 785408   ;;  %v508_v25 = vmov 0.0   ;;  %vm509_vm1 = vmmov 0   ;;  %s638_s1 = inlined_call_operand.vmem [shape: bf16[96,576], index: 1, kind: input, shape index: {}]   ;;  %s639_s0 = inlined_call_operand.vmem [shape: bf16[8,96], index: 0, kind: input, shape index: {}]   ;;  %s640_s2 = inlined_call_operand.vmem [shape: f32[1,576], index: 2, kind: input, shape index: {}]   ;;  %s641_s3 = inlined_call_operand.vmem [shape: bf16[8,576], index: 3, kind: output, shape index: {}]  }
   0x1   :  { %v465_v0 = vld [vmem:[%s638_s1 + $0x4] ss:$20 sps:$4 sm:$0xff]   ;;  %271 = vmatprep.mubr.bf16.mxu0 %v507_v1  ;;  %312 = vmatprep.mubr.bf16.mxu1 %v507_v1  ;;  %v467_v2 = vld [vmem:[%s638_s1] ss:$20 sps:$4 sm:$0xff]   ;;  %v470_v4 = vld [vmem:[%s638_s1 + $0x28] ss:$20 sps:$4 sm:$0xff]   ;;  %v54_v33 = vlaneseq }
   0x2   :  { %239 = vmatprep.subr.bf16.mxu0 %v465_v0  ;;  %v468_v3 = vld [vmem:[%s638_s1 + $0x2c] ss:$20 sps:$4 sm:$0xff]   ;;  %v471_v5 = vld [vmem:[%s638_s1 + $0x54] ss:$20 sps:$4 sm:$0xff]   ;;  %v473_v6 = vld [vmem:[%s638_s1 + $0x50] ss:$20 sps:$4 sm:$0xff]  }
   0x3   :  { %240 = vmatpush1.bf16.msra.mxu0 %v467_v2  ;;  %v474_v7 = vld [vmem:[%s638_s1 + $0x7c] ss:$20 sps:$4 sm:$0xff]   ;;  %v482_v8 = vld [vmem:[%s638_s1 + $0xc] ss:$20 sps:$4 sm:$0xff]   ;;  %v477_v11 = vld [vmem:[%s638_s1 + $0xa4] ss:$20 sps:$4 sm:$0xff]  }
   0x4   :  { %241 = vmatprep.subr.bf16.mxu0 %v468_v3  ;;  %v476_v9 = vld [vmem:[%s638_s1 + $0x78] ss:$20 sps:$4 sm:$0xff]   ;;  %v485_v10 = vld [vmem:[%s638_s1 + $0x8] ss:$20 sps:$4 sm:$0xff]   ;;  %280 = vmatprep.subr.bf16.mxu1 %v482_v8  ;;  %v488_v13 = vld [vmem:[%s638_s1 + $0x30] ss:$20 sps:$4 sm:$0xff]  }
   0x5   :  { %v486_v12 = vld [vmem:[%s638_s1 + $0x34] ss:$20 sps:$4 sm:$0xff]   ;;  %281 = vmatpush1.bf16.msra.mxu1 %v485_v10  ;;  %v490_v14 = vld [vmem:[%s638_s1 + $0x5c] ss:$20 sps:$4 sm:$0xff]   ;;  %v480_v16 = vld [vmem:[%s638_s1 + $0xcc] ss:$20 sps:$4 sm:$0xff]  }
   0x6   :  { %282 = vmatprep.subr.bf16.mxu1 %v486_v12  ;;  %v479_v15 = vld [vmem:[%s638_s1 + $0xa0] ss:$20 sps:$4 sm:$0xff]   ;;  %v492_v17 = vld [vmem:[%s638_s1 + $0x58] ss:$20 sps:$4 sm:$0xff]   ;;  %v484_v19 = vld [vmem:[%s638_s1 + $0xc8] ss:$20 sps:$4 sm:$0xff]  }
   0x7   :  { %242 = vmatpush1.bf16.msra.mxu0 %v470_v4  ;;  %v494_v18 = vld [vmem:[%s638_s1 + $0x84] ss:$20 sps:$4 sm:$0xff]   ;;  %v496_v20 = vld [vmem:[%s638_s1 + $0x80] ss:$20 sps:$4 sm:$0xff]   ;;  %v500_v24 = vld [vmem:[%s638_s1 + $0xa8] ss:$20 sps:$4 sm:$0xff]  }
   0x8   :  { %243 = vmatprep.subr.bf16.mxu0 %v471_v5  ;;  %v498_v21 = vld [vmem:[%s638_s1 + $0xac] ss:$20 sps:$4 sm:$0xff]   ;;  %v489_v23 = vld [vmem:[%s638_s1 + $0x10] ss:$20 sps:$4 sm:$0xff]   ;;  %v502_v26 = vld [vmem:[%s638_s1 + $0xd4] ss:$20 sps:$4 sm:$0xff]  }
   0x9   :  { %283 = vmatpush1.bf16.msra.mxu1 %v488_v13  ;;  %v15_v22 = vld [vmem:[%s639_s0] sm:$0xf]  ;;  %v493_v27 = vld [vmem:[%s638_s1 + $0x38] ss:$20 sps:$4 sm:$0xff]   ;;  %v504_v28 = vld [vmem:[%s638_s1 + $0xd0] ss:$20 sps:$4 sm:$0xff]  }
   0xa   :  { %284 = vmatprep.subr.bf16.mxu1 %v490_v14  ;;  %v497_v29 = vld [vmem:[%s638_s1 + $0x60] ss:$20 sps:$4 sm:$0xff]   ;;  %v501_v30 = vld [vmem:[%s638_s1 + $0x88] ss:$20 sps:$4 sm:$0xff]   ;;  %v505_v31 = vld [vmem:[%s638_s1 + $0xb0] ss:$20 sps:$4 sm:$0xff]  }
   0xb   :  { %244 = vmatpush1.bf16.msra.mxu0 %v473_v6  ;;  %v506_v32 = vld [vmem:[%s638_s1 + $0xd8] ss:$20 sps:$4 sm:$0xff]   ;;  %v55_v34 = vshrl.u32 %v54_v33, 7  ;;  %v52_v36 = vld [vmem:[%s640_s2] sm:$0x1f]  ;;  %vm394_vm2 = vcmask 519168  }
   0xc   :  { %245 = vmatprep.subr.bf16.mxu0 %v474_v7 }
   0xd   :  { %285 = vmatpush1.bf16.msra.mxu1 %v492_v17  ;;  %v56_v35 = vsub.s32 0, %v55_v34  ;;  %v60_v37 = vsub.s32 1, %v55_v34  ;;  %v64_v43 = vsub.s32 2, %v55_v34  ;;  %v68_v46 = vsub.s32 3, %v55_v34 }
   0xe   :  { %286 = vmatprep.subr.bf16.mxu1 %v494_v18  ;;  %v72_v2 = vsub.s32 4, %v55_v34 }
   0xf   :  { %246 = vmatpush1.bf16.msra.mxu0 %v476_v9  ;;  %v57_v38 = vrot.slane %v52_v36, %v56_v35  ;;  %v61_v39 = vrot.slane %v52_v36, %v60_v37  ;;  %v65_v51 = vrot.slane %v52_v36, %v64_v43  ;;  %v69_v53 = vrot.slane %v52_v36, %v68_v46 }
  0x10   :  { %247 = vmatprep.subr.bf16.mxu0 %v477_v11  ;;  %v73_v3 = vrot.slane %v52_v36, %v72_v2 }
  0x11   :  { %287 = vmatpush1.bf16.msra.mxu1 %v496_v20 }
  0x12   :  { %288 = vmatprep.subr.bf16.mxu1 %v498_v21 }
  0x13   :  { %248 = vmatpush1.bf16.msra.mxu0 %v479_v15 }
  0x14   :  { %249 = vmatprep.subr.bf16.mxu0 %v480_v16 }
  0x15   :  { %289 = vmatpush1.bf16.msra.mxu1 %v500_v24 }
  0x16   :  { %290 = vmatprep.subr.bf16.mxu1 %v502_v26 }
  0x17   :  { %250 = vmatpush1.bf16.msra.mxu0 %v484_v19 }
  0x18   :  { %446 = vmatprep.subr.bf16.mxu0 %v508_v25 }
  0x19   :  { %291 = vmatpush1.bf16.msra.mxu1 %v504_v28 }
  0x1a   :  { %430 = vmatmul.mubr.msk.bf16.vlgmr.msra.gmra.mrb[0].mxu0 %vm235_vm0, %v15_v22 }
  0x1b   :  { %447 = vmatpush3.bf16.msra.mxu0 %v489_v23  ;;  %458 = vmatprep.mubr.msk.bf16.mxu0 %vm509_vm1, %v508_v25 }
  0x1c   :  { %448 = vmatprep.subr.bf16.mxu0 %v508_v25  ;;  %431 = vmatmul.mubr.msk.bf16.vlgmr.msra.gmra.mrb[0].mxu1 %vm235_vm0, %v15_v22 }
  0x1f   :  { %449 = vmatpush3.bf16.msra.mxu0 %v493_v27 }
  0x20   :  { %450 = vmatprep.subr.bf16.mxu0 %v508_v25 }
  0x23   :  { %451 = vmatpush3.bf16.msra.mxu0 %v497_v29 }
  0x24   :  { %452 = vmatprep.subr.bf16.mxu0 %v508_v25 }
  0x27   :  { %453 = vmatpush3.bf16.msra.mxu0 %v501_v30 }
  0x28   :  { %454 = vmatprep.subr.bf16.mxu0 %v508_v25 }
  0x2b   :  { %455 = vmatpush3.bf16.msra.mxu0 %v505_v31 }
  0x2c   :  { %456 = vmatprep.subr.bf16.mxu0 %v508_v25 }
  0x2f   :  { %457 = vmatpush3.bf16.msra.mxu0 %v506_v32 }
  0x32   :  { %459 = vmatmul.mubr.msk.bf16.vlgmr.msra.gmra.mrb[4].mxu0 %vm235_vm0, %v15_v22 }
  0xed   :  { %v273_v40 = vpop.f32.mrb[0].mxu0 }
  0xee   :  { %v274_v41 = vadd.f32 %v273_v40, %v57_v38  ;;  %v275_v42 = vpop.f32.mrb[1].mxu0 }
  0xef   :  { %v276_v44 = vadd.f32 %v275_v42, %v61_v39  ;;  %v277_v45 = vpop.f32.mrb[2].mxu0  ;;  %v314_v55 = vpop.f32.mrb[0].mxu1 }
  0xf0   :  { %v361_v47 = vmax.f32 %v274_v41, 0.0  ;;  %v278_v48 = vpop.f32.mrb[3].mxu0  ;;  %v315_v56 = vadd.f32 %v314_v55, %v65_v51  ;;  %v316_v57 = vpop.f32.mrb[1].mxu1 }
  0xf1   :  { %v362_v49 = vmax.f32 %v276_v44, 0.0  ;;  %v317_v58 = vadd.f32 %v316_v57, %v69_v53  ;;  %v318_v59 = vpop.f32.mrb[2].mxu1 }
  0xf2   :  { %v366_v50 = vmin.f32 %v361_v47, 6.0  ;;  %v363_v60 = vmax.f32 %v315_v56, 0.0  ;;  %v319_v61 = vpop.f32.mrb[3].mxu1 }
  0xf3   :  { %v367_v52 = vmin.f32 %v362_v49, 6.0  ;;  %v364_v62 = vmax.f32 %v317_v58, 0.0 }
  0xf4   :  { %v368_v63 = vmin.f32 %v363_v60, 6.0 }
  0xf5   :  { %v436_v54 = vpack.c.bf16 %v367_v52, %v366_v50  ;;  %v369_v0 = vmin.f32 %v364_v62, 6.0 }
  0xf7   :  { %392 = vst [vmem:[%s641_s3] sm:$0xff] %v436_v54  ;;  %v437_v1 = vpack.c.bf16 %v369_v0, %v368_v63 }
  0xf9   :  { %393 = vst [vmem:[%s641_s3 + $0x8] sm:$0xff] %v437_v1 }
 0x105   :  { %v355_v4 = vpop.f32.mrb[4].mxu0 }
 0x106   :  { %v356_v5 = vadd.f32 %v355_v4, %v73_v3  ;;  %v460_v6 = vpop.f32.mrb[5].mxu0 }
 0x107   :  { %v358_v7 = vpop.f32.mrb[6].mxu0 }
 0x108   :  { %v365_v8 = vmax.f32 %v356_v5, 0.0  ;;  %v461_v9 = vpop.f32.mrb[7].mxu0 }
 0x10a   :  { %v370_v10 = vmin.f32 %v365_v8, 6.0 }
 0x10c   :  { %v438_v11 = vpack.c.bf16 %v370_v10, %v370_v10 }
 0x10e   :  { %395 = vst.msk [vmem:[%s641_s3 + $0x10] sm:$0xf] %vm394_vm2, %v438_v11 }

// kernel: age_gender_forward.54
= control target key start
LH: loop header
LB: loop body
LE: loop exit
PB: predicated region body
PF: predicated region fallthrough
CT: control target
= control target key end

     0   :  { %v422_v1 = vmov 0.0   ;;  %vm423_vm0 = vmmov 0   ;;  %vm308_vm1 = vcmask 781312   ;;  %s528_s1 = inlined_call_operand.vmem [shape: bf16[384,96], index: 1, kind: input, shape index: {}]   ;;  %s529_s0 = inlined_call_operand.vmem [shape: bf16[8,384], index: 0, kind: input, shape index: {}]   ;;  %s530_s2 = inlined_call_operand.vmem [shape: f32[1,96], index: 2, kind: input, shape index: {}]   ;;  %s531_s3 = inlined_call_operand.vmem [shape: bf16[8,96], index: 3, kind: output, shape index: {}]  }
   0x1   :  { %v395_v0 = vld [vmem:[%s528_s1 + $0x40] sm:$0xff]   ;;  %373 = vmatprep.subr.bf16.mxu1 %v422_v1  ;;  %389 = vmatprep.mubr.msk.bf16.mxu1 %vm423_vm0, %v422_v1  ;;  %v398_v4 = vld [vmem:[%s528_s1 + $0x48] sm:$0xff]   ;;  %v401_v7 = vld [vmem:[%s528_s1 + $0x50] sm:$0xff]  }
   0x2   :  { %v396_v2 = vld [vmem:[%s528_s1] sm:$0xff]   ;;  %342 = vmatprep.subr.bf16.mxu0 %v395_v0  ;;  %v399_v5 = vld [vmem:[%s528_s1 + $0x8] sm:$0xff]   ;;  %v402_v8 = vld [vmem:[%s528_s1 + $0x10] sm:$0xff]  }
   0x3   :  { %v397_v3 = vld [vmem:[%s528_s1 + $0x80] sm:$0xff]   ;;  %343 = vmatpush3.bf16.msra.mxu0 %v396_v2  ;;  %v400_v6 = vld [vmem:[%s528_s1 + $0x88] sm:$0xff]   ;;  %v403_v9 = vld [vmem:[%s528_s1 + $0x90] sm:$0xff]  }
   0x4   :  { %374 = vmatpush3.bf16.msra.mxu1 %v397_v3  ;;  %344 = vmatprep.subr.bf16.mxu0 %v398_v4  ;;  %v404_v10 = vld [vmem:[%s528_s1 + $0x58] sm:$0xff]   ;;  %v407_v13 = vld [vmem:[%s528_s1 + $0x60] sm:$0xff]   ;;  %v410_v16 = vld [vmem:[%s528_s1 + $0x68] sm:$0xff]  }
   0x5   :  { %375 = vmatprep.subr.bf16.mxu1 %v422_v1  ;;  %v405_v11 = vld [vmem:[%s528_s1 + $0x18] sm:$0xff]   ;;  %v408_v14 = vld [vmem:[%s528_s1 + $0x20] sm:$0xff]   ;;  %v411_v17 = vld [vmem:[%s528_s1 + $0x28] sm:$0xff]  }
   0x6   :  { %v406_v12 = vld [vmem:[%s528_s1 + $0x98] sm:$0xff]   ;;  %v409_v15 = vld [vmem:[%s528_s1 + $0xa0] sm:$0xff]   ;;  %v412_v18 = vld [vmem:[%s528_s1 + $0xa8] sm:$0xff]  }
   0x7   :  { %345 = vmatpush3.bf16.msra.mxu0 %v399_v5  ;;  %v413_v19 = vld [vmem:[%s528_s1 + $0x70] sm:$0xff]   ;;  %v15_v22 = vld [vmem:[%s529_s0] sm:$0xff]  ;;  %v416_v23 = vld [vmem:[%s528_s1 + $0x78] sm:$0xff]  }
   0x8   :  { %376 = vmatpush3.bf16.msra.mxu1 %v400_v6  ;;  %346 = vmatprep.subr.bf16.mxu0 %v401_v7  ;;  %v414_v20 = vld [vmem:[%s528_s1 + $0x30] sm:$0xff]   ;;  %v316_v24 = vcombine.high %v15_v22, %v15_v22  ;;  %v417_v25 = vld [vmem:[%s528_s1 + $0x38] sm:$0xff]   ;;  %v315_v27 = vcombine.low %v15_v22, %v15_v22  ;;  %v420_v28 = vld [vmem:[%s529_s0 + $0x8] ss:$0 sps:$4 sm:$0xff]  }
   0x9   :  { %377 = vmatprep.subr.bf16.mxu1 %v422_v1  ;;  %v415_v21 = vld [vmem:[%s528_s1 + $0xb0] sm:$0xff]   ;;  %v421_v26 = vld [vmem:[%s528_s1 + $0xb8] sm:$0xff]   ;;  %v314_v31 = vld [vmem:[%s530_s2] ss:$0 sm:$0xff] }
   0xa   :  { %259 = vmatprep.mubr.bf16.mxu0 %v316_v24 }
   0xb   :  { %347 = vmatpush3.bf16.msra.mxu0 %v402_v8 }
   0xc   :  { %378 = vmatpush3.bf16.msra.mxu1 %v403_v9  ;;  %348 = vmatprep.subr.bf16.mxu0 %v404_v10 }
   0xd   :  { %379 = vmatprep.subr.bf16.mxu1 %v422_v1 }
   0xf   :  { %349 = vmatpush3.bf16.msra.mxu0 %v405_v11 }
  0x10   :  { %380 = vmatpush3.bf16.msra.mxu1 %v406_v12  ;;  %350 = vmatprep.subr.bf16.mxu0 %v407_v13 }
  0x11   :  { %381 = vmatprep.subr.bf16.mxu1 %v422_v1 }
  0x13   :  { %351 = vmatpush3.bf16.msra.mxu0 %v408_v14 }
  0x14   :  { %382 = vmatpush3.bf16.msra.mxu1 %v409_v15  ;;  %352 = vmatprep.subr.bf16.mxu0 %v410_v16 }
  0x15   :  { %383 = vmatprep.subr.bf16.mxu1 %v422_v1 }
  0x17   :  { %353 = vmatpush3.bf16.msra.mxu0 %v411_v17 }
  0x18   :  { %384 = vmatpush3.bf16.msra.mxu1 %v412_v18  ;;  %354 = vmatprep.subr.bf16.mxu0 %v413_v19 }
  0x19   :  { %385 = vmatprep.subr.bf16.mxu1 %v422_v1 }
  0x1b   :  { %355 = vmatpush3.bf16.msra.mxu0 %v414_v20 }
  0x1c   :  { %386 = vmatpush3.bf16.msra.mxu1 %v415_v21  ;;  %356 = vmatprep.subr.bf16.mxu0 %v416_v23 }
  0x1d   :  { %387 = vmatprep.subr.bf16.mxu1 %v422_v1 }
  0x1f   :  { %357 = vmatpush3.bf16.msra.mxu0 %v417_v25 }
  0x20   :  { %388 = vmatpush3.bf16.msra.mxu1 %v421_v26 }
  0x22   :  { %260 = vmatmul.mubr.bf16.vlgmr.msra.gmra.mrb[0].mxu0 %v315_v27 }
  0x23   :  { %390 = vmatmul.mubr.bf16.vlgmr.msra.gmra.mrb[0].mxu1 %v420_v28 }
  0xf5   :  { %v358_v29 = vpop.f32.mrb[0].mxu0 }
  0xf6   :  { %v359_v30 = vpop.f32.mrb[1].mxu0  ;;  %v301_v32 = vpop.f32.mrb[0].mxu1 }
  0xf7   :  { %v360_v33 = vadd.f32 %v359_v30, %v358_v29  ;;  %v361_v34 = vpop.f32.mrb[2].mxu0  ;;  %v391_v35 = vpop.f32.mrb[1].mxu1 }
  0xf8   :  { %v362_v36 = vpop.f32.mrb[3].mxu0  ;;  %v304_v37 = vpop.f32.mrb[2].mxu1 }
  0xf9   :  { %v262_v38 = vadd.f32 %v360_v33, %v314_v31  ;;  %v392_v39 = vpop.f32.mrb[3].mxu1 }
  0xfb   :  { %v302_v40 = vadd.f32 %v301_v32, %v262_v38 }
  0xfd   :  { %v307_v41 = vpack.c.bf16 %v302_v40, %v302_v40 }
  0xff   :  { %309 = vst.msk [vmem:[%s531_s3] sm:$0xf] %vm308_vm1, %v307_v41 }

// kernel: age_gender_forward.56
= control target key start
LH: loop header
LB: loop body
LE: loop exit
PB: predicated region body
PF: predicated region fallthrough
CT: control target
= control target key end

     0   :  { %v614_v35 = vmov 0.0   ;;  %vm615_vm0 = vmmov 0   ;;  %vm333_vm1 = vcmask 523264   ;;  %vm461_vm2 = vcmask 781312   ;;  %s767_s1 = inlined_call_operand.vmem [shape: bf16[576,96], index: 1, kind: input, shape index: {}]   ;;  %s768_s0 = inlined_call_operand.vmem [shape: bf16[8,576], index: 0, kind: input, shape index: {}]   ;;  %s769_s2 = inlined_call_operand.vmem [shape: f32[1,96], index: 2, kind: input, shape index: {}]   ;;  %s770_s3 = inlined_call_operand.vmem [shape: bf16[8,96], index: 3, kind: input, shape index: {}]   ;;  %s771_s4 = inlined_call_operand.vmem [shape: bf16[8,96], index: 4, kind: output, shape index: {}]  }
   0x1   :  { %v573_v0 = vld [vmem:[%s767_s1 + $0x40] sm:$0xff]   ;;  %v577_v4 = vld [vmem:[%s767_s1 + $0x48] sm:$0xff]   ;;  %v581_v8 = vld [vmem:[%s767_s1 + $0x50] sm:$0xff]  }
   0x2   :  { %v574_v1 = vld [vmem:[%s767_s1] sm:$0xff]   ;;  %510 = vmatprep.subr.bf16.mxu0 %v573_v0  ;;  %v578_v5 = vld [vmem:[%s767_s1 + $0x8] sm:$0xff]   ;;  %v582_v9 = vld [vmem:[%s767_s1 + $0x10] sm:$0xff]  }
   0x3   :  { %v575_v2 = vld [vmem:[%s767_s1 + $0xc0] sm:$0xff]   ;;  %511 = vmatpush3.bf16.msra.mxu0 %v574_v1  ;;  %v579_v6 = vld [vmem:[%s767_s1 + $0xc8] sm:$0xff]   ;;  %v583_v10 = vld [vmem:[%s767_s1 + $0xd0] sm:$0xff]  }
   0x4   :  { %v576_v3 = vld [vmem:[%s767_s1 + $0x80] sm:$0xff]   ;;  %532 = vmatprep.subr.bf16.mxu1 %v575_v2  ;;  %512 = vmatprep.subr.bf16.mxu0 %v577_v4  ;;  %v580_v7 = vld [vmem:[%s767_s1 + $0x88] sm:$0xff]   ;;  %v584_v11 = vld [vmem:[%s767_s1 + $0x90] sm:$0xff]  }
   0x5   :  { %533 = vmatpush3.bf16.msra.mxu1 %v576_v3  ;;  %v585_v12 = vld [vmem:[%s767_s1 + $0x58] sm:$0xff]   ;;  %v589_v16 = vld [vmem:[%s767_s1 + $0x60] sm:$0xff]   ;;  %v593_v20 = vld [vmem:[%s767_s1 + $0x68] sm:$0xff]  }
   0x6   :  { %534 = vmatprep.subr.bf16.mxu1 %v579_v6  ;;  %v586_v13 = vld [vmem:[%s767_s1 + $0x18] sm:$0xff]   ;;  %v590_v17 = vld [vmem:[%s767_s1 + $0x20] sm:$0xff]   ;;  %v594_v21 = vld [vmem:[%s767_s1 + $0x28] sm:$0xff]  }
   0x7   :  { %513 = vmatpush3.bf16.msra.mxu0 %v578_v5  ;;  %v587_v14 = vld [vmem:[%s767_s1 + $0xd8] sm:$0xff]   ;;  %v591_v18 = vld [vmem:[%s767_s1 + $0xe0] sm:$0xff]   ;;  %v595_v22 = vld [vmem:[%s767_s1 + $0xe8] sm:$0xff]  }
   0x8   :  { %514 = vmatprep.subr.bf16.mxu0 %v581_v8  ;;  %v588_v15 = vld [vmem:[%s767_s1 + $0x98] sm:$0xff]   ;;  %v592_v19 = vld [vmem:[%s767_s1 + $0xa0] sm:$0xff]   ;;  %v596_v23 = vld [vmem:[%s767_s1 + $0xa8] sm:$0xff]  }
   0x9   :  { %535 = vmatpush3.bf16.msra.mxu1 %v580_v7  ;;  %v597_v24 = vld [vmem:[%s767_s1 + $0x70] sm:$0xff]   ;;  %v601_v28 = vld [vmem:[%s767_s1 + $0x78] sm:$0xff]   ;;  %v18_v31 = vld [vmem:[%s768_s0] sm:$0xff] }
   0xa   :  { %536 = vmatprep.subr.bf16.mxu1 %v583_v10  ;;  %v598_v25 = vld [vmem:[%s767_s1 + $0x30] sm:$0xff]   ;;  %v602_v29 = vld [vmem:[%s767_s1 + $0x38] sm:$0xff]   ;;  %v468_v32 = vcombine.low %v18_v31, %v18_v31  ;;  %v469_v33 = vcombine.high %v18_v31, %v18_v31  ;;  %v19_v36 = vld [vmem:[%s768_s0 + $0x8] sm:$0xff] }
   0xb   :  { %515 = vmatpush3.bf16.msra.mxu0 %v582_v9  ;;  %v599_v26 = vld [vmem:[%s767_s1 + $0xf0] sm:$0xff]   ;;  %v603_v30 = vld [vmem:[%s767_s1 + $0xf8] sm:$0xff]   ;;  %v470_v37 = vcombine.low %v19_v36, %v19_v36  ;;  %v471_v38 = vcombine.high %v19_v36, %v19_v36  ;;  %v610_v39 = vld [vmem:[%s767_s1 + $0x100] sm:$0xff]  }
   0xc   :  { %516 = vmatprep.subr.bf16.mxu0 %v585_v12  ;;  %v600_v27 = vld [vmem:[%s767_s1 + $0xb0] sm:$0xff]   ;;  %v607_v34 = vld [vmem:[%s767_s1 + $0xb8] sm:$0xff]   ;;  %369 = vmatprep.mubr.bf16.mxu0 %v469_v33  ;;  %v611_v40 = vld [vmem:[%s767_s1 + $0x108] sm:$0xff]  }
   0xd   :  { %537 = vmatpush3.bf16.msra.mxu1 %v584_v11  ;;  %409 = vmatprep.mubr.bf16.mxu1 %v471_v38  ;;  %v612_v41 = vld [vmem:[%s767_s1 + $0x110] sm:$0xff]   ;;  %v613_v42 = vld [vmem:[%s767_s1 + $0x118] sm:$0xff]   ;;  %v467_v45 = vld [vmem:[%s769_s2] ss:$0 sm:$0xff] }
   0xe   :  { %538 = vmatprep.subr.bf16.mxu1 %v587_v14  ;;  %v606_v43 = vld [vmem:[%s768_s0 + $0x10] ss:$0 sps:$4 sm:$0xff]   ;;  %v457_v57 = vld [vmem:[%s770_s3] sm:$0xf] }
   0xf   :  { %517 = vmatpush3.bf16.msra.mxu0 %v586_v13  ;;  %v458_v58 = vunpack.c.l.bf16 %v457_v57 }
  0x10   :  { %518 = vmatprep.subr.bf16.mxu0 %v589_v16 }
  0x11   :  { %539 = vmatpush3.bf16.msra.mxu1 %v588_v15 }
  0x12   :  { %540 = vmatprep.subr.bf16.mxu1 %v591_v18 }
  0x13   :  { %519 = vmatpush3.bf16.msra.mxu0 %v590_v17 }
  0x14   :  { %520 = vmatprep.subr.bf16.mxu0 %v593_v20 }
  0x15   :  { %541 = vmatpush3.bf16.msra.mxu1 %v592_v19 }
  0x16   :  { %542 = vmatprep.subr.bf16.mxu1 %v595_v22 }
  0x17   :  { %521 = vmatpush3.bf16.msra.mxu0 %v594_v21 }
  0x18   :  { %522 = vmatprep.subr.bf16.mxu0 %v597_v24 }
  0x19   :  { %543 = vmatpush3.bf16.msra.mxu1 %v596_v23 }
  0x1a   :  { %544 = vmatprep.subr.bf16.mxu1 %v599_v26 }
  0x1b   :  { %523 = vmatpush3.bf16.msra.mxu0 %v598_v25 }
  0x1c   :  { %524 = vmatprep.subr.bf16.mxu0 %v601_v28 }
  0x1d   :  { %545 = vmatpush3.bf16.msra.mxu1 %v600_v27 }
  0x1e   :  { %546 = vmatprep.subr.bf16.mxu1 %v603_v30 }
  0x1f   :  { %525 = vmatpush3.bf16.msra.mxu0 %v602_v29 }
  0x20   :  { %559 = vmatprep.subr.bf16.mxu0 %v614_v35 }
  0x21   :  { %547 = vmatpush3.bf16.msra.mxu1 %v607_v34 }
  0x22   :  { %370 = vmatmul.mubr.bf16.vlgmr.msra.gmra.mrb[0].mxu0 %v468_v32 }
  0x23   :  { %560 = vmatpush3.bf16.msra.mxu0 %v610_v39  ;;  %567 = vmatprep.mubr.msk.bf16.mxu0 %vm615_vm0, %v614_v35 }
  0x24   :  { %410 = vmatmul.mubr.bf16.vlgmr.msra.gmra.mrb[0].mxu1 %v470_v37  ;;  %561 = vmatprep.subr.bf16.mxu0 %v614_v35 }
  0x27   :  { %562 = vmatpush3.bf16.msra.mxu0 %v611_v40 }
  0x28   :  { %563 = vmatprep.subr.bf16.mxu0 %v614_v35 }
  0x2b   :  { %564 = vmatpush3.bf16.msra.mxu0 %v612_v41 }
  0x2c   :  { %565 = vmatprep.subr.bf16.mxu0 %v614_v35 }
  0x2f   :  { %566 = vmatpush3.bf16.msra.mxu0 %v613_v42 }
  0x32   :  { %568 = vmatmul.mubr.msk.bf16.vlgmr.msra.gmra.mrb[4].mxu0 %vm333_vm1, %v606_v43 }
  0xf5   :  { %v526_v44 = vpop.f32.mrb[0].mxu0 }
  0xf6   :  { %v527_v46 = vpop.f32.mrb[1].mxu0 }
  0xf7   :  { %v528_v47 = vadd.f32 %v527_v46, %v526_v44  ;;  %v529_v48 = vpop.f32.mrb[2].mxu0  ;;  %v548_v49 = vpop.f32.mrb[0].mxu1 }
  0xf8   :  { %v530_v50 = vpop.f32.mrb[3].mxu0  ;;  %v549_v51 = vpop.f32.mrb[1].mxu1 }
  0xf9   :  { %v372_v52 = vadd.f32 %v528_v47, %v467_v45  ;;  %v550_v53 = vadd.f32 %v549_v51, %v548_v49  ;;  %v551_v54 = vpop.f32.mrb[2].mxu1 }
  0xfa   :  { %v552_v55 = vpop.f32.mrb[3].mxu1 }
  0xfb   :  { %v412_v56 = vadd.f32 %v550_v53, %v372_v52 }
 0x105   :  { %v451_v59 = vpop.f32.mrb[4].mxu0 }
 0x106   :  { %v452_v60 = vadd.f32 %v451_v59, %v412_v56  ;;  %v569_v61 = vpop.f32.mrb[5].mxu0 }
 0x107   :  { %v454_v62 = vpop.f32.mrb[6].mxu0 }
 0x108   :  { %v459_v63 = vadd.f32 %v458_v58, %v452_v60  ;;  %v570_v0 = vpop.f32.mrb[7].mxu0 }
 0x10a   :  { %v460_v1 = vpack.c.bf16 %v459_v63, %v459_v63 }
 0x10c   :  { %462 = vst.msk [vmem:[%s771_s4] sm:$0xf] %vm461_vm2, %v460_v1 }

// kernel: age_gender_forward.61
= control target key start
LH: loop header
LB: loop body
LE: loop exit
PB: predicated region body
PF: predicated region fallthrough
CT: control target
= control target key end

     0   :  { %v98_v19 = vlaneseq  ;;  %v922_v20 = vmov 1966171168   ;;  %vm562_vm0 = vcmask 261120   ;;  %vm812_vm1 = vcmask 1040384   ;;  %s1234_s1 = inlined_call_operand.vmem [shape: bf16[160,960], index: 1, kind: input, shape index: {}]   ;;  %s1235_s0 = inlined_call_operand.vmem [shape: bf16[2,160], index: 0, kind: input, shape index: {}]   ;;  %s1236_s2 = inlined_call_operand.vmem [shape: f32[1,960], index: 2, kind: input, shape index: {}]   ;;  %s1237_s3 = inlined_call_operand.vmem [shape: bf16[2,960], index: 3, kind: output, shape index: {}]  }
   0x1   :  { %v16_v0 = vld [vmem:[%s1234_s1] sm:$0xff]  ;;  %v17_v2 = vld [vmem:[%s1234_s1 + $0x8] sm:$0xff]  ;;  %v148_v21 = vunpack.c.l.s4 %v922_v20  ;;  %vm813_vm2 = vcmask 1041409   ;;  %vm815_vm4 = vcmask 1042434   ;;  %vm817_vm6 = vcmask 1043459  }
   0x2   :  { %v20_v1 = vld [vmem:[%s1234_s1 + $0x20] sm:$0xff]  ;;  %v21_v4 = vld [vmem:[%s1234_s1 + $0x28] sm:$0xff]  ;;  %v991_v30 = vshrl.u32 %v98_v19, 7  ;;  %vm814_vm3 = vmor %vm813_vm2, %vm812_vm1  ;;  %vm819_vm8 = vcmask 1044484   ;;  %vm821_vm10 = vcmask 1045509   ;;  %vm823_vm12 = vcmask 1046534  }
   0x3   :  { %v834_v3 = vcombine.high %v16_v0, %v20_v1  ;;  %v833_v5 = vcombine.low %v16_v0, %v20_v1  ;;  %v24_v6 = vld [vmem:[%s1234_s1 + $0x40] sm:$0xff]  ;;  %v836_v8 = vcombine.high %v17_v2, %v21_v4  ;;  %v835_v9 = vcombine.low %v17_v2, %v21_v4  ;;  %v25_v11 = vld [vmem:[%s1234_s1 + $0x48] sm:$0xff]  ;;  %vm816_vm5 = vmor %vm815_vm4, %vm814_vm3 }
   0x4   :  { %v28_v7 = vld [vmem:[%s1234_s1 + $0x60] sm:$0xff]  ;;  %v29_v12 = vld [vmem:[%s1234_s1 + $0x68] sm:$0xff]  ;;  %v149_v31 = vunpack.c.0.s8 %v148_v21  ;;  %vm818_vm7 = vmor %vm817_vm6, %vm816_vm5  ;;  %vm825_vm14 = vcmask 523271  }
   0x5   :  { %v842_v10 = vcombine.high %v24_v6, %v28_v7  ;;  %v32_v13 = vld [vmem:[%s1234_s1 + $0x80] sm:$0xff]  ;;  %566 = vmatprep.subr.bf16.mxu0 %v834_v3  ;;  %v844_v14 = vcombine.high %v25_v11, %v29_v12  ;;  %v33_v16 = vld [vmem:[%s1234_s1 + $0x88] sm:$0xff]  ;;  %607 = vmatprep.subr.bf16.mxu1 %v836_v8  ;;  %v841_v18 = vcombine.low %v24_v6, %v28_v7  ;;  %vm820_vm9 = vmor %vm819_vm8, %vm818_vm7 }
   0x6   :  { %v36_v15 = vld [vmem:[%s1234_s1 + $0xa0] sm:$0xff]  ;;  %v37_v17 = vld [vmem:[%s1234_s1 + $0xa8] sm:$0xff]  ;;  %567 = vmatpush1.bf16.msra.mxu0 %v833_v5  ;;  %608 = vmatpush1.bf16.msra.mxu1 %v835_v9  ;;  %v843_v22 = vcombine.low %v25_v11, %v29_v12  ;;  %v1006_v40 = vsub.s32 %v149_v31, %v991_v30  ;;  %vm822_vm11 = vmor %vm821_vm10, %vm820_vm9 }
   0x7   :  { %568 = vmatprep.subr.bf16.mxu0 %v842_v10  ;;  %v850_v23 = vcombine.high %v32_v13, %v36_v15  ;;  %609 = vmatprep.subr.bf16.mxu1 %v844_v14  ;;  %v852_v24 = vcombine.high %v33_v16, %v37_v17  ;;  %v40_v25 = vld [vmem:[%s1234_s1 + $0xc0] sm:$0xff]  ;;  %v41_v27 = vld [vmem:[%s1234_s1 + $0xc8] sm:$0xff]  ;;  %v849_v29 = vcombine.low %v32_v13, %v36_v15  ;;  %vm824_vm13 = vmor %vm823_vm12, %vm822_vm11 }
   0x8   :  { %v44_v26 = vld [vmem:[%s1234_s1 + $0xe0] sm:$0xff]  ;;  %v45_v28 = vld [vmem:[%s1234_s1 + $0xe8] sm:$0xff]  ;;  %v851_v32 = vcombine.low %v33_v16, %v37_v17  ;;  %vm826_vm15 = vmor %vm825_vm14, %vm824_vm13 }
   0x9   :  { %v858_v33 = vcombine.high %v40_v25, %v44_v26  ;;  %v860_v34 = vcombine.high %v41_v27, %v45_v28  ;;  %v48_v35 = vld [vmem:[%s1234_s1 + $0x100] sm:$0xff]  ;;  %v49_v37 = vld [vmem:[%s1234_s1 + $0x108] sm:$0xff]  ;;  %v857_v39 = vcombine.low %v40_v25, %v44_v26  ;;  %v859_v41 = vcombine.low %v41_v27, %v45_v28  ;;  %v19_v25 = vld [vmem:[%s1234_s1 + $0x18] sm:$0xff] }
   0xa   :  { %569 = vmatpush1.bf16.msra.mxu0 %v841_v18  ;;  %610 = vmatpush1.bf16.msra.mxu1 %v843_v22  ;;  %v52_v36 = vld [vmem:[%s1234_s1 + $0x120] sm:$0xff]  ;;  %v53_v38 = vld [vmem:[%s1234_s1 + $0x128] sm:$0xff]  ;;  %v23_v26 = vld [vmem:[%s1234_s1 + $0x38] sm:$0xff] }
   0xb   :  { %570 = vmatprep.subr.bf16.mxu0 %v850_v23  ;;  %611 = vmatprep.subr.bf16.mxu1 %v852_v24  ;;  %v866_v42 = vcombine.high %v48_v35, %v52_v36  ;;  %v1011_v43 = vld.sshfl [vmem:[%s1235_s0] sm:$0x11 pattern:$0x75316420]  ;;  %v868_v44 = vcombine.high %v49_v37, %v53_v38  ;;  %v57_v48 = vld [vmem:[%s1234_s1 + $0x148] sm:$0xff]  ;;  %v865_v50 = vcombine.low %v48_v35, %v52_v36  ;;  %v18_v23 = vld [vmem:[%s1234_s1 + $0x10] sm:$0xff] }
   0xc   :  { %v56_v45 = vld [vmem:[%s1234_s1 + $0x140] sm:$0xff]  ;;  %v146_v47 = vcombine.high %v1011_v43, %v1011_v43  ;;  %v61_v49 = vld [vmem:[%s1234_s1 + $0x168] sm:$0xff]  ;;  %v867_v52 = vcombine.low %v49_v37, %v53_v38  ;;  %v22_v24 = vld [vmem:[%s1234_s1 + $0x30] sm:$0xff]  ;;  %v840_v31 = vcombine.high %v19_v25, %v23_v26  ;;  %v839_v38 = vcombine.low %v19_v25, %v23_v26 }
   0xd   :  { %v60_v46 = vld [vmem:[%s1234_s1 + $0x160] sm:$0xff]  ;;  %v876_v54 = vcombine.high %v57_v48, %v61_v49  ;;  %v65_v57 = vld [vmem:[%s1234_s1 + $0x188] sm:$0xff]  ;;  %v875_v60 = vcombine.low %v57_v48, %v61_v49  ;;  %v27_v35 = vld [vmem:[%s1234_s1 + $0x58] sm:$0xff]  ;;  %v837_v37 = vcombine.low %v18_v23, %v22_v24 }
   0xe   :  { %571 = vmatpush1.bf16.msra.mxu0 %v849_v29  ;;  %612 = vmatpush1.bf16.msra.mxu1 %v851_v32  ;;  %v1028_v51 = vrot.slane %v146_v47, %v1006_v40  ;;  %v874_v53 = vcombine.high %v56_v45, %v60_v46  ;;  %v64_v55 = vld [vmem:[%s1234_s1 + $0x180] sm:$0xff]  ;;  %v69_v58 = vld [vmem:[%s1234_s1 + $0x1a8] sm:$0xff]  ;;  %v873_v59 = vcombine.low %v56_v45, %v60_v46  ;;  %v26_v32 = vld [vmem:[%s1234_s1 + $0x50] sm:$0xff] }
   0xf   :  { %572 = vmatprep.subr.bf16.mxu0 %v858_v33  ;;  %613 = vmatprep.subr.bf16.mxu1 %v860_v34  ;;  %v68_v56 = vld [vmem:[%s1234_s1 + $0x1a0] sm:$0xff]  ;;  %v884_v62 = vcombine.high %v65_v57, %v69_v58  ;;  %v73_v1 = vld [vmem:[%s1234_s1 + $0x1c8] sm:$0xff]  ;;  %v883_v4 = vcombine.low %v65_v57, %v69_v58  ;;  %v838_v29 = vcombine.high %v18_v23, %v22_v24  ;;  %v30_v33 = vld [vmem:[%s1234_s1 + $0x70] sm:$0xff] }
  0x10   :  { %913 = vmatprep.mubr.msk.bf16.mxu0 %vm562_vm0, %v1028_v51  ;;  %914 = vmatprep.mubr.msk.bf16.mxu1 %vm562_vm0, %v1028_v51  ;;  %v882_v61 = vcombine.high %v64_v55, %v68_v56  ;;  %v72_v63 = vld [vmem:[%s1234_s1 + $0x1c0] sm:$0xff]  ;;  %v77_v2 = vld [vmem:[%s1234_s1 + $0x1e8] sm:$0xff]  ;;  %v881_v3 = vcombine.low %v64_v55, %v68_v56  ;;  %v1102_v34 = vrot.slane %v1011_v43, %v1006_v40  ;;  %v31_v36 = vld [vmem:[%s1234_s1 + $0x78] sm:$0xff] }
  0x11   :  { %v76_v0 = vld [vmem:[%s1234_s1 + $0x1e0] sm:$0xff]  ;;  %v892_v6 = vcombine.high %v73_v1, %v77_v2  ;;  %v81_v9 = vld [vmem:[%s1234_s1 + $0x208] sm:$0xff]  ;;  %v891_v12 = vcombine.low %v73_v1, %v77_v2  ;;  %v38_v43 = vld [vmem:[%s1234_s1 + $0xb0] sm:$0xff]  ;;  %v845_v46 = vcombine.low %v26_v32, %v30_v33  ;;  %v847_v47 = vcombine.low %v27_v35, %v31_v36 }
  0x12   :  { %573 = vmatpush1.bf16.msra.mxu0 %v857_v39  ;;  %614 = vmatpush1.bf16.msra.mxu1 %v859_v41  ;;  %v890_v5 = vcombine.high %v72_v63, %v76_v0  ;;  %v80_v7 = vld [vmem:[%s1234_s1 + $0x200] sm:$0xff]  ;;  %v85_v10 = vld [vmem:[%s1234_s1 + $0x228] sm:$0xff]  ;;  %v889_v11 = vcombine.low %v72_v63, %v76_v0  ;;  %v846_v39 = vcombine.high %v26_v32, %v30_v33  ;;  %v39_v45 = vld [vmem:[%s1234_s1 + $0xb8] sm:$0xff] }
  0x13   :  { %574 = vmatprep.subr.bf16.mxu0 %v866_v42  ;;  %615 = vmatprep.subr.bf16.mxu1 %v868_v44  ;;  %v84_v8 = vld [vmem:[%s1234_s1 + $0x220] sm:$0xff]  ;;  %v900_v14 = vcombine.high %v81_v9, %v85_v10  ;;  %v89_v17 = vld [vmem:[%s1234_s1 + $0x248] sm:$0xff]  ;;  %v899_v20 = vcombine.low %v81_v9, %v85_v10  ;;  %v848_v41 = vcombine.high %v27_v35, %v31_v36  ;;  %v34_v42 = vld [vmem:[%s1234_s1 + $0x90] sm:$0xff] }
  0x14   :  { %v898_v13 = vcombine.high %v80_v7, %v84_v8  ;;  %v88_v15 = vld [vmem:[%s1234_s1 + $0x240] sm:$0xff]  ;;  %v93_v18 = vld [vmem:[%s1234_s1 + $0x268] sm:$0xff]  ;;  %v897_v19 = vcombine.low %v80_v7, %v84_v8  ;;  %v35_v44 = vld [vmem:[%s1234_s1 + $0x98] sm:$0xff]  ;;  %v854_v48 = vcombine.high %v34_v42, %v38_v43  ;;  %v853_v55 = vcombine.low %v34_v42, %v38_v43 }
  0x15   :  { %v92_v16 = vld [vmem:[%s1234_s1 + $0x260] sm:$0xff]  ;;  %v908_v22 = vcombine.high %v89_v17, %v93_v18  ;;  %v907_v28 = vcombine.low %v89_v17, %v93_v18  ;;  %v856_v49 = vcombine.high %v35_v44, %v39_v45  ;;  %v855_v56 = vcombine.low %v35_v44, %v39_v45  ;;  %v58_v2 = vld [vmem:[%s1234_s1 + $0x150] sm:$0xff] }
  0x16   :  { %575 = vmatpush1.bf16.msra.mxu0 %v865_v50  ;;  %616 = vmatpush1.bf16.msra.mxu1 %v867_v52  ;;  %v906_v21 = vcombine.high %v88_v15, %v92_v16  ;;  %v905_v27 = vcombine.low %v88_v15, %v92_v16  ;;  %v42_v50 = vld [vmem:[%s1234_s1 + $0xd0] sm:$0xff] }
  0x17   :  { %576 = vmatprep.subr.bf16.mxu0 %v874_v53  ;;  %617 = vmatprep.subr.bf16.mxu1 %v876_v54  ;;  %v46_v52 = vld [vmem:[%s1234_s1 + $0xf0] sm:$0xff]  ;;  %v43_v53 = vld [vmem:[%s1234_s1 + $0xd8] sm:$0xff] }
  0x18   :  { %v47_v54 = vld [vmem:[%s1234_s1 + $0xf8] sm:$0xff]  ;;  %v862_v57 = vcombine.high %v42_v50, %v46_v52  ;;  %v66_v10 = vld [vmem:[%s1234_s1 + $0x190] sm:$0xff] }
  0x19   :  { %v864_v58 = vcombine.high %v43_v53, %v47_v54  ;;  %v863_v63 = vcombine.low %v43_v53, %v47_v54  ;;  %v74_v18 = vld [vmem:[%s1234_s1 + $0x1d0] sm:$0xff] }
  0x1a   :  { %577 = vmatpush1.bf16.msra.mxu0 %v873_v59  ;;  %618 = vmatpush1.bf16.msra.mxu1 %v875_v60  ;;  %v50_v59 = vld [vmem:[%s1234_s1 + $0x110] sm:$0xff] }
  0x1b   :  { %578 = vmatprep.subr.bf16.mxu0 %v882_v61  ;;  %619 = vmatprep.subr.bf16.mxu1 %v884_v62  ;;  %v54_v60 = vld [vmem:[%s1234_s1 + $0x130] sm:$0xff]  ;;  %v55_v61 = vld [vmem:[%s1234_s1 + $0x138] sm:$0xff]  ;;  %v861_v62 = vcombine.low %v42_v50, %v46_v52  ;;  %v104_v50 = vsub.s32 1, %v991_v30  ;;  %v112_v52 = vsub.s32 3, %v991_v30 }
  0x1c   :  { %v870_v0 = vcombine.high %v50_v59, %v54_v60  ;;  %v82_v26 = vld [vmem:[%s1234_s1 + $0x210] sm:$0xff] }
  0x1d   :  { %v90_v36 = vld [vmem:[%s1234_s1 + $0x250] sm:$0xff] }
  0x1e   :  { %579 = vmatpush1.bf16.msra.mxu0 %v881_v3  ;;  %620 = vmatpush1.bf16.msra.mxu1 %v883_v4  ;;  %v62_v3 = vld [vmem:[%s1234_s1 + $0x170] sm:$0xff]  ;;  %v59_v4 = vld [vmem:[%s1234_s1 + $0x158] sm:$0xff] }
  0x1f   :  { %580 = vmatprep.subr.bf16.mxu0 %v890_v5  ;;  %621 = vmatprep.subr.bf16.mxu1 %v892_v6  ;;  %v63_v5 = vld [vmem:[%s1234_s1 + $0x178] sm:$0xff]  ;;  %v869_v6 = vcombine.low %v50_v59, %v54_v60  ;;  %v878_v8 = vcombine.high %v58_v2, %v62_v3 }
  0x20   :  { %v880_v9 = vcombine.high %v59_v4, %v63_v5  ;;  %v879_v15 = vcombine.low %v59_v4, %v63_v5 }
  0x22   :  { %581 = vmatpush1.bf16.msra.mxu0 %v889_v11  ;;  %622 = vmatpush1.bf16.msra.mxu1 %v891_v12  ;;  %v70_v11 = vld [vmem:[%s1234_s1 + $0x1b0] sm:$0xff]  ;;  %v67_v12 = vld [vmem:[%s1234_s1 + $0x198] sm:$0xff] }
  0x23   :  { %582 = vmatprep.subr.bf16.mxu0 %v898_v13  ;;  %623 = vmatprep.subr.bf16.mxu1 %v900_v14  ;;  %v71_v13 = vld [vmem:[%s1234_s1 + $0x1b8] sm:$0xff]  ;;  %v877_v14 = vcombine.low %v58_v2, %v62_v3  ;;  %v886_v16 = vcombine.high %v66_v10, %v70_v11 }
  0x24   :  { %v888_v17 = vcombine.high %v67_v12, %v71_v13  ;;  %v887_v23 = vcombine.low %v67_v12, %v71_v13 }
  0x26   :  { %583 = vmatpush1.bf16.msra.mxu0 %v897_v19  ;;  %624 = vmatpush1.bf16.msra.mxu1 %v899_v20  ;;  %v78_v19 = vld [vmem:[%s1234_s1 + $0x1f0] sm:$0xff]  ;;  %v75_v20 = vld [vmem:[%s1234_s1 + $0x1d8] sm:$0xff] }
  0x27   :  { %584 = vmatprep.subr.bf16.mxu0 %v906_v21  ;;  %625 = vmatprep.subr.bf16.mxu1 %v908_v22  ;;  %v79_v21 = vld [vmem:[%s1234_s1 + $0x1f8] sm:$0xff]  ;;  %v885_v22 = vcombine.low %v66_v10, %v70_v11  ;;  %v894_v24 = vcombine.high %v74_v18, %v78_v19 }
  0x28   :  { %v896_v25 = vcombine.high %v75_v20, %v79_v21  ;;  %v895_v32 = vcombine.low %v75_v20, %v79_v21 }
  0x2a   :  { %585 = vmatpush1.bf16.msra.mxu0 %v905_v27  ;;  %626 = vmatpush1.bf16.msra.mxu1 %v907_v28  ;;  %v86_v27 = vld [vmem:[%s1234_s1 + $0x230] sm:$0xff]  ;;  %v83_v28 = vld [vmem:[%s1234_s1 + $0x218] sm:$0xff] }
  0x2b   :  { %648 = vmatprep.subr.bf16.mxu0 %v838_v29  ;;  %689 = vmatprep.subr.bf16.mxu1 %v840_v31  ;;  %v87_v29 = vld [vmem:[%s1234_s1 + $0x238] sm:$0xff]  ;;  %v893_v31 = vcombine.low %v74_v18, %v78_v19  ;;  %v902_v33 = vcombine.high %v82_v26, %v86_v27  ;;  %v120_v18 = vsub.s32 5, %v991_v30  ;;  %v128_v19 = vsub.s32 7, %v991_v30 }
  0x2c   :  { %v904_v35 = vcombine.high %v83_v28, %v87_v29  ;;  %v903_v42 = vcombine.low %v83_v28, %v87_v29 }
  0x2d   :  { %599 = vmatmul.mubr.bf16.vlgmr.msra.gmra.mrb[0].mxu0 %v1102_v34  ;;  %640 = vmatmul.mubr.bf16.vlgmr.msra.gmra.mrb[0].mxu1 %v1102_v34 }
  0x2e   :  { %649 = vmatpush1.bf16.msra.mxu0 %v837_v37  ;;  %690 = vmatpush1.bf16.msra.mxu1 %v839_v38  ;;  %v94_v37 = vld [vmem:[%s1234_s1 + $0x270] sm:$0xff]  ;;  %v91_v38 = vld [vmem:[%s1234_s1 + $0x258] sm:$0xff] }
  0x2f   :  { %650 = vmatprep.subr.bf16.mxu0 %v846_v39  ;;  %691 = vmatprep.subr.bf16.mxu1 %v848_v41  ;;  %v95_v39 = vld [vmem:[%s1234_s1 + $0x278] sm:$0xff]  ;;  %v901_v41 = vcombine.low %v82_v26, %v86_v27  ;;  %v910_v43 = vcombine.high %v90_v36, %v94_v37  ;;  %v909_v45 = vcombine.low %v90_v36, %v94_v37 }
  0x30   :  { %915 = vmatprep.mubr.msk.bf16.mxu0 %vm562_vm0, %v1028_v51  ;;  %916 = vmatprep.mubr.msk.bf16.mxu1 %vm562_vm0, %v1028_v51  ;;  %v51_v51 = vld [vmem:[%s1234_s1 + $0x118] sm:$0xff]  ;;  %v912_v44 = vcombine.high %v91_v38, %v95_v39 }
  0x31   :  { %v872_v1 = vcombine.high %v51_v51, %v55_v61  ;;  %v871_v7 = vcombine.low %v51_v51, %v55_v61 }
  0x32   :  { %651 = vmatpush1.bf16.msra.mxu0 %v845_v46  ;;  %692 = vmatpush1.bf16.msra.mxu1 %v847_v47  ;;  %v911_v46 = vcombine.low %v91_v38, %v95_v39  ;;  %v100_v47 = vsub.s32 0, %v991_v30 }
  0x33   :  { %652 = vmatprep.subr.bf16.mxu0 %v854_v48  ;;  %693 = vmatprep.subr.bf16.mxu1 %v856_v49  ;;  %v96_v48 = vld [vmem:[%s1236_s2] sm:$0xff]  ;;  %v108_v49 = vsub.s32 2, %v991_v30 }
  0x34   :  { %v101_v53 = vrot.slane %v96_v48, %v100_v47 }
  0x35   :  { %v109_v54 = vrot.slane %v96_v48, %v108_v49 }
  0x36   :  { %653 = vmatpush1.bf16.msra.mxu0 %v853_v55  ;;  %694 = vmatpush1.bf16.msra.mxu1 %v855_v56  ;;  %v105_v55 = vrot.slane %v96_v48, %v104_v50  ;;  %v113_v56 = vrot.slane %v96_v48, %v112_v52 }
  0x37   :  { %654 = vmatprep.subr.bf16.mxu0 %v862_v57  ;;  %695 = vmatprep.subr.bf16.mxu1 %v864_v58 }
  0x3a   :  { %655 = vmatpush1.bf16.msra.mxu0 %v861_v62  ;;  %696 = vmatpush1.bf16.msra.mxu1 %v863_v63 }
  0x3b   :  { %656 = vmatprep.subr.bf16.mxu0 %v870_v0  ;;  %697 = vmatprep.subr.bf16.mxu1 %v872_v1 }
  0x3e   :  { %657 = vmatpush1.bf16.msra.mxu0 %v869_v6  ;;  %698 = vmatpush1.bf16.msra.mxu1 %v871_v7 }
  0x3f   :  { %658 = vmatprep.subr.bf16.mxu0 %v878_v8  ;;  %699 = vmatprep.subr.bf16.mxu1 %v880_v9 }
  0x42   :  { %659 = vmatpush1.bf16.msra.mxu0 %v877_v14  ;;  %700 = vmatpush1.bf16.msra.mxu1 %v879_v15 }
  0x43   :  { %660 = vmatprep.subr.bf16.mxu0 %v886_v16  ;;  %701 = vmatprep.subr.bf16.mxu1 %v888_v17  ;;  %v116_v16 = vsub.s32 4, %v991_v30  ;;  %v124_v17 = vsub.s32 6, %v991_v30 }
  0x45   :  { %v117_v20 = vrot.slane %v96_v48, %v116_v16  ;;  %v125_v21 = vrot.slane %v96_v48, %v124_v17 }
  0x46   :  { %661 = vmatpush1.bf16.msra.mxu0 %v885_v22  ;;  %702 = vmatpush1.bf16.msra.mxu1 %v887_v23  ;;  %v121_v22 = vrot.slane %v96_v48, %v120_v18  ;;  %v129_v23 = vrot.slane %v96_v48, %v128_v19 }
  0x47   :  { %662 = vmatprep.subr.bf16.mxu0 %v894_v24  ;;  %703 = vmatprep.subr.bf16.mxu1 %v896_v25 }
  0x4a   :  { %663 = vmatpush1.bf16.msra.mxu0 %v893_v31  ;;  %704 = vmatpush1.bf16.msra.mxu1 %v895_v32 }
  0x4b   :  { %664 = vmatprep.subr.bf16.mxu0 %v902_v33  ;;  %705 = vmatprep.subr.bf16.mxu1 %v904_v35 }
  0x4e   :  { %665 = vmatpush1.bf16.msra.mxu0 %v901_v41  ;;  %706 = vmatpush1.bf16.msra.mxu1 %v903_v42 }
  0x4f   :  { %666 = vmatprep.subr.bf16.mxu0 %v910_v43  ;;  %707 = vmatprep.subr.bf16.mxu1 %v912_v44 }
  0x52   :  { %667 = vmatpush1.bf16.msra.mxu0 %v909_v45  ;;  %708 = vmatpush1.bf16.msra.mxu1 %v911_v46 }
  0x55   :  { %681 = vmatmul.mubr.bf16.vlgmr.msra.gmra.mrb[4].mxu0 %v1102_v34  ;;  %722 = vmatmul.mubr.bf16.vlgmr.msra.gmra.mrb[4].mxu1 %v1102_v34 }
 0x100   :  { %v600_v57 = vpop.f32.mrb[0].mxu0  ;;  %v641_v59 = vpop.f32.mrb[0].mxu1 }
 0x101   :  { %v601_v58 = vadd.f32 %v600_v57, %v101_v53  ;;  %v602_v34 = vpop.f32.mrb[1].mxu0  ;;  %v642_v60 = vadd.f32 %v641_v59, %v109_v54  ;;  %v643_v61 = vpop.f32.mrb[1].mxu1 }
 0x102   :  { %v603_v51 = vadd.f32 %v602_v34, %v105_v55  ;;  %v604_v62 = vpop.f32.mrb[2].mxu0  ;;  %v644_v0 = vadd.f32 %v643_v61, %v113_v56  ;;  %v645_v1 = vpop.f32.mrb[2].mxu1 }
 0x103   :  { %v730_v63 = vmax.f32 %v601_v58, 0.0  ;;  %v605_v2 = vpop.f32.mrb[3].mxu0  ;;  %v732_v3 = vmax.f32 %v642_v60, 0.0  ;;  %v646_v5 = vpop.f32.mrb[3].mxu1 }
 0x104   :  { %v731_v4 = vmax.f32 %v603_v51, 0.0  ;;  %v733_v7 = vmax.f32 %v644_v0, 0.0 }
 0x105   :  { %v738_v6 = vmin.f32 %v730_v63, 6.0  ;;  %v740_v8 = vmin.f32 %v732_v3, 6.0 }
 0x106   :  { %v739_v9 = vmin.f32 %v731_v4, 6.0  ;;  %v741_v10 = vmin.f32 %v733_v7, 6.0 }
 0x108   :  { %v917_v11 = vpack.c.bf16 %v739_v9, %v738_v6  ;;  %v918_v12 = vpack.c.bf16 %v741_v10, %v740_v8 }
 0x10a   :  { %v772_v13 = vrot.slane %v917_v11, %v1006_v40  ;;  %v779_v14 = vrot.slane %v918_v12, %v1006_v40 }
 0x10c   :  { %v794_v15 = vcombine.low %v772_v13, %v779_v14 }
 0x10e   :  { %v802_v52 = vrot.slane %v794_v15, %v1006_v40 }
 0x128   :  { %v682_v24 = vpop.f32.mrb[4].mxu0  ;;  %v723_v26 = vpop.f32.mrb[4].mxu1 }
 0x129   :  { %v683_v25 = vadd.f32 %v682_v24, %v117_v20  ;;  %v684_v27 = vpop.f32.mrb[5].mxu0  ;;  %v724_v28 = vadd.f32 %v723_v26, %v125_v21  ;;  %v725_v31 = vpop.f32.mrb[5].mxu1 }
 0x12a   :  { %v685_v29 = vadd.f32 %v684_v27, %v121_v22  ;;  %v686_v32 = vpop.f32.mrb[6].mxu0  ;;  %v726_v30 = vadd.f32 %v725_v31, %v129_v23  ;;  %v727_v35 = vpop.f32.mrb[6].mxu1 }
 0x12b   :  { %v734_v33 = vmax.f32 %v683_v25, 0.0  ;;  %v687_v36 = vpop.f32.mrb[7].mxu0  ;;  %v736_v37 = vmax.f32 %v724_v28, 0.0  ;;  %v728_v39 = vpop.f32.mrb[7].mxu1 }
 0x12c   :  { %v735_v38 = vmax.f32 %v685_v29, 0.0  ;;  %v737_v42 = vmax.f32 %v726_v30, 0.0 }
 0x12d   :  { %v742_v41 = vmin.f32 %v734_v33, 6.0  ;;  %v744_v43 = vmin.f32 %v736_v37, 6.0 }
 0x12e   :  { %v743_v44 = vmin.f32 %v735_v38, 6.0  ;;  %v745_v45 = vmin.f32 %v737_v42, 6.0 }
 0x130   :  { %v919_v46 = vpack.c.bf16 %v743_v44, %v742_v41  ;;  %v920_v47 = vpack.c.bf16 %v745_v45, %v744_v43 }
 0x132   :  { %v786_v48 = vrot.slane %v919_v46, %v1006_v40  ;;  %v793_v49 = vrot.slane %v920_v47, %v1006_v40 }
 0x134   :  { %v795_v50 = vcombine.low %v786_v48, %v793_v49 }
 0x136   :  { %v809_v53 = vrot.slane %v795_v50, %v1006_v40 }
 0x138   :  { %v810_v54 = vcombine.low %v802_v52, %v809_v53 }
 0x13a   :  { %827 = vst.msk [vmem:[%s1237_s3] sm:$0xff] %vm826_vm15, %v810_v54 }

// kernel: age_gender_forward.60
= control target key start
LH: loop header
LB: loop body
LE: loop exit
PB: predicated region body
PF: predicated region fallthrough
CT: control target
= control target key end

     0   :  { %v90_v32 = vlaneseq  ;;  %v852_v33 = vmov 1966171168   ;;  %vm504_vm0 = vcmask 523264   ;;  %vm651_vm1 = vcmask 1040384   ;;  %s1118_s1 = inlined_call_operand.vmem [shape: bf16[576,160], index: 1, kind: input, shape index: {}]   ;;  %s1119_s0 = inlined_call_operand.vmem [shape: bf16[2,576], index: 0, kind: input, shape index: {}]   ;;  %s1120_s2 = inlined_call_operand.vmem [shape: f32[1,160], index: 2, kind: input, shape index: {}]   ;;  %s1121_s3 = inlined_call_operand.vmem [shape: bf16[2,160], index: 3, kind: output, shape index: {}]  }
   0x1   :  { %v743_v0 = vld [vmem:[%s1118_s1 + $0x104] ss:$8 sps:$4 sm:$0xff]   ;;  %v745_v1 = vld [vmem:[%s1118_s1 + $0x100] ss:$8 sps:$4 sm:$0xff]   ;;  %v746_v2 = vld [vmem:[%s1118_s1 + $0x114] ss:$8 sps:$4 sm:$0xff]   ;;  %v103_v34 = vunpack.c.l.s4 %v852_v33 }
   0x2   :  { %549 = vmatprep.subr.bf16.mxu0 %v743_v0  ;;  %v748_v3 = vld [vmem:[%s1118_s1 + $0x110] ss:$8 sps:$4 sm:$0xff]   ;;  %v749_v4 = vld [vmem:[%s1118_s1 + $0x124] ss:$8 sps:$4 sm:$0xff]   ;;  %v754_v6 = vld [vmem:[%s1118_s1] ss:$8 sps:$4 sm:$0xff]  }
   0x3   :  { %550 = vmatpush1.bf16.msra.mxu0 %v745_v1  ;;  %v752_v5 = vld [vmem:[%s1118_s1 + $0x4] ss:$8 sps:$4 sm:$0xff]   ;;  %v751_v7 = vld [vmem:[%s1118_s1 + $0x120] ss:$8 sps:$4 sm:$0xff]   ;;  %v758_v8 = vld [vmem:[%s1118_s1 + $0x14] ss:$8 sps:$4 sm:$0xff]   ;;  %v104_v40 = vunpack.c.0.s8 %v103_v34 }
   0x4   :  { %551 = vmatprep.subr.bf16.mxu0 %v746_v2  ;;  %508 = vmatprep.subr.bf16.mxu1 %v752_v5  ;;  %v760_v9 = vld [vmem:[%s1118_s1 + $0x10] ss:$8 sps:$4 sm:$0xff]   ;;  %v755_v10 = vld [vmem:[%s1118_s1 + $0x134] ss:$8 sps:$4 sm:$0xff]   ;;  %v764_v12 = vld [vmem:[%s1118_s1 + $0x24] ss:$8 sps:$4 sm:$0xff]  }
   0x5   :  { %509 = vmatpush1.bf16.msra.mxu1 %v754_v6  ;;  %v757_v11 = vld [vmem:[%s1118_s1 + $0x130] ss:$8 sps:$4 sm:$0xff]   ;;  %v761_v13 = vld [vmem:[%s1118_s1 + $0x144] ss:$8 sps:$4 sm:$0xff]   ;;  %v766_v14 = vld [vmem:[%s1118_s1 + $0x20] ss:$8 sps:$4 sm:$0xff]  }
   0x6   :  { %510 = vmatprep.subr.bf16.mxu1 %v758_v8  ;;  %v770_v15 = vld [vmem:[%s1118_s1 + $0x34] ss:$8 sps:$4 sm:$0xff]   ;;  %v763_v16 = vld [vmem:[%s1118_s1 + $0x140] ss:$8 sps:$4 sm:$0xff]   ;;  %v772_v18 = vld [vmem:[%s1118_s1 + $0x30] ss:$8 sps:$4 sm:$0xff]  }
   0x7   :  { %552 = vmatpush1.bf16.msra.mxu0 %v748_v3  ;;  %v767_v17 = vld [vmem:[%s1118_s1 + $0x154] ss:$8 sps:$4 sm:$0xff]   ;;  %v776_v19 = vld [vmem:[%s1118_s1 + $0x44] ss:$8 sps:$4 sm:$0xff]   ;;  %v769_v20 = vld [vmem:[%s1118_s1 + $0x150] ss:$8 sps:$4 sm:$0xff]  }
   0x8   :  { %553 = vmatprep.subr.bf16.mxu0 %v749_v4  ;;  %v773_v21 = vld [vmem:[%s1118_s1 + $0x164] ss:$8 sps:$4 sm:$0xff]   ;;  %v778_v22 = vld [vmem:[%s1118_s1 + $0x40] ss:$8 sps:$4 sm:$0xff]   ;;  %v782_v23 = vld [vmem:[%s1118_s1 + $0x54] ss:$8 sps:$4 sm:$0xff]  }
   0x9   :  { %511 = vmatpush1.bf16.msra.mxu1 %v760_v9  ;;  %v775_v24 = vld [vmem:[%s1118_s1 + $0x160] ss:$8 sps:$4 sm:$0xff]   ;;  %v779_v25 = vld [vmem:[%s1118_s1 + $0x174] ss:$8 sps:$4 sm:$0xff]   ;;  %v784_v26 = vld [vmem:[%s1118_s1 + $0x50] ss:$8 sps:$4 sm:$0xff]  }
   0xa   :  { %512 = vmatprep.subr.bf16.mxu1 %v764_v12  ;;  %v788_v27 = vld [vmem:[%s1118_s1 + $0x64] ss:$8 sps:$4 sm:$0xff]   ;;  %v781_v28 = vld [vmem:[%s1118_s1 + $0x170] ss:$8 sps:$4 sm:$0xff]   ;;  %v790_v30 = vld [vmem:[%s1118_s1 + $0x60] ss:$8 sps:$4 sm:$0xff]  }
   0xb   :  { %554 = vmatpush1.bf16.msra.mxu0 %v751_v7  ;;  %v785_v29 = vld [vmem:[%s1118_s1 + $0x184] ss:$8 sps:$4 sm:$0xff]   ;;  %v794_v31 = vld [vmem:[%s1118_s1 + $0x74] ss:$8 sps:$4 sm:$0xff]   ;;  %v787_v35 = vld [vmem:[%s1118_s1 + $0x180] ss:$8 sps:$4 sm:$0xff]  }
   0xc   :  { %555 = vmatprep.subr.bf16.mxu0 %v755_v10  ;;  %v791_v36 = vld [vmem:[%s1118_s1 + $0x194] ss:$8 sps:$4 sm:$0xff]   ;;  %v796_v37 = vld [vmem:[%s1118_s1 + $0x70] ss:$8 sps:$4 sm:$0xff]   ;;  %v800_v38 = vld [vmem:[%s1118_s1 + $0x84] ss:$8 sps:$4 sm:$0xff]  }
   0xd   :  { %513 = vmatpush1.bf16.msra.mxu1 %v766_v14  ;;  %v982_v39 = vshrl.u32 %v90_v32, 7  ;;  %v793_v41 = vld [vmem:[%s1118_s1 + $0x190] ss:$8 sps:$4 sm:$0xff]   ;;  %v797_v42 = vld [vmem:[%s1118_s1 + $0x1a4] ss:$8 sps:$4 sm:$0xff]   ;;  %vm652_vm2 = vcmask 254977  }
   0xe   :  { %514 = vmatprep.subr.bf16.mxu1 %v770_v15  ;;  %v802_v43 = vld [vmem:[%s1118_s1 + $0x80] ss:$8 sps:$4 sm:$0xff]   ;;  %v806_v44 = vld [vmem:[%s1118_s1 + $0x94] ss:$8 sps:$4 sm:$0xff]   ;;  %v808_v48 = vld [vmem:[%s1118_s1 + $0x90] ss:$8 sps:$4 sm:$0xff]  }
   0xf   :  { %556 = vmatpush1.bf16.msra.mxu0 %v757_v11  ;;  %v997_v45 = vsub.s32 %v104_v40, %v982_v39  ;;  %v799_v46 = vld [vmem:[%s1118_s1 + $0x1a0] ss:$8 sps:$4 sm:$0xff]   ;;  %v803_v47 = vld [vmem:[%s1118_s1 + $0x1b4] ss:$8 sps:$4 sm:$0xff]   ;;  %v812_v49 = vld [vmem:[%s1118_s1 + $0xa4] ss:$8 sps:$4 sm:$0xff]  }
  0x10   :  { %557 = vmatprep.subr.bf16.mxu0 %v761_v13  ;;  %v1014_v50 = vld [vmem:[%s1119_s0] sm:$0x1f]  ;;  %v805_v52 = vld [vmem:[%s1118_s1 + $0x1b0] ss:$8 sps:$4 sm:$0xff]   ;;  %v818_v56 = vld [vmem:[%s1118_s1 + $0xb4] ss:$8 sps:$4 sm:$0xff]  }
  0x11   :  { %515 = vmatpush1.bf16.msra.mxu1 %v772_v18  ;;  %v108_v51 = vrot.slane %v1014_v50, %v997_v45  ;;  %v809_v53 = vld [vmem:[%s1118_s1 + $0x1c4] ss:$8 sps:$4 sm:$0xff]   ;;  %v814_v54 = vld [vmem:[%s1118_s1 + $0xa0] ss:$8 sps:$4 sm:$0xff]   ;;  %v820_v59 = vld [vmem:[%s1118_s1 + $0xb0] ss:$8 sps:$4 sm:$0xff]  }
  0x12   :  { %516 = vmatprep.subr.bf16.mxu1 %v776_v19  ;;  %v811_v58 = vld [vmem:[%s1118_s1 + $0x1c0] ss:$8 sps:$4 sm:$0xff]   ;;  %v815_v61 = vld [vmem:[%s1118_s1 + $0x1d4] ss:$8 sps:$4 sm:$0xff]   ;;  %v824_v62 = vld [vmem:[%s1118_s1 + $0xc4] ss:$8 sps:$4 sm:$0xff]   ;;  %v101_v19 = vcombine.high %v1014_v50, %v1014_v50 }
  0x13   :  { %558 = vmatpush1.bf16.msra.mxu0 %v763_v16  ;;  %v116_v55 = vcombine.high %v108_v51, %v108_v51  ;;  %v817_v63 = vld [vmem:[%s1118_s1 + $0x1d0] ss:$8 sps:$4 sm:$0xff]   ;;  %v826_v0 = vld [vmem:[%s1118_s1 + $0xc0] ss:$8 sps:$4 sm:$0xff]   ;;  %v821_v1 = vld [vmem:[%s1118_s1 + $0x1e4] ss:$8 sps:$4 sm:$0xff]   ;;  %v123_v7 = vrot.slane %v108_v51, %v997_v45 }
  0x14   :  { %559 = vmatprep.subr.bf16.mxu0 %v767_v17  ;;  %v830_v2 = vld [vmem:[%s1118_s1 + $0xd4] ss:$8 sps:$4 sm:$0xff]   ;;  %v823_v3 = vld [vmem:[%s1118_s1 + $0x1e0] ss:$8 sps:$4 sm:$0xff]   ;;  %v832_v4 = vld [vmem:[%s1118_s1 + $0xd0] ss:$8 sps:$4 sm:$0xff]  }
  0x15   :  { %517 = vmatpush1.bf16.msra.mxu1 %v778_v22  ;;  %v137_v57 = vrot.slane %v116_v55, %v997_v45  ;;  %v827_v5 = vld [vmem:[%s1118_s1 + $0x1f4] ss:$8 sps:$4 sm:$0xff]   ;;  %v837_v6 = vld [vmem:[%s1118_s1 + $0xe4] ss:$8 sps:$4 sm:$0xff]   ;;  %v829_v8 = vld [vmem:[%s1118_s1 + $0x1f0] ss:$8 sps:$4 sm:$0xff]   ;;  %v138_v12 = vcombine.high %v123_v7, %v123_v7  ;;  %v115_v22 = vrot.slane %v101_v19, %v997_v45 }
  0x16   :  { %518 = vmatprep.subr.bf16.mxu1 %v782_v23  ;;  %v839_v9 = vld [vmem:[%s1118_s1 + $0xe0] ss:$8 sps:$4 sm:$0xff]   ;;  %v836_v10 = vld [vmem:[%s1118_s1 + $0x204] ss:$8 sps:$4 sm:$0xff]   ;;  %v843_v11 = vld [vmem:[%s1118_s1 + $0xf4] ss:$8 sps:$4 sm:$0xff]  }
  0x17   :  { %560 = vmatpush1.bf16.msra.mxu0 %v769_v20  ;;  %v139_v60 = vcombine.high %v137_v57, %v137_v57  ;;  %540 = vmatprep.mubr.bf16.mxu1 %v137_v57  ;;  %v834_v13 = vld [vmem:[%s1118_s1 + $0x200] ss:$8 sps:$4 sm:$0xff]   ;;  %v845_v14 = vld [vmem:[%s1118_s1 + $0xf0] ss:$8 sps:$4 sm:$0xff]   ;;  %v842_v15 = vld [vmem:[%s1118_s1 + $0x214] ss:$8 sps:$4 sm:$0xff]  }
  0x18   :  { %561 = vmatprep.subr.bf16.mxu0 %v773_v21  ;;  %v840_v16 = vld [vmem:[%s1118_s1 + $0x210] ss:$8 sps:$4 sm:$0xff]   ;;  %v848_v17 = vld [vmem:[%s1118_s1 + $0x224] ss:$8 sps:$4 sm:$0xff]   ;;  %v853_v18 = vmov 0   ;;  %vm653_vm3 = vmor %vm652_vm2, %vm651_vm1 }
  0x19   :  { %519 = vmatpush1.bf16.msra.mxu1 %v784_v26  ;;  %581 = vmatprep.mubr.bf16.mxu0 %v139_v60  ;;  %v846_v20 = vld [vmem:[%s1118_s1 + $0x220] ss:$8 sps:$4 sm:$0xff]   ;;  %v851_v21 = vld [vmem:[%s1118_s1 + $0x234] ss:$8 sps:$4 sm:$0xff]   ;;  %v849_v23 = vld [vmem:[%s1118_s1 + $0x230] ss:$8 sps:$4 sm:$0xff]  }
  0x1a   :  { %520 = vmatprep.subr.bf16.mxu1 %v788_v27  ;;  %v92_v26 = vsub.s32 0, %v982_v39 }
  0x1b   :  { %562 = vmatpush1.bf16.msra.mxu0 %v775_v24  ;;  %v130_v24 = vrot.slane %v115_v22, %v997_v45 }
  0x1c   :  { %563 = vmatprep.subr.bf16.mxu0 %v779_v25 }
  0x1d   :  { %521 = vmatpush1.bf16.msra.mxu1 %v790_v30 }
  0x1e   :  { %522 = vmatprep.subr.bf16.mxu1 %v794_v31 }
  0x1f   :  { %564 = vmatpush1.bf16.msra.mxu0 %v781_v28  ;;  %v88_v28 = vld [vmem:[%s1120_s2] sm:$0x3] }
  0x20   :  { %565 = vmatprep.subr.bf16.mxu0 %v785_v29  ;;  %v96_v29 = vsub.s32 1, %v982_v39  ;;  %v93_v32 = vrot.slane %v88_v28, %v92_v26 }
  0x21   :  { %523 = vmatpush1.bf16.msra.mxu1 %v796_v37 }
  0x22   :  { %524 = vmatprep.subr.bf16.mxu1 %v800_v38  ;;  %v97_v33 = vrot.slane %v88_v28, %v96_v29 }
  0x23   :  { %566 = vmatpush1.bf16.msra.mxu0 %v787_v35 }
  0x24   :  { %567 = vmatprep.subr.bf16.mxu0 %v791_v36 }
  0x25   :  { %525 = vmatpush1.bf16.msra.mxu1 %v802_v43 }
  0x26   :  { %526 = vmatprep.subr.bf16.mxu1 %v806_v44 }
  0x27   :  { %568 = vmatpush1.bf16.msra.mxu0 %v793_v41 }
  0x28   :  { %569 = vmatprep.subr.bf16.mxu0 %v797_v42 }
  0x29   :  { %527 = vmatpush1.bf16.msra.mxu1 %v808_v48 }
  0x2a   :  { %528 = vmatprep.subr.bf16.mxu1 %v812_v49 }
  0x2b   :  { %570 = vmatpush1.bf16.msra.mxu0 %v799_v46 }
  0x2c   :  { %571 = vmatprep.subr.bf16.mxu0 %v803_v47 }
  0x2d   :  { %529 = vmatpush1.bf16.msra.mxu1 %v814_v54 }
  0x2e   :  { %530 = vmatprep.subr.bf16.mxu1 %v818_v56 }
  0x2f   :  { %572 = vmatpush1.bf16.msra.mxu0 %v805_v52 }
  0x30   :  { %573 = vmatprep.subr.bf16.mxu0 %v809_v53 }
  0x31   :  { %531 = vmatpush1.bf16.msra.mxu1 %v820_v59 }
  0x32   :  { %532 = vmatprep.subr.bf16.mxu1 %v824_v62 }
  0x33   :  { %574 = vmatpush1.bf16.msra.mxu0 %v811_v58 }
  0x34   :  { %575 = vmatprep.subr.bf16.mxu0 %v815_v61 }
  0x35   :  { %533 = vmatpush1.bf16.msra.mxu1 %v826_v0 }
  0x36   :  { %534 = vmatprep.subr.bf16.mxu1 %v830_v2 }
  0x37   :  { %576 = vmatpush1.bf16.msra.mxu0 %v817_v63 }
  0x38   :  { %577 = vmatprep.subr.bf16.mxu0 %v821_v1 }
  0x39   :  { %535 = vmatpush1.bf16.msra.mxu1 %v832_v4 }
  0x3a   :  { %536 = vmatprep.subr.bf16.mxu1 %v837_v6 }
  0x3b   :  { %578 = vmatpush1.bf16.msra.mxu0 %v823_v3 }
  0x3c   :  { %579 = vmatprep.subr.bf16.mxu0 %v827_v5 }
  0x3d   :  { %537 = vmatpush1.bf16.msra.mxu1 %v839_v9 }
  0x3e   :  { %538 = vmatprep.subr.bf16.mxu1 %v843_v11 }
  0x3f   :  { %580 = vmatpush1.bf16.msra.mxu0 %v829_v8 }
  0x40   :  { %590 = vmatprep.subr.bf16.mxu0 %v836_v10 }
  0x41   :  { %539 = vmatpush1.bf16.msra.mxu1 %v845_v14 }
  0x42   :  { %582 = vmatmul.mubr.bf16.vlgmr.msra.gmra.mrb[0].mxu0 %v138_v12 }
  0x43   :  { %591 = vmatpush1.bf16.msra.mxu0 %v834_v13  ;;  %622 = vmatprep.mubr.bf16.mxu0 %v853_v18 }
  0x44   :  { %592 = vmatprep.subr.bf16.mxu0 %v842_v15  ;;  %541 = vmatmul.mubr.bf16.vlgmr.msra.gmra.mrb[0].mxu1 %v123_v7 }
  0x47   :  { %593 = vmatpush1.bf16.msra.mxu0 %v840_v16 }
  0x48   :  { %594 = vmatprep.subr.bf16.mxu0 %v848_v17 }
  0x4b   :  { %595 = vmatpush1.bf16.msra.mxu0 %v846_v20 }
  0x4c   :  { %596 = vmatprep.subr.bf16.mxu0 %v851_v21 }
  0x4f   :  { %597 = vmatpush1.bf16.msra.mxu0 %v849_v23 }
  0x52   :  { %731 = vmatmul.mubr.msk.bf16.vlgmr.msra.gmra.mrb[0].mxu0 %vm504_vm0, %v130_v24 }
 0x117   :  { %v542_v25 = vpop.f32.mrb[0].mxu1 }
 0x118   :  { %v544_v27 = vpop.f32.mrb[1].mxu1  ;;  %v543_v34 = vadd.f32 %v542_v25, %v93_v32 }
 0x119   :  { %v546_v30 = vpop.f32.mrb[2].mxu1  ;;  %v545_v35 = vadd.f32 %v544_v27, %v97_v33 }
 0x11a   :  { %v547_v31 = vpop.f32.mrb[3].mxu1 }
 0x125   :  { %v624_v36 = vpop.f32.mrb[0].mxu0 }
 0x126   :  { %v734_v37 = vadd.f32 %v624_v36, %v543_v34  ;;  %v626_v38 = vpop.f32.mrb[1].mxu0 }
 0x127   :  { %v736_v40 = vadd.f32 %v626_v38, %v545_v35  ;;  %v628_v41 = vpop.f32.mrb[2].mxu0 }
 0x128   :  { %v629_v42 = vpop.f32.mrb[3].mxu0 }
 0x129   :  { %v732_v43 = vpack.c.bf16 %v736_v40, %v734_v37 }
 0x12b   :  { %v642_v44 = vrot.slane %v732_v43, %v997_v45 }
 0x12d   :  { %v649_v39 = vrot.slane %v642_v44, %v997_v45 }
 0x12f   :  { %654 = vst.msk [vmem:[%s1121_s3] sm:$0x3] %vm653_vm3, %v649_v39 }

// kernel: age_gender_forward.62
= control target key start
LH: loop header
LB: loop body
LE: loop exit
PB: predicated region body
PF: predicated region fallthrough
CT: control target
= control target key end

     0   :  { %v141_v35 = vlaneseq  ;;  %v1324_v36 = vmov 1966171168   ;;  %vm808_vm0 = vcmask 523264   ;;  %vm1011_vm1 = vcmask 1040384   ;;  %s1744_s1 = inlined_call_operand.vmem [shape: bf16[960,160], index: 1, kind: input, shape index: {}]   ;;  %s1745_s0 = inlined_call_operand.vmem [shape: bf16[2,960], index: 0, kind: input, shape index: {}]   ;;  %s1746_s2 = inlined_call_operand.vmem [shape: f32[1,160], index: 2, kind: input, shape index: {}]   ;;  %s1747_s3 = inlined_call_operand.vmem [shape: bf16[2,160], index: 3, kind: input, shape index: {}]   ;;  %s1748_s4 = inlined_call_operand.vmem [shape: bf16[2,160], index: 4, kind: output, shape index: {}]  }
   0x1   :  { %v1143_v0 = vld [vmem:[%s1744_s1 + $0x4] ss:$8 sps:$4 sm:$0xff]   ;;  %v1145_v1 = vld [vmem:[%s1744_s1] ss:$8 sps:$4 sm:$0xff]   ;;  %v1149_v4 = vld [vmem:[%s1744_s1 + $0x14] ss:$8 sps:$4 sm:$0xff]   ;;  %v154_v37 = vunpack.c.l.s4 %v1324_v36 }
   0x2   :  { %812 = vmatprep.subr.bf16.mxu0 %v1143_v0  ;;  %v1146_v2 = vld [vmem:[%s1744_s1 + $0x104] ss:$8 sps:$4 sm:$0xff]   ;;  %v1148_v3 = vld [vmem:[%s1744_s1 + $0x100] ss:$8 sps:$4 sm:$0xff]   ;;  %v1151_v5 = vld [vmem:[%s1744_s1 + $0x10] ss:$8 sps:$4 sm:$0xff]  }
   0x3   :  { %813 = vmatpush1.bf16.msra.mxu0 %v1145_v1  ;;  %853 = vmatprep.subr.bf16.mxu1 %v1146_v2  ;;  %v1152_v6 = vld [vmem:[%s1744_s1 + $0x114] ss:$8 sps:$4 sm:$0xff]   ;;  %v1154_v7 = vld [vmem:[%s1744_s1 + $0x110] ss:$8 sps:$4 sm:$0xff]   ;;  %v1155_v8 = vld [vmem:[%s1744_s1 + $0x24] ss:$8 sps:$4 sm:$0xff]   ;;  %v155_v43 = vunpack.c.0.s8 %v154_v37 }
   0x4   :  { %854 = vmatpush1.bf16.msra.mxu1 %v1148_v3  ;;  %814 = vmatprep.subr.bf16.mxu0 %v1149_v4  ;;  %v1157_v9 = vld [vmem:[%s1744_s1 + $0x20] ss:$8 sps:$4 sm:$0xff]   ;;  %v1158_v10 = vld [vmem:[%s1744_s1 + $0x124] ss:$8 sps:$4 sm:$0xff]   ;;  %v1161_v11 = vld [vmem:[%s1744_s1 + $0x34] ss:$8 sps:$4 sm:$0xff]  }
   0x5   :  { %855 = vmatprep.subr.bf16.mxu1 %v1152_v6  ;;  %v1160_v12 = vld [vmem:[%s1744_s1 + $0x120] ss:$8 sps:$4 sm:$0xff]   ;;  %v1164_v13 = vld [vmem:[%s1744_s1 + $0x134] ss:$8 sps:$4 sm:$0xff]   ;;  %v1163_v14 = vld [vmem:[%s1744_s1 + $0x30] ss:$8 sps:$4 sm:$0xff]  }
   0x6   :  { %v1167_v15 = vld [vmem:[%s1744_s1 + $0x44] ss:$8 sps:$4 sm:$0xff]   ;;  %v1166_v16 = vld [vmem:[%s1744_s1 + $0x130] ss:$8 sps:$4 sm:$0xff]   ;;  %v1169_v18 = vld [vmem:[%s1744_s1 + $0x40] ss:$8 sps:$4 sm:$0xff]  }
   0x7   :  { %815 = vmatpush1.bf16.msra.mxu0 %v1151_v5  ;;  %v1170_v17 = vld [vmem:[%s1744_s1 + $0x144] ss:$8 sps:$4 sm:$0xff]   ;;  %v1173_v19 = vld [vmem:[%s1744_s1 + $0x54] ss:$8 sps:$4 sm:$0xff]   ;;  %v1172_v20 = vld [vmem:[%s1744_s1 + $0x140] ss:$8 sps:$4 sm:$0xff]  }
   0x8   :  { %816 = vmatprep.subr.bf16.mxu0 %v1155_v8  ;;  %856 = vmatpush1.bf16.msra.mxu1 %v1154_v7  ;;  %v1176_v21 = vld [vmem:[%s1744_s1 + $0x154] ss:$8 sps:$4 sm:$0xff]   ;;  %v1175_v22 = vld [vmem:[%s1744_s1 + $0x50] ss:$8 sps:$4 sm:$0xff]   ;;  %v1179_v23 = vld [vmem:[%s1744_s1 + $0x64] ss:$8 sps:$4 sm:$0xff]  }
   0x9   :  { %857 = vmatprep.subr.bf16.mxu1 %v1158_v10  ;;  %v1178_v24 = vld [vmem:[%s1744_s1 + $0x150] ss:$8 sps:$4 sm:$0xff]   ;;  %v1182_v25 = vld [vmem:[%s1744_s1 + $0x164] ss:$8 sps:$4 sm:$0xff]   ;;  %v1181_v26 = vld [vmem:[%s1744_s1 + $0x60] ss:$8 sps:$4 sm:$0xff]  }
   0xa   :  { %v1185_v27 = vld [vmem:[%s1744_s1 + $0x74] ss:$8 sps:$4 sm:$0xff]   ;;  %v1184_v28 = vld [vmem:[%s1744_s1 + $0x160] ss:$8 sps:$4 sm:$0xff]   ;;  %v1187_v30 = vld [vmem:[%s1744_s1 + $0x70] ss:$8 sps:$4 sm:$0xff]  }
   0xb   :  { %817 = vmatpush1.bf16.msra.mxu0 %v1157_v9  ;;  %v1188_v29 = vld [vmem:[%s1744_s1 + $0x174] ss:$8 sps:$4 sm:$0xff]   ;;  %v1191_v31 = vld [vmem:[%s1744_s1 + $0x84] ss:$8 sps:$4 sm:$0xff]   ;;  %v1190_v32 = vld [vmem:[%s1744_s1 + $0x170] ss:$8 sps:$4 sm:$0xff]  }
   0xc   :  { %818 = vmatprep.subr.bf16.mxu0 %v1161_v11  ;;  %858 = vmatpush1.bf16.msra.mxu1 %v1160_v12  ;;  %v1194_v33 = vld [vmem:[%s1744_s1 + $0x184] ss:$8 sps:$4 sm:$0xff]   ;;  %v1193_v34 = vld [vmem:[%s1744_s1 + $0x80] ss:$8 sps:$4 sm:$0xff]   ;;  %v1197_v38 = vld [vmem:[%s1744_s1 + $0x94] ss:$8 sps:$4 sm:$0xff]  }
   0xd   :  { %859 = vmatprep.subr.bf16.mxu1 %v1164_v13  ;;  %v1196_v39 = vld [vmem:[%s1744_s1 + $0x180] ss:$8 sps:$4 sm:$0xff]   ;;  %v1200_v40 = vld [vmem:[%s1744_s1 + $0x194] ss:$8 sps:$4 sm:$0xff]   ;;  %v1199_v41 = vld [vmem:[%s1744_s1 + $0x90] ss:$8 sps:$4 sm:$0xff]  }
   0xe   :  { %v1468_v42 = vshrl.u32 %v141_v35, 7  ;;  %v1203_v44 = vld [vmem:[%s1744_s1 + $0xa4] ss:$8 sps:$4 sm:$0xff]   ;;  %v1202_v45 = vld [vmem:[%s1744_s1 + $0x190] ss:$8 sps:$4 sm:$0xff]   ;;  %vm1012_vm2 = vcmask 254977  }
   0xf   :  { %819 = vmatpush1.bf16.msra.mxu0 %v1163_v14  ;;  %v1206_v46 = vld [vmem:[%s1744_s1 + $0x1a4] ss:$8 sps:$4 sm:$0xff]   ;;  %v1205_v47 = vld [vmem:[%s1744_s1 + $0xa0] ss:$8 sps:$4 sm:$0xff]   ;;  %v1209_v49 = vld [vmem:[%s1744_s1 + $0xb4] ss:$8 sps:$4 sm:$0xff]  }
  0x10   :  { %820 = vmatprep.subr.bf16.mxu0 %v1167_v15  ;;  %860 = vmatpush1.bf16.msra.mxu1 %v1166_v16  ;;  %v1483_v48 = vsub.s32 %v155_v43, %v1468_v42  ;;  %v1208_v50 = vld [vmem:[%s1744_s1 + $0x1a0] ss:$8 sps:$4 sm:$0xff]   ;;  %v1212_v51 = vld [vmem:[%s1744_s1 + $0x1b4] ss:$8 sps:$4 sm:$0xff]   ;;  %v1211_v53 = vld [vmem:[%s1744_s1 + $0xb0] ss:$8 sps:$4 sm:$0xff]  }
  0x11   :  { %861 = vmatprep.subr.bf16.mxu1 %v1170_v17  ;;  %v18_v52 = vld [vmem:[%s1745_s0] sm:$0xff]  ;;  %v1214_v56 = vld [vmem:[%s1744_s1 + $0x1b0] ss:$8 sps:$4 sm:$0xff]   ;;  %v1221_v61 = vld [vmem:[%s1744_s1 + $0xd4] ss:$8 sps:$4 sm:$0xff]  }
  0x12   :  { %v159_v54 = vrot.slane %v18_v52, %v1483_v48  ;;  %v1215_v55 = vld [vmem:[%s1744_s1 + $0xc4] ss:$8 sps:$4 sm:$0xff]   ;;  %v1217_v59 = vld [vmem:[%s1744_s1 + $0xc0] ss:$8 sps:$4 sm:$0xff]   ;;  %v152_v63 = vcombine.high %v18_v52, %v18_v52  ;;  %v1224_v1 = vld [vmem:[%s1744_s1 + $0x1d4] ss:$8 sps:$4 sm:$0xff]  }
  0x13   :  { %821 = vmatpush1.bf16.msra.mxu0 %v1169_v18  ;;  %v1218_v58 = vld [vmem:[%s1744_s1 + $0x1c4] ss:$8 sps:$4 sm:$0xff]   ;;  %v1220_v62 = vld [vmem:[%s1744_s1 + $0x1c0] ss:$8 sps:$4 sm:$0xff]   ;;  %v1223_v2 = vld [vmem:[%s1744_s1 + $0xd0] ss:$8 sps:$4 sm:$0xff]  }
  0x14   :  { %822 = vmatprep.subr.bf16.mxu0 %v1173_v19  ;;  %862 = vmatpush1.bf16.msra.mxu1 %v1172_v20  ;;  %v167_v57 = vcombine.high %v159_v54, %v159_v54  ;;  %v1227_v3 = vld [vmem:[%s1744_s1 + $0xe4] ss:$8 sps:$4 sm:$0xff]   ;;  %v1226_v4 = vld [vmem:[%s1744_s1 + $0x1d0] ss:$8 sps:$4 sm:$0xff]   ;;  %v1533_v5 = vrot.slane %v152_v63, %v1483_v48  ;;  %v1229_v7 = vld [vmem:[%s1744_s1 + $0xe0] ss:$8 sps:$4 sm:$0xff]   ;;  %v175_v13 = vrot.slane %v159_v54, %v1483_v48 }
  0x15   :  { %863 = vmatprep.subr.bf16.mxu1 %v1176_v21  ;;  %v1230_v6 = vld [vmem:[%s1744_s1 + $0x1e4] ss:$8 sps:$4 sm:$0xff]   ;;  %v1233_v8 = vld [vmem:[%s1744_s1 + $0xf4] ss:$8 sps:$4 sm:$0xff]   ;;  %v1232_v9 = vld [vmem:[%s1744_s1 + $0x1e0] ss:$8 sps:$4 sm:$0xff]  }
  0x16   :  { %v189_v60 = vrot.slane %v167_v57, %v1483_v48  ;;  %v168_v10 = vcombine.high %v1533_v5, %v1533_v5  ;;  %v1236_v11 = vld [vmem:[%s1744_s1 + $0x1f4] ss:$8 sps:$4 sm:$0xff]   ;;  %v1235_v12 = vld [vmem:[%s1744_s1 + $0xf0] ss:$8 sps:$4 sm:$0xff]   ;;  %v1242_v14 = vld [vmem:[%s1744_s1 + $0x204] ss:$8 sps:$4 sm:$0xff]   ;;  %v197_v19 = vcombine.high %v175_v13, %v175_v13 }
  0x17   :  { %823 = vmatpush1.bf16.msra.mxu0 %v1175_v22  ;;  %v1239_v15 = vld [vmem:[%s1744_s1 + $0x1f0] ss:$8 sps:$4 sm:$0xff]   ;;  %v1254_v17 = vld [vmem:[%s1744_s1 + $0x304] ss:$8 sps:$4 sm:$0xff]   ;;  %v1240_v18 = vld [vmem:[%s1744_s1 + $0x200] ss:$8 sps:$4 sm:$0xff]  }
  0x18   :  { %824 = vmatprep.subr.bf16.mxu0 %v1179_v23  ;;  %864 = vmatpush1.bf16.msra.mxu1 %v1178_v24  ;;  %v199_v0 = vcombine.high %v189_v60, %v189_v60  ;;  %v196_v16 = vrot.slane %v168_v10, %v1483_v48  ;;  %v1245_v20 = vld [vmem:[%s1744_s1 + $0x214] ss:$8 sps:$4 sm:$0xff]   ;;  %v1252_v21 = vld [vmem:[%s1744_s1 + $0x300] ss:$8 sps:$4 sm:$0xff]   ;;  %v1243_v24 = vld [vmem:[%s1744_s1 + $0x210] ss:$8 sps:$4 sm:$0xff]  }
  0x19   :  { %865 = vmatprep.subr.bf16.mxu1 %v1182_v25  ;;  %844 = vmatprep.mubr.bf16.mxu0 %v189_v60  ;;  %v1260_v23 = vld [vmem:[%s1744_s1 + $0x314] ss:$8 sps:$4 sm:$0xff]   ;;  %v1248_v25 = vld [vmem:[%s1744_s1 + $0x224] ss:$8 sps:$4 sm:$0xff]   ;;  %v1255_v36 = vld [vmem:[%s1744_s1 + $0x240] ss:$8 sps:$4 sm:$0xff]  }
  0x1a   :  { %885 = vmatprep.mubr.bf16.mxu1 %v199_v0  ;;  %v200_v22 = vcombine.high %v196_v16, %v196_v16  ;;  %v1278_v35 = vld [vmem:[%s1744_s1 + $0x344] ss:$8 sps:$4 sm:$0xff]   ;;  %v1263_v37 = vld [vmem:[%s1744_s1 + $0x254] ss:$8 sps:$4 sm:$0xff]   ;;  %v1282_v43 = vld [vmem:[%s1744_s1 + $0x350] ss:$8 sps:$4 sm:$0xff]  }
  0x1b   :  { %825 = vmatpush1.bf16.msra.mxu0 %v1181_v26  ;;  %v1258_v26 = vld [vmem:[%s1744_s1 + $0x310] ss:$8 sps:$4 sm:$0xff]   ;;  %v1279_v54 = vld [vmem:[%s1744_s1 + $0x280] ss:$8 sps:$4 sm:$0xff]   ;;  %v1308_v57 = vld [vmem:[%s1744_s1 + $0x394] ss:$8 sps:$4 sm:$0xff]  }
  0x1c   :  { %826 = vmatprep.subr.bf16.mxu0 %v1185_v27  ;;  %866 = vmatpush1.bf16.msra.mxu1 %v1184_v28  ;;  %v1266_v27 = vld [vmem:[%s1744_s1 + $0x324] ss:$8 sps:$4 sm:$0xff]   ;;  %v1246_v28 = vld [vmem:[%s1744_s1 + $0x220] ss:$8 sps:$4 sm:$0xff]   ;;  %v1294_v52 = vld [vmem:[%s1744_s1 + $0x370] ss:$8 sps:$4 sm:$0xff]  }
  0x1d   :  { %867 = vmatprep.subr.bf16.mxu1 %v1188_v29  ;;  %v1251_v29 = vld [vmem:[%s1744_s1 + $0x234] ss:$8 sps:$4 sm:$0xff]   ;;  %v1306_v60 = vld [vmem:[%s1744_s1 + $0x390] ss:$8 sps:$4 sm:$0xff]   ;;  %v1312_v0 = vld [vmem:[%s1744_s1 + $0x3a0] ss:$8 sps:$4 sm:$0xff]  }
  0x1e   :  { %v1299_v63 = vld [vmem:[%s1744_s1 + $0x2b4] ss:$8 sps:$4 sm:$0xff]   ;;  %v1317_v10 = vld [vmem:[%s1744_s1 + $0x2e4] ss:$8 sps:$4 sm:$0xff]   ;;  %vm1013_vm3 = vmor %vm1012_vm2, %vm1011_vm1 }
  0x1f   :  { %827 = vmatpush1.bf16.msra.mxu0 %v1187_v30  ;;  %v1264_v30 = vld [vmem:[%s1744_s1 + $0x320] ss:$8 sps:$4 sm:$0xff]  }
  0x20   :  { %828 = vmatprep.subr.bf16.mxu0 %v1191_v31  ;;  %868 = vmatpush1.bf16.msra.mxu1 %v1190_v32  ;;  %v1272_v31 = vld [vmem:[%s1744_s1 + $0x334] ss:$8 sps:$4 sm:$0xff]   ;;  %v1249_v32 = vld [vmem:[%s1744_s1 + $0x230] ss:$8 sps:$4 sm:$0xff]  }
  0x21   :  { %869 = vmatprep.subr.bf16.mxu1 %v1194_v33  ;;  %v1257_v33 = vld [vmem:[%s1744_s1 + $0x244] ss:$8 sps:$4 sm:$0xff]  }
  0x23   :  { %829 = vmatpush1.bf16.msra.mxu0 %v1193_v34  ;;  %v1270_v34 = vld [vmem:[%s1744_s1 + $0x330] ss:$8 sps:$4 sm:$0xff]  }
  0x24   :  { %830 = vmatprep.subr.bf16.mxu0 %v1197_v38  ;;  %870 = vmatpush1.bf16.msra.mxu1 %v1196_v39  ;;  %v1276_v38 = vld [vmem:[%s1744_s1 + $0x340] ss:$8 sps:$4 sm:$0xff]   ;;  %v1284_v39 = vld [vmem:[%s1744_s1 + $0x354] ss:$8 sps:$4 sm:$0xff]  }
  0x25   :  { %871 = vmatprep.subr.bf16.mxu1 %v1200_v40  ;;  %v1261_v40 = vld [vmem:[%s1744_s1 + $0x250] ss:$8 sps:$4 sm:$0xff]  }
  0x27   :  { %831 = vmatpush1.bf16.msra.mxu0 %v1199_v41  ;;  %v1269_v41 = vld [vmem:[%s1744_s1 + $0x264] ss:$8 sps:$4 sm:$0xff]  }
  0x28   :  { %832 = vmatprep.subr.bf16.mxu0 %v1203_v44  ;;  %872 = vmatpush1.bf16.msra.mxu1 %v1202_v45  ;;  %v1290_v44 = vld [vmem:[%s1744_s1 + $0x364] ss:$8 sps:$4 sm:$0xff]   ;;  %v1267_v45 = vld [vmem:[%s1744_s1 + $0x260] ss:$8 sps:$4 sm:$0xff]  }
  0x29   :  { %873 = vmatprep.subr.bf16.mxu1 %v1206_v46  ;;  %v1275_v46 = vld [vmem:[%s1744_s1 + $0x274] ss:$8 sps:$4 sm:$0xff]  }
  0x2b   :  { %833 = vmatpush1.bf16.msra.mxu0 %v1205_v47  ;;  %v1288_v47 = vld [vmem:[%s1744_s1 + $0x360] ss:$8 sps:$4 sm:$0xff]  }
  0x2c   :  { %834 = vmatprep.subr.bf16.mxu0 %v1209_v49  ;;  %874 = vmatpush1.bf16.msra.mxu1 %v1208_v50  ;;  %v1296_v49 = vld [vmem:[%s1744_s1 + $0x374] ss:$8 sps:$4 sm:$0xff]   ;;  %v1273_v50 = vld [vmem:[%s1744_s1 + $0x270] ss:$8 sps:$4 sm:$0xff]  }
  0x2d   :  { %875 = vmatprep.subr.bf16.mxu1 %v1212_v51  ;;  %v1281_v51 = vld [vmem:[%s1744_s1 + $0x284] ss:$8 sps:$4 sm:$0xff]  }
  0x2f   :  { %835 = vmatpush1.bf16.msra.mxu0 %v1211_v53  ;;  %v1302_v53 = vld [vmem:[%s1744_s1 + $0x384] ss:$8 sps:$4 sm:$0xff]  }
  0x30   :  { %836 = vmatprep.subr.bf16.mxu0 %v1215_v55  ;;  %876 = vmatpush1.bf16.msra.mxu1 %v1214_v56  ;;  %v1287_v55 = vld [vmem:[%s1744_s1 + $0x294] ss:$8 sps:$4 sm:$0xff]   ;;  %v1300_v56 = vld [vmem:[%s1744_s1 + $0x380] ss:$8 sps:$4 sm:$0xff]  }
  0x31   :  { %877 = vmatprep.subr.bf16.mxu1 %v1218_v58  ;;  %v1285_v58 = vld [vmem:[%s1744_s1 + $0x290] ss:$8 sps:$4 sm:$0xff]  }
  0x33   :  { %837 = vmatpush1.bf16.msra.mxu0 %v1217_v59  ;;  %v1293_v59 = vld [vmem:[%s1744_s1 + $0x2a4] ss:$8 sps:$4 sm:$0xff]  }
  0x34   :  { %838 = vmatprep.subr.bf16.mxu0 %v1221_v61  ;;  %878 = vmatpush1.bf16.msra.mxu1 %v1220_v62  ;;  %v1314_v61 = vld [vmem:[%s1744_s1 + $0x3a4] ss:$8 sps:$4 sm:$0xff]   ;;  %v1291_v62 = vld [vmem:[%s1744_s1 + $0x2a0] ss:$8 sps:$4 sm:$0xff]  }
  0x35   :  { %879 = vmatprep.subr.bf16.mxu1 %v1224_v1  ;;  %v1320_v1 = vld [vmem:[%s1744_s1 + $0x3b4] ss:$8 sps:$4 sm:$0xff]  }
  0x37   :  { %839 = vmatpush1.bf16.msra.mxu0 %v1223_v2  ;;  %v1297_v2 = vld [vmem:[%s1744_s1 + $0x2b0] ss:$8 sps:$4 sm:$0xff]  }
  0x38   :  { %840 = vmatprep.subr.bf16.mxu0 %v1227_v3  ;;  %880 = vmatpush1.bf16.msra.mxu1 %v1226_v4  ;;  %v1305_v3 = vld [vmem:[%s1744_s1 + $0x2c4] ss:$8 sps:$4 sm:$0xff]   ;;  %v182_v4 = vrot.slane %v1533_v5, %v1483_v48  ;;  %v1309_v5 = vld [vmem:[%s1744_s1 + $0x2d0] ss:$8 sps:$4 sm:$0xff]  }
  0x39   :  { %881 = vmatprep.subr.bf16.mxu1 %v1230_v6  ;;  %v1318_v6 = vld [vmem:[%s1744_s1 + $0x3b0] ss:$8 sps:$4 sm:$0xff]  }
  0x3b   :  { %841 = vmatpush1.bf16.msra.mxu0 %v1229_v7  ;;  %v1303_v7 = vld [vmem:[%s1744_s1 + $0x2c0] ss:$8 sps:$4 sm:$0xff]  }
  0x3c   :  { %842 = vmatprep.subr.bf16.mxu0 %v1233_v8  ;;  %882 = vmatpush1.bf16.msra.mxu1 %v1232_v9  ;;  %v1311_v8 = vld [vmem:[%s1744_s1 + $0x2d4] ss:$8 sps:$4 sm:$0xff]   ;;  %v198_v9 = vcombine.high %v182_v4, %v182_v4 }
  0x3d   :  { %883 = vmatprep.subr.bf16.mxu1 %v1236_v11  ;;  %v1315_v11 = vld [vmem:[%s1744_s1 + $0x2e0] ss:$8 sps:$4 sm:$0xff]  }
  0x3f   :  { %843 = vmatpush1.bf16.msra.mxu0 %v1235_v12  ;;  %v1323_v12 = vld [vmem:[%s1744_s1 + $0x2f4] ss:$8 sps:$4 sm:$0xff]  }
  0x40   :  { %894 = vmatprep.subr.bf16.mxu0 %v1242_v14  ;;  %884 = vmatpush1.bf16.msra.mxu1 %v1239_v15  ;;  %v143_v14 = vsub.s32 0, %v1468_v42  ;;  %v139_v15 = vld [vmem:[%s1746_s2] sm:$0x3] }
  0x41   :  { %935 = vmatprep.subr.bf16.mxu1 %v1254_v17 }
  0x42   :  { %845 = vmatmul.mubr.bf16.vlgmr.msra.gmra.mrb[0].mxu0 %v175_v13  ;;  %v1321_v13 = vld [vmem:[%s1744_s1 + $0x2f0] ss:$8 sps:$4 sm:$0xff]   ;;  %v144_v17 = vrot.slane %v139_v15, %v143_v14 }
  0x43   :  { %895 = vmatpush1.bf16.msra.mxu0 %v1240_v18  ;;  %926 = vmatprep.mubr.bf16.mxu0 %v196_v16  ;;  %v147_v16 = vsub.s32 1, %v1468_v42 }
  0x44   :  { %886 = vmatmul.mubr.bf16.vlgmr.msra.gmra.mrb[0].mxu1 %v197_v19  ;;  %896 = vmatprep.subr.bf16.mxu0 %v1245_v20 }
  0x45   :  { %936 = vmatpush1.bf16.msra.mxu1 %v1252_v21  ;;  %1139 = vmatprep.mubr.msk.bf16.mxu1 %vm808_vm0, %v200_v22  ;;  %v148_v18 = vrot.slane %v139_v15, %v147_v16 }
  0x46   :  { %937 = vmatprep.subr.bf16.mxu1 %v1260_v23 }
  0x47   :  { %897 = vmatpush1.bf16.msra.mxu0 %v1243_v24 }
  0x48   :  { %898 = vmatprep.subr.bf16.mxu0 %v1248_v25 }
  0x49   :  { %938 = vmatpush1.bf16.msra.mxu1 %v1258_v26 }
  0x4a   :  { %939 = vmatprep.subr.bf16.mxu1 %v1266_v27 }
  0x4b   :  { %899 = vmatpush1.bf16.msra.mxu0 %v1246_v28 }
  0x4c   :  { %900 = vmatprep.subr.bf16.mxu0 %v1251_v29 }
  0x4d   :  { %940 = vmatpush1.bf16.msra.mxu1 %v1264_v30 }
  0x4e   :  { %941 = vmatprep.subr.bf16.mxu1 %v1272_v31 }
  0x4f   :  { %901 = vmatpush1.bf16.msra.mxu0 %v1249_v32  ;;  %v1325_v32 = vmov 1983009808  }
  0x50   :  { %902 = vmatprep.subr.bf16.mxu0 %v1257_v33  ;;  %v980_v33 = vunpack.c.l.s4 %v1325_v32 }
  0x51   :  { %942 = vmatpush1.bf16.msra.mxu1 %v1270_v34 }
  0x52   :  { %943 = vmatprep.subr.bf16.mxu1 %v1278_v35 }
  0x53   :  { %903 = vmatpush1.bf16.msra.mxu0 %v1255_v36 }
  0x54   :  { %904 = vmatprep.subr.bf16.mxu0 %v1263_v37  ;;  %v981_v37 = vunpack.c.0.s8 %v980_v33 }
  0x55   :  { %944 = vmatpush1.bf16.msra.mxu1 %v1276_v38  ;;  %v976_v38 = vld [vmem:[%s1747_s3] sm:$0x3] }
  0x56   :  { %945 = vmatprep.subr.bf16.mxu1 %v1284_v39  ;;  %v977_v39 = vunpack.c.l.bf16 %v976_v38 }
  0x57   :  { %905 = vmatpush1.bf16.msra.mxu0 %v1261_v40  ;;  %v984_v40 = vsub.s32 %v981_v37, %v1468_v42 }
  0x58   :  { %906 = vmatprep.subr.bf16.mxu0 %v1269_v41 }
  0x59   :  { %946 = vmatpush1.bf16.msra.mxu1 %v1282_v43  ;;  %v985_v41 = vrot.slane %v977_v39, %v984_v40 }
  0x5a   :  { %947 = vmatprep.subr.bf16.mxu1 %v1290_v44 }
  0x5b   :  { %907 = vmatpush1.bf16.msra.mxu0 %v1267_v45 }
  0x5c   :  { %908 = vmatprep.subr.bf16.mxu0 %v1275_v46 }
  0x5d   :  { %948 = vmatpush1.bf16.msra.mxu1 %v1288_v47  ;;  %v986_v47 = vcombine.high %v985_v41, %v985_v41 }
  0x5e   :  { %949 = vmatprep.subr.bf16.mxu1 %v1296_v49 }
  0x5f   :  { %909 = vmatpush1.bf16.msra.mxu0 %v1273_v50 }
  0x60   :  { %910 = vmatprep.subr.bf16.mxu0 %v1281_v51 }
  0x61   :  { %950 = vmatpush1.bf16.msra.mxu1 %v1294_v52 }
  0x62   :  { %951 = vmatprep.subr.bf16.mxu1 %v1302_v53 }
  0x63   :  { %911 = vmatpush1.bf16.msra.mxu0 %v1279_v54 }
  0x64   :  { %912 = vmatprep.subr.bf16.mxu0 %v1287_v55 }
  0x65   :  { %952 = vmatpush1.bf16.msra.mxu1 %v1300_v56 }
  0x66   :  { %953 = vmatprep.subr.bf16.mxu1 %v1308_v57 }
  0x67   :  { %913 = vmatpush1.bf16.msra.mxu0 %v1285_v58 }
  0x68   :  { %914 = vmatprep.subr.bf16.mxu0 %v1293_v59 }
  0x69   :  { %954 = vmatpush1.bf16.msra.mxu1 %v1306_v60 }
  0x6a   :  { %955 = vmatprep.subr.bf16.mxu1 %v1314_v61 }
  0x6b   :  { %915 = vmatpush1.bf16.msra.mxu0 %v1291_v62 }
  0x6c   :  { %916 = vmatprep.subr.bf16.mxu0 %v1299_v63 }
  0x6d   :  { %956 = vmatpush1.bf16.msra.mxu1 %v1312_v0 }
  0x6e   :  { %957 = vmatprep.subr.bf16.mxu1 %v1320_v1 }
  0x6f   :  { %917 = vmatpush1.bf16.msra.mxu0 %v1297_v2 }
  0x70   :  { %918 = vmatprep.subr.bf16.mxu0 %v1305_v3 }
  0x71   :  { %958 = vmatpush1.bf16.msra.mxu1 %v1318_v6 }
  0x73   :  { %919 = vmatpush1.bf16.msra.mxu0 %v1303_v7 }
  0x74   :  { %920 = vmatprep.subr.bf16.mxu0 %v1311_v8  ;;  %968 = vmatmul.mubr.bf16.vlgmr.msra.gmra.mrb[4].mxu1 %v198_v9 }
  0x77   :  { %921 = vmatpush1.bf16.msra.mxu0 %v1309_v5 }
  0x78   :  { %922 = vmatprep.subr.bf16.mxu0 %v1317_v10 }
  0x7b   :  { %923 = vmatpush1.bf16.msra.mxu0 %v1315_v11 }
  0x7c   :  { %924 = vmatprep.subr.bf16.mxu0 %v1323_v12 }
  0x7f   :  { %925 = vmatpush1.bf16.msra.mxu0 %v1321_v13 }
  0x82   :  { %927 = vmatmul.mubr.bf16.vlgmr.msra.gmra.mrb[4].mxu0 %v182_v4 }
 0x115   :  { %v846_v19 = vpop.f32.mrb[0].mxu0 }
 0x116   :  { %v847_v20 = vadd.f32 %v846_v19, %v144_v17  ;;  %v848_v21 = vpop.f32.mrb[1].mxu0 }
 0x117   :  { %v849_v22 = vadd.f32 %v848_v21, %v148_v18  ;;  %v850_v23 = vpop.f32.mrb[2].mxu0  ;;  %v887_v24 = vpop.f32.mrb[0].mxu1 }
 0x118   :  { %v888_v25 = vadd.f32 %v887_v24, %v847_v20  ;;  %v851_v26 = vpop.f32.mrb[3].mxu0  ;;  %v889_v27 = vpop.f32.mrb[1].mxu1 }
 0x119   :  { %v890_v28 = vadd.f32 %v889_v27, %v849_v22  ;;  %v891_v29 = vpop.f32.mrb[2].mxu1 }
 0x11a   :  { %v892_v30 = vpop.f32.mrb[3].mxu1 }
 0x147   :  { %v969_v31 = vpop.f32.mrb[4].mxu1 }
 0x148   :  { %v971_v34 = vpop.f32.mrb[5].mxu1 }
 0x149   :  { %v973_v35 = vpop.f32.mrb[6].mxu1 }
 0x14a   :  { %v974_v36 = vpop.f32.mrb[7].mxu1 }
 0x155   :  { %v928_v43 = vpop.f32.mrb[4].mxu0 }
 0x156   :  { %v929_v44 = vadd.f32 %v928_v43, %v888_v25  ;;  %v930_v45 = vpop.f32.mrb[5].mxu0 }
 0x157   :  { %v931_v46 = vadd.f32 %v930_v45, %v890_v28  ;;  %v932_v49 = vpop.f32.mrb[6].mxu0 }
 0x158   :  { %v970_v50 = vadd.f32 %v969_v31, %v929_v44  ;;  %v933_v51 = vpop.f32.mrb[7].mxu0 }
 0x159   :  { %v972_v52 = vadd.f32 %v971_v34, %v931_v46 }
 0x15a   :  { %v989_v53 = vadd.f32 %v985_v41, %v970_v50 }
 0x15b   :  { %v990_v54 = vadd.f32 %v986_v47, %v972_v52 }
 0x15d   :  { %v1140_v55 = vpack.c.bf16 %v990_v54, %v989_v53 }
 0x15f   :  { %v1002_v56 = vrot.slane %v1140_v55, %v1483_v48 }
 0x161   :  { %v1009_v42 = vrot.slane %v1002_v56, %v1483_v48 }
 0x163   :  { %1014 = vst.msk [vmem:[%s1748_s4] sm:$0x3] %vm1013_vm3, %v1009_v42 }

// kernel: age_gender_forward.66
= control target key start
LH: loop header
LB: loop body
LE: loop exit
PB: predicated region body
PF: predicated region fallthrough
CT: control target
= control target key end

     0   :  { %v258_v29 = vlaneseq  ;;  %v2162_v30 = vmov 1966171168   ;;  %vm1290_vm0 = vcmask 523264   ;;  %vm1648_vm1 = vcmask 1040384   ;;  %s2801_s1 = inlined_call_operand.vmem [shape: bf16[960,320], index: 1, kind: input, shape index: {}]   ;;  %s2802_s0 = inlined_call_operand.vmem [shape: bf16[2,960], index: 0, kind: input, shape index: {}]   ;;  %s2803_s2 = inlined_call_operand.vmem [shape: f32[1,320], index: 2, kind: input, shape index: {}]   ;;  %s2804_s3 = inlined_call_operand.vmem [shape: bf16[2,320], index: 3, kind: output, shape index: {}]  }
   0x1   :  { %v1921_v0 = vld [vmem:[%s2801_s1 + $0x4] ss:$12 sps:$4 sm:$0xff]   ;;  %v1925_v2 = vld [vmem:[%s2801_s1] ss:$12 sps:$4 sm:$0xff]   ;;  %v1927_v4 = vld [vmem:[%s2801_s1 + $0x1c] ss:$12 sps:$4 sm:$0xff]   ;;  %v276_v31 = vunpack.c.l.s4 %v2162_v30 }
   0x2   :  { %v1923_v1 = vld [vmem:[%s2801_s1 + $0x484] ss:$12 sps:$4 sm:$0xff]   ;;  %1294 = vmatprep.subr.bf16.mxu0 %v1921_v0  ;;  %v1926_v3 = vld [vmem:[%s2801_s1 + $0x480] ss:$12 sps:$4 sm:$0xff]   ;;  %v1929_v5 = vld [vmem:[%s2801_s1 + $0x49c] ss:$12 sps:$4 sm:$0xff]  }
   0x3   :  { %1417 = vmatprep.subr.bf16.mxu1 %v1923_v1  ;;  %1295 = vmatpush1.bf16.msra.mxu0 %v1925_v2  ;;  %v1931_v6 = vld [vmem:[%s2801_s1 + $0x18] ss:$12 sps:$4 sm:$0xff]   ;;  %v1933_v8 = vld [vmem:[%s2801_s1 + $0x34] ss:$12 sps:$4 sm:$0xff]   ;;  %v1937_v10 = vld [vmem:[%s2801_s1 + $0x30] ss:$12 sps:$4 sm:$0xff]   ;;  %v277_v37 = vunpack.c.0.s8 %v276_v31 }
   0x4   :  { %1418 = vmatpush1.bf16.msra.mxu1 %v1926_v3  ;;  %1296 = vmatprep.subr.bf16.mxu0 %v1927_v4  ;;  %v1932_v7 = vld [vmem:[%s2801_s1 + $0x498] ss:$12 sps:$4 sm:$0xff]   ;;  %v1935_v9 = vld [vmem:[%s2801_s1 + $0x4b4] ss:$12 sps:$4 sm:$0xff]   ;;  %v1938_v11 = vld [vmem:[%s2801_s1 + $0x4b0] ss:$12 sps:$4 sm:$0xff]  }
   0x5   :  { %1419 = vmatprep.subr.bf16.mxu1 %v1929_v5  ;;  %v1939_v12 = vld [vmem:[%s2801_s1 + $0x4c] ss:$12 sps:$4 sm:$0xff]   ;;  %v1943_v14 = vld [vmem:[%s2801_s1 + $0x48] ss:$12 sps:$4 sm:$0xff]   ;;  %v1945_v16 = vld [vmem:[%s2801_s1 + $0x64] ss:$12 sps:$4 sm:$0xff]  }
   0x6   :  { %v1941_v13 = vld [vmem:[%s2801_s1 + $0x4cc] ss:$12 sps:$4 sm:$0xff]   ;;  %v1944_v15 = vld [vmem:[%s2801_s1 + $0x4c8] ss:$12 sps:$4 sm:$0xff]   ;;  %v1947_v17 = vld [vmem:[%s2801_s1 + $0x4e4] ss:$12 sps:$4 sm:$0xff]  }
   0x7   :  { %1297 = vmatpush1.bf16.msra.mxu0 %v1931_v6  ;;  %v1949_v18 = vld [vmem:[%s2801_s1 + $0x60] ss:$12 sps:$4 sm:$0xff]   ;;  %v1951_v20 = vld [vmem:[%s2801_s1 + $0x7c] ss:$12 sps:$4 sm:$0xff]   ;;  %v1955_v22 = vld [vmem:[%s2801_s1 + $0x78] ss:$12 sps:$4 sm:$0xff]  }
   0x8   :  { %1420 = vmatpush1.bf16.msra.mxu1 %v1932_v7  ;;  %1298 = vmatprep.subr.bf16.mxu0 %v1933_v8  ;;  %v1950_v19 = vld [vmem:[%s2801_s1 + $0x4e0] ss:$12 sps:$4 sm:$0xff]   ;;  %v1953_v21 = vld [vmem:[%s2801_s1 + $0x4fc] ss:$12 sps:$4 sm:$0xff]   ;;  %v1956_v23 = vld [vmem:[%s2801_s1 + $0x4f8] ss:$12 sps:$4 sm:$0xff]  }
   0x9   :  { %1421 = vmatprep.subr.bf16.mxu1 %v1935_v9  ;;  %v1957_v24 = vld [vmem:[%s2801_s1 + $0x94] ss:$12 sps:$4 sm:$0xff]   ;;  %v1961_v26 = vld [vmem:[%s2801_s1 + $0x90] ss:$12 sps:$4 sm:$0xff]   ;;  %v1963_v28 = vld [vmem:[%s2801_s1 + $0xac] ss:$12 sps:$4 sm:$0xff]  }
   0xa   :  { %v1959_v25 = vld [vmem:[%s2801_s1 + $0x514] ss:$12 sps:$4 sm:$0xff]   ;;  %v1962_v27 = vld [vmem:[%s2801_s1 + $0x510] ss:$12 sps:$4 sm:$0xff]   ;;  %v1965_v32 = vld [vmem:[%s2801_s1 + $0x52c] ss:$12 sps:$4 sm:$0xff]  }
   0xb   :  { %1299 = vmatpush1.bf16.msra.mxu0 %v1937_v10  ;;  %v1967_v33 = vld [vmem:[%s2801_s1 + $0xa8] ss:$12 sps:$4 sm:$0xff]   ;;  %v1969_v35 = vld [vmem:[%s2801_s1 + $0xc4] ss:$12 sps:$4 sm:$0xff]   ;;  %v2283_v36 = vshrl.u32 %v258_v29, 7  ;;  %vm1649_vm2 = vcmask 1041409  }
   0xc   :  { %1422 = vmatpush1.bf16.msra.mxu1 %v1938_v11  ;;  %1300 = vmatprep.subr.bf16.mxu0 %v1939_v12  ;;  %v1968_v34 = vld [vmem:[%s2801_s1 + $0x528] ss:$12 sps:$4 sm:$0xff]   ;;  %v1971_v38 = vld [vmem:[%s2801_s1 + $0x544] ss:$12 sps:$4 sm:$0xff]   ;;  %v1973_v39 = vld [vmem:[%s2801_s1 + $0xc0] ss:$12 sps:$4 sm:$0xff]  }
   0xd   :  { %1423 = vmatprep.subr.bf16.mxu1 %v1941_v13  ;;  %v1974_v40 = vld [vmem:[%s2801_s1 + $0x540] ss:$12 sps:$4 sm:$0xff]   ;;  %v1975_v41 = vld [vmem:[%s2801_s1 + $0xdc] ss:$12 sps:$4 sm:$0xff]   ;;  %v2301_v43 = vsub.s32 %v277_v37, %v2283_v36  ;;  %v1979_v47 = vld [vmem:[%s2801_s1 + $0xd8] ss:$12 sps:$4 sm:$0xff]  }
   0xe   :  { %v1977_v42 = vld [vmem:[%s2801_s1 + $0x55c] ss:$12 sps:$4 sm:$0xff]   ;;  %v15_v44 = vld [vmem:[%s2802_s0] sm:$0xff]  ;;  %v1987_v57 = vld [vmem:[%s2801_s1 + $0x10c] ss:$12 sps:$4 sm:$0xff]   ;;  %vm1651_vm4 = vcmask 518146  }
   0xf   :  { %1301 = vmatpush1.bf16.msra.mxu0 %v1943_v14  ;;  %v274_v45 = vcombine.high %v15_v44, %v15_v44  ;;  %v2307_v46 = vrot.slane %v15_v44, %v2301_v43  ;;  %v1980_v48 = vld [vmem:[%s2801_s1 + $0x558] ss:$12 sps:$4 sm:$0xff]   ;;  %v1981_v51 = vld [vmem:[%s2801_s1 + $0xf4] ss:$12 sps:$4 sm:$0xff]   ;;  %v1985_v53 = vld [vmem:[%s2801_s1 + $0xf0] ss:$12 sps:$4 sm:$0xff]  }
  0x10   :  { %1424 = vmatpush1.bf16.msra.mxu1 %v1944_v15  ;;  %1302 = vmatprep.subr.bf16.mxu0 %v1945_v16  ;;  %v1983_v52 = vld [vmem:[%s2801_s1 + $0x574] ss:$12 sps:$4 sm:$0xff]   ;;  %v1986_v56 = vld [vmem:[%s2801_s1 + $0x570] ss:$12 sps:$4 sm:$0xff]   ;;  %v1989_v59 = vld [vmem:[%s2801_s1 + $0x58c] ss:$12 sps:$4 sm:$0xff]  }
  0x11   :  { %1425 = vmatprep.subr.bf16.mxu1 %v1947_v17  ;;  %v288_v49 = vrot.slane %v274_v45, %v2301_v43  ;;  %v289_v50 = vcombine.high %v2307_v46, %v2307_v46  ;;  %v1991_v61 = vld [vmem:[%s2801_s1 + $0x108] ss:$12 sps:$4 sm:$0xff]   ;;  %v1993_v0 = vld [vmem:[%s2801_s1 + $0x124] ss:$12 sps:$4 sm:$0xff]   ;;  %v1997_v2 = vld [vmem:[%s2801_s1 + $0x120] ss:$12 sps:$4 sm:$0xff]  }
  0x12   :  { %v1992_v63 = vld [vmem:[%s2801_s1 + $0x588] ss:$12 sps:$4 sm:$0xff]   ;;  %v2001_v6 = vld [vmem:[%s2801_s1 + $0xe0] ss:$12 sps:$4 sm:$0xff]   ;;  %v2002_v7 = vld [vmem:[%s2801_s1 + $0x138] ss:$12 sps:$4 sm:$0xff]  }
  0x13   :  { %1303 = vmatpush1.bf16.msra.mxu0 %v1949_v18  ;;  %v290_v54 = vcombine.high %v288_v49, %v288_v49  ;;  %v2328_v55 = vrot.slane %v289_v50, %v2301_v43  ;;  %v2351_v62 = vrot.slane %v288_v49, %v2301_v43  ;;  %v1996_v1 = vld [vmem:[%s2801_s1 + $0xc8] ss:$12 sps:$4 sm:$0xff]   ;;  %v2003_v8 = vld [vmem:[%s2801_s1 + $0x20] ss:$12 sps:$4 sm:$0xff]   ;;  %v2006_v10 = vld [vmem:[%s2801_s1 + $0xf8] ss:$12 sps:$4 sm:$0xff]  }
  0x14   :  { %1426 = vmatpush1.bf16.msra.mxu1 %v1950_v19  ;;  %1304 = vmatprep.subr.bf16.mxu0 %v1951_v20  ;;  %v1998_v4 = vld [vmem:[%s2801_s1 + $0x8] ss:$12 sps:$4 sm:$0xff]   ;;  %v2007_v11 = vld [vmem:[%s2801_s1 + $0x150] ss:$12 sps:$4 sm:$0xff]   ;;  %v2008_v12 = vld [vmem:[%s2801_s1 + $0x38] ss:$12 sps:$4 sm:$0xff]   ;;  %v2423_v20 = vrot.slane %v2307_v46, %v2301_v43 }
  0x15   :  { %1427 = vmatprep.subr.bf16.mxu1 %v1953_v21  ;;  %v2337_v58 = vrot.slane %v290_v54, %v2301_v43  ;;  %1326 = vmatprep.mubr.bf16.mxu0 %v2328_v55  ;;  %v2369_v3 = vcombine.high %v2351_v62, %v2351_v62  ;;  %v1999_v5 = vld [vmem:[%s2801_s1 + $0x13c] ss:$12 sps:$4 sm:$0xff]   ;;  %v2004_v9 = vld [vmem:[%s2801_s1 + $0x154] ss:$12 sps:$4 sm:$0xff]   ;;  %v2009_v13 = vld [vmem:[%s2801_s1 + $0x16c] ss:$12 sps:$4 sm:$0xff]  }
  0x16   :  { %v2011_v14 = vld [vmem:[%s2801_s1 + $0x110] ss:$12 sps:$4 sm:$0xff]   ;;  %v2012_v15 = vld [vmem:[%s2801_s1 + $0x168] ss:$12 sps:$4 sm:$0xff]   ;;  %v2014_v19 = vld [vmem:[%s2801_s1 + $0x180] ss:$12 sps:$4 sm:$0xff]  }
  0x17   :  { %1305 = vmatpush1.bf16.msra.mxu0 %v1955_v22  ;;  %v2344_v60 = vcombine.high %v2337_v58, %v2337_v58  ;;  %v2013_v16 = vld [vmem:[%s2801_s1 + $0x50] ss:$12 sps:$4 sm:$0xff]   ;;  %v2017_v18 = vld [vmem:[%s2801_s1 + $0x128] ss:$12 sps:$4 sm:$0xff]   ;;  %v2028_v30 = vld [vmem:[%s2801_s1 + $0x98] ss:$12 sps:$4 sm:$0xff]  }
  0x18   :  { %1428 = vmatpush1.bf16.msra.mxu1 %v1956_v23  ;;  %1306 = vmatprep.subr.bf16.mxu0 %v1957_v24  ;;  %v2016_v17 = vld [vmem:[%s2801_s1 + $0x184] ss:$12 sps:$4 sm:$0xff]   ;;  %v2018_v21 = vld [vmem:[%s2801_s1 + $0x68] ss:$12 sps:$4 sm:$0xff]   ;;  %v2022_v23 = vld [vmem:[%s2801_s1 + $0x140] ss:$12 sps:$4 sm:$0xff]  }
  0x19   :  { %1429 = vmatprep.subr.bf16.mxu1 %v1959_v25  ;;  %1838 = vmatprep.mubr.msk.bf16.mxu1 %vm1290_vm0, %v2344_v60  ;;  %v2021_v22 = vld [vmem:[%s2801_s1 + $0x19c] ss:$12 sps:$4 sm:$0xff]   ;;  %v2019_v24 = vld [vmem:[%s2801_s1 + $0x198] ss:$12 sps:$4 sm:$0xff]   ;;  %v2023_v25 = vld [vmem:[%s2801_s1 + $0x80] ss:$12 sps:$4 sm:$0xff]  }
  0x1a   :  { %v2024_v29 = vld [vmem:[%s2801_s1 + $0x1b0] ss:$12 sps:$4 sm:$0xff]   ;;  %v2031_v31 = vld [vmem:[%s2801_s1 + $0x1cc] ss:$12 sps:$4 sm:$0xff]   ;;  %v2037_v37 = vld [vmem:[%s2801_s1 + $0x248] ss:$12 sps:$4 sm:$0xff]  }
  0x1b   :  { %1307 = vmatpush1.bf16.msra.mxu0 %v1961_v26  ;;  %v2026_v26 = vld [vmem:[%s2801_s1 + $0x1b4] ss:$12 sps:$4 sm:$0xff]   ;;  %v2047_v46 = vld [vmem:[%s2801_s1 + $0x278] ss:$12 sps:$4 sm:$0xff]   ;;  %v2052_v50 = vld [vmem:[%s2801_s1 + $0x290] ss:$12 sps:$4 sm:$0xff]  }
  0x1c   :  { %1430 = vmatpush1.bf16.msra.mxu1 %v1962_v27  ;;  %1308 = vmatprep.subr.bf16.mxu0 %v1963_v28  ;;  %v321_v27 = vcombine.high %v2328_v55, %v2328_v55  ;;  %v2027_v28 = vld [vmem:[%s2801_s1 + $0x158] ss:$12 sps:$4 sm:$0xff]   ;;  %v2043_v44 = vld [vmem:[%s2801_s1 + $0x1a0] ss:$12 sps:$4 sm:$0xff]   ;;  %v2057_v54 = vld [vmem:[%s2801_s1 + $0x2a8] ss:$12 sps:$4 sm:$0xff]  }
  0x1d   :  { %1431 = vmatprep.subr.bf16.mxu1 %v1965_v32  ;;  %v2032_v32 = vld [vmem:[%s2801_s1 + $0x170] ss:$12 sps:$4 sm:$0xff]   ;;  %v2046_v45 = vld [vmem:[%s2801_s1 + $0x214] ss:$12 sps:$4 sm:$0xff]   ;;  %v2051_v49 = vld [vmem:[%s2801_s1 + $0x22c] ss:$12 sps:$4 sm:$0xff]  }
  0x1e   :  { %vm1650_vm3 = vmor %vm1649_vm2, %vm1648_vm1 }
  0x1f   :  { %1309 = vmatpush1.bf16.msra.mxu0 %v1967_v33  ;;  %v2029_v33 = vld [vmem:[%s2801_s1 + $0x1c8] ss:$12 sps:$4 sm:$0xff]   ;;  %vm1652_vm5 = vmor %vm1651_vm4, %vm1650_vm3 }
  0x20   :  { %1432 = vmatpush1.bf16.msra.mxu1 %v1968_v34  ;;  %1310 = vmatprep.subr.bf16.mxu0 %v1969_v35  ;;  %v2033_v34 = vld [vmem:[%s2801_s1 + $0xb0] ss:$12 sps:$4 sm:$0xff]  }
  0x21   :  { %1433 = vmatprep.subr.bf16.mxu1 %v1971_v38  ;;  %v2036_v35 = vld [vmem:[%s2801_s1 + $0x1e4] ss:$12 sps:$4 sm:$0xff]   ;;  %v2034_v38 = vld [vmem:[%s2801_s1 + $0x1e0] ss:$12 sps:$4 sm:$0xff]  }
  0x23   :  { %1311 = vmatpush1.bf16.msra.mxu0 %v1973_v39  ;;  %v2038_v39 = vld [vmem:[%s2801_s1 + $0x188] ss:$12 sps:$4 sm:$0xff]  }
  0x24   :  { %1434 = vmatpush1.bf16.msra.mxu1 %v1974_v40  ;;  %1312 = vmatprep.subr.bf16.mxu0 %v1975_v41  ;;  %v2041_v40 = vld [vmem:[%s2801_s1 + $0x1fc] ss:$12 sps:$4 sm:$0xff]   ;;  %v2042_v41 = vld [vmem:[%s2801_s1 + $0x260] ss:$12 sps:$4 sm:$0xff]  }
  0x25   :  { %1435 = vmatprep.subr.bf16.mxu1 %v1977_v42  ;;  %v2039_v42 = vld [vmem:[%s2801_s1 + $0x1f8] ss:$12 sps:$4 sm:$0xff]  }
  0x27   :  { %1313 = vmatpush1.bf16.msra.mxu0 %v1979_v47  ;;  %v2044_v47 = vld [vmem:[%s2801_s1 + $0x210] ss:$12 sps:$4 sm:$0xff]  }
  0x28   :  { %1436 = vmatpush1.bf16.msra.mxu1 %v1980_v48  ;;  %1314 = vmatprep.subr.bf16.mxu0 %v1981_v51  ;;  %v2048_v48 = vld [vmem:[%s2801_s1 + $0x1b8] ss:$12 sps:$4 sm:$0xff]   ;;  %v2049_v51 = vld [vmem:[%s2801_s1 + $0x228] ss:$12 sps:$4 sm:$0xff]  }
  0x29   :  { %1437 = vmatprep.subr.bf16.mxu1 %v1983_v52  ;;  %v2053_v52 = vld [vmem:[%s2801_s1 + $0x1d0] ss:$12 sps:$4 sm:$0xff]  }
  0x2b   :  { %1315 = vmatpush1.bf16.msra.mxu0 %v1985_v53  ;;  %v2056_v53 = vld [vmem:[%s2801_s1 + $0x244] ss:$12 sps:$4 sm:$0xff]  }
  0x2c   :  { %1438 = vmatpush1.bf16.msra.mxu1 %v1986_v56  ;;  %1316 = vmatprep.subr.bf16.mxu0 %v1987_v57  ;;  %v2058_v56 = vld [vmem:[%s2801_s1 + $0x1e8] ss:$12 sps:$4 sm:$0xff]  }
  0x2d   :  { %1439 = vmatprep.subr.bf16.mxu1 %v1989_v59  ;;  %v2061_v57 = vld [vmem:[%s2801_s1 + $0x25c] ss:$12 sps:$4 sm:$0xff]   ;;  %v2062_v59 = vld [vmem:[%s2801_s1 + $0x2c0] ss:$12 sps:$4 sm:$0xff]  }
  0x2f   :  { %1317 = vmatpush1.bf16.msra.mxu0 %v1991_v61  ;;  %v2059_v61 = vld [vmem:[%s2801_s1 + $0x258] ss:$12 sps:$4 sm:$0xff]  }
  0x30   :  { %1440 = vmatpush1.bf16.msra.mxu1 %v1992_v63  ;;  %1318 = vmatprep.subr.bf16.mxu0 %v1993_v0  ;;  %v2063_v63 = vld [vmem:[%s2801_s1 + $0x200] ss:$12 sps:$4 sm:$0xff]  }
  0x31   :  { %1841 = vmatprep.subr.bf16.mxu1 %v1996_v1  ;;  %v2066_v0 = vld [vmem:[%s2801_s1 + $0x274] ss:$12 sps:$4 sm:$0xff]   ;;  %v2067_v1 = vld [vmem:[%s2801_s1 + $0x2d8] ss:$12 sps:$4 sm:$0xff]  }
  0x33   :  { %1450 = vmatmul.mubr.bf16.vlgmr.msra.gmra.mrb[0].mxu1 %v2369_v3  ;;  %1319 = vmatpush1.bf16.msra.mxu0 %v1997_v2  ;;  %v2064_v2 = vld [vmem:[%s2801_s1 + $0x270] ss:$12 sps:$4 sm:$0xff]  }
  0x34   :  { %1842 = vmatpush3.bf16.msra.mxu1 %v1998_v4  ;;  %1320 = vmatprep.subr.bf16.mxu0 %v1999_v5  ;;  %v2068_v4 = vld [vmem:[%s2801_s1 + $0x218] ss:$12 sps:$4 sm:$0xff]  }
  0x35   :  { %1843 = vmatprep.subr.bf16.mxu1 %v2001_v6  ;;  %1490 = vmatprep.mubr.bf16.mxu1 %v2328_v55  ;;  %v2054_v55 = vld [vmem:[%s2801_s1 + $0x240] ss:$12 sps:$4 sm:$0xff]   ;;  %v2072_v6 = vld [vmem:[%s2801_s1 + $0x2f0] ss:$12 sps:$4 sm:$0xff]  }
  0x36   :  { %v2071_v5 = vld [vmem:[%s2801_s1 + $0x28c] ss:$12 sps:$4 sm:$0xff]  }
  0x37   :  { %1321 = vmatpush1.bf16.msra.mxu0 %v2002_v7  ;;  %v2069_v7 = vld [vmem:[%s2801_s1 + $0x288] ss:$12 sps:$4 sm:$0xff]  }
  0x38   :  { %1844 = vmatpush3.bf16.msra.mxu1 %v2003_v8  ;;  %1322 = vmatprep.subr.bf16.mxu0 %v2004_v9  ;;  %v2073_v8 = vld [vmem:[%s2801_s1 + $0x230] ss:$12 sps:$4 sm:$0xff]  }
  0x39   :  { %1845 = vmatprep.subr.bf16.mxu1 %v2006_v10  ;;  %v2076_v9 = vld [vmem:[%s2801_s1 + $0x2a4] ss:$12 sps:$4 sm:$0xff]   ;;  %v2077_v10 = vld [vmem:[%s2801_s1 + $0x3c8] ss:$12 sps:$4 sm:$0xff]  }
  0x3b   :  { %1323 = vmatpush1.bf16.msra.mxu0 %v2007_v11  ;;  %v2074_v11 = vld [vmem:[%s2801_s1 + $0x2a0] ss:$12 sps:$4 sm:$0xff]  }
  0x3c   :  { %1846 = vmatpush3.bf16.msra.mxu1 %v2008_v12  ;;  %1324 = vmatprep.subr.bf16.mxu0 %v2009_v13  ;;  %v319_v12 = vcombine.high %v2423_v20, %v2423_v20  ;;  %v2078_v13 = vld [vmem:[%s2801_s1 + $0x308] ss:$12 sps:$4 sm:$0xff]  }
  0x3d   :  { %1847 = vmatprep.subr.bf16.mxu1 %v2011_v14  ;;  %v2081_v14 = vld [vmem:[%s2801_s1 + $0x2bc] ss:$12 sps:$4 sm:$0xff]  }
  0x3f   :  { %1325 = vmatpush1.bf16.msra.mxu0 %v2012_v15  ;;  %v2082_v15 = vld [vmem:[%s2801_s1 + $0x3e0] ss:$12 sps:$4 sm:$0xff]  }
  0x40   :  { %1848 = vmatpush3.bf16.msra.mxu1 %v2013_v16  ;;  %1335 = vmatprep.subr.bf16.mxu0 %v2016_v17  ;;  %v2079_v16 = vld [vmem:[%s2801_s1 + $0x2b8] ss:$12 sps:$4 sm:$0xff]   ;;  %v2083_v17 = vld [vmem:[%s2801_s1 + $0x320] ss:$12 sps:$4 sm:$0xff]  }
  0x41   :  { %1849 = vmatprep.subr.bf16.mxu1 %v2017_v18  ;;  %v2086_v18 = vld [vmem:[%s2801_s1 + $0x2d4] ss:$12 sps:$4 sm:$0xff]  }
  0x42   :  { %1327 = vmatmul.mubr.bf16.vlgmr.msra.gmra.mrb[0].mxu0 %v2423_v20 }
  0x43   :  { %1336 = vmatpush1.bf16.msra.mxu0 %v2014_v19  ;;  %1367 = vmatprep.mubr.bf16.mxu0 %v321_v27  ;;  %v2087_v19 = vld [vmem:[%s2801_s1 + $0x3f8] ss:$12 sps:$4 sm:$0xff]  }
  0x44   :  { %1850 = vmatpush3.bf16.msra.mxu1 %v2018_v21  ;;  %1337 = vmatprep.subr.bf16.mxu0 %v2021_v22  ;;  %v2088_v21 = vld [vmem:[%s2801_s1 + $0x338] ss:$12 sps:$4 sm:$0xff]  }
  0x45   :  { %1851 = vmatprep.subr.bf16.mxu1 %v2022_v23  ;;  %v2091_v22 = vld [vmem:[%s2801_s1 + $0x2ec] ss:$12 sps:$4 sm:$0xff]   ;;  %v2092_v23 = vld [vmem:[%s2801_s1 + $0x410] ss:$12 sps:$4 sm:$0xff]  }
  0x47   :  { %1338 = vmatpush1.bf16.msra.mxu0 %v2019_v24  ;;  %v2089_v24 = vld [vmem:[%s2801_s1 + $0x2e8] ss:$12 sps:$4 sm:$0xff]  }
  0x48   :  { %1852 = vmatpush3.bf16.msra.mxu1 %v2023_v25  ;;  %1339 = vmatprep.subr.bf16.mxu0 %v2026_v26  ;;  %v2093_v25 = vld [vmem:[%s2801_s1 + $0x350] ss:$12 sps:$4 sm:$0xff]  }
  0x49   :  { %1853 = vmatprep.subr.bf16.mxu1 %v2027_v28  ;;  %v2096_v26 = vld [vmem:[%s2801_s1 + $0x304] ss:$12 sps:$4 sm:$0xff]   ;;  %v2094_v28 = vld [vmem:[%s2801_s1 + $0x300] ss:$12 sps:$4 sm:$0xff]  }
  0x4b   :  { %1340 = vmatpush1.bf16.msra.mxu0 %v2024_v29  ;;  %v2098_v29 = vld [vmem:[%s2801_s1 + $0x368] ss:$12 sps:$4 sm:$0xff]  }
  0x4c   :  { %1854 = vmatpush3.bf16.msra.mxu1 %v2028_v30  ;;  %1341 = vmatprep.subr.bf16.mxu0 %v2031_v31  ;;  %v2101_v30 = vld [vmem:[%s2801_s1 + $0x31c] ss:$12 sps:$4 sm:$0xff]   ;;  %v2102_v31 = vld [vmem:[%s2801_s1 + $0x440] ss:$12 sps:$4 sm:$0xff]  }
  0x4d   :  { %1855 = vmatprep.subr.bf16.mxu1 %v2032_v32  ;;  %v2099_v32 = vld [vmem:[%s2801_s1 + $0x318] ss:$12 sps:$4 sm:$0xff]  }
  0x4f   :  { %1342 = vmatpush1.bf16.msra.mxu0 %v2029_v33  ;;  %v2103_v33 = vld [vmem:[%s2801_s1 + $0x380] ss:$12 sps:$4 sm:$0xff]  }
  0x50   :  { %1856 = vmatpush3.bf16.msra.mxu1 %v2033_v34  ;;  %1343 = vmatprep.subr.bf16.mxu0 %v2036_v35  ;;  %v2106_v34 = vld [vmem:[%s2801_s1 + $0x334] ss:$12 sps:$4 sm:$0xff]   ;;  %v2107_v35 = vld [vmem:[%s2801_s1 + $0x458] ss:$12 sps:$4 sm:$0xff]  }
  0x51   :  { %1863 = vmatprep.subr.bf16.mxu1 %v2037_v37  ;;  %v2104_v37 = vld [vmem:[%s2801_s1 + $0x330] ss:$12 sps:$4 sm:$0xff]  }
  0x53   :  { %1491 = vmatmul.mubr.bf16.vlgmr.msra.gmra.mrb[4].mxu1 %v2423_v20  ;;  %1344 = vmatpush1.bf16.msra.mxu0 %v2034_v38  ;;  %v2084_v20 = vld [vmem:[%s2801_s1 + $0x2d0] ss:$12 sps:$4 sm:$0xff]   ;;  %v2108_v38 = vld [vmem:[%s2801_s1 + $0x398] ss:$12 sps:$4 sm:$0xff]  }
  0x54   :  { %1864 = vmatpush3.bf16.msra.mxu1 %v2038_v39  ;;  %1345 = vmatprep.subr.bf16.mxu0 %v2041_v40  ;;  %v2111_v39 = vld [vmem:[%s2801_s1 + $0x34c] ss:$12 sps:$4 sm:$0xff]   ;;  %v2109_v40 = vld [vmem:[%s2801_s1 + $0x348] ss:$12 sps:$4 sm:$0xff]  }
  0x55   :  { %1865 = vmatprep.subr.bf16.mxu1 %v2042_v41  ;;  %1530 = vmatprep.mubr.bf16.mxu1 %v321_v27  ;;  %v2097_v27 = vld [vmem:[%s2801_s1 + $0x428] ss:$12 sps:$4 sm:$0xff]   ;;  %v2113_v41 = vld [vmem:[%s2801_s1 + $0x3b0] ss:$12 sps:$4 sm:$0xff]  }
  0x57   :  { %1346 = vmatpush1.bf16.msra.mxu0 %v2039_v42  ;;  %v2116_v42 = vld [vmem:[%s2801_s1 + $0x364] ss:$12 sps:$4 sm:$0xff]  }
  0x58   :  { %1866 = vmatpush3.bf16.msra.mxu1 %v2043_v44  ;;  %1347 = vmatprep.subr.bf16.mxu0 %v2046_v45  ;;  %v2114_v44 = vld [vmem:[%s2801_s1 + $0x360] ss:$12 sps:$4 sm:$0xff]   ;;  %v2117_v45 = vld [vmem:[%s2801_s1 + $0x488] ss:$12 sps:$4 sm:$0xff]  }
  0x59   :  { %1867 = vmatprep.subr.bf16.mxu1 %v2047_v46  ;;  %v2163_v46 = vmov 0  }
  0x5b   :  { %1348 = vmatpush1.bf16.msra.mxu0 %v2044_v47  ;;  %v2120_v47 = vld [vmem:[%s2801_s1 + $0x37c] ss:$12 sps:$4 sm:$0xff]  }
  0x5c   :  { %1868 = vmatpush3.bf16.msra.mxu1 %v2048_v48  ;;  %1349 = vmatprep.subr.bf16.mxu0 %v2051_v49  ;;  %v2118_v48 = vld [vmem:[%s2801_s1 + $0x378] ss:$12 sps:$4 sm:$0xff]   ;;  %v2121_v49 = vld [vmem:[%s2801_s1 + $0x4a0] ss:$12 sps:$4 sm:$0xff]  }
  0x5d   :  { %1869 = vmatprep.subr.bf16.mxu1 %v2052_v50  ;;  %v2124_v50 = vld [vmem:[%s2801_s1 + $0x394] ss:$12 sps:$4 sm:$0xff]  }
  0x5f   :  { %1350 = vmatpush1.bf16.msra.mxu0 %v2049_v51  ;;  %v2122_v51 = vld [vmem:[%s2801_s1 + $0x390] ss:$12 sps:$4 sm:$0xff]  }
  0x60   :  { %1870 = vmatpush3.bf16.msra.mxu1 %v2053_v52  ;;  %1351 = vmatprep.subr.bf16.mxu0 %v2056_v53  ;;  %v2125_v52 = vld [vmem:[%s2801_s1 + $0x4b8] ss:$12 sps:$4 sm:$0xff]  }
  0x61   :  { %1871 = vmatprep.subr.bf16.mxu1 %v2057_v54  ;;  %v2128_v53 = vld [vmem:[%s2801_s1 + $0x3ac] ss:$12 sps:$4 sm:$0xff]   ;;  %v2129_v54 = vld [vmem:[%s2801_s1 + $0x4d0] ss:$12 sps:$4 sm:$0xff]  }
  0x63   :  { %1352 = vmatpush1.bf16.msra.mxu0 %v2054_v55  ;;  %v2132_v55 = vld [vmem:[%s2801_s1 + $0x3c4] ss:$12 sps:$4 sm:$0xff]  }
  0x64   :  { %1872 = vmatpush3.bf16.msra.mxu1 %v2058_v56  ;;  %1353 = vmatprep.subr.bf16.mxu0 %v2061_v57  ;;  %v2130_v56 = vld [vmem:[%s2801_s1 + $0x3c0] ss:$12 sps:$4 sm:$0xff]   ;;  %v2133_v57 = vld [vmem:[%s2801_s1 + $0x4e8] ss:$12 sps:$4 sm:$0xff]  }
  0x65   :  { %1873 = vmatprep.subr.bf16.mxu1 %v2062_v59  ;;  %v2136_v59 = vld [vmem:[%s2801_s1 + $0x3dc] ss:$12 sps:$4 sm:$0xff]  }
  0x67   :  { %1354 = vmatpush1.bf16.msra.mxu0 %v2059_v61  ;;  %v2134_v61 = vld [vmem:[%s2801_s1 + $0x3d8] ss:$12 sps:$4 sm:$0xff]  }
  0x68   :  { %1874 = vmatpush3.bf16.msra.mxu1 %v2063_v63  ;;  %1355 = vmatprep.subr.bf16.mxu0 %v2066_v0  ;;  %v2137_v63 = vld [vmem:[%s2801_s1 + $0x500] ss:$12 sps:$4 sm:$0xff]  }
  0x69   :  { %1875 = vmatprep.subr.bf16.mxu1 %v2067_v1  ;;  %v2140_v0 = vld [vmem:[%s2801_s1 + $0x3f4] ss:$12 sps:$4 sm:$0xff]   ;;  %v2138_v1 = vld [vmem:[%s2801_s1 + $0x3f0] ss:$12 sps:$4 sm:$0xff]  }
  0x6b   :  { %1356 = vmatpush1.bf16.msra.mxu0 %v2064_v2  ;;  %v2141_v2 = vld [vmem:[%s2801_s1 + $0x518] ss:$12 sps:$4 sm:$0xff]  }
  0x6c   :  { %1876 = vmatpush3.bf16.msra.mxu1 %v2068_v4  ;;  %1357 = vmatprep.subr.bf16.mxu0 %v2071_v5  ;;  %v2144_v4 = vld [vmem:[%s2801_s1 + $0x40c] ss:$12 sps:$4 sm:$0xff]   ;;  %v2142_v5 = vld [vmem:[%s2801_s1 + $0x408] ss:$12 sps:$4 sm:$0xff]  }
  0x6d   :  { %1877 = vmatprep.subr.bf16.mxu1 %v2072_v6  ;;  %v2145_v6 = vld [vmem:[%s2801_s1 + $0x530] ss:$12 sps:$4 sm:$0xff]  }
  0x6f   :  { %1358 = vmatpush1.bf16.msra.mxu0 %v2069_v7  ;;  %v2148_v7 = vld [vmem:[%s2801_s1 + $0x424] ss:$12 sps:$4 sm:$0xff]  }
  0x70   :  { %1878 = vmatpush3.bf16.msra.mxu1 %v2073_v8  ;;  %1359 = vmatprep.subr.bf16.mxu0 %v2076_v9  ;;  %v2146_v8 = vld [vmem:[%s2801_s1 + $0x420] ss:$12 sps:$4 sm:$0xff]   ;;  %v2149_v9 = vld [vmem:[%s2801_s1 + $0x548] ss:$12 sps:$4 sm:$0xff]  }
  0x71   :  { %1885 = vmatprep.subr.bf16.mxu1 %v2077_v10  ;;  %v2152_v10 = vld [vmem:[%s2801_s1 + $0x43c] ss:$12 sps:$4 sm:$0xff]  }
  0x73   :  { %1531 = vmatmul.mubr.bf16.vlgmr.msra.gmra.mrb[8].mxu1 %v319_v12  ;;  %1360 = vmatpush1.bf16.msra.mxu0 %v2074_v11  ;;  %v2150_v11 = vld [vmem:[%s2801_s1 + $0x438] ss:$12 sps:$4 sm:$0xff]  }
  0x74   :  { %1886 = vmatpush3.bf16.msra.mxu1 %v2078_v13  ;;  %1361 = vmatprep.subr.bf16.mxu0 %v2081_v14  ;;  %v2156_v13 = vld [vmem:[%s2801_s1 + $0x454] ss:$12 sps:$4 sm:$0xff]   ;;  %v2154_v14 = vld [vmem:[%s2801_s1 + $0x450] ss:$12 sps:$4 sm:$0xff]  }
  0x75   :  { %1887 = vmatprep.subr.bf16.mxu1 %v2082_v15  ;;  %1570 = vmatprep.mubr.bf16.mxu1 %v2337_v58  ;;  %v2157_v15 = vld [vmem:[%s2801_s1 + $0x578] ss:$12 sps:$4 sm:$0xff]  }
  0x77   :  { %1362 = vmatpush1.bf16.msra.mxu0 %v2079_v16  ;;  %v2160_v16 = vld [vmem:[%s2801_s1 + $0x46c] ss:$12 sps:$4 sm:$0xff]  }
  0x78   :  { %1888 = vmatpush3.bf16.msra.mxu1 %v2083_v17  ;;  %1363 = vmatprep.subr.bf16.mxu0 %v2086_v18  ;;  %v2158_v17 = vld [vmem:[%s2801_s1 + $0x468] ss:$12 sps:$4 sm:$0xff]   ;;  %v2161_v18 = vld [vmem:[%s2801_s1 + $0x590] ss:$12 sps:$4 sm:$0xff]  }
  0x79   :  { %1889 = vmatprep.subr.bf16.mxu1 %v2087_v19 }
  0x7b   :  { %1364 = vmatpush1.bf16.msra.mxu0 %v2084_v20 }
  0x7c   :  { %1890 = vmatpush3.bf16.msra.mxu1 %v2088_v21  ;;  %1365 = vmatprep.subr.bf16.mxu0 %v2091_v22 }
  0x7d   :  { %1891 = vmatprep.subr.bf16.mxu1 %v2092_v23 }
  0x7f   :  { %1366 = vmatpush1.bf16.msra.mxu0 %v2089_v24 }
  0x80   :  { %1892 = vmatpush3.bf16.msra.mxu1 %v2093_v25  ;;  %1376 = vmatprep.subr.bf16.mxu0 %v2096_v26 }
  0x81   :  { %1893 = vmatprep.subr.bf16.mxu1 %v2097_v27 }
  0x82   :  { %1368 = vmatmul.mubr.bf16.vlgmr.msra.gmra.mrb[0].mxu0 %v319_v12  ;;  %v2153_v12 = vld [vmem:[%s2801_s1 + $0x560] ss:$12 sps:$4 sm:$0xff]  }
  0x83   :  { %1377 = vmatpush1.bf16.msra.mxu0 %v2094_v28  ;;  %1408 = vmatprep.mubr.bf16.mxu0 %v2337_v58  ;;  %v2112_v58 = vld [vmem:[%s2801_s1 + $0x470] ss:$12 sps:$4 sm:$0xff]   ;;  %v268_v28 = vsub.s32 2, %v2283_v36 }
  0x84   :  { %1894 = vmatpush3.bf16.msra.mxu1 %v2098_v29  ;;  %1378 = vmatprep.subr.bf16.mxu0 %v2101_v30  ;;  %v256_v29 = vld [vmem:[%s2803_s2] sm:$0x7] }
  0x85   :  { %1895 = vmatprep.subr.bf16.mxu1 %v2102_v31  ;;  %v269_v30 = vrot.slane %v256_v29, %v268_v28 }
  0x87   :  { %1379 = vmatpush1.bf16.msra.mxu0 %v2099_v32 }
  0x88   :  { %1896 = vmatpush3.bf16.msra.mxu1 %v2103_v33  ;;  %1380 = vmatprep.subr.bf16.mxu0 %v2106_v34 }
  0x89   :  { %1897 = vmatprep.subr.bf16.mxu1 %v2107_v35 }
  0x8b   :  { %1381 = vmatpush1.bf16.msra.mxu0 %v2104_v37 }
  0x8c   :  { %1898 = vmatpush3.bf16.msra.mxu1 %v2108_v38  ;;  %1382 = vmatprep.subr.bf16.mxu0 %v2111_v39 }
  0x8d   :  { %1899 = vmatprep.subr.bf16.mxu1 %v2112_v58 }
  0x8f   :  { %1383 = vmatpush1.bf16.msra.mxu0 %v2109_v40 }
  0x90   :  { %1900 = vmatpush3.bf16.msra.mxu1 %v2113_v41  ;;  %1384 = vmatprep.subr.bf16.mxu0 %v2116_v42  ;;  %v260_v42 = vsub.s32 0, %v2283_v36 }
  0x91   :  { %1578 = vmatprep.subr.bf16.mxu1 %v2163_v46 }
  0x93   :  { %1571 = vmatmul.mubr.bf16.vlgmr.msra.gmra.mrb[12].mxu1 %v2351_v62  ;;  %1385 = vmatpush1.bf16.msra.mxu0 %v2114_v44  ;;  %v264_v44 = vsub.s32 1, %v2283_v36 }
  0x94   :  { %1579 = vmatpush1.bf16.msra.mxu1 %v2117_v45  ;;  %1386 = vmatprep.subr.bf16.mxu0 %v2120_v47  ;;  %v261_v45 = vrot.slane %v256_v29, %v260_v42 }
  0x95   :  { %1580 = vmatprep.subr.bf16.mxu1 %v2163_v46  ;;  %1839 = vmatprep.mubr.msk.bf16.mxu1 %vm1290_vm0, %v2344_v60  ;;  %v2126_v60 = vld [vmem:[%s2801_s1 + $0x3a8] ss:$12 sps:$4 sm:$0xff]  }
  0x97   :  { %1387 = vmatpush1.bf16.msra.mxu0 %v2118_v48 }
  0x98   :  { %1581 = vmatpush1.bf16.msra.mxu1 %v2121_v49  ;;  %1388 = vmatprep.subr.bf16.mxu0 %v2124_v50 }
  0x99   :  { %1582 = vmatprep.subr.bf16.mxu1 %v2163_v46 }
  0x9b   :  { %1389 = vmatpush1.bf16.msra.mxu0 %v2122_v51 }
  0x9c   :  { %1583 = vmatpush1.bf16.msra.mxu1 %v2125_v52  ;;  %1390 = vmatprep.subr.bf16.mxu0 %v2128_v53 }
  0x9d   :  { %1584 = vmatprep.subr.bf16.mxu1 %v2163_v46 }
  0x9f   :  { %1391 = vmatpush1.bf16.msra.mxu0 %v2126_v60 }
  0xa0   :  { %1585 = vmatpush1.bf16.msra.mxu1 %v2129_v54  ;;  %1392 = vmatprep.subr.bf16.mxu0 %v2132_v55 }
  0xa1   :  { %1586 = vmatprep.subr.bf16.mxu1 %v2163_v46 }
  0xa3   :  { %1393 = vmatpush1.bf16.msra.mxu0 %v2130_v56 }
  0xa4   :  { %1587 = vmatpush1.bf16.msra.mxu1 %v2133_v57  ;;  %1394 = vmatprep.subr.bf16.mxu0 %v2136_v59 }
  0xa5   :  { %1588 = vmatprep.subr.bf16.mxu1 %v2163_v46 }
  0xa7   :  { %1395 = vmatpush1.bf16.msra.mxu0 %v2134_v61 }
  0xa8   :  { %1589 = vmatpush1.bf16.msra.mxu1 %v2137_v63  ;;  %1396 = vmatprep.subr.bf16.mxu0 %v2140_v0 }
  0xa9   :  { %1590 = vmatprep.subr.bf16.mxu1 %v2163_v46 }
  0xab   :  { %1397 = vmatpush1.bf16.msra.mxu0 %v2138_v1 }
  0xac   :  { %1591 = vmatpush1.bf16.msra.mxu1 %v2141_v2  ;;  %1398 = vmatprep.subr.bf16.mxu0 %v2144_v4 }
  0xad   :  { %1592 = vmatprep.subr.bf16.mxu1 %v2163_v46 }
  0xaf   :  { %1399 = vmatpush1.bf16.msra.mxu0 %v2142_v5 }
  0xb0   :  { %1593 = vmatpush1.bf16.msra.mxu1 %v2145_v6  ;;  %1400 = vmatprep.subr.bf16.mxu0 %v2148_v7 }
  0xb1   :  { %1594 = vmatprep.subr.bf16.mxu1 %v2163_v46 }
  0xb3   :  { %1401 = vmatpush1.bf16.msra.mxu0 %v2146_v8 }
  0xb4   :  { %1595 = vmatpush1.bf16.msra.mxu1 %v2149_v9  ;;  %1402 = vmatprep.subr.bf16.mxu0 %v2152_v10 }
  0xb5   :  { %1596 = vmatprep.subr.bf16.mxu1 %v2163_v46 }
  0xb7   :  { %1403 = vmatpush1.bf16.msra.mxu0 %v2150_v11 }
  0xb8   :  { %1597 = vmatpush1.bf16.msra.mxu1 %v2153_v12  ;;  %1404 = vmatprep.subr.bf16.mxu0 %v2156_v13 }
  0xb9   :  { %1598 = vmatprep.subr.bf16.mxu1 %v2163_v46 }
  0xbb   :  { %1405 = vmatpush1.bf16.msra.mxu0 %v2154_v14 }
  0xbc   :  { %1599 = vmatpush1.bf16.msra.mxu1 %v2157_v15  ;;  %1406 = vmatprep.subr.bf16.mxu0 %v2160_v16 }
  0xbd   :  { %1600 = vmatprep.subr.bf16.mxu1 %v2163_v46  ;;  %v265_v46 = vrot.slane %v256_v29, %v264_v44 }
  0xbf   :  { %1407 = vmatpush1.bf16.msra.mxu0 %v2158_v17 }
  0xc0   :  { %1601 = vmatpush1.bf16.msra.mxu1 %v2161_v18 }
  0xc2   :  { %1409 = vmatmul.mubr.bf16.vlgmr.msra.gmra.mrb[0].mxu0 %v2351_v62 }
  0xc3   :  { %1611 = vmatmul.mubr.bf16.vlgmr.msra.gmra.mrb[16].mxu1 %v2369_v3 }
 0x106   :  { %v1451_v19 = vpop.f32.mrb[0].mxu1 }
 0x107   :  { %v1453_v20 = vpop.f32.mrb[1].mxu1 }
 0x108   :  { %v1455_v21 = vpop.f32.mrb[2].mxu1 }
 0x109   :  { %v1456_v22 = vpop.f32.mrb[3].mxu1 }
 0x126   :  { %v1857_v23 = vpop.f32.mrb[4].mxu1 }
 0x127   :  { %v1858_v24 = vpop.f32.mrb[5].mxu1 }
 0x128   :  { %v1859_v25 = vadd.f32 %v1858_v24, %v1857_v23  ;;  %v1860_v26 = vpop.f32.mrb[6].mxu1 }
 0x129   :  { %v1861_v27 = vpop.f32.mrb[7].mxu1 }
 0x12a   :  { %v1493_v32 = vadd.f32 %v1859_v25, %v269_v30 }
 0x146   :  { %v1879_v31 = vpop.f32.mrb[8].mxu1 }
 0x147   :  { %v1880_v62 = vpop.f32.mrb[9].mxu1 }
 0x148   :  { %v1881_v3 = vadd.f32 %v1880_v62, %v1879_v31  ;;  %v1882_v33 = vpop.f32.mrb[10].mxu1 }
 0x149   :  { %v1883_v34 = vpop.f32.mrb[11].mxu1 }
 0x14a   :  { %v1533_v35 = vadd.f32 %v1881_v3, %v1493_v32 }
 0x166   :  { %v1901_v37 = vpop.f32.mrb[12].mxu1 }
 0x167   :  { %v1902_v38 = vpop.f32.mrb[13].mxu1 }
 0x168   :  { %v1903_v39 = vadd.f32 %v1902_v38, %v1901_v37  ;;  %v1904_v58 = vpop.f32.mrb[14].mxu1 }
 0x169   :  { %v1905_v40 = vpop.f32.mrb[15].mxu1 }
 0x16a   :  { %v1573_v41 = vadd.f32 %v1903_v39, %v1533_v35 }
 0x195   :  { %v1410_v47 = vpop.f32.mrb[0].mxu0 }
 0x196   :  { %v1612_v48 = vpop.f32.mrb[16].mxu1  ;;  %v1907_v49 = vadd.f32 %v1410_v47, %v261_v45  ;;  %v1412_v51 = vpop.f32.mrb[1].mxu0 }
 0x197   :  { %v1613_v50 = vadd.f32 %v1612_v48, %v1573_v41  ;;  %v1614_v52 = vpop.f32.mrb[17].mxu1  ;;  %v1909_v53 = vadd.f32 %v1412_v51, %v265_v46  ;;  %v1414_v60 = vpop.f32.mrb[2].mxu0 }
 0x198   :  { %v1615_v54 = vpop.f32.mrb[18].mxu1  ;;  %v1908_v55 = vadd.f32 %v1907_v49, %v1451_v19  ;;  %v1415_v56 = vpop.f32.mrb[3].mxu0 }
 0x199   :  { %v1616_v57 = vpop.f32.mrb[19].mxu1  ;;  %v1620_v59 = vpack.c.bf16 %v1613_v50, %v1613_v50  ;;  %v1910_v61 = vadd.f32 %v1909_v53, %v1453_v20 }
 0x19b   :  { %v1840_v63 = vpack.c.bf16 %v1910_v61, %v1908_v55  ;;  %v1638_v36 = vrot.slane %v1620_v59, %v2301_v43 }
 0x19d   :  { %v1631_v0 = vrot.slane %v1840_v63, %v2301_v43 }
 0x19f   :  { %v1639_v1 = vcombine.low %v1631_v0, %v1638_v36 }
 0x1a1   :  { %v1646_v2 = vrot.slane %v1639_v1, %v2301_v43 }
 0x1a3   :  { %1653 = vst.msk [vmem:[%s2804_s3] sm:$0x7] %vm1652_vm5, %v1646_v2 }

// kernel: age_gender_forward.67
= control target key start
LH: loop header
LB: loop body
LE: loop exit
PB: predicated region body
PF: predicated region fallthrough
CT: control target
= control target key end

     0   :  { %v233_v17 = vlaneseq  ;;  %v5986_v18 = vmov 1966171168   ;;  %vm338_vm0 = vcmask 1041409   ;;  %vm1349_vm1 = vcmask 523264   ;;  %s7799_s1 = inlined_call_operand.vmem [shape: bf16[320,1280], index: 1, kind: input, shape index: {}]   ;;  %s7800_s0 = inlined_call_operand.vmem [shape: bf16[2,1,320], index: 0, kind: input, shape index: {}]   ;;  %s7801_s3 = inlined_call_operand.vmem [shape: bf16[1280,512], index: 3, kind: input, shape index: {}]   ;;  %s7802_s2 = inlined_call_operand.vmem [shape: f32[1,1280], index: 2, kind: input, shape index: {}]   ;;  %s7803_s5 = inlined_call_operand.vmem [shape: bf16[512,128], index: 5, kind: input, shape index: {}]   ;;  %s7804_s4 = inlined_call_operand.vmem [shape: f32[1,512], index: 4, kind: input, shape index: {}]   ;;  %s7805_s6 = inlined_call_operand.vmem [shape: f32[1,128], index: 6, kind: input, shape index: {}]   ;;  %s7806_s7 = inlined_call_operand.vmem [shape: f32[2,128], index: 7, kind: output, shape index: {}]  }
   0x1   :  { %v5173_v0 = vld [vmem:[%s7799_s1 + $0x4] ss:$40 sps:$4 sm:$0xff]   ;;  %v5175_v1 = vld [vmem:[%s7799_s1] ss:$40 sps:$4 sm:$0xff]   ;;  %v5176_v2 = vld [vmem:[%s7799_s1 + $0x54] ss:$40 sps:$4 sm:$0xff]   ;;  %v294_v19 = vunpack.c.l.s4 %v5986_v18 }
   0x2   :  { %1353 = vmatprep.subr.bf16.mxu0 %v5173_v0  ;;  %v5178_v3 = vld [vmem:[%s7799_s1 + $0x50] ss:$40 sps:$4 sm:$0xff]   ;;  %v5179_v4 = vld [vmem:[%s7799_s1 + $0xa4] ss:$40 sps:$4 sm:$0xff]   ;;  %v5181_v5 = vld [vmem:[%s7799_s1 + $0xa0] ss:$40 sps:$4 sm:$0xff]  }
   0x3   :  { %1354 = vmatpush1.bf16.msra.mxu0 %v5175_v1  ;;  %v5182_v6 = vld [vmem:[%s7799_s1 + $0xf4] ss:$40 sps:$4 sm:$0xff]   ;;  %v5184_v7 = vld [vmem:[%s7799_s1 + $0xf0] ss:$40 sps:$4 sm:$0xff]   ;;  %v5185_v8 = vld [vmem:[%s7799_s1 + $0x144] ss:$40 sps:$4 sm:$0xff]   ;;  %v295_v26 = vunpack.c.0.s8 %v294_v19 }
   0x4   :  { %1355 = vmatprep.subr.bf16.mxu0 %v5176_v2  ;;  %v5187_v9 = vld [vmem:[%s7799_s1 + $0x140] ss:$40 sps:$4 sm:$0xff]   ;;  %v5188_v10 = vld [vmem:[%s7799_s1 + $0x194] ss:$40 sps:$4 sm:$0xff]   ;;  %v5190_v13 = vld [vmem:[%s7799_s1 + $0x190] ss:$40 sps:$4 sm:$0xff]  }
   0x5   :  { %v5209_v11 = vld [vmem:[%s7799_s1 + $0xc] ss:$40 sps:$4 sm:$0xff]   ;;  %v5211_v12 = vld [vmem:[%s7799_s1 + $0x8] ss:$40 sps:$4 sm:$0xff]   ;;  %v5215_v14 = vld [vmem:[%s7799_s1 + $0x5c] ss:$40 sps:$4 sm:$0xff]  }
   0x6   :  { %1435 = vmatprep.subr.bf16.mxu1 %v5209_v11  ;;  %v5217_v15 = vld [vmem:[%s7799_s1 + $0x58] ss:$40 sps:$4 sm:$0xff]   ;;  %v5191_v16 = vld [vmem:[%s7799_s1 + $0x1e4] ss:$40 sps:$4 sm:$0xff]   ;;  %v5194_v22 = vld [vmem:[%s7799_s1 + $0x234] ss:$40 sps:$4 sm:$0xff]  }
   0x7   :  { %1356 = vmatpush1.bf16.msra.mxu0 %v5178_v3  ;;  %1436 = vmatpush1.bf16.msra.mxu1 %v5211_v12  ;;  %v5193_v20 = vld [vmem:[%s7799_s1 + $0x1e0] ss:$40 sps:$4 sm:$0xff]   ;;  %v5221_v21 = vld [vmem:[%s7799_s1 + $0xac] ss:$40 sps:$4 sm:$0xff]   ;;  %v5227_v24 = vld [vmem:[%s7799_s1 + $0xfc] ss:$40 sps:$4 sm:$0xff]  }
   0x8   :  { %1357 = vmatprep.subr.bf16.mxu0 %v5179_v4  ;;  %1437 = vmatprep.subr.bf16.mxu1 %v5215_v14  ;;  %v5223_v23 = vld [vmem:[%s7799_s1 + $0xa8] ss:$40 sps:$4 sm:$0xff]   ;;  %v6094_v25 = vshrl.u32 %v233_v17, 7  ;;  %v5197_v28 = vld [vmem:[%s7799_s1 + $0x284] ss:$40 sps:$4 sm:$0xff]  }
   0x9   :  { %v5196_v27 = vld [vmem:[%s7799_s1 + $0x230] ss:$40 sps:$4 sm:$0xff]   ;;  %v5233_v30 = vld [vmem:[%s7799_s1 + $0x14c] ss:$40 sps:$4 sm:$0xff]   ;;  %v5199_v36 = vld [vmem:[%s7799_s1 + $0x280] ss:$40 sps:$4 sm:$0xff]  }
   0xa   :  { %v5229_v29 = vld [vmem:[%s7799_s1 + $0xf8] ss:$40 sps:$4 sm:$0xff]   ;;  %v298_v32 = vsub.s32 %v295_v26, %v6094_v25  ;;  %v5235_v37 = vld [vmem:[%s7799_s1 + $0x148] ss:$40 sps:$4 sm:$0xff]   ;;  %v5200_v39 = vld [vmem:[%s7799_s1 + $0x2d4] ss:$40 sps:$4 sm:$0xff]  }
   0xb   :  { %1358 = vmatpush1.bf16.msra.mxu0 %v5181_v5  ;;  %1438 = vmatpush1.bf16.msra.mxu1 %v5217_v15  ;;  %v4501_v31 = vld.sshfl [vmem:[%s7800_s0] sm:$0x13 pattern:$0x75316420]  ;;  %v5239_v41 = vld [vmem:[%s7799_s1 + $0x19c] ss:$40 sps:$4 sm:$0xff]  }
   0xc   :  { %1359 = vmatprep.subr.bf16.mxu0 %v5182_v6  ;;  %1439 = vmatprep.subr.bf16.mxu1 %v5221_v21  ;;  %v4502_v33 = vld.sshfl [vmem:[%s7800_s0 + $0x3] sm:$0x13 pattern:$0x75316420]  ;;  %v292_v34 = vcombine.high %v4501_v31, %v4501_v31  ;;  %v5202_v44 = vld [vmem:[%s7799_s1 + $0x2d0] ss:$40 sps:$4 sm:$0xff]   ;;  %v299_v1 = vrot.slane %v4501_v31, %v298_v32 }
   0xd   :  { %v315_v35 = vcombine.high %v4502_v33, %v4502_v33  ;;  %v5241_v45 = vld [vmem:[%s7799_s1 + $0x198] ss:$40 sps:$4 sm:$0xff]   ;;  %v5203_v46 = vld [vmem:[%s7799_s1 + $0x324] ss:$40 sps:$4 sm:$0xff]   ;;  %v5247_v52 = vld [vmem:[%s7799_s1 + $0x1e8] ss:$40 sps:$4 sm:$0xff]   ;;  %v322_v60 = vrot.slane %v4502_v33, %v298_v32 }
   0xe   :  { %v306_v38 = vrot.slane %v292_v34, %v298_v32  ;;  %v5245_v48 = vld [vmem:[%s7799_s1 + $0x1ec] ss:$40 sps:$4 sm:$0xff]   ;;  %v5205_v50 = vld [vmem:[%s7799_s1 + $0x320] ss:$40 sps:$4 sm:$0xff]   ;;  %v5251_v54 = vld [vmem:[%s7799_s1 + $0x23c] ss:$40 sps:$4 sm:$0xff]   ;;  %v307_v26 = vcombine.high %v299_v1, %v299_v1 }
   0xf   :  { %1360 = vmatpush1.bf16.msra.mxu0 %v5184_v7  ;;  %1440 = vmatpush1.bf16.msra.mxu1 %v5223_v23  ;;  %v329_v40 = vrot.slane %v315_v35, %v298_v32  ;;  %v5206_v53 = vld [vmem:[%s7799_s1 + $0x374] ss:$40 sps:$4 sm:$0xff]   ;;  %v5208_v55 = vld [vmem:[%s7799_s1 + $0x370] ss:$40 sps:$4 sm:$0xff]   ;;  %v5212_v57 = vld [vmem:[%s7799_s1 + $0x3c4] ss:$40 sps:$4 sm:$0xff]   ;;  %v334_v2 = vunpack.c.l.b16 %v322_v60  ;;  %v331_v7 = vunpack.c.l.b16 %v299_v1  ;;  %v330_v19 = vcombine.high %v322_v60, %v322_v60 }
  0x10   :  { %1361 = vmatprep.subr.bf16.mxu0 %v5185_v8  ;;  %1441 = vmatprep.subr.bf16.mxu1 %v5227_v24  ;;  %v332_v42 = vunpack.c.l.b16 %v306_v38  ;;  %v5253_v56 = vld [vmem:[%s7799_s1 + $0x238] ss:$40 sps:$4 sm:$0xff]   ;;  %v5257_v58 = vld [vmem:[%s7799_s1 + $0x28c] ss:$40 sps:$4 sm:$0xff]   ;;  %v5259_v61 = vld [vmem:[%s7799_s1 + $0x288] ss:$40 sps:$4 sm:$0xff]   ;;  %v333_v32 = vunpack.c.l.b16 %v307_v26 }
  0x11   :  { %v335_v43 = vunpack.c.l.b16 %v329_v40  ;;  %v5214_v59 = vld [vmem:[%s7799_s1 + $0x3c0] ss:$40 sps:$4 sm:$0xff]   ;;  %v5218_v62 = vld [vmem:[%s7799_s1 + $0x414] ss:$40 sps:$4 sm:$0xff]   ;;  %v5220_v0 = vld [vmem:[%s7799_s1 + $0x410] ss:$40 sps:$4 sm:$0xff]  }
  0x12   :  { %v5263_v63 = vld [vmem:[%s7799_s1 + $0x2dc] ss:$40 sps:$4 sm:$0xff]   ;;  %v5265_v3 = vld [vmem:[%s7799_s1 + $0x2d8] ss:$40 sps:$4 sm:$0xff]   ;;  %v5269_v5 = vld [vmem:[%s7799_s1 + $0x32c] ss:$40 sps:$4 sm:$0xff]  }
  0x13   :  { %1362 = vmatpush1.bf16.msra.mxu0 %v5187_v9  ;;  %1442 = vmatpush1.bf16.msra.mxu1 %v5229_v29  ;;  %v340_v47 = vrot.slane %v335_v43, 7  ;;  %v5224_v4 = vld [vmem:[%s7799_s1 + $0x464] ss:$40 sps:$4 sm:$0xff]   ;;  %v5226_v6 = vld [vmem:[%s7799_s1 + $0x460] ss:$40 sps:$4 sm:$0xff]   ;;  %v337_v8 = vrot.slane %v334_v2, 7 }
  0x14   :  { %1363 = vmatprep.subr.bf16.mxu0 %v5188_v10  ;;  %1443 = vmatprep.subr.bf16.mxu1 %v5233_v30  ;;  %v5271_v9 = vld [vmem:[%s7799_s1 + $0x328] ss:$40 sps:$4 sm:$0xff]   ;;  %v5230_v10 = vld [vmem:[%s7799_s1 + $0x4b4] ss:$40 sps:$4 sm:$0xff]   ;;  %v5277_v14 = vld [vmem:[%s7799_s1 + $0x378] ss:$40 sps:$4 sm:$0xff]  }
  0x15   :  { %v341_v49 = vsel %vm338_vm0, %v340_v47, %v332_v42  ;;  %v5275_v11 = vld [vmem:[%s7799_s1 + $0x37c] ss:$40 sps:$4 sm:$0xff]   ;;  %v5232_v12 = vld [vmem:[%s7799_s1 + $0x4b0] ss:$40 sps:$4 sm:$0xff]   ;;  %v5236_v18 = vld [vmem:[%s7799_s1 + $0x500] ss:$40 sps:$4 sm:$0xff]  }
  0x16   :  { %v6143_v51 = vpack.c.b16 %v341_v49, %v341_v49  ;;  %v5238_v15 = vld [vmem:[%s7799_s1 + $0x504] ss:$40 sps:$4 sm:$0xff]   ;;  %v5283_v21 = vld [vmem:[%s7799_s1 + $0x3c8] ss:$40 sps:$4 sm:$0xff]   ;;  %v5987_v24 = vmov 0  }
  0x17   :  { %1364 = vmatpush1.bf16.msra.mxu0 %v5190_v13  ;;  %1444 = vmatpush1.bf16.msra.mxu1 %v5235_v37  ;;  %v339_v13 = vsel %vm338_vm0, %v337_v8, %v331_v7  ;;  %v5242_v23 = vld [vmem:[%s7799_s1 + $0x550] ss:$40 sps:$4 sm:$0xff]   ;;  %v5293_v30 = vld [vmem:[%s7799_s1 + $0x46c] ss:$40 sps:$4 sm:$0xff]   ;;  %v5248_v31 = vld [vmem:[%s7799_s1 + $0x5a0] ss:$40 sps:$4 sm:$0xff]  }
  0x18   :  { %1365 = vmatprep.subr.bf16.mxu0 %v5191_v16  ;;  %1445 = vmatprep.subr.bf16.mxu1 %v5239_v41  ;;  %v5281_v16 = vld [vmem:[%s7799_s1 + $0x3cc] ss:$40 sps:$4 sm:$0xff]   ;;  %v6217_v17 = vpack.c.b16 %v339_v13, %v339_v13  ;;  %v5289_v29 = vld [vmem:[%s7799_s1 + $0x418] ss:$40 sps:$4 sm:$0xff]   ;;  %v5295_v35 = vld [vmem:[%s7799_s1 + $0x468] ss:$40 sps:$4 sm:$0xff]  }
  0x19   :  { %1385 = vmatprep.mubr.bf16.mxu0 %v6143_v51  ;;  %1467 = vmatprep.mubr.bf16.mxu1 %v6143_v51  ;;  %v5256_v34 = vld [vmem:[%s7799_s1 + $0x5f4] ss:$40 sps:$4 sm:$0xff]   ;;  %v5254_v37 = vld [vmem:[%s7799_s1 + $0x5f0] ss:$40 sps:$4 sm:$0xff]   ;;  %v5266_v47 = vld [vmem:[%s7799_s1 + $0x60] ss:$40 sps:$4 sm:$0xff]  }
  0x1a   :  { %v5301_v40 = vld [vmem:[%s7799_s1 + $0x4b8] ss:$40 sps:$4 sm:$0xff]   ;;  %v5307_v41 = vld [vmem:[%s7799_s1 + $0x50c] ss:$40 sps:$4 sm:$0xff]   ;;  %v5344_v2 = vld [vmem:[%s7799_s1 + $0x68] ss:$40 sps:$4 sm:$0xff]  }
  0x1b   :  { %1366 = vmatpush1.bf16.msra.mxu0 %v5193_v20  ;;  %1446 = vmatpush1.bf16.msra.mxu1 %v5241_v45  ;;  %v5244_v20 = vld [vmem:[%s7799_s1 + $0x554] ss:$40 sps:$4 sm:$0xff]   ;;  %v5260_v43 = vld [vmem:[%s7799_s1 + $0x10] ss:$40 sps:$4 sm:$0xff]   ;;  %v5302_v8 = vld [vmem:[%s7799_s1 + $0x240] ss:$40 sps:$4 sm:$0xff]  }
  0x1c   :  { %1367 = vmatprep.subr.bf16.mxu0 %v5194_v22  ;;  %1447 = vmatprep.subr.bf16.mxu1 %v5245_v48  ;;  %v5287_v22 = vld [vmem:[%s7799_s1 + $0x41c] ss:$40 sps:$4 sm:$0xff]   ;;  %v5305_v45 = vld [vmem:[%s7799_s1 + $0x508] ss:$40 sps:$4 sm:$0xff]   ;;  %v5311_v49 = vld [vmem:[%s7799_s1 + $0x558] ss:$40 sps:$4 sm:$0xff]  }
  0x1d   :  { %v5274_v48 = vld [vmem:[%s7799_s1 + $0xb4] ss:$40 sps:$4 sm:$0xff]   ;;  %v5284_v60 = vld [vmem:[%s7799_s1 + $0x150] ss:$40 sps:$4 sm:$0xff]   ;;  %v5316_v13 = vld [vmem:[%s7799_s1 + $0x2e4] ss:$40 sps:$4 sm:$0xff]  }
  0x1e   :  { %v5298_v1 = vld [vmem:[%s7799_s1 + $0x1f4] ss:$40 sps:$4 sm:$0xff]  }
  0x1f   :  { %1368 = vmatpush1.bf16.msra.mxu0 %v5196_v27  ;;  %1448 = vmatpush1.bf16.msra.mxu1 %v5247_v52  ;;  %v336_v27 = vunpack.c.l.b16 %v330_v19  ;;  %v5272_v52 = vld [vmem:[%s7799_s1 + $0xb0] ss:$40 sps:$4 sm:$0xff]   ;;  %v5358_v7 = vld [vmem:[%s7799_s1 + $0x10c] ss:$40 sps:$4 sm:$0xff]  }
  0x20   :  { %1369 = vmatprep.subr.bf16.mxu0 %v5197_v28  ;;  %1449 = vmatprep.subr.bf16.mxu1 %v5251_v54  ;;  %v5250_v28 = vld [vmem:[%s7799_s1 + $0x5a4] ss:$40 sps:$4 sm:$0xff]   ;;  %v5317_v54 = vld [vmem:[%s7799_s1 + $0x5a8] ss:$40 sps:$4 sm:$0xff]  }
  0x21   :  { %v342_v33 = vrot.slane %v336_v27, 7  ;;  %v5368_v19 = vld [vmem:[%s7799_s1 + $0x1a8] ss:$40 sps:$4 sm:$0xff]   ;;  %v5382_v26 = vld [vmem:[%s7799_s1 + $0x24c] ss:$40 sps:$4 sm:$0xff]  }
  0x22   :  { %v5326_v27 = vld [vmem:[%s7799_s1 + $0x380] ss:$40 sps:$4 sm:$0xff]  }
  0x23   :  { %1370 = vmatpush1.bf16.msra.mxu0 %v5199_v36  ;;  %1450 = vmatpush1.bf16.msra.mxu1 %v5253_v56  ;;  %v5299_v36 = vld [vmem:[%s7799_s1 + $0x4bc] ss:$40 sps:$4 sm:$0xff]   ;;  %v343_v38 = vsel %vm338_vm0, %v342_v33, %v333_v32  ;;  %v5278_v56 = vld [vmem:[%s7799_s1 + $0x100] ss:$40 sps:$4 sm:$0xff]  }
  0x24   :  { %1371 = vmatprep.subr.bf16.mxu0 %v5200_v39  ;;  %1451 = vmatprep.subr.bf16.mxu1 %v5257_v58  ;;  %v5262_v39 = vld [vmem:[%s7799_s1 + $0x14] ss:$40 sps:$4 sm:$0xff]   ;;  %v6270_v42 = vpack.c.b16 %v343_v38, %v343_v38  ;;  %v5323_v58 = vld [vmem:[%s7799_s1 + $0x5f8] ss:$40 sps:$4 sm:$0xff]   ;;  %v5334_v32 = vld [vmem:[%s7799_s1 + $0x424] ss:$40 sps:$4 sm:$0xff]  }
  0x25   :  { %v5386_v33 = vld [vmem:[%s7799_s1 + $0x298] ss:$40 sps:$4 sm:$0xff]   ;;  %v5400_v38 = vld [vmem:[%s7799_s1 + $0x33c] ss:$40 sps:$4 sm:$0xff]  }
  0x27   :  { %1372 = vmatpush1.bf16.msra.mxu0 %v5202_v44  ;;  %1452 = vmatpush1.bf16.msra.mxu1 %v5259_v61  ;;  %v5268_v44 = vld [vmem:[%s7799_s1 + $0x64] ss:$40 sps:$4 sm:$0xff]  }
  0x28   :  { %1373 = vmatprep.subr.bf16.mxu0 %v5203_v46  ;;  %1453 = vmatprep.subr.bf16.mxu1 %v5263_v63  ;;  %v5313_v46 = vld [vmem:[%s7799_s1 + $0x55c] ss:$40 sps:$4 sm:$0xff]   ;;  %v5346_v63 = vld [vmem:[%s7799_s1 + $0x6c] ss:$40 sps:$4 sm:$0xff]  }
  0x29   :  { %v5292_v61 = vld [vmem:[%s7799_s1 + $0x1a4] ss:$40 sps:$4 sm:$0xff]  }
  0x2b   :  { %1374 = vmatpush1.bf16.msra.mxu0 %v5205_v50  ;;  %1454 = vmatpush1.bf16.msra.mxu1 %v5265_v3  ;;  %v5319_v50 = vld [vmem:[%s7799_s1 + $0x5ac] ss:$40 sps:$4 sm:$0xff]   ;;  %v5352_v3 = vld [vmem:[%s7799_s1 + $0xbc] ss:$40 sps:$4 sm:$0xff]  }
  0x2c   :  { %1375 = vmatprep.subr.bf16.mxu0 %v5206_v53  ;;  %1455 = vmatprep.subr.bf16.mxu1 %v5269_v5  ;;  %v5280_v53 = vld [vmem:[%s7799_s1 + $0x104] ss:$40 sps:$4 sm:$0xff]  }
  0x2d   :  { %v5304_v5 = vld [vmem:[%s7799_s1 + $0x244] ss:$40 sps:$4 sm:$0xff]  }
  0x2f   :  { %1376 = vmatpush1.bf16.msra.mxu0 %v5208_v55  ;;  %1456 = vmatpush1.bf16.msra.mxu1 %v5271_v9  ;;  %v5325_v55 = vld [vmem:[%s7799_s1 + $0x5fc] ss:$40 sps:$4 sm:$0xff]  }
  0x30   :  { %1377 = vmatprep.subr.bf16.mxu0 %v5212_v57  ;;  %1457 = vmatprep.subr.bf16.mxu1 %v5275_v11  ;;  %v5286_v57 = vld [vmem:[%s7799_s1 + $0x154] ss:$40 sps:$4 sm:$0xff]  }
  0x31   :  { %v5310_v9 = vld [vmem:[%s7799_s1 + $0x294] ss:$40 sps:$4 sm:$0xff]  }
  0x32   :  { %v5364_v11 = vld [vmem:[%s7799_s1 + $0x15c] ss:$40 sps:$4 sm:$0xff]  }
  0x33   :  { %1378 = vmatpush1.bf16.msra.mxu0 %v5214_v59  ;;  %1458 = vmatpush1.bf16.msra.mxu1 %v5277_v14  ;;  %v5340_v59 = vld [vmem:[%s7799_s1 + $0x1c] ss:$40 sps:$4 sm:$0xff]   ;;  %v5362_v14 = vld [vmem:[%s7799_s1 + $0x158] ss:$40 sps:$4 sm:$0xff]  }
  0x34   :  { %1379 = vmatprep.subr.bf16.mxu0 %v5218_v62  ;;  %1459 = vmatprep.subr.bf16.mxu1 %v5281_v16  ;;  %v5338_v62 = vld [vmem:[%s7799_s1 + $0x18] ss:$40 sps:$4 sm:$0xff]  }
  0x35   :  { %v5314_v16 = vld [vmem:[%s7799_s1 + $0x2e0] ss:$40 sps:$4 sm:$0xff]  }
  0x37   :  { %1380 = vmatpush1.bf16.msra.mxu0 %v5220_v0  ;;  %1460 = vmatpush1.bf16.msra.mxu1 %v5283_v21  ;;  %v5290_v0 = vld [vmem:[%s7799_s1 + $0x1a0] ss:$40 sps:$4 sm:$0xff]   ;;  %v5320_v21 = vld [vmem:[%s7799_s1 + $0x330] ss:$40 sps:$4 sm:$0xff]  }
  0x38   :  { %1381 = vmatprep.subr.bf16.mxu0 %v5224_v4  ;;  %1461 = vmatprep.subr.bf16.mxu1 %v5287_v22  ;;  %v5296_v4 = vld [vmem:[%s7799_s1 + $0x1f0] ss:$40 sps:$4 sm:$0xff]   ;;  %v5328_v22 = vld [vmem:[%s7799_s1 + $0x384] ss:$40 sps:$4 sm:$0xff]  }
  0x3b   :  { %1382 = vmatpush1.bf16.msra.mxu0 %v5226_v6  ;;  %1462 = vmatpush1.bf16.msra.mxu1 %v5289_v29  ;;  %v5350_v6 = vld [vmem:[%s7799_s1 + $0xb8] ss:$40 sps:$4 sm:$0xff]   ;;  %v5380_v29 = vld [vmem:[%s7799_s1 + $0x248] ss:$40 sps:$4 sm:$0xff]  }
  0x3c   :  { %1383 = vmatprep.subr.bf16.mxu0 %v5230_v10  ;;  %1463 = vmatprep.subr.bf16.mxu1 %v5293_v30  ;;  %v5356_v10 = vld [vmem:[%s7799_s1 + $0x108] ss:$40 sps:$4 sm:$0xff]   ;;  %v5388_v30 = vld [vmem:[%s7799_s1 + $0x29c] ss:$40 sps:$4 sm:$0xff]  }
  0x3f   :  { %1384 = vmatpush1.bf16.msra.mxu0 %v5232_v12  ;;  %1464 = vmatpush1.bf16.msra.mxu1 %v5295_v35  ;;  %v5308_v12 = vld [vmem:[%s7799_s1 + $0x290] ss:$40 sps:$4 sm:$0xff]   ;;  %v5332_v35 = vld [vmem:[%s7799_s1 + $0x420] ss:$40 sps:$4 sm:$0xff]  }
  0x40   :  { %1394 = vmatprep.subr.bf16.mxu0 %v5238_v15  ;;  %1465 = vmatprep.subr.bf16.mxu1 %v5299_v36  ;;  %v5370_v15 = vld [vmem:[%s7799_s1 + $0x1ac] ss:$40 sps:$4 sm:$0xff]  }
  0x41   :  { %v5337_v36 = vld [vmem:[%s7799_s1 + $0x474] ss:$40 sps:$4 sm:$0xff]  }
  0x42   :  { %1386 = vmatmul.mubr.bf16.vlgmr.msra.gmra.mrb[0].mxu0 %v6217_v17 }
  0x43   :  { %1395 = vmatpush1.bf16.msra.mxu0 %v5236_v18  ;;  %1426 = vmatprep.mubr.bf16.mxu0 %v5987_v24  ;;  %v5322_v18 = vld [vmem:[%s7799_s1 + $0x334] ss:$40 sps:$4 sm:$0xff]  }
  0x44   :  { %1396 = vmatprep.subr.bf16.mxu0 %v5244_v20  ;;  %1466 = vmatpush1.bf16.msra.mxu1 %v5301_v40  ;;  %v5376_v20 = vld [vmem:[%s7799_s1 + $0x1fc] ss:$40 sps:$4 sm:$0xff]  }
  0x45   :  { %1476 = vmatprep.subr.bf16.mxu1 %v5307_v41  ;;  %v5343_v40 = vld [vmem:[%s7799_s1 + $0x4c4] ss:$40 sps:$4 sm:$0xff]   ;;  %v5398_v41 = vld [vmem:[%s7799_s1 + $0x338] ss:$40 sps:$4 sm:$0xff]  }
  0x47   :  { %1397 = vmatpush1.bf16.msra.mxu0 %v5242_v23  ;;  %1468 = vmatmul.mubr.bf16.vlgmr.msra.gmra.mrb[0].mxu1 %v6217_v17  ;;  %v5374_v23 = vld [vmem:[%s7799_s1 + $0x1f8] ss:$40 sps:$4 sm:$0xff]  }
  0x48   :  { %1398 = vmatprep.subr.bf16.mxu0 %v5250_v28  ;;  %1477 = vmatpush1.bf16.msra.mxu1 %v5305_v45  ;;  %v5331_v28 = vld [vmem:[%s7799_s1 + $0x3d4] ss:$40 sps:$4 sm:$0xff]  }
  0x49   :  { %1478 = vmatprep.subr.bf16.mxu1 %v5313_v46  ;;  %1508 = vmatprep.mubr.bf16.mxu1 %v5987_v24  ;;  %v5349_v45 = vld [vmem:[%s7799_s1 + $0x514] ss:$40 sps:$4 sm:$0xff]   ;;  %v5404_v46 = vld [vmem:[%s7799_s1 + $0x388] ss:$40 sps:$4 sm:$0xff]  }
  0x4b   :  { %1399 = vmatpush1.bf16.msra.mxu0 %v5248_v31  ;;  %v5329_v31 = vld [vmem:[%s7799_s1 + $0x3d0] ss:$40 sps:$4 sm:$0xff]  }
  0x4c   :  { %1400 = vmatprep.subr.bf16.mxu0 %v5256_v34  ;;  %1479 = vmatpush1.bf16.msra.mxu1 %v5311_v49  ;;  %v5394_v34 = vld [vmem:[%s7799_s1 + $0x2ec] ss:$40 sps:$4 sm:$0xff]  }
  0x4d   :  { %1480 = vmatprep.subr.bf16.mxu1 %v5319_v50  ;;  %v5355_v49 = vld [vmem:[%s7799_s1 + $0x564] ss:$40 sps:$4 sm:$0xff]   ;;  %v5410_v50 = vld [vmem:[%s7799_s1 + $0x3d8] ss:$40 sps:$4 sm:$0xff]  }
  0x4f   :  { %1401 = vmatpush1.bf16.msra.mxu0 %v5254_v37  ;;  %v5392_v37 = vld [vmem:[%s7799_s1 + $0x2e8] ss:$40 sps:$4 sm:$0xff]  }
  0x50   :  { %1517 = vmatprep.subr.bf16.mxu0 %v5262_v39  ;;  %1481 = vmatpush1.bf16.msra.mxu1 %v5317_v54  ;;  %v5335_v39 = vld [vmem:[%s7799_s1 + $0x470] ss:$40 sps:$4 sm:$0xff]   ;;  %v5361_v54 = vld [vmem:[%s7799_s1 + $0x5b4] ss:$40 sps:$4 sm:$0xff]  }
  0x51   :  { %1482 = vmatprep.subr.bf16.mxu1 %v5325_v55  ;;  %v5416_v55 = vld [vmem:[%s7799_s1 + $0x428] ss:$40 sps:$4 sm:$0xff]  }
  0x52   :  { %4703 = vmatmul.mubr.msk.bf16.vlgmr.msra.gmra.mrb[0].mxu0 %vm1349_vm1, %v6270_v42 }
  0x53   :  { %1518 = vmatpush1.bf16.msra.mxu0 %v5260_v43  ;;  %1549 = vmatprep.mubr.bf16.mxu0 %v6143_v51  ;;  %v5406_v43 = vld [vmem:[%s7799_s1 + $0x38c] ss:$40 sps:$4 sm:$0xff]  }
  0x54   :  { %1519 = vmatprep.subr.bf16.mxu0 %v5268_v44  ;;  %1483 = vmatpush1.bf16.msra.mxu1 %v5323_v58  ;;  %v5341_v44 = vld [vmem:[%s7799_s1 + $0x4c0] ss:$40 sps:$4 sm:$0xff]   ;;  %v5367_v58 = vld [vmem:[%s7799_s1 + $0x604] ss:$40 sps:$4 sm:$0xff]  }
  0x55   :  { %1599 = vmatprep.subr.bf16.mxu1 %v5340_v59  ;;  %v5422_v59 = vld [vmem:[%s7799_s1 + $0x478] ss:$40 sps:$4 sm:$0xff]  }
  0x57   :  { %1520 = vmatpush1.bf16.msra.mxu0 %v5266_v47  ;;  %4704 = vmatmul.mubr.msk.bf16.vlgmr.msra.gmra.mrb[0].mxu1 %vm1349_vm1, %v6270_v42  ;;  %v5412_v47 = vld [vmem:[%s7799_s1 + $0x3dc] ss:$40 sps:$4 sm:$0xff]  }
  0x58   :  { %1521 = vmatprep.subr.bf16.mxu0 %v5274_v48  ;;  %1600 = vmatpush1.bf16.msra.mxu1 %v5338_v62  ;;  %v5347_v48 = vld [vmem:[%s7799_s1 + $0x510] ss:$40 sps:$4 sm:$0xff]   ;;  %v5373_v62 = vld [vmem:[%s7799_s1 + $0x24] ss:$40 sps:$4 sm:$0xff]  }
  0x59   :  { %1601 = vmatprep.subr.bf16.mxu1 %v5346_v63  ;;  %1631 = vmatprep.mubr.bf16.mxu1 %v6143_v51  ;;  %v5428_v63 = vld [vmem:[%s7799_s1 + $0x4c8] ss:$40 sps:$4 sm:$0xff]  }
  0x5b   :  { %1522 = vmatpush1.bf16.msra.mxu0 %v5272_v52  ;;  %v5418_v52 = vld [vmem:[%s7799_s1 + $0x42c] ss:$40 sps:$4 sm:$0xff]  }
  0x5c   :  { %1523 = vmatprep.subr.bf16.mxu0 %v5280_v53  ;;  %1602 = vmatpush1.bf16.msra.mxu1 %v5344_v2  ;;  %v5353_v53 = vld [vmem:[%s7799_s1 + $0x560] ss:$40 sps:$4 sm:$0xff]   ;;  %v5379_v2 = vld [vmem:[%s7799_s1 + $0x74] ss:$40 sps:$4 sm:$0xff]  }
  0x5d   :  { %1603 = vmatprep.subr.bf16.mxu1 %v5352_v3  ;;  %v5434_v3 = vld [vmem:[%s7799_s1 + $0x518] ss:$40 sps:$4 sm:$0xff]  }
  0x5f   :  { %1524 = vmatpush1.bf16.msra.mxu0 %v5278_v56  ;;  %v5424_v56 = vld [vmem:[%s7799_s1 + $0x47c] ss:$40 sps:$4 sm:$0xff]  }
  0x60   :  { %1525 = vmatprep.subr.bf16.mxu0 %v5286_v57  ;;  %1604 = vmatpush1.bf16.msra.mxu1 %v5350_v6  ;;  %v5359_v57 = vld [vmem:[%s7799_s1 + $0x5b0] ss:$40 sps:$4 sm:$0xff]   ;;  %v5385_v6 = vld [vmem:[%s7799_s1 + $0xc4] ss:$40 sps:$4 sm:$0xff]  }
  0x61   :  { %1605 = vmatprep.subr.bf16.mxu1 %v5358_v7  ;;  %v5440_v7 = vld [vmem:[%s7799_s1 + $0x568] ss:$40 sps:$4 sm:$0xff]  }
  0x63   :  { %1526 = vmatpush1.bf16.msra.mxu0 %v5284_v60  ;;  %v5430_v60 = vld [vmem:[%s7799_s1 + $0x4cc] ss:$40 sps:$4 sm:$0xff]  }
  0x64   :  { %1527 = vmatprep.subr.bf16.mxu0 %v5292_v61  ;;  %1606 = vmatpush1.bf16.msra.mxu1 %v5356_v10  ;;  %v5365_v61 = vld [vmem:[%s7799_s1 + $0x600] ss:$40 sps:$4 sm:$0xff]   ;;  %v5391_v10 = vld [vmem:[%s7799_s1 + $0x114] ss:$40 sps:$4 sm:$0xff]  }
  0x65   :  { %1607 = vmatprep.subr.bf16.mxu1 %v5364_v11  ;;  %v5446_v11 = vld [vmem:[%s7799_s1 + $0x5b8] ss:$40 sps:$4 sm:$0xff]  }
  0x67   :  { %1528 = vmatpush1.bf16.msra.mxu0 %v5290_v0  ;;  %v5436_v0 = vld [vmem:[%s7799_s1 + $0x51c] ss:$40 sps:$4 sm:$0xff]  }
  0x68   :  { %1529 = vmatprep.subr.bf16.mxu0 %v5298_v1  ;;  %1608 = vmatpush1.bf16.msra.mxu1 %v5362_v14  ;;  %v5371_v1 = vld [vmem:[%s7799_s1 + $0x20] ss:$40 sps:$4 sm:$0xff]  }
  0x69   :  { %1609 = vmatprep.subr.bf16.mxu1 %v5370_v15  ;;  %v5452_v14 = vld [vmem:[%s7799_s1 + $0x608] ss:$40 sps:$4 sm:$0xff]   ;;  %v5475_v15 = vld [vmem:[%s7801_s3 + $0x4] ss:$16 sps:$4 sm:$0xff]  }
  0x6b   :  { %1530 = vmatpush1.bf16.msra.mxu0 %v5296_v4  ;;  %v5442_v4 = vld [vmem:[%s7799_s1 + $0x56c] ss:$40 sps:$4 sm:$0xff]  }
  0x6c   :  { %1531 = vmatprep.subr.bf16.mxu0 %v5304_v5  ;;  %1610 = vmatpush1.bf16.msra.mxu1 %v5368_v19  ;;  %v5377_v5 = vld [vmem:[%s7799_s1 + $0x70] ss:$40 sps:$4 sm:$0xff]  }
  0x6d   :  { %1611 = vmatprep.subr.bf16.mxu1 %v5376_v20  ;;  %v5473_v19 = vld [vmem:[%s7801_s3] ss:$16 sps:$4 sm:$0xff]   ;;  %v5481_v20 = vld [vmem:[%s7801_s3 + $0x24] ss:$16 sps:$4 sm:$0xff]  }
  0x6f   :  { %1532 = vmatpush1.bf16.msra.mxu0 %v5302_v8  ;;  %v5448_v8 = vld [vmem:[%s7799_s1 + $0x5bc] ss:$40 sps:$4 sm:$0xff]  }
  0x70   :  { %1533 = vmatprep.subr.bf16.mxu0 %v5310_v9  ;;  %1612 = vmatpush1.bf16.msra.mxu1 %v5374_v23  ;;  %v5383_v9 = vld [vmem:[%s7799_s1 + $0xc0] ss:$40 sps:$4 sm:$0xff]  }
  0x71   :  { %1613 = vmatprep.subr.bf16.mxu1 %v5382_v26  ;;  %v5479_v23 = vld [vmem:[%s7801_s3 + $0x20] ss:$16 sps:$4 sm:$0xff]   ;;  %v5487_v26 = vld [vmem:[%s7801_s3 + $0x44] ss:$16 sps:$4 sm:$0xff]  }
  0x73   :  { %1534 = vmatpush1.bf16.msra.mxu0 %v5308_v12  ;;  %v5389_v12 = vld [vmem:[%s7799_s1 + $0x110] ss:$40 sps:$4 sm:$0xff]  }
  0x74   :  { %1535 = vmatprep.subr.bf16.mxu0 %v5316_v13  ;;  %1614 = vmatpush1.bf16.msra.mxu1 %v5380_v29  ;;  %v5397_v13 = vld [vmem:[%s7799_s1 + $0x164] ss:$40 sps:$4 sm:$0xff]   ;;  %v5485_v29 = vld [vmem:[%s7801_s3 + $0x40] ss:$16 sps:$4 sm:$0xff]  }
  0x75   :  { %1615 = vmatprep.subr.bf16.mxu1 %v5388_v30  ;;  %v5413_v30 = vld [vmem:[%s7799_s1 + $0x250] ss:$40 sps:$4 sm:$0xff]  }
  0x77   :  { %1536 = vmatpush1.bf16.msra.mxu0 %v5314_v16  ;;  %v5395_v16 = vld [vmem:[%s7799_s1 + $0x160] ss:$40 sps:$4 sm:$0xff]  }
  0x78   :  { %1537 = vmatprep.subr.bf16.mxu0 %v5322_v18  ;;  %1616 = vmatpush1.bf16.msra.mxu1 %v5386_v33  ;;  %v5403_v18 = vld [vmem:[%s7799_s1 + $0x1b4] ss:$40 sps:$4 sm:$0xff]   ;;  %v5491_v33 = vld [vmem:[%s7801_s3 + $0x60] ss:$16 sps:$4 sm:$0xff]  }
  0x79   :  { %1617 = vmatprep.subr.bf16.mxu1 %v5394_v34  ;;  %v5419_v34 = vld [vmem:[%s7799_s1 + $0x2a0] ss:$40 sps:$4 sm:$0xff]  }
  0x7b   :  { %1538 = vmatpush1.bf16.msra.mxu0 %v5320_v21  ;;  %v5401_v21 = vld [vmem:[%s7799_s1 + $0x1b0] ss:$40 sps:$4 sm:$0xff]  }
  0x7c   :  { %1539 = vmatprep.subr.bf16.mxu0 %v5328_v22  ;;  %1618 = vmatpush1.bf16.msra.mxu1 %v5392_v37  ;;  %v5409_v22 = vld [vmem:[%s7799_s1 + $0x204] ss:$40 sps:$4 sm:$0xff]   ;;  %v5497_v37 = vld [vmem:[%s7801_s3 + $0x80] ss:$16 sps:$4 sm:$0xff]  }
  0x7d   :  { %1619 = vmatprep.subr.bf16.mxu1 %v5400_v38  ;;  %v5425_v38 = vld [vmem:[%s7799_s1 + $0x2f0] ss:$40 sps:$4 sm:$0xff]  }
  0x7f   :  { %1540 = vmatpush1.bf16.msra.mxu0 %v5326_v27  ;;  %v5407_v27 = vld [vmem:[%s7799_s1 + $0x200] ss:$40 sps:$4 sm:$0xff]  }
  0x80   :  { %1541 = vmatprep.subr.bf16.mxu0 %v5331_v28  ;;  %1620 = vmatpush1.bf16.msra.mxu1 %v5398_v41  ;;  %v5415_v28 = vld [vmem:[%s7799_s1 + $0x254] ss:$40 sps:$4 sm:$0xff]   ;;  %v5503_v41 = vld [vmem:[%s7801_s3 + $0xa0] ss:$16 sps:$4 sm:$0xff]  }
  0x81   :  { %1621 = vmatprep.subr.bf16.mxu1 %v5406_v43  ;;  %v5431_v43 = vld [vmem:[%s7799_s1 + $0x340] ss:$40 sps:$4 sm:$0xff]  }
  0x83   :  { %1542 = vmatpush1.bf16.msra.mxu0 %v5329_v31  ;;  %v5493_v31 = vld [vmem:[%s7801_s3 + $0x64] ss:$16 sps:$4 sm:$0xff]  }
  0x84   :  { %1543 = vmatprep.subr.bf16.mxu0 %v5334_v32  ;;  %1622 = vmatpush1.bf16.msra.mxu1 %v5404_v46  ;;  %v5421_v32 = vld [vmem:[%s7799_s1 + $0x2a4] ss:$40 sps:$4 sm:$0xff]   ;;  %v5509_v46 = vld [vmem:[%s7801_s3 + $0xc0] ss:$16 sps:$4 sm:$0xff]  }
  0x85   :  { %1623 = vmatprep.subr.bf16.mxu1 %v5412_v47  ;;  %v5437_v47 = vld [vmem:[%s7799_s1 + $0x390] ss:$40 sps:$4 sm:$0xff]  }
  0x87   :  { %1544 = vmatpush1.bf16.msra.mxu0 %v5332_v35  ;;  %v5499_v35 = vld [vmem:[%s7801_s3 + $0x84] ss:$16 sps:$4 sm:$0xff]  }
  0x88   :  { %1545 = vmatprep.subr.bf16.mxu0 %v5337_v36  ;;  %1624 = vmatpush1.bf16.msra.mxu1 %v5410_v50  ;;  %v5427_v36 = vld [vmem:[%s7799_s1 + $0x2f4] ss:$40 sps:$4 sm:$0xff]   ;;  %v5515_v50 = vld [vmem:[%s7801_s3 + $0xe0] ss:$16 sps:$4 sm:$0xff]  }
  0x89   :  { %1625 = vmatprep.subr.bf16.mxu1 %v5418_v52  ;;  %v5443_v52 = vld [vmem:[%s7799_s1 + $0x3e0] ss:$40 sps:$4 sm:$0xff]  }
  0x8b   :  { %1546 = vmatpush1.bf16.msra.mxu0 %v5335_v39  ;;  %v5505_v39 = vld [vmem:[%s7801_s3 + $0xa4] ss:$16 sps:$4 sm:$0xff]  }
  0x8c   :  { %1547 = vmatprep.subr.bf16.mxu0 %v5343_v40  ;;  %1626 = vmatpush1.bf16.msra.mxu1 %v5416_v55  ;;  %v5433_v40 = vld [vmem:[%s7799_s1 + $0x344] ss:$40 sps:$4 sm:$0xff]   ;;  %v5521_v55 = vld [vmem:[%s7801_s3 + $0x100] ss:$16 sps:$4 sm:$0xff]  }
  0x8d   :  { %1627 = vmatprep.subr.bf16.mxu1 %v5424_v56  ;;  %v5449_v56 = vld [vmem:[%s7799_s1 + $0x430] ss:$40 sps:$4 sm:$0xff]  }
  0x8f   :  { %1548 = vmatpush1.bf16.msra.mxu0 %v5341_v44  ;;  %v5511_v44 = vld [vmem:[%s7801_s3 + $0xc4] ss:$16 sps:$4 sm:$0xff]  }
  0x90   :  { %1558 = vmatprep.subr.bf16.mxu0 %v5349_v45  ;;  %1628 = vmatpush1.bf16.msra.mxu1 %v5422_v59  ;;  %v5439_v45 = vld [vmem:[%s7799_s1 + $0x394] ss:$40 sps:$4 sm:$0xff]   ;;  %v5527_v59 = vld [vmem:[%s7801_s3 + $0x120] ss:$16 sps:$4 sm:$0xff]  }
  0x91   :  { %1629 = vmatprep.subr.bf16.mxu1 %v5430_v60  ;;  %v5455_v60 = vld [vmem:[%s7799_s1 + $0x480] ss:$40 sps:$4 sm:$0xff]  }
  0x92   :  { %1550 = vmatmul.mubr.bf16.vlgmr.msra.gmra.mrb[4].mxu0 %v6217_v17 }
  0x93   :  { %1559 = vmatpush1.bf16.msra.mxu0 %v5347_v48  ;;  %1590 = vmatprep.mubr.bf16.mxu0 %v5987_v24  ;;  %v5517_v48 = vld [vmem:[%s7801_s3 + $0xe4] ss:$16 sps:$4 sm:$0xff]  }
  0x94   :  { %1560 = vmatprep.subr.bf16.mxu0 %v5355_v49  ;;  %1630 = vmatpush1.bf16.msra.mxu1 %v5428_v63  ;;  %v5445_v49 = vld [vmem:[%s7799_s1 + $0x3e4] ss:$40 sps:$4 sm:$0xff]   ;;  %v5533_v63 = vld [vmem:[%s7801_s3 + $0x140] ss:$16 sps:$4 sm:$0xff]  }
  0x95   :  { %1640 = vmatprep.subr.bf16.mxu1 %v5436_v0  ;;  %v5458_v0 = vld [vmem:[%s7799_s1 + $0x4d0] ss:$40 sps:$4 sm:$0xff]  }
  0x97   :  { %1561 = vmatpush1.bf16.msra.mxu0 %v5353_v53  ;;  %1632 = vmatmul.mubr.bf16.vlgmr.msra.gmra.mrb[4].mxu1 %v6217_v17  ;;  %v5523_v53 = vld [vmem:[%s7801_s3 + $0x104] ss:$16 sps:$4 sm:$0xff]  }
  0x98   :  { %1562 = vmatprep.subr.bf16.mxu0 %v5361_v54  ;;  %1641 = vmatpush1.bf16.msra.mxu1 %v5434_v3  ;;  %v5451_v54 = vld [vmem:[%s7799_s1 + $0x434] ss:$40 sps:$4 sm:$0xff]   ;;  %v5539_v3 = vld [vmem:[%s7801_s3 + $0x160] ss:$16 sps:$4 sm:$0xff]  }
  0x99   :  { %1642 = vmatprep.subr.bf16.mxu1 %v5442_v4  ;;  %1672 = vmatprep.mubr.bf16.mxu1 %v5987_v24  ;;  %v5461_v4 = vld [vmem:[%s7799_s1 + $0x520] ss:$40 sps:$4 sm:$0xff]  }
  0x9b   :  { %1563 = vmatpush1.bf16.msra.mxu0 %v5359_v57  ;;  %v5529_v57 = vld [vmem:[%s7801_s3 + $0x124] ss:$16 sps:$4 sm:$0xff]  }
  0x9c   :  { %1564 = vmatprep.subr.bf16.mxu0 %v5367_v58  ;;  %1643 = vmatpush1.bf16.msra.mxu1 %v5440_v7  ;;  %v5457_v58 = vld [vmem:[%s7799_s1 + $0x484] ss:$40 sps:$4 sm:$0xff]   ;;  %v5545_v7 = vld [vmem:[%s7801_s3 + $0x180] ss:$16 sps:$4 sm:$0xff]  }
  0x9d   :  { %1644 = vmatprep.subr.bf16.mxu1 %v5448_v8  ;;  %v5464_v8 = vld [vmem:[%s7799_s1 + $0x570] ss:$40 sps:$4 sm:$0xff]  }
  0x9f   :  { %1565 = vmatpush1.bf16.msra.mxu0 %v5365_v61  ;;  %v5535_v61 = vld [vmem:[%s7801_s3 + $0x144] ss:$16 sps:$4 sm:$0xff]  }
  0xa0   :  { %1681 = vmatprep.subr.bf16.mxu0 %v5373_v62  ;;  %1645 = vmatpush1.bf16.msra.mxu1 %v5446_v11  ;;  %v5460_v62 = vld [vmem:[%s7799_s1 + $0x4d4] ss:$40 sps:$4 sm:$0xff]   ;;  %v5551_v11 = vld [vmem:[%s7801_s3 + $0x1a0] ss:$16 sps:$4 sm:$0xff]  }
  0xa2   :  { %4705 = vmatmul.mubr.msk.bf16.vlgmr.msra.gmra.mrb[4].mxu0 %vm1349_vm1, %v6270_v42 }
  0xa3   :  { %1682 = vmatpush1.bf16.msra.mxu0 %v5371_v1  ;;  %1713 = vmatprep.mubr.bf16.mxu0 %v6143_v51  ;;  %v5454_v51 = vld [vmem:[%s7799_s1 + $0x60c] ss:$40 sps:$4 sm:$0xff]  }
  0xa4   :  { %1683 = vmatprep.subr.bf16.mxu0 %v5379_v2  ;;  %1646 = vmatprep.subr.bf16.mxu1 %v5454_v51  ;;  %v5541_v1 = vld [vmem:[%s7801_s3 + $0x164] ss:$16 sps:$4 sm:$0xff]   ;;  %v5467_v51 = vld [vmem:[%s7799_s1 + $0x5c0] ss:$40 sps:$4 sm:$0xff]  }
  0xa5   :  { %1647 = vmatpush1.bf16.msra.mxu1 %v5452_v14  ;;  %v5463_v2 = vld [vmem:[%s7799_s1 + $0x524] ss:$40 sps:$4 sm:$0xff]  }
  0xa6   :  { %3735 = vmatprep.subr.bf16.mxu1 %v5475_v15  ;;  %v5565_v14 = vld [vmem:[%s7801_s3 + $0x1e4] ss:$16 sps:$4 sm:$0xff]   ;;  %v5478_v15 = vld [vmem:[%s7801_s3 + $0xc] ss:$16 sps:$4 sm:$0xff]  }
  0xa7   :  { %1684 = vmatpush1.bf16.msra.mxu0 %v5377_v5  ;;  %v5547_v5 = vld [vmem:[%s7801_s3 + $0x184] ss:$16 sps:$4 sm:$0xff]  }
  0xa8   :  { %1685 = vmatprep.subr.bf16.mxu0 %v5385_v6  ;;  %4706 = vmatmul.mubr.msk.bf16.vlgmr.msra.gmra.mrb[4].mxu1 %vm1349_vm1, %v6270_v42  ;;  %v5466_v6 = vld [vmem:[%s7799_s1 + $0x574] ss:$40 sps:$4 sm:$0xff]  }
  0xa9   :  { %3736 = vmatpush1.bf16.msra.mxu1 %v5473_v19  ;;  %v5476_v19 = vld [vmem:[%s7801_s3 + $0x8] ss:$16 sps:$4 sm:$0xff]  }
  0xaa   :  { %3737 = vmatprep.subr.bf16.mxu1 %v5481_v20  ;;  %v5484_v20 = vld [vmem:[%s7801_s3 + $0x2c] ss:$16 sps:$4 sm:$0xff]  }
  0xab   :  { %1686 = vmatpush1.bf16.msra.mxu0 %v5383_v9  ;;  %v5553_v9 = vld [vmem:[%s7801_s3 + $0x1a4] ss:$16 sps:$4 sm:$0xff]  }
  0xac   :  { %1687 = vmatprep.subr.bf16.mxu0 %v5391_v10  ;;  %v5469_v10 = vld [vmem:[%s7799_s1 + $0x5c4] ss:$40 sps:$4 sm:$0xff]  }
  0xad   :  { %3738 = vmatpush1.bf16.msra.mxu1 %v5479_v23  ;;  %v5488_v23 = vld [vmem:[%s7801_s3 + $0x48] ss:$16 sps:$4 sm:$0xff]  }
  0xae   :  { %3739 = vmatprep.subr.bf16.mxu1 %v5487_v26  ;;  %v5496_v26 = vld [vmem:[%s7801_s3 + $0x6c] ss:$16 sps:$4 sm:$0xff]  }
  0xaf   :  { %1688 = vmatpush1.bf16.msra.mxu0 %v5389_v12  ;;  %v5472_v12 = vld [vmem:[%s7799_s1 + $0x614] ss:$40 sps:$4 sm:$0xff]  }
  0xb0   :  { %1689 = vmatprep.subr.bf16.mxu0 %v5397_v13  ;;  %v5557_v13 = vld [vmem:[%s7801_s3 + $0x1c0] ss:$16 sps:$4 sm:$0xff]  }
  0xb1   :  { %3740 = vmatpush1.bf16.msra.mxu1 %v5485_v29  ;;  %v5508_v29 = vld [vmem:[%s7801_s3 + $0xac] ss:$16 sps:$4 sm:$0xff]  }
  0xb2   :  { %3741 = vmatprep.subr.bf16.mxu1 %v5493_v31  ;;  %v5514_v31 = vld [vmem:[%s7801_s3 + $0xcc] ss:$16 sps:$4 sm:$0xff]  }
  0xb3   :  { %1690 = vmatpush1.bf16.msra.mxu0 %v5395_v16  ;;  %v5563_v16 = vld [vmem:[%s7801_s3 + $0x1e0] ss:$16 sps:$4 sm:$0xff]  }
  0xb4   :  { %1691 = vmatprep.subr.bf16.mxu0 %v5403_v18  ;;  %v5571_v18 = vld [vmem:[%s7801_s3 + $0x204] ss:$16 sps:$4 sm:$0xff]  }
  0xb5   :  { %3742 = vmatpush1.bf16.msra.mxu1 %v5491_v33  ;;  %v5520_v33 = vld [vmem:[%s7801_s3 + $0xec] ss:$16 sps:$4 sm:$0xff]  }
  0xb6   :  { %3743 = vmatprep.subr.bf16.mxu1 %v5499_v35  ;;  %v5526_v35 = vld [vmem:[%s7801_s3 + $0x10c] ss:$16 sps:$4 sm:$0xff]  }
  0xb7   :  { %1692 = vmatpush1.bf16.msra.mxu0 %v5401_v21  ;;  %v5482_v21 = vld [vmem:[%s7801_s3 + $0x28] ss:$16 sps:$4 sm:$0xff]  }
  0xb8   :  { %1693 = vmatprep.subr.bf16.mxu0 %v5409_v22  ;;  %v5490_v22 = vld [vmem:[%s7801_s3 + $0x4c] ss:$16 sps:$4 sm:$0xff]  }
  0xb9   :  { %3744 = vmatpush1.bf16.msra.mxu1 %v5497_v37  ;;  %v5532_v37 = vld [vmem:[%s7801_s3 + $0x12c] ss:$16 sps:$4 sm:$0xff]  }
  0xba   :  { %3745 = vmatprep.subr.bf16.mxu1 %v5505_v39  ;;  %v5538_v39 = vld [vmem:[%s7801_s3 + $0x14c] ss:$16 sps:$4 sm:$0xff]  }
  0xbb   :  { %1694 = vmatpush1.bf16.msra.mxu0 %v5407_v27  ;;  %v5502_v27 = vld [vmem:[%s7801_s3 + $0x8c] ss:$16 sps:$4 sm:$0xff]  }
  0xbc   :  { %1695 = vmatprep.subr.bf16.mxu0 %v5415_v28  ;;  %v5500_v28 = vld [vmem:[%s7801_s3 + $0x88] ss:$16 sps:$4 sm:$0xff]  }
  0xbd   :  { %3746 = vmatpush1.bf16.msra.mxu1 %v5503_v41  ;;  %v5544_v41 = vld [vmem:[%s7801_s3 + $0x16c] ss:$16 sps:$4 sm:$0xff]  }
  0xbe   :  { %3747 = vmatprep.subr.bf16.mxu1 %v5511_v44  ;;  %v5550_v44 = vld [vmem:[%s7801_s3 + $0x18c] ss:$16 sps:$4 sm:$0xff]  }
  0xbf   :  { %1696 = vmatpush1.bf16.msra.mxu0 %v5413_v30  ;;  %v5506_v30 = vld [vmem:[%s7801_s3 + $0xa8] ss:$16 sps:$4 sm:$0xff]  }
  0xc0   :  { %1697 = vmatprep.subr.bf16.mxu0 %v5421_v32  ;;  %v5512_v32 = vld [vmem:[%s7801_s3 + $0xc8] ss:$16 sps:$4 sm:$0xff]  }
  0xc1   :  { %3748 = vmatpush1.bf16.msra.mxu1 %v5509_v46  ;;  %v6851_v46 = vld [vmem:[%s7802_s2] sm:$0xff] }
  0xc2   :  { %3749 = vmatprep.subr.bf16.mxu1 %v5517_v48  ;;  %v5556_v48 = vld [vmem:[%s7801_s3 + $0x1ac] ss:$16 sps:$4 sm:$0xff]  }
  0xc3   :  { %1698 = vmatpush1.bf16.msra.mxu0 %v5419_v34  ;;  %v5518_v34 = vld [vmem:[%s7801_s3 + $0xe8] ss:$16 sps:$4 sm:$0xff]  }
  0xc4   :  { %1699 = vmatprep.subr.bf16.mxu0 %v5427_v36  ;;  %v5524_v36 = vld [vmem:[%s7801_s3 + $0x108] ss:$16 sps:$4 sm:$0xff]  }
  0xc5   :  { %3750 = vmatpush1.bf16.msra.mxu1 %v5515_v50  ;;  %v5554_v50 = vld [vmem:[%s7801_s3 + $0x1a8] ss:$16 sps:$4 sm:$0xff]  }
  0xc6   :  { %3751 = vmatprep.subr.bf16.mxu1 %v5523_v53  ;;  %v5562_v53 = vld [vmem:[%s7801_s3 + $0x1cc] ss:$16 sps:$4 sm:$0xff]  }
  0xc7   :  { %1700 = vmatpush1.bf16.msra.mxu0 %v5425_v38  ;;  %v5530_v38 = vld [vmem:[%s7801_s3 + $0x128] ss:$16 sps:$4 sm:$0xff]  }
  0xc8   :  { %1701 = vmatprep.subr.bf16.mxu0 %v5433_v40  ;;  %v5536_v40 = vld [vmem:[%s7801_s3 + $0x148] ss:$16 sps:$4 sm:$0xff]  }
  0xc9   :  { %3752 = vmatpush1.bf16.msra.mxu1 %v5521_v55 }
  0xca   :  { %3753 = vmatprep.subr.bf16.mxu1 %v5529_v57 }
  0xcb   :  { %1702 = vmatpush1.bf16.msra.mxu0 %v5431_v43  ;;  %v5542_v43 = vld [vmem:[%s7801_s3 + $0x168] ss:$16 sps:$4 sm:$0xff]  }
  0xcc   :  { %1703 = vmatprep.subr.bf16.mxu0 %v5439_v45  ;;  %v5548_v45 = vld [vmem:[%s7801_s3 + $0x188] ss:$16 sps:$4 sm:$0xff]  }
  0xcd   :  { %3754 = vmatpush1.bf16.msra.mxu1 %v5527_v59  ;;  %v5568_v59 = vld [vmem:[%s7801_s3 + $0x1ec] ss:$16 sps:$4 sm:$0xff]  }
  0xce   :  { %3755 = vmatprep.subr.bf16.mxu1 %v5535_v61 }
  0xcf   :  { %1704 = vmatpush1.bf16.msra.mxu0 %v5437_v47  ;;  %v6854_v47 = vsub.s32 0, %v6094_v25 }
  0xd0   :  { %1705 = vmatprep.subr.bf16.mxu0 %v5445_v49  ;;  %v6860_v49 = vsub.s32 1, %v6094_v25 }
  0xd1   :  { %3756 = vmatpush1.bf16.msra.mxu1 %v5533_v63 }
  0xd2   :  { %3757 = vmatprep.subr.bf16.mxu1 %v5541_v1 }
  0xd3   :  { %1706 = vmatpush1.bf16.msra.mxu0 %v5443_v52  ;;  %v236_v52 = vrot.slane %v6851_v46, %v6854_v47 }
  0xd4   :  { %1707 = vmatprep.subr.bf16.mxu0 %v5451_v54  ;;  %v240_v54 = vrot.slane %v6851_v46, %v6860_v49 }
  0xd5   :  { %3758 = vmatpush1.bf16.msra.mxu1 %v5539_v3 }
  0xd6   :  { %3759 = vmatprep.subr.bf16.mxu1 %v5547_v5 }
  0xd7   :  { %1708 = vmatpush1.bf16.msra.mxu0 %v5449_v56 }
  0xd8   :  { %1709 = vmatprep.subr.bf16.mxu0 %v5457_v58  ;;  %v5560_v58 = vld [vmem:[%s7801_s3 + $0x1c8] ss:$16 sps:$4 sm:$0xff]  }
  0xd9   :  { %3760 = vmatpush1.bf16.msra.mxu1 %v5545_v7  ;;  %v5574_v7 = vld [vmem:[%s7801_s3 + $0x20c] ss:$16 sps:$4 sm:$0xff]  }
  0xda   :  { %3761 = vmatprep.subr.bf16.mxu1 %v5553_v9  ;;  %v5577_v9 = vld [vmem:[%s7801_s3 + $0x224] ss:$16 sps:$4 sm:$0xff]  }
  0xdb   :  { %1710 = vmatpush1.bf16.msra.mxu0 %v5455_v60 }
  0xdc   :  { %1711 = vmatprep.subr.bf16.mxu0 %v5460_v62 }
  0xdd   :  { %3762 = vmatpush1.bf16.msra.mxu1 %v5551_v11  ;;  %v247_v11 = vsub.s32 3, %v6094_v25 }
  0xdf   :  { %1712 = vmatpush1.bf16.msra.mxu0 %v5458_v0 }
  0xe0   :  { %1722 = vmatprep.subr.bf16.mxu0 %v5463_v2  ;;  %v5566_v2 = vld [vmem:[%s7801_s3 + $0x1e8] ss:$16 sps:$4 sm:$0xff]  }
  0xe2   :  { %1714 = vmatmul.mubr.bf16.vlgmr.msra.gmra.mrb[8].mxu0 %v6217_v17  ;;  %v5559_v17 = vld [vmem:[%s7801_s3 + $0x1c4] ss:$16 sps:$4 sm:$0xff]  }
  0xe3   :  { %1723 = vmatpush1.bf16.msra.mxu0 %v5461_v4  ;;  %1754 = vmatprep.mubr.bf16.mxu0 %v5987_v24  ;;  %v5470_v24 = vld [vmem:[%s7799_s1 + $0x610] ss:$40 sps:$4 sm:$0xff]  }
  0xe4   :  { %1724 = vmatprep.subr.bf16.mxu0 %v5466_v6  ;;  %3763 = vmatprep.subr.bf16.mxu1 %v5559_v17  ;;  %v5569_v4 = vld [vmem:[%s7801_s3 + $0x200] ss:$16 sps:$4 sm:$0xff]   ;;  %v5572_v6 = vld [vmem:[%s7801_s3 + $0x208] ss:$16 sps:$4 sm:$0xff]   ;;  %v5583_v17 = vld [vmem:[%s7801_s3 + $0x244] ss:$16 sps:$4 sm:$0xff]  }
  0xe5   :  { %3764 = vmatpush1.bf16.msra.mxu1 %v5557_v13  ;;  %v5586_v13 = vld [vmem:[%s7801_s3 + $0x24c] ss:$16 sps:$4 sm:$0xff]  }
  0xe6   :  { %3765 = vmatprep.subr.bf16.mxu1 %v5565_v14  ;;  %v5581_v14 = vld [vmem:[%s7801_s3 + $0x240] ss:$16 sps:$4 sm:$0xff]  }
  0xe7   :  { %1725 = vmatpush1.bf16.msra.mxu0 %v5464_v8 }
  0xe8   :  { %1726 = vmatprep.subr.bf16.mxu0 %v5469_v10  ;;  %v5580_v10 = vld [vmem:[%s7801_s3 + $0x22c] ss:$16 sps:$4 sm:$0xff]  }
  0xe9   :  { %3766 = vmatpush1.bf16.msra.mxu1 %v5563_v16 }
  0xea   :  { %3776 = vmatprep.subr.bf16.mxu1 %v5571_v18  ;;  %v5584_v18 = vld [vmem:[%s7801_s3 + $0x248] ss:$16 sps:$4 sm:$0xff]  }
  0xeb   :  { %1727 = vmatpush1.bf16.msra.mxu0 %v5467_v51  ;;  %v5575_v51 = vld [vmem:[%s7801_s3 + $0x220] ss:$16 sps:$4 sm:$0xff]  }
  0xec   :  { %1728 = vmatprep.subr.bf16.mxu0 %v5472_v12  ;;  %v5578_v12 = vld [vmem:[%s7801_s3 + $0x228] ss:$16 sps:$4 sm:$0xff]  }
  0xef   :  { %1729 = vmatpush1.bf16.msra.mxu0 %v5470_v24  ;;  %v248_v24 = vrot.slane %v6851_v46, %v247_v11 }
  0xf0   :  { %3940 = vmatprep.subr.bf16.mxu0 %v5478_v15  ;;  %v5589_v15 = vld [vmem:[%s7801_s3 + $0x264] ss:$16 sps:$4 sm:$0xff]  }
  0xf2   :  { %4707 = vmatmul.mubr.msk.bf16.vlgmr.msra.gmra.mrb[8].mxu0 %vm1349_vm1, %v6270_v42  ;;  %v5494_v42 = vld [vmem:[%s7801_s3 + $0x68] ss:$16 sps:$4 sm:$0xff]  }
  0xf3   :  { %3941 = vmatpush1.bf16.msra.mxu0 %v5476_v19 }
  0xf4   :  { %3942 = vmatprep.subr.bf16.mxu0 %v5484_v20  ;;  %v5592_v20 = vld [vmem:[%s7801_s3 + $0x26c] ss:$16 sps:$4 sm:$0xff]  }
  0xf7   :  { %3943 = vmatpush1.bf16.msra.mxu0 %v5482_v21 }
  0xf8   :  { %3944 = vmatprep.subr.bf16.mxu0 %v5490_v22 }
  0xfb   :  { %3945 = vmatpush1.bf16.msra.mxu0 %v5488_v23  ;;  %v5587_v23 = vld [vmem:[%s7801_s3 + $0x260] ss:$16 sps:$4 sm:$0xff]  }
  0xfc   :  { %3946 = vmatprep.subr.bf16.mxu0 %v5496_v26 }
  0xff   :  { %3947 = vmatpush1.bf16.msra.mxu0 %v5494_v42  ;;  %v5595_v42 = vld [vmem:[%s7801_s3 + $0x284] ss:$16 sps:$4 sm:$0xff]  }
 0x100   :  { %3948 = vmatprep.subr.bf16.mxu0 %v5502_v27 }
 0x103   :  { %3949 = vmatpush1.bf16.msra.mxu0 %v5500_v28  ;;  %v5590_v28 = vld [vmem:[%s7801_s3 + $0x268] ss:$16 sps:$4 sm:$0xff]  }
 0x104   :  { %3950 = vmatprep.subr.bf16.mxu0 %v5508_v29  ;;  %v5598_v29 = vld [vmem:[%s7801_s3 + $0x28c] ss:$16 sps:$4 sm:$0xff]  }
 0x107   :  { %3951 = vmatpush1.bf16.msra.mxu0 %v5506_v30 }
 0x108   :  { %3952 = vmatprep.subr.bf16.mxu0 %v5514_v31  ;;  %v5593_v31 = vld [vmem:[%s7801_s3 + $0x280] ss:$16 sps:$4 sm:$0xff]  }
 0x10b   :  { %3953 = vmatpush1.bf16.msra.mxu0 %v5512_v32  ;;  %v5601_v32 = vld [vmem:[%s7801_s3 + $0x2a4] ss:$16 sps:$4 sm:$0xff]  }
 0x10c   :  { %3954 = vmatprep.subr.bf16.mxu0 %v5520_v33 }
 0x10f   :  { %3955 = vmatpush1.bf16.msra.mxu0 %v5518_v34  ;;  %v5596_v34 = vld [vmem:[%s7801_s3 + $0x288] ss:$16 sps:$4 sm:$0xff]  }
 0x110   :  { %3956 = vmatprep.subr.bf16.mxu0 %v5526_v35  ;;  %v5604_v35 = vld [vmem:[%s7801_s3 + $0x2ac] ss:$16 sps:$4 sm:$0xff]  }
 0x113   :  { %3957 = vmatpush1.bf16.msra.mxu0 %v5524_v36  ;;  %v5599_v36 = vld [vmem:[%s7801_s3 + $0x2a0] ss:$16 sps:$4 sm:$0xff]  }
 0x114   :  { %3958 = vmatprep.subr.bf16.mxu0 %v5532_v37  ;;  %v5607_v37 = vld [vmem:[%s7801_s3 + $0x2c4] ss:$16 sps:$4 sm:$0xff]  }
 0x117   :  { %3959 = vmatpush1.bf16.msra.mxu0 %v5530_v38  ;;  %v5602_v38 = vld [vmem:[%s7801_s3 + $0x2a8] ss:$16 sps:$4 sm:$0xff]  }
 0x118   :  { %3960 = vmatprep.subr.bf16.mxu0 %v5538_v39  ;;  %v5610_v39 = vld [vmem:[%s7801_s3 + $0x2cc] ss:$16 sps:$4 sm:$0xff]  }
 0x11b   :  { %3961 = vmatpush1.bf16.msra.mxu0 %v5536_v40  ;;  %v5605_v40 = vld [vmem:[%s7801_s3 + $0x2c0] ss:$16 sps:$4 sm:$0xff]  }
 0x11c   :  { %3962 = vmatprep.subr.bf16.mxu0 %v5544_v41  ;;  %v5613_v41 = vld [vmem:[%s7801_s3 + $0x2e4] ss:$16 sps:$4 sm:$0xff]  }
 0x11f   :  { %3963 = vmatpush1.bf16.msra.mxu0 %v5542_v43  ;;  %v5608_v43 = vld [vmem:[%s7801_s3 + $0x2c8] ss:$16 sps:$4 sm:$0xff]  }
 0x120   :  { %3964 = vmatprep.subr.bf16.mxu0 %v5550_v44  ;;  %v5616_v44 = vld [vmem:[%s7801_s3 + $0x2ec] ss:$16 sps:$4 sm:$0xff]  }
 0x123   :  { %3965 = vmatpush1.bf16.msra.mxu0 %v5548_v45  ;;  %v5611_v45 = vld [vmem:[%s7801_s3 + $0x2e0] ss:$16 sps:$4 sm:$0xff]  }
 0x124   :  { %3966 = vmatprep.subr.bf16.mxu0 %v5556_v48  ;;  %v5619_v48 = vld [vmem:[%s7801_s3 + $0x304] ss:$16 sps:$4 sm:$0xff]  }
 0x125   :  { %v1428_v55 = vpop.f32.mrb[0].mxu0 }
 0x126   :  { %v5105_v56 = vadd.f32 %v1428_v55, %v236_v52  ;;  %v1430_v57 = vpop.f32.mrb[1].mxu0  ;;  %v5622_v52 = vld [vmem:[%s7801_s3 + $0x30c] ss:$16 sps:$4 sm:$0xff]   ;;  %v5620_v55 = vld [vmem:[%s7801_s3 + $0x308] ss:$16 sps:$4 sm:$0xff]  }
 0x127   :  { %v5106_v60 = vadd.f32 %v1430_v57, %v240_v54  ;;  %v1432_v61 = vpop.f32.mrb[2].mxu0  ;;  %3967 = vmatpush1.bf16.msra.mxu0 %v5554_v50  ;;  %v5614_v50 = vld [vmem:[%s7801_s3 + $0x2e8] ss:$16 sps:$4 sm:$0xff]   ;;  %v5625_v54 = vld [vmem:[%s7801_s3 + $0x324] ss:$16 sps:$4 sm:$0xff]  }
 0x128   :  { %v1763_v62 = vmax.f32 %v5105_v56, 0.0  ;;  %v1433_v63 = vpop.f32.mrb[3].mxu0  ;;  %3968 = vmatprep.subr.bf16.mxu0 %v5562_v53  ;;  %v5617_v53 = vld [vmem:[%s7801_s3 + $0x300] ss:$16 sps:$4 sm:$0xff]   ;;  %v5628_v56 = vld [vmem:[%s7801_s3 + $0x32c] ss:$16 sps:$4 sm:$0xff]  }
 0x129   :  { %v1764_v0 = vmax.f32 %v5106_v60, 0.0  ;;  %v5623_v57 = vld [vmem:[%s7801_s3 + $0x320] ss:$16 sps:$4 sm:$0xff]   ;;  %v5634_v60 = vld [vmem:[%s7801_s3 + $0x34c] ss:$16 sps:$4 sm:$0xff]  }
 0x12a   :  { %v1773_v1 = vmin.f32 %v1763_v62, 6.0  ;;  %v6918_v16 = vpop.f32.mrb[0].mxu1  ;;  %v5629_v61 = vld [vmem:[%s7801_s3 + $0x340] ss:$16 sps:$4 sm:$0xff]   ;;  %v5637_v62 = vld [vmem:[%s7801_s3 + $0x364] ss:$16 sps:$4 sm:$0xff]  }
 0x12b   :  { %v1774_v3 = vmin.f32 %v1764_v0, 6.0  ;;  %3969 = vmatpush1.bf16.msra.mxu0 %v5560_v58  ;;  %v1512_v19 = vpop.f32.mrb[1].mxu1  ;;  %v5631_v58 = vld [vmem:[%s7801_s3 + $0x344] ss:$16 sps:$4 sm:$0xff]   ;;  %v5632_v63 = vld [vmem:[%s7801_s3 + $0x348] ss:$16 sps:$4 sm:$0xff]  }
 0x12c   :  { %3970 = vmatprep.subr.bf16.mxu0 %v5568_v59  ;;  %v1783_v8 = vpack.c.bf16 %v1773_v1, %v1773_v1  ;;  %v5108_v21 = vadd.f32 %v1512_v19, %v248_v24  ;;  %v1514_v22 = vpop.f32.mrb[2].mxu1  ;;  %v5626_v59 = vld [vmem:[%s7801_s3 + $0x328] ss:$16 sps:$4 sm:$0xff]   ;;  %v5640_v0 = vld [vmem:[%s7801_s3 + $0x36c] ss:$16 sps:$4 sm:$0xff]  }
 0x12d   :  { %v1784_v5 = vpack.c.bf16 %v1774_v3, %v1774_v3  ;;  %v1515_v26 = vpop.f32.mrb[3].mxu1  ;;  %v5635_v1 = vld [vmem:[%s7801_s3 + $0x360] ss:$16 sps:$4 sm:$0xff]   ;;  %v5643_v3 = vld [vmem:[%s7801_s3 + $0x384] ss:$16 sps:$4 sm:$0xff]  }
 0x12e   :  { %v1766_v27 = vmax.f32 %v5108_v21, 0.0  ;;  %v5658_v24 = vld [vmem:[%s7801_s3 + $0x3cc] ss:$16 sps:$4 sm:$0xff]   ;;  %v5667_v22 = vld [vmem:[%s7801_s3 + $0x404] ss:$16 sps:$4 sm:$0xff]  }
 0x12f   :  { %3767 = vmatprep.mubr.bf16.mxu1 %v1784_v5  ;;  %3971 = vmatpush1.bf16.msra.mxu0 %v5566_v2  ;;  %v243_v2 = vsub.s32 2, %v6094_v25  ;;  %v5664_v19 = vld [vmem:[%s7801_s3 + $0x3ec] ss:$16 sps:$4 sm:$0xff]  }
 0x130   :  { %3972 = vmatprep.mubr.bf16.mxu0 %v1784_v5  ;;  %3768 = vmatmul.mubr.bf16.vlgmr.msra.gmra.mrb[8].mxu1 %v1783_v8  ;;  %v1776_v30 = vmin.f32 %v1766_v27, 6.0  ;;  %v5646_v5 = vld [vmem:[%s7801_s3 + $0x38c] ss:$16 sps:$4 sm:$0xff]  }
 0x131   :  { %3777 = vmatpush1.bf16.msra.mxu1 %v5569_v4  ;;  %3981 = vmatprep.subr.bf16.mxu0 %v5574_v7  ;;  %v5638_v4 = vld [vmem:[%s7801_s3 + $0x368] ss:$16 sps:$4 sm:$0xff]   ;;  %v244_v7 = vrot.slane %v6851_v46, %v243_v2  ;;  %v5670_v26 = vld [vmem:[%s7801_s3 + $0x40c] ss:$16 sps:$4 sm:$0xff]  }
 0x132   :  { %3973 = vmatmul.mubr.bf16.vlgmr.msra.gmra.mrb[12].mxu0 %v1783_v8  ;;  %3778 = vmatprep.subr.bf16.mxu1 %v5577_v9  ;;  %v1786_v33 = vpack.c.bf16 %v1776_v30, %v1776_v30  ;;  %v5649_v8 = vld [vmem:[%s7801_s3 + $0x3a4] ss:$16 sps:$4 sm:$0xff]   ;;  %v5644_v9 = vld [vmem:[%s7801_s3 + $0x388] ss:$16 sps:$4 sm:$0xff]   ;;  %v255_v30 = vsub.s32 5, %v6094_v25 }
 0x133   :  { %3982 = vmatpush1.bf16.msra.mxu0 %v5572_v6  ;;  %v5641_v6 = vld [vmem:[%s7801_s3 + $0x380] ss:$16 sps:$4 sm:$0xff]  }
 0x134   :  { %3983 = vmatprep.subr.bf16.mxu0 %v5580_v10  ;;  %3808 = vmatprep.mubr.bf16.mxu1 %v1786_v33  ;;  %v5652_v10 = vld [vmem:[%s7801_s3 + $0x3ac] ss:$16 sps:$4 sm:$0xff]  }
 0x135   :  { %3779 = vmatpush1.bf16.msra.mxu1 %v5575_v51  ;;  %4013 = vmatprep.mubr.bf16.mxu0 %v1786_v33  ;;  %v5647_v51 = vld [vmem:[%s7801_s3 + $0x3a0] ss:$16 sps:$4 sm:$0xff]   ;;  %v5679_v33 = vld [vmem:[%s7801_s3 + $0x444] ss:$16 sps:$4 sm:$0xff]  }
 0x136   :  { %3780 = vmatprep.subr.bf16.mxu1 %v5583_v17  ;;  %v5107_v17 = vadd.f32 %v6918_v16, %v244_v7  ;;  %v5661_v16 = vld [vmem:[%s7801_s3 + $0x3e4] ss:$16 sps:$4 sm:$0xff]  }
 0x137   :  { %3984 = vmatpush1.bf16.msra.mxu0 %v5578_v12  ;;  %v5655_v12 = vld [vmem:[%s7801_s3 + $0x3c4] ss:$16 sps:$4 sm:$0xff]  }
 0x138   :  { %3985 = vmatprep.subr.bf16.mxu0 %v5586_v13  ;;  %v5650_v13 = vld [vmem:[%s7801_s3 + $0x3a8] ss:$16 sps:$4 sm:$0xff]  }
 0x139   :  { %3781 = vmatpush1.bf16.msra.mxu1 %v5581_v14  ;;  %v5653_v14 = vld [vmem:[%s7801_s3 + $0x3c0] ss:$16 sps:$4 sm:$0xff]  }
 0x13a   :  { %3782 = vmatprep.subr.bf16.mxu1 %v5589_v15  ;;  %v1765_v15 = vmax.f32 %v5107_v17, 0.0  ;;  %v5715_v17 = vld [vmem:[%s7801_s3 + $0x504] ss:$16 sps:$4 sm:$0xff]  }
 0x13b   :  { %3986 = vmatpush1.bf16.msra.mxu0 %v5584_v18  ;;  %v5656_v18 = vld [vmem:[%s7801_s3 + $0x3c8] ss:$16 sps:$4 sm:$0xff]  }
 0x13c   :  { %3987 = vmatprep.subr.bf16.mxu0 %v5592_v20  ;;  %v5659_v20 = vld [vmem:[%s7801_s3 + $0x3e0] ss:$16 sps:$4 sm:$0xff]   ;;  %v1775_v21 = vmin.f32 %v1765_v15, 6.0  ;;  %v5716_v15 = vld [vmem:[%s7801_s3 + $0x508] ss:$16 sps:$4 sm:$0xff]  }
 0x13d   :  { %3783 = vmatpush1.bf16.msra.mxu1 %v5587_v23  ;;  %v5662_v23 = vld [vmem:[%s7801_s3 + $0x3e8] ss:$16 sps:$4 sm:$0xff]  }
 0x13e   :  { %3784 = vmatprep.subr.bf16.mxu1 %v5595_v42  ;;  %v5665_v42 = vld [vmem:[%s7801_s3 + $0x400] ss:$16 sps:$4 sm:$0xff]   ;;  %v1785_v27 = vpack.c.bf16 %v1775_v21, %v1775_v21  ;;  %v5730_v21 = vld [vmem:[%s7801_s3 + $0x54c] ss:$16 sps:$4 sm:$0xff]  }
 0x13f   :  { %3988 = vmatpush1.bf16.msra.mxu0 %v5590_v28  ;;  %v5673_v28 = vld [vmem:[%s7801_s3 + $0x424] ss:$16 sps:$4 sm:$0xff]  }
 0x140   :  { %3989 = vmatprep.subr.bf16.mxu0 %v5598_v29  ;;  %v5668_v29 = vld [vmem:[%s7801_s3 + $0x408] ss:$16 sps:$4 sm:$0xff]  }
 0x141   :  { %3785 = vmatpush1.bf16.msra.mxu1 %v5593_v31  ;;  %v5676_v31 = vld [vmem:[%s7801_s3 + $0x42c] ss:$16 sps:$4 sm:$0xff]  }
 0x142   :  { %3786 = vmatprep.subr.bf16.mxu1 %v5601_v32  ;;  %v5671_v32 = vld [vmem:[%s7801_s3 + $0x420] ss:$16 sps:$4 sm:$0xff]  }
 0x143   :  { %3990 = vmatpush1.bf16.msra.mxu0 %v5596_v34  ;;  %v5674_v34 = vld [vmem:[%s7801_s3 + $0x428] ss:$16 sps:$4 sm:$0xff]  }
 0x144   :  { %3991 = vmatprep.subr.bf16.mxu0 %v5604_v35  ;;  %v256_v35 = vrot.slane %v6851_v46, %v255_v30  ;;  %v5739_v30 = vld [vmem:[%s7801_s3 + $0x584] ss:$16 sps:$4 sm:$0xff]  }
 0x145   :  { %3787 = vmatpush1.bf16.msra.mxu1 %v5599_v36  ;;  %v5682_v36 = vld [vmem:[%s7801_s3 + $0x44c] ss:$16 sps:$4 sm:$0xff]  }
 0x146   :  { %3788 = vmatprep.subr.bf16.mxu1 %v5607_v37  ;;  %v5677_v37 = vld [vmem:[%s7801_s3 + $0x440] ss:$16 sps:$4 sm:$0xff]  }
 0x147   :  { %3992 = vmatpush1.bf16.msra.mxu0 %v5602_v38 }
 0x148   :  { %3993 = vmatprep.subr.bf16.mxu0 %v5610_v39  ;;  %v5685_v39 = vld [vmem:[%s7801_s3 + $0x464] ss:$16 sps:$4 sm:$0xff]  }
 0x149   :  { %3789 = vmatpush1.bf16.msra.mxu1 %v5605_v40 }
 0x14a   :  { %3790 = vmatprep.subr.bf16.mxu1 %v5613_v41  ;;  %v5680_v41 = vld [vmem:[%s7801_s3 + $0x448] ss:$16 sps:$4 sm:$0xff]  }
 0x14b   :  { %3994 = vmatpush1.bf16.msra.mxu0 %v5608_v43 }
 0x14c   :  { %3995 = vmatprep.subr.bf16.mxu0 %v5616_v44 }
 0x14d   :  { %3791 = vmatpush1.bf16.msra.mxu1 %v5611_v45  ;;  %v5688_v45 = vld [vmem:[%s7801_s3 + $0x46c] ss:$16 sps:$4 sm:$0xff]  }
 0x14e   :  { %3792 = vmatprep.subr.bf16.mxu1 %v5619_v48 }
 0x14f   :  { %3996 = vmatpush1.bf16.msra.mxu0 %v5614_v50  ;;  %v5683_v50 = vld [vmem:[%s7801_s3 + $0x460] ss:$16 sps:$4 sm:$0xff]  }
 0x150   :  { %3997 = vmatprep.subr.bf16.mxu0 %v5622_v52 }
 0x151   :  { %3793 = vmatpush1.bf16.msra.mxu1 %v5617_v53  ;;  %v5691_v53 = vld [vmem:[%s7801_s3 + $0x484] ss:$16 sps:$4 sm:$0xff]  }
 0x152   :  { %3794 = vmatprep.subr.bf16.mxu1 %v5625_v54  ;;  %v5686_v54 = vld [vmem:[%s7801_s3 + $0x468] ss:$16 sps:$4 sm:$0xff]  }
 0x153   :  { %3998 = vmatpush1.bf16.msra.mxu0 %v5620_v55 }
 0x154   :  { %3999 = vmatprep.subr.bf16.mxu0 %v5628_v56  ;;  %v5694_v56 = vld [vmem:[%s7801_s3 + $0x48c] ss:$16 sps:$4 sm:$0xff]  }
 0x155   :  { %3795 = vmatpush1.bf16.msra.mxu1 %v5623_v57  ;;  %v5689_v57 = vld [vmem:[%s7801_s3 + $0x480] ss:$16 sps:$4 sm:$0xff]  }
 0x156   :  { %3796 = vmatprep.subr.bf16.mxu1 %v5631_v58 }
 0x157   :  { %4000 = vmatpush1.bf16.msra.mxu0 %v5626_v59  ;;  %v5697_v59 = vld [vmem:[%s7801_s3 + $0x4a4] ss:$16 sps:$4 sm:$0xff]  }
 0x158   :  { %4001 = vmatprep.subr.bf16.mxu0 %v5634_v60  ;;  %v5692_v60 = vld [vmem:[%s7801_s3 + $0x488] ss:$16 sps:$4 sm:$0xff]  }
 0x159   :  { %3797 = vmatpush1.bf16.msra.mxu1 %v5629_v61  ;;  %v5700_v61 = vld [vmem:[%s7801_s3 + $0x4ac] ss:$16 sps:$4 sm:$0xff]  }
 0x15a   :  { %3798 = vmatprep.subr.bf16.mxu1 %v5637_v62  ;;  %v5695_v62 = vld [vmem:[%s7801_s3 + $0x4a0] ss:$16 sps:$4 sm:$0xff]  }
 0x15b   :  { %4002 = vmatpush1.bf16.msra.mxu0 %v5632_v63  ;;  %v5703_v63 = vld [vmem:[%s7801_s3 + $0x4c4] ss:$16 sps:$4 sm:$0xff]  }
 0x15c   :  { %4003 = vmatprep.subr.bf16.mxu0 %v5640_v0  ;;  %v5698_v0 = vld [vmem:[%s7801_s3 + $0x4a8] ss:$16 sps:$4 sm:$0xff]  }
 0x15d   :  { %3799 = vmatpush1.bf16.msra.mxu1 %v5635_v1  ;;  %v5706_v1 = vld [vmem:[%s7801_s3 + $0x4cc] ss:$16 sps:$4 sm:$0xff]  }
 0x15e   :  { %3800 = vmatprep.subr.bf16.mxu1 %v5643_v3  ;;  %v5701_v3 = vld [vmem:[%s7801_s3 + $0x4c0] ss:$16 sps:$4 sm:$0xff]  }
 0x15f   :  { %4004 = vmatpush1.bf16.msra.mxu0 %v5638_v4  ;;  %v5709_v4 = vld [vmem:[%s7801_s3 + $0x4e4] ss:$16 sps:$4 sm:$0xff]  }
 0x160   :  { %4005 = vmatprep.subr.bf16.mxu0 %v5646_v5 }
 0x161   :  { %3801 = vmatpush1.bf16.msra.mxu1 %v5641_v6  ;;  %v5704_v6 = vld [vmem:[%s7801_s3 + $0x4c8] ss:$16 sps:$4 sm:$0xff]  }
 0x162   :  { %3802 = vmatprep.subr.bf16.mxu1 %v5649_v8  ;;  %v5712_v8 = vld [vmem:[%s7801_s3 + $0x4ec] ss:$16 sps:$4 sm:$0xff]  }
 0x163   :  { %4006 = vmatpush1.bf16.msra.mxu0 %v5644_v9 }
 0x164   :  { %4007 = vmatprep.subr.bf16.mxu0 %v5652_v10  ;;  %v5707_v10 = vld [vmem:[%s7801_s3 + $0x4e0] ss:$16 sps:$4 sm:$0xff]  }
 0x165   :  { %3803 = vmatpush1.bf16.msra.mxu1 %v5647_v51 }
 0x166   :  { %3804 = vmatprep.subr.bf16.mxu1 %v5655_v12  ;;  %v5710_v12 = vld [vmem:[%s7801_s3 + $0x4e8] ss:$16 sps:$4 sm:$0xff]  }
 0x167   :  { %4008 = vmatpush1.bf16.msra.mxu0 %v5650_v13  ;;  %v5718_v13 = vld [vmem:[%s7801_s3 + $0x50c] ss:$16 sps:$4 sm:$0xff]  }
 0x168   :  { %4009 = vmatprep.subr.bf16.mxu0 %v5658_v24  ;;  %v5713_v24 = vld [vmem:[%s7801_s3 + $0x500] ss:$16 sps:$4 sm:$0xff]  }
 0x169   :  { %3805 = vmatpush1.bf16.msra.mxu1 %v5653_v14  ;;  %v5721_v14 = vld [vmem:[%s7801_s3 + $0x524] ss:$16 sps:$4 sm:$0xff]  }
 0x16a   :  { %3806 = vmatprep.subr.bf16.mxu1 %v5661_v16  ;;  %v5724_v16 = vld [vmem:[%s7801_s3 + $0x52c] ss:$16 sps:$4 sm:$0xff]  }
 0x16b   :  { %4010 = vmatpush1.bf16.msra.mxu0 %v5656_v18  ;;  %v5719_v18 = vld [vmem:[%s7801_s3 + $0x520] ss:$16 sps:$4 sm:$0xff]  }
 0x16c   :  { %4011 = vmatprep.subr.bf16.mxu0 %v5664_v19  ;;  %v5727_v19 = vld [vmem:[%s7801_s3 + $0x544] ss:$16 sps:$4 sm:$0xff]  }
 0x16d   :  { %3807 = vmatpush1.bf16.msra.mxu1 %v5659_v20  ;;  %v5722_v20 = vld [vmem:[%s7801_s3 + $0x528] ss:$16 sps:$4 sm:$0xff]  }
 0x16e   :  { %3817 = vmatprep.subr.bf16.mxu1 %v5667_v22  ;;  %v5725_v22 = vld [vmem:[%s7801_s3 + $0x540] ss:$16 sps:$4 sm:$0xff]  }
 0x16f   :  { %4012 = vmatpush1.bf16.msra.mxu0 %v5662_v23  ;;  %v5733_v23 = vld [vmem:[%s7801_s3 + $0x564] ss:$16 sps:$4 sm:$0xff]  }
 0x170   :  { %3809 = vmatmul.mubr.bf16.vlgmr.msra.gmra.mrb[8].mxu1 %v1785_v27  ;;  %4022 = vmatprep.subr.bf16.mxu0 %v5670_v26  ;;  %v5728_v26 = vld [vmem:[%s7801_s3 + $0x548] ss:$16 sps:$4 sm:$0xff]  }
 0x171   :  { %3818 = vmatpush1.bf16.msra.mxu1 %v5665_v42  ;;  %v5736_v42 = vld [vmem:[%s7801_s3 + $0x56c] ss:$16 sps:$4 sm:$0xff]  }
 0x172   :  { %4014 = vmatmul.mubr.bf16.vlgmr.msra.gmra.mrb[12].mxu0 %v1785_v27  ;;  %3819 = vmatprep.subr.bf16.mxu1 %v5673_v28  ;;  %v5731_v27 = vld [vmem:[%s7801_s3 + $0x560] ss:$16 sps:$4 sm:$0xff]   ;;  %v263_v28 = vsub.s32 7, %v6094_v25 }
 0x173   :  { %4023 = vmatpush1.bf16.msra.mxu0 %v5668_v29  ;;  %v251_v29 = vsub.s32 4, %v6094_v25 }
 0x174   :  { %4024 = vmatprep.subr.bf16.mxu0 %v5676_v31  ;;  %v5734_v31 = vld [vmem:[%s7801_s3 + $0x568] ss:$16 sps:$4 sm:$0xff]  }
 0x175   :  { %3820 = vmatpush1.bf16.msra.mxu1 %v5671_v32  ;;  %v7116_v38 = vpop.f32.mrb[4].mxu0  ;;  %v5742_v32 = vld [vmem:[%s7801_s3 + $0x58c] ss:$16 sps:$4 sm:$0xff]  }
 0x176   :  { %3821 = vmatprep.subr.bf16.mxu1 %v5679_v33  ;;  %v1594_v40 = vpop.f32.mrb[5].mxu0  ;;  %v5737_v33 = vld [vmem:[%s7801_s3 + $0x580] ss:$16 sps:$4 sm:$0xff]  }
 0x177   :  { %4025 = vmatpush1.bf16.msra.mxu0 %v5674_v34  ;;  %v5110_v43 = vadd.f32 %v1594_v40, %v256_v35  ;;  %v1596_v44 = vpop.f32.mrb[6].mxu0  ;;  %v264_v34 = vrot.slane %v6851_v46, %v263_v28  ;;  %v252_v35 = vrot.slane %v6851_v46, %v251_v29  ;;  %v5743_v46 = vld [vmem:[%s7801_s3 + $0x5a0] ss:$16 sps:$4 sm:$0xff]   ;;  %v5808_v29 = vld [vmem:[%s7801_s3 + $0x6ec] ss:$16 sps:$4 sm:$0xff]  }
 0x178   :  { %4026 = vmatprep.subr.bf16.mxu0 %v5682_v36  ;;  %v1597_v48 = vpop.f32.mrb[7].mxu0  ;;  %v5745_v36 = vld [vmem:[%s7801_s3 + $0x5a4] ss:$16 sps:$4 sm:$0xff]   ;;  %v5746_v44 = vld [vmem:[%s7801_s3 + $0x5a8] ss:$16 sps:$4 sm:$0xff]  }
 0x179   :  { %3822 = vmatpush1.bf16.msra.mxu1 %v5677_v37  ;;  %v1768_v52 = vmax.f32 %v5110_v43, 0.0  ;;  %v5740_v37 = vld [vmem:[%s7801_s3 + $0x588] ss:$16 sps:$4 sm:$0xff]   ;;  %v5751_v43 = vld [vmem:[%s7801_s3 + $0x5c4] ss:$16 sps:$4 sm:$0xff]  }
 0x17a   :  { %3823 = vmatprep.subr.bf16.mxu1 %v5685_v39  ;;  %v5748_v39 = vld [vmem:[%s7801_s3 + $0x5ac] ss:$16 sps:$4 sm:$0xff]  }
 0x17b   :  { %4027 = vmatpush1.bf16.msra.mxu0 %v5680_v41  ;;  %v1778_v55 = vmin.f32 %v1768_v52, 6.0  ;;  %v7169_v5 = vpop.f32.mrb[4].mxu1  ;;  %v5109_v41 = vadd.f32 %v7116_v38, %v252_v35  ;;  %v5749_v38 = vld [vmem:[%s7801_s3 + $0x5c0] ss:$16 sps:$4 sm:$0xff]   ;;  %v5757_v52 = vld [vmem:[%s7801_s3 + $0x5e4] ss:$16 sps:$4 sm:$0xff]  }
 0x17c   :  { %4028 = vmatprep.subr.bf16.mxu0 %v5688_v45  ;;  %v1676_v7 = vpop.f32.mrb[5].mxu1  ;;  %v5754_v45 = vld [vmem:[%s7801_s3 + $0x5cc] ss:$16 sps:$4 sm:$0xff]   ;;  %v5811_v35 = vld [vmem:[%s7801_s3 + $0x704] ss:$16 sps:$4 sm:$0xff]  }
 0x17d   :  { %3824 = vmatpush1.bf16.msra.mxu1 %v5683_v50  ;;  %v1788_v58 = vpack.c.bf16 %v1778_v55, %v1778_v55  ;;  %v1678_v9 = vpop.f32.mrb[6].mxu1  ;;  %v5112_v40 = vadd.f32 %v1676_v7, %v264_v34  ;;  %v1767_v50 = vmax.f32 %v5109_v41, 0.0  ;;  %v5755_v55 = vld [vmem:[%s7801_s3 + $0x5e0] ss:$16 sps:$4 sm:$0xff]   ;;  %v5775_v7 = vld [vmem:[%s7801_s3 + $0x644] ss:$16 sps:$4 sm:$0xff]  }
 0x17e   :  { %3825 = vmatprep.subr.bf16.mxu1 %v5691_v53  ;;  %v1679_v51 = vpop.f32.mrb[7].mxu1  ;;  %v5752_v53 = vld [vmem:[%s7801_s3 + $0x5c8] ss:$16 sps:$4 sm:$0xff]   ;;  %v5778_v9 = vld [vmem:[%s7801_s3 + $0x64c] ss:$16 sps:$4 sm:$0xff]  }
 0x17f   :  { %4029 = vmatpush1.bf16.msra.mxu0 %v5686_v54  ;;  %3849 = vmatprep.mubr.bf16.mxu1 %v1788_v58  ;;  %v1770_v48 = vmax.f32 %v5112_v40, 0.0  ;;  %v5760_v54 = vld [vmem:[%s7801_s3 + $0x5ec] ss:$16 sps:$4 sm:$0xff]   ;;  %v5781_v51 = vld [vmem:[%s7801_s3 + $0x664] ss:$16 sps:$4 sm:$0xff]  }
 0x180   :  { %4030 = vmatprep.subr.bf16.mxu0 %v5694_v56  ;;  %4054 = vmatprep.mubr.bf16.mxu0 %v1788_v58  ;;  %v5763_v58 = vld [vmem:[%s7801_s3 + $0x604] ss:$16 sps:$4 sm:$0xff]   ;;  %v5806_v34 = vld [vmem:[%s7801_s3 + $0x6e8] ss:$16 sps:$4 sm:$0xff]   ;;  %v5820_v40 = vld [vmem:[%s7801_s3 + $0x72c] ss:$16 sps:$4 sm:$0xff]  }
 0x181   :  { %3826 = vmatpush1.bf16.msra.mxu1 %v5689_v57  ;;  %v1780_v56 = vmin.f32 %v1770_v48, 6.0  ;;  %v1777_v57 = vmin.f32 %v1767_v50, 6.0  ;;  %v5815_v41 = vld [vmem:[%s7801_s3 + $0x720] ss:$16 sps:$4 sm:$0xff]   ;;  %v5829_v48 = vld [vmem:[%s7801_s3 + $0x764] ss:$16 sps:$4 sm:$0xff]  }
 0x182   :  { %3827 = vmatprep.subr.bf16.mxu1 %v5697_v59  ;;  %v5758_v59 = vld [vmem:[%s7801_s3 + $0x5e8] ss:$16 sps:$4 sm:$0xff]  }
 0x183   :  { %4031 = vmatpush1.bf16.msra.mxu0 %v5692_v60  ;;  %v5766_v60 = vld [vmem:[%s7801_s3 + $0x60c] ss:$16 sps:$4 sm:$0xff]   ;;  %v5824_v50 = vld [vmem:[%s7801_s3 + $0x748] ss:$16 sps:$4 sm:$0xff]  }
 0x184   :  { %4032 = vmatprep.subr.bf16.mxu0 %v5700_v61  ;;  %v5761_v61 = vld [vmem:[%s7801_s3 + $0x600] ss:$16 sps:$4 sm:$0xff]  }
 0x185   :  { %3828 = vmatpush1.bf16.msra.mxu1 %v5695_v62  ;;  %v1790_v62 = vpack.c.bf16 %v1780_v56, %v1780_v56  ;;  %v5830_v56 = vld [vmem:[%s7801_s3 + $0x768] ss:$16 sps:$4 sm:$0xff]  }
 0x186   :  { %3829 = vmatprep.subr.bf16.mxu1 %v5703_v63  ;;  %v1787_v63 = vpack.c.bf16 %v1777_v57, %v1777_v57  ;;  %v7439_v57 = vld [vmem:[%s7802_s2 + $0x8] sm:$0x3] }
 0x187   :  { %4033 = vmatpush1.bf16.msra.mxu0 %v5698_v0  ;;  %v5769_v0 = vld [vmem:[%s7801_s3 + $0x624] ss:$16 sps:$4 sm:$0xff]  }
 0x188   :  { %4034 = vmatprep.subr.bf16.mxu0 %v5706_v1  ;;  %v5764_v1 = vld [vmem:[%s7801_s3 + $0x608] ss:$16 sps:$4 sm:$0xff]  }
 0x189   :  { %3830 = vmatpush1.bf16.msra.mxu1 %v5701_v3  ;;  %v5772_v3 = vld [vmem:[%s7801_s3 + $0x62c] ss:$16 sps:$4 sm:$0xff]  }
 0x18a   :  { %3831 = vmatprep.subr.bf16.mxu1 %v5709_v4  ;;  %v5767_v4 = vld [vmem:[%s7801_s3 + $0x620] ss:$16 sps:$4 sm:$0xff]  }
 0x18b   :  { %4035 = vmatpush1.bf16.msra.mxu0 %v5704_v6  ;;  %v5770_v6 = vld [vmem:[%s7801_s3 + $0x628] ss:$16 sps:$4 sm:$0xff]  }
 0x18c   :  { %4036 = vmatprep.subr.bf16.mxu0 %v5712_v8  ;;  %v5773_v8 = vld [vmem:[%s7801_s3 + $0x640] ss:$16 sps:$4 sm:$0xff]  }
 0x18d   :  { %3832 = vmatpush1.bf16.msra.mxu1 %v5707_v10  ;;  %v5776_v10 = vld [vmem:[%s7801_s3 + $0x648] ss:$16 sps:$4 sm:$0xff]  }
 0x18e   :  { %3833 = vmatprep.subr.bf16.mxu1 %v5715_v17  ;;  %v5779_v17 = vld [vmem:[%s7801_s3 + $0x660] ss:$16 sps:$4 sm:$0xff]  }
 0x18f   :  { %4037 = vmatpush1.bf16.msra.mxu0 %v5710_v12  ;;  %v5784_v12 = vld [vmem:[%s7801_s3 + $0x66c] ss:$16 sps:$4 sm:$0xff]  }
 0x190   :  { %4038 = vmatprep.subr.bf16.mxu0 %v5718_v13  ;;  %v5782_v13 = vld [vmem:[%s7801_s3 + $0x668] ss:$16 sps:$4 sm:$0xff]  }
 0x191   :  { %3834 = vmatpush1.bf16.msra.mxu1 %v5713_v24  ;;  %v5787_v24 = vld [vmem:[%s7801_s3 + $0x684] ss:$16 sps:$4 sm:$0xff]  }
 0x192   :  { %3835 = vmatprep.subr.bf16.mxu1 %v5721_v14  ;;  %v5790_v14 = vld [vmem:[%s7801_s3 + $0x68c] ss:$16 sps:$4 sm:$0xff]  }
 0x193   :  { %4039 = vmatpush1.bf16.msra.mxu0 %v5716_v15  ;;  %v5785_v15 = vld [vmem:[%s7801_s3 + $0x680] ss:$16 sps:$4 sm:$0xff]  }
 0x194   :  { %4040 = vmatprep.subr.bf16.mxu0 %v5724_v16  ;;  %v5788_v16 = vld [vmem:[%s7801_s3 + $0x688] ss:$16 sps:$4 sm:$0xff]  }
 0x195   :  { %3836 = vmatpush1.bf16.msra.mxu1 %v5719_v18  ;;  %v5793_v18 = vld [vmem:[%s7801_s3 + $0x6a4] ss:$16 sps:$4 sm:$0xff]  }
 0x196   :  { %3837 = vmatprep.subr.bf16.mxu1 %v5727_v19  ;;  %v5796_v19 = vld [vmem:[%s7801_s3 + $0x6ac] ss:$16 sps:$4 sm:$0xff]  }
 0x197   :  { %4041 = vmatpush1.bf16.msra.mxu0 %v5722_v20  ;;  %v5791_v20 = vld [vmem:[%s7801_s3 + $0x6a0] ss:$16 sps:$4 sm:$0xff]  }
 0x198   :  { %4042 = vmatprep.subr.bf16.mxu0 %v5730_v21  ;;  %v5794_v21 = vld [vmem:[%s7801_s3 + $0x6a8] ss:$16 sps:$4 sm:$0xff]  }
 0x199   :  { %3838 = vmatpush1.bf16.msra.mxu1 %v5725_v22  ;;  %v5799_v22 = vld [vmem:[%s7801_s3 + $0x6c4] ss:$16 sps:$4 sm:$0xff]  }
 0x19a   :  { %3839 = vmatprep.subr.bf16.mxu1 %v5733_v23  ;;  %v5802_v23 = vld [vmem:[%s7801_s3 + $0x6cc] ss:$16 sps:$4 sm:$0xff]  }
 0x19b   :  { %4043 = vmatpush1.bf16.msra.mxu0 %v5728_v26  ;;  %v5797_v26 = vld [vmem:[%s7801_s3 + $0x6c0] ss:$16 sps:$4 sm:$0xff]  }
 0x19c   :  { %4044 = vmatprep.subr.bf16.mxu0 %v5736_v42  ;;  %v5805_v42 = vld [vmem:[%s7801_s3 + $0x6e4] ss:$16 sps:$4 sm:$0xff]  }
 0x19d   :  { %3840 = vmatpush1.bf16.msra.mxu1 %v5731_v27  ;;  %v5800_v27 = vld [vmem:[%s7801_s3 + $0x6c8] ss:$16 sps:$4 sm:$0xff]  }
 0x19e   :  { %3841 = vmatprep.subr.bf16.mxu1 %v5739_v30 }
 0x19f   :  { %4045 = vmatpush1.bf16.msra.mxu0 %v5734_v31  ;;  %v5803_v31 = vld [vmem:[%s7801_s3 + $0x6e0] ss:$16 sps:$4 sm:$0xff]  }
 0x1a0   :  { %4046 = vmatprep.subr.bf16.mxu0 %v5742_v32 }
 0x1a1   :  { %3842 = vmatpush1.bf16.msra.mxu1 %v5737_v33 }
 0x1a2   :  { %3843 = vmatprep.subr.bf16.mxu1 %v5745_v36  ;;  %v5809_v36 = vld [vmem:[%s7801_s3 + $0x700] ss:$16 sps:$4 sm:$0xff]  }
 0x1a3   :  { %4047 = vmatpush1.bf16.msra.mxu0 %v5740_v37  ;;  %v5814_v37 = vld [vmem:[%s7801_s3 + $0x70c] ss:$16 sps:$4 sm:$0xff]  }
 0x1a4   :  { %4048 = vmatprep.subr.bf16.mxu0 %v5748_v39  ;;  %v5817_v39 = vld [vmem:[%s7801_s3 + $0x724] ss:$16 sps:$4 sm:$0xff]  }
 0x1a5   :  { %3844 = vmatpush1.bf16.msra.mxu1 %v5743_v46  ;;  %v5812_v46 = vld [vmem:[%s7801_s3 + $0x708] ss:$16 sps:$4 sm:$0xff]  }
 0x1a6   :  { %3845 = vmatprep.subr.bf16.mxu1 %v5751_v43  ;;  %v5823_v43 = vld [vmem:[%s7801_s3 + $0x744] ss:$16 sps:$4 sm:$0xff]  }
 0x1a7   :  { %4049 = vmatpush1.bf16.msra.mxu0 %v5746_v44  ;;  %v5818_v44 = vld [vmem:[%s7801_s3 + $0x728] ss:$16 sps:$4 sm:$0xff]  }
 0x1a8   :  { %4050 = vmatprep.subr.bf16.mxu0 %v5754_v45  ;;  %v5826_v45 = vld [vmem:[%s7801_s3 + $0x74c] ss:$16 sps:$4 sm:$0xff]  }
 0x1a9   :  { %3846 = vmatpush1.bf16.msra.mxu1 %v5749_v38  ;;  %v5821_v38 = vld [vmem:[%s7801_s3 + $0x740] ss:$16 sps:$4 sm:$0xff]  }
 0x1aa   :  { %3847 = vmatprep.subr.bf16.mxu1 %v5757_v52  ;;  %v5832_v52 = vld [vmem:[%s7801_s3 + $0x76c] ss:$16 sps:$4 sm:$0xff]  }
 0x1ab   :  { %4051 = vmatpush1.bf16.msra.mxu0 %v5752_v53  ;;  %v5827_v53 = vld [vmem:[%s7801_s3 + $0x760] ss:$16 sps:$4 sm:$0xff]  }
 0x1ac   :  { %4052 = vmatprep.subr.bf16.mxu0 %v5760_v54  ;;  %v259_v54 = vsub.s32 6, %v6094_v25  ;;  %v5984_v25 = vld [vmem:[%s7803_s5 + $0xb8] sm:$0xff]  }
 0x1ad   :  { %3848 = vmatpush1.bf16.msra.mxu1 %v5755_v55  ;;  %v5835_v55 = vld [vmem:[%s7801_s3 + $0x784] ss:$16 sps:$4 sm:$0xff]  }
 0x1ae   :  { %3858 = vmatprep.subr.bf16.mxu1 %v5763_v58  ;;  %v5838_v58 = vld [vmem:[%s7801_s3 + $0x78c] ss:$16 sps:$4 sm:$0xff]  }
 0x1af   :  { %4053 = vmatpush1.bf16.msra.mxu0 %v5758_v59  ;;  %v5833_v59 = vld [vmem:[%s7801_s3 + $0x780] ss:$16 sps:$4 sm:$0xff]  }
 0x1b0   :  { %3850 = vmatmul.mubr.bf16.vlgmr.msra.gmra.mrb[8].mxu1 %v1787_v63  ;;  %4063 = vmatprep.subr.bf16.mxu0 %v5766_v60  ;;  %v5985_v60 = vld [vmem:[%s7802_s2] sm:$0xff] }
 0x1b1   :  { %3859 = vmatpush1.bf16.msra.mxu1 %v5761_v61  ;;  %3890 = vmatprep.mubr.bf16.mxu1 %v1790_v62  ;;  %v260_v61 = vrot.slane %v5985_v60, %v259_v54  ;;  %v5896_v54 = vld [vmem:[%s7801_s3 + $0x8c8] ss:$16 sps:$4 sm:$0xff]   ;;  %v5910_v60 = vld [vmem:[%s7801_s3 + $0x90c] ss:$16 sps:$4 sm:$0xff]  }
 0x1b2   :  { %4055 = vmatmul.mubr.bf16.vlgmr.msra.gmra.mrb[12].mxu0 %v1787_v63  ;;  %3860 = vmatprep.subr.bf16.mxu1 %v5769_v0  ;;  %v272_v63 = vrot.slane %v7439_v57, %v6860_v49  ;;  %v5836_v0 = vld [vmem:[%s7801_s3 + $0x788] ss:$16 sps:$4 sm:$0xff]  }
 0x1b3   :  { %4064 = vmatpush1.bf16.msra.mxu0 %v5764_v1  ;;  %4095 = vmatprep.mubr.bf16.mxu0 %v1790_v62  ;;  %v5841_v62 = vld [vmem:[%s7801_s3 + $0x7a4] ss:$16 sps:$4 sm:$0xff]   ;;  %v5844_v1 = vld [vmem:[%s7801_s3 + $0x7ac] ss:$16 sps:$4 sm:$0xff]  }
 0x1b4   :  { %4065 = vmatprep.subr.bf16.mxu0 %v5772_v3  ;;  %v5839_v3 = vld [vmem:[%s7801_s3 + $0x7a0] ss:$16 sps:$4 sm:$0xff]  }
 0x1b5   :  { %3861 = vmatpush1.bf16.msra.mxu1 %v5767_v4  ;;  %v5111_v4 = vadd.f32 %v7169_v5, %v260_v61  ;;  %v5845_v5 = vld [vmem:[%s7801_s3 + $0x7c0] ss:$16 sps:$4 sm:$0xff]  }
 0x1b6   :  { %3862 = vmatprep.subr.bf16.mxu1 %v5775_v7  ;;  %v5905_v61 = vld [vmem:[%s7801_s3 + $0x900] ss:$16 sps:$4 sm:$0xff]  }
 0x1b7   :  { %4066 = vmatpush1.bf16.msra.mxu0 %v5770_v6  ;;  %v5847_v6 = vld [vmem:[%s7801_s3 + $0x7c4] ss:$16 sps:$4 sm:$0xff]  }
 0x1b8   :  { %4067 = vmatprep.subr.bf16.mxu0 %v5778_v9  ;;  %v5850_v9 = vld [vmem:[%s7801_s3 + $0x7cc] ss:$16 sps:$4 sm:$0xff]  }
 0x1b9   :  { %3863 = vmatpush1.bf16.msra.mxu1 %v5773_v8  ;;  %v5842_v8 = vld [vmem:[%s7801_s3 + $0x7a8] ss:$16 sps:$4 sm:$0xff]  }
 0x1ba   :  { %3864 = vmatprep.subr.bf16.mxu1 %v5781_v51  ;;  %v5853_v51 = vld [vmem:[%s7801_s3 + $0x7e4] ss:$16 sps:$4 sm:$0xff]  }
 0x1bb   :  { %4068 = vmatpush1.bf16.msra.mxu0 %v5776_v10  ;;  %v1769_v10 = vmax.f32 %v5111_v4, 0.0  ;;  %v5914_v4 = vld [vmem:[%s7801_s3 + $0x928] ss:$16 sps:$4 sm:$0xff]  }
 0x1bc   :  { %4069 = vmatprep.subr.bf16.mxu0 %v5784_v12  ;;  %v5848_v12 = vld [vmem:[%s7801_s3 + $0x7c8] ss:$16 sps:$4 sm:$0xff]  }
 0x1bd   :  { %3865 = vmatpush1.bf16.msra.mxu1 %v5779_v17 }
 0x1be   :  { %3866 = vmatprep.subr.bf16.mxu1 %v5787_v24  ;;  %v5851_v24 = vld [vmem:[%s7801_s3 + $0x7e0] ss:$16 sps:$4 sm:$0xff]  }
 0x1bf   :  { %4070 = vmatpush1.bf16.msra.mxu0 %v5782_v13  ;;  %v5856_v13 = vld [vmem:[%s7801_s3 + $0x7ec] ss:$16 sps:$4 sm:$0xff]  }
 0x1c0   :  { %4071 = vmatprep.subr.bf16.mxu0 %v5790_v14  ;;  %v1779_v14 = vmin.f32 %v1769_v10, 6.0  ;;  %v5923_v10 = vld [vmem:[%s7801_s3 + $0x960] ss:$16 sps:$4 sm:$0xff]  }
 0x1c1   :  { %3867 = vmatpush1.bf16.msra.mxu1 %v5785_v15  ;;  %v5859_v15 = vld [vmem:[%s7801_s3 + $0x804] ss:$16 sps:$4 sm:$0xff]  }
 0x1c2   :  { %3868 = vmatprep.subr.bf16.mxu1 %v5793_v18  ;;  %v5854_v18 = vld [vmem:[%s7801_s3 + $0x7e8] ss:$16 sps:$4 sm:$0xff]  }
 0x1c3   :  { %4072 = vmatpush1.bf16.msra.mxu0 %v5788_v16 }
 0x1c4   :  { %4073 = vmatprep.subr.bf16.mxu0 %v5796_v19  ;;  %v5862_v19 = vld [vmem:[%s7801_s3 + $0x80c] ss:$16 sps:$4 sm:$0xff]  }
 0x1c5   :  { %3869 = vmatpush1.bf16.msra.mxu1 %v5791_v20  ;;  %v7371_v28 = vpop.f32.mrb[8].mxu0  ;;  %v5857_v20 = vld [vmem:[%s7801_s3 + $0x800] ss:$16 sps:$4 sm:$0xff]  }
 0x1c6   :  { %3870 = vmatprep.subr.bf16.mxu1 %v5799_v22  ;;  %v7376_v30 = vpop.f32.mrb[9].mxu0  ;;  %v5865_v22 = vld [vmem:[%s7801_s3 + $0x824] ss:$16 sps:$4 sm:$0xff]  }
 0x1c7   :  { %4074 = vmatpush1.bf16.msra.mxu0 %v5794_v21  ;;  %v1760_v32 = vpop.f32.mrb[10].mxu0  ;;  %v5114_v7 = vadd.f32 %v7376_v30, %v272_v63  ;;  %v1789_v21 = vpack.c.bf16 %v1779_v14, %v1779_v14  ;;  %v5866_v30 = vld [vmem:[%s7801_s3 + $0x828] ss:$16 sps:$4 sm:$0xff]   ;;  %v5937_v14 = vld [vmem:[%s7801_s3 + $0x9a4] ss:$16 sps:$4 sm:$0xff]  }
 0x1c8   :  { %4075 = vmatprep.subr.bf16.mxu0 %v5802_v23  ;;  %v1761_v33 = vpop.f32.mrb[11].mxu0  ;;  %v5869_v32 = vld [vmem:[%s7801_s3 + $0x840] ss:$16 sps:$4 sm:$0xff]   ;;  %v5908_v63 = vld [vmem:[%s7801_s3 + $0x908] ss:$16 sps:$4 sm:$0xff]  }
 0x1c9   :  { %3871 = vmatpush1.bf16.msra.mxu1 %v5797_v26  ;;  %v1772_v17 = vmax.f32 %v5114_v7, 0.0  ;;  %v5860_v26 = vld [vmem:[%s7801_s3 + $0x808] ss:$16 sps:$4 sm:$0xff]   ;;  %v5877_v33 = vld [vmem:[%s7801_s3 + $0x864] ss:$16 sps:$4 sm:$0xff]  }
 0x1ca   :  { %3872 = vmatprep.subr.bf16.mxu1 %v5805_v42  ;;  %v5868_v42 = vld [vmem:[%s7801_s3 + $0x82c] ss:$16 sps:$4 sm:$0xff]   ;;  %v5917_v7 = vld [vmem:[%s7801_s3 + $0x940] ss:$16 sps:$4 sm:$0xff]  }
 0x1cb   :  { %4076 = vmatpush1.bf16.msra.mxu0 %v5800_v27  ;;  %v1782_v16 = vmin.f32 %v1772_v17, 6.0  ;;  %v5863_v27 = vld [vmem:[%s7801_s3 + $0x820] ss:$16 sps:$4 sm:$0xff]   ;;  %v5926_v17 = vld [vmem:[%s7801_s3 + $0x968] ss:$16 sps:$4 sm:$0xff]  }
 0x1cc   :  { %4077 = vmatprep.subr.bf16.mxu0 %v5808_v29  ;;  %v5871_v29 = vld [vmem:[%s7801_s3 + $0x844] ss:$16 sps:$4 sm:$0xff]  }
 0x1cd   :  { %3873 = vmatpush1.bf16.msra.mxu1 %v5803_v31  ;;  %v1792_v23 = vpack.c.bf16 %v1782_v16, %v1782_v16  ;;  %v5874_v31 = vld [vmem:[%s7801_s3 + $0x84c] ss:$16 sps:$4 sm:$0xff]  }
 0x1ce   :  { %3874 = vmatprep.subr.bf16.mxu1 %v5811_v35  ;;  %v5880_v35 = vld [vmem:[%s7801_s3 + $0x86c] ss:$16 sps:$4 sm:$0xff]  }
 0x1cf   :  { %4078 = vmatpush1.bf16.msra.mxu0 %v5806_v34  ;;  %v5872_v34 = vld [vmem:[%s7801_s3 + $0x848] ss:$16 sps:$4 sm:$0xff]   ;;  %v5940_v16 = vld [vmem:[%s7801_s3 + $0x9ac] ss:$16 sps:$4 sm:$0xff]  }
 0x1d0   :  { %4079 = vmatprep.subr.bf16.mxu0 %v5814_v37  ;;  %v5883_v37 = vld [vmem:[%s7801_s3 + $0x884] ss:$16 sps:$4 sm:$0xff]  }
 0x1d1   :  { %3875 = vmatpush1.bf16.msra.mxu1 %v5809_v36  ;;  %v5875_v36 = vld [vmem:[%s7801_s3 + $0x860] ss:$16 sps:$4 sm:$0xff]  }
 0x1d2   :  { %3876 = vmatprep.subr.bf16.mxu1 %v5817_v39  ;;  %v5878_v39 = vld [vmem:[%s7801_s3 + $0x868] ss:$16 sps:$4 sm:$0xff]  }
 0x1d3   :  { %4080 = vmatpush1.bf16.msra.mxu0 %v5812_v46  ;;  %v5886_v46 = vld [vmem:[%s7801_s3 + $0x88c] ss:$16 sps:$4 sm:$0xff]  }
 0x1d4   :  { %4081 = vmatprep.subr.bf16.mxu0 %v5820_v40  ;;  %v5881_v40 = vld [vmem:[%s7801_s3 + $0x880] ss:$16 sps:$4 sm:$0xff]  }
 0x1d5   :  { %3877 = vmatpush1.bf16.msra.mxu1 %v5815_v41  ;;  %v5889_v41 = vld [vmem:[%s7801_s3 + $0x8a4] ss:$16 sps:$4 sm:$0xff]  }
 0x1d6   :  { %3878 = vmatprep.subr.bf16.mxu1 %v5823_v43  ;;  %v5884_v43 = vld [vmem:[%s7801_s3 + $0x888] ss:$16 sps:$4 sm:$0xff]  }
 0x1d7   :  { %4082 = vmatpush1.bf16.msra.mxu0 %v5818_v44  ;;  %v5892_v44 = vld [vmem:[%s7801_s3 + $0x8ac] ss:$16 sps:$4 sm:$0xff]  }
 0x1d8   :  { %4083 = vmatprep.subr.bf16.mxu0 %v5826_v45  ;;  %v5887_v45 = vld [vmem:[%s7801_s3 + $0x8a0] ss:$16 sps:$4 sm:$0xff]  }
 0x1d9   :  { %3879 = vmatpush1.bf16.msra.mxu1 %v5821_v38  ;;  %v5895_v38 = vld [vmem:[%s7801_s3 + $0x8c4] ss:$16 sps:$4 sm:$0xff]  }
 0x1da   :  { %3880 = vmatprep.subr.bf16.mxu1 %v5829_v48  ;;  %v5890_v48 = vld [vmem:[%s7801_s3 + $0x8a8] ss:$16 sps:$4 sm:$0xff]  }
 0x1db   :  { %4084 = vmatpush1.bf16.msra.mxu0 %v5824_v50  ;;  %v5898_v50 = vld [vmem:[%s7801_s3 + $0x8cc] ss:$16 sps:$4 sm:$0xff]  }
 0x1dc   :  { %4085 = vmatprep.subr.bf16.mxu0 %v5832_v52  ;;  %v5893_v52 = vld [vmem:[%s7801_s3 + $0x8c0] ss:$16 sps:$4 sm:$0xff]  }
 0x1dd   :  { %3881 = vmatpush1.bf16.msra.mxu1 %v5827_v53  ;;  %v5901_v53 = vld [vmem:[%s7801_s3 + $0x8e4] ss:$16 sps:$4 sm:$0xff]  }
 0x1de   :  { %3882 = vmatprep.subr.bf16.mxu1 %v5835_v55  ;;  %v5904_v55 = vld [vmem:[%s7801_s3 + $0x8ec] ss:$16 sps:$4 sm:$0xff]  }
 0x1df   :  { %4086 = vmatpush1.bf16.msra.mxu0 %v5830_v56  ;;  %v5899_v56 = vld [vmem:[%s7801_s3 + $0x8e0] ss:$16 sps:$4 sm:$0xff]  }
 0x1e0   :  { %4087 = vmatprep.subr.bf16.mxu0 %v5838_v58  ;;  %v5907_v58 = vld [vmem:[%s7801_s3 + $0x904] ss:$16 sps:$4 sm:$0xff]  }
 0x1e1   :  { %3883 = vmatpush1.bf16.msra.mxu1 %v5833_v59  ;;  %v5902_v59 = vld [vmem:[%s7801_s3 + $0x8e8] ss:$16 sps:$4 sm:$0xff]  }
 0x1e2   :  { %3884 = vmatprep.subr.bf16.mxu1 %v5841_v62  ;;  %v5913_v62 = vld [vmem:[%s7801_s3 + $0x924] ss:$16 sps:$4 sm:$0xff]  }
 0x1e3   :  { %4088 = vmatpush1.bf16.msra.mxu0 %v5836_v0  ;;  %v5916_v0 = vld [vmem:[%s7801_s3 + $0x92c] ss:$16 sps:$4 sm:$0xff]  }
 0x1e4   :  { %4089 = vmatprep.subr.bf16.mxu0 %v5844_v1  ;;  %v5911_v1 = vld [vmem:[%s7801_s3 + $0x920] ss:$16 sps:$4 sm:$0xff]  }
 0x1e5   :  { %3885 = vmatpush1.bf16.msra.mxu1 %v5839_v3  ;;  %v5919_v3 = vld [vmem:[%s7801_s3 + $0x944] ss:$16 sps:$4 sm:$0xff]  }
 0x1e6   :  { %3886 = vmatprep.subr.bf16.mxu1 %v5847_v6  ;;  %v5922_v6 = vld [vmem:[%s7801_s3 + $0x94c] ss:$16 sps:$4 sm:$0xff]  }
 0x1e7   :  { %4090 = vmatpush1.bf16.msra.mxu0 %v5842_v8  ;;  %v5925_v8 = vld [vmem:[%s7801_s3 + $0x964] ss:$16 sps:$4 sm:$0xff]  }
 0x1e8   :  { %4091 = vmatprep.subr.bf16.mxu0 %v5850_v9  ;;  %v5920_v9 = vld [vmem:[%s7801_s3 + $0x948] ss:$16 sps:$4 sm:$0xff]  }
 0x1e9   :  { %3887 = vmatpush1.bf16.msra.mxu1 %v5845_v5  ;;  %v5928_v5 = vld [vmem:[%s7801_s3 + $0x96c] ss:$16 sps:$4 sm:$0xff]  }
 0x1ea   :  { %3888 = vmatprep.subr.bf16.mxu1 %v5853_v51  ;;  %v5931_v51 = vld [vmem:[%s7801_s3 + $0x984] ss:$16 sps:$4 sm:$0xff]  }
 0x1eb   :  { %4092 = vmatpush1.bf16.msra.mxu0 %v5848_v12  ;;  %v5934_v12 = vld [vmem:[%s7801_s3 + $0x98c] ss:$16 sps:$4 sm:$0xff]  }
 0x1ec   :  { %4093 = vmatprep.subr.bf16.mxu0 %v5856_v13  ;;  %v5929_v13 = vld [vmem:[%s7801_s3 + $0x980] ss:$16 sps:$4 sm:$0xff]  }
 0x1ed   :  { %3889 = vmatpush1.bf16.msra.mxu1 %v5851_v24  ;;  %v268_v24 = vrot.slane %v7439_v57, %v6854_v47  ;;  %v5935_v57 = vld [vmem:[%s7801_s3 + $0x9a0] ss:$16 sps:$4 sm:$0xff]  }
 0x1ee   :  { %3899 = vmatprep.subr.bf16.mxu1 %v5859_v15  ;;  %v5932_v15 = vld [vmem:[%s7801_s3 + $0x988] ss:$16 sps:$4 sm:$0xff]  }
 0x1ef   :  { %4094 = vmatpush1.bf16.msra.mxu0 %v5854_v18  ;;  %v5113_v18 = vadd.f32 %v7371_v28, %v268_v24  ;;  %v5941_v28 = vld [vmem:[%s7801_s3 + $0x9c0] ss:$16 sps:$4 sm:$0xff]   ;;  %v5976_v24 = vld [vmem:[%s7803_s5 + $0x98] sm:$0xff]  }
 0x1f0   :  { %3891 = vmatmul.mubr.bf16.vlgmr.msra.gmra.mrb[8].mxu1 %v1789_v21  ;;  %4104 = vmatprep.subr.bf16.mxu0 %v5862_v19  ;;  %v5943_v19 = vld [vmem:[%s7801_s3 + $0x9c4] ss:$16 sps:$4 sm:$0xff]  }
 0x1f1   :  { %3900 = vmatpush1.bf16.msra.mxu1 %v5857_v20  ;;  %3931 = vmatprep.mubr.bf16.mxu1 %v1792_v23  ;;  %v5938_v20 = vld [vmem:[%s7801_s3 + $0x9a8] ss:$16 sps:$4 sm:$0xff]  }
 0x1f2   :  { %4096 = vmatmul.mubr.bf16.vlgmr.msra.gmra.mrb[12].mxu0 %v1789_v21  ;;  %3901 = vmatprep.subr.bf16.mxu1 %v5865_v22  ;;  %v5946_v21 = vld [vmem:[%s7801_s3 + $0x9cc] ss:$16 sps:$4 sm:$0xff]   ;;  %v1771_v22 = vmax.f32 %v5113_v18, 0.0 }
 0x1f3   :  { %4105 = vmatpush1.bf16.msra.mxu0 %v5860_v26  ;;  %4136 = vmatprep.mubr.bf16.mxu0 %v1792_v23  ;;  %v5949_v23 = vld [vmem:[%s7801_s3 + $0x9e4] ss:$16 sps:$4 sm:$0xff]   ;;  %v5944_v26 = vld [vmem:[%s7801_s3 + $0x9c8] ss:$16 sps:$4 sm:$0xff]  }
 0x1f4   :  { %4106 = vmatprep.subr.bf16.mxu0 %v5868_v42  ;;  %v5952_v42 = vld [vmem:[%s7801_s3 + $0x9ec] ss:$16 sps:$4 sm:$0xff]  }
 0x1f5   :  { %3902 = vmatpush1.bf16.msra.mxu1 %v5863_v27  ;;  %v5947_v27 = vld [vmem:[%s7801_s3 + $0x9e0] ss:$16 sps:$4 sm:$0xff]  }
 0x1f6   :  { %3903 = vmatprep.subr.bf16.mxu1 %v5871_v29  ;;  %v1781_v29 = vmin.f32 %v1771_v22, 6.0 }
 0x1f7   :  { %4107 = vmatpush1.bf16.msra.mxu0 %v5866_v30  ;;  %v5953_v30 = vld [vmem:[%s7803_s5 + $0x40] sm:$0xff]  }
 0x1f8   :  { %4108 = vmatprep.subr.bf16.mxu0 %v5874_v31  ;;  %v5950_v31 = vld [vmem:[%s7801_s3 + $0x9e8] ss:$16 sps:$4 sm:$0xff]  }
 0x1f9   :  { %3904 = vmatpush1.bf16.msra.mxu1 %v5869_v32  ;;  %v5954_v32 = vld [vmem:[%s7803_s5] sm:$0xff]  }
 0x1fa   :  { %3905 = vmatprep.subr.bf16.mxu1 %v5877_v33  ;;  %v1791_v33 = vpack.c.bf16 %v1781_v29, %v1781_v29 }
 0x1fb   :  { %4109 = vmatpush1.bf16.msra.mxu0 %v5872_v34  ;;  %v5955_v34 = vld [vmem:[%s7803_s5 + $0x48] sm:$0xff]  }
 0x1fc   :  { %4110 = vmatprep.subr.bf16.mxu0 %v5880_v35  ;;  %v5956_v35 = vld [vmem:[%s7803_s5 + $0x8] sm:$0xff]  }
 0x1fd   :  { %3906 = vmatpush1.bf16.msra.mxu1 %v5875_v36  ;;  %v5957_v36 = vld [vmem:[%s7803_s5 + $0x50] sm:$0xff]  }
 0x1fe   :  { %3907 = vmatprep.subr.bf16.mxu1 %v5883_v37  ;;  %v5958_v37 = vld [vmem:[%s7803_s5 + $0x10] sm:$0xff]  }
 0x1ff   :  { %4111 = vmatpush1.bf16.msra.mxu0 %v5878_v39  ;;  %v5959_v39 = vld [vmem:[%s7803_s5 + $0x58] sm:$0xff]  }
 0x200   :  { %4112 = vmatprep.subr.bf16.mxu0 %v5886_v46  ;;  %v5960_v46 = vld [vmem:[%s7803_s5 + $0x18] sm:$0xff]  }
 0x201   :  { %3908 = vmatpush1.bf16.msra.mxu1 %v5881_v40  ;;  %v5961_v40 = vld [vmem:[%s7803_s5 + $0x60] sm:$0xff]  }
 0x202   :  { %3909 = vmatprep.subr.bf16.mxu1 %v5889_v41  ;;  %v5962_v41 = vld [vmem:[%s7803_s5 + $0x20] sm:$0xff]  }
 0x203   :  { %4113 = vmatpush1.bf16.msra.mxu0 %v5884_v43  ;;  %v5963_v43 = vld [vmem:[%s7803_s5 + $0x68] sm:$0xff]  }
 0x204   :  { %4114 = vmatprep.subr.bf16.mxu0 %v5892_v44  ;;  %v5964_v44 = vld [vmem:[%s7803_s5 + $0x28] sm:$0xff]  }
 0x205   :  { %3910 = vmatpush1.bf16.msra.mxu1 %v5887_v45  ;;  %v5965_v45 = vld [vmem:[%s7803_s5 + $0x70] sm:$0xff]  }
 0x206   :  { %3911 = vmatprep.subr.bf16.mxu1 %v5895_v38  ;;  %v5966_v38 = vld [vmem:[%s7803_s5 + $0x30] sm:$0xff]  }
 0x207   :  { %4115 = vmatpush1.bf16.msra.mxu0 %v5890_v48  ;;  %v5967_v48 = vld [vmem:[%s7803_s5 + $0x78] sm:$0xff]  }
 0x208   :  { %4116 = vmatprep.subr.bf16.mxu0 %v5898_v50  ;;  %v5968_v50 = vld [vmem:[%s7803_s5 + $0x38] sm:$0xff]  }
 0x209   :  { %3912 = vmatpush1.bf16.msra.mxu1 %v5893_v52  ;;  %v5969_v52 = vld [vmem:[%s7803_s5 + $0xc0] sm:$0xff]  }
 0x20a   :  { %3913 = vmatprep.subr.bf16.mxu1 %v5901_v53  ;;  %v2113_v53 = vld [vmem:[%s7804_s4] sm:$0xf] }
 0x20b   :  { %4117 = vmatpush1.bf16.msra.mxu0 %v5896_v54  ;;  %v2118_v54 = vrot.slane %v2113_v53, %v6854_v47  ;;  %v2126_v18 = vrot.slane %v2113_v53, %v243_v2 }
 0x20c   :  { %4118 = vmatprep.subr.bf16.mxu0 %v5904_v55  ;;  %v2122_v55 = vrot.slane %v2113_v53, %v6860_v49  ;;  %v5970_v49 = vld [vmem:[%s7803_s5 + $0x80] sm:$0xff]  }
 0x20d   :  { %3914 = vmatpush1.bf16.msra.mxu1 %v5899_v56 }
 0x20e   :  { %3915 = vmatprep.subr.bf16.mxu1 %v5907_v58  ;;  %v2130_v58 = vrot.slane %v2113_v53, %v247_v11  ;;  %v5971_v11 = vld [vmem:[%s7803_s5 + $0xc8] sm:$0xff]  }
 0x20f   :  { %4119 = vmatpush1.bf16.msra.mxu0 %v5902_v59 }
 0x210   :  { %4120 = vmatprep.subr.bf16.mxu0 %v5910_v60 }
 0x211   :  { %3916 = vmatpush1.bf16.msra.mxu1 %v5905_v61 }
 0x212   :  { %3917 = vmatprep.subr.bf16.mxu1 %v5913_v62 }
 0x213   :  { %4121 = vmatpush1.bf16.msra.mxu0 %v5908_v63 }
 0x214   :  { %4122 = vmatprep.subr.bf16.mxu0 %v5916_v0 }
 0x215   :  { %3918 = vmatpush1.bf16.msra.mxu1 %v5911_v1 }
 0x216   :  { %3919 = vmatprep.subr.bf16.mxu1 %v5919_v3 }
 0x217   :  { %4123 = vmatpush1.bf16.msra.mxu0 %v5914_v4 }
 0x218   :  { %4124 = vmatprep.subr.bf16.mxu0 %v5922_v6 }
 0x219   :  { %3920 = vmatpush1.bf16.msra.mxu1 %v5917_v7 }
 0x21a   :  { %3921 = vmatprep.subr.bf16.mxu1 %v5925_v8 }
 0x21b   :  { %4125 = vmatpush1.bf16.msra.mxu0 %v5920_v9 }
 0x21c   :  { %4126 = vmatprep.subr.bf16.mxu0 %v5928_v5 }
 0x21d   :  { %3922 = vmatpush1.bf16.msra.mxu1 %v5923_v10 }
 0x21e   :  { %3923 = vmatprep.subr.bf16.mxu1 %v5931_v51  ;;  %v5972_v51 = vld [vmem:[%s7803_s5 + $0x88] sm:$0xff]  }
 0x21f   :  { %4127 = vmatpush1.bf16.msra.mxu0 %v5926_v17  ;;  %v5973_v17 = vld [vmem:[%s7803_s5 + $0xd0] sm:$0xff]  }
 0x220   :  { %4128 = vmatprep.subr.bf16.mxu0 %v5934_v12  ;;  %v5974_v12 = vld [vmem:[%s7803_s5 + $0x90] sm:$0xff]  }
 0x221   :  { %3924 = vmatpush1.bf16.msra.mxu1 %v5929_v13  ;;  %v5975_v13 = vld [vmem:[%s7803_s5 + $0xd8] sm:$0xff]  }
 0x222   :  { %3925 = vmatprep.subr.bf16.mxu1 %v5937_v14  ;;  %v5977_v14 = vld [vmem:[%s7803_s5 + $0xe0] sm:$0xff]  }
 0x223   :  { %4129 = vmatpush1.bf16.msra.mxu0 %v5932_v15  ;;  %v5978_v15 = vld [vmem:[%s7803_s5 + $0xa0] sm:$0xff]  }
 0x224   :  { %4130 = vmatprep.subr.bf16.mxu0 %v5940_v16  ;;  %v5979_v16 = vld [vmem:[%s7803_s5 + $0xe8] sm:$0xff]  }
 0x225   :  { %3926 = vmatpush1.bf16.msra.mxu1 %v5935_v57  ;;  %v5980_v57 = vld [vmem:[%s7803_s5 + $0xa8] sm:$0xff]  }
 0x226   :  { %3927 = vmatprep.subr.bf16.mxu1 %v5943_v19  ;;  %v5981_v19 = vld [vmem:[%s7803_s5 + $0xf0] sm:$0xff]  }
 0x227   :  { %4131 = vmatpush1.bf16.msra.mxu0 %v5938_v20  ;;  %v5982_v20 = vld [vmem:[%s7803_s5 + $0xb0] sm:$0xff]  }
 0x228   :  { %4132 = vmatprep.subr.bf16.mxu0 %v5946_v21 }
 0x229   :  { %3928 = vmatpush1.bf16.msra.mxu1 %v5941_v28  ;;  %v5983_v28 = vld [vmem:[%s7803_s5 + $0xf8] sm:$0xff]  }
 0x22a   :  { %3929 = vmatprep.subr.bf16.mxu1 %v5949_v23 }
 0x22b   :  { %4133 = vmatpush1.bf16.msra.mxu0 %v5944_v26 }
 0x22c   :  { %4134 = vmatprep.subr.bf16.mxu0 %v5952_v42 }
 0x22d   :  { %3930 = vmatpush1.bf16.msra.mxu1 %v5947_v27 }
 0x22e   :  { %5061 = vmatprep.subr.bf16.mxu1 %v5953_v30  ;;  %v5028_v30 = vld [vmem:[%s7805_s6] ss:$0 sm:$0xff] }
 0x22f   :  { %4135 = vmatpush1.bf16.msra.mxu0 %v5950_v31 }
 0x230   :  { %3932 = vmatmul.mubr.bf16.vlgmr.msra.gmra.mrb[8].mxu1 %v1791_v33 }
 0x231   :  { %5062 = vmatpush3.bf16.msra.mxu1 %v5954_v32 }
 0x232   :  { %4137 = vmatmul.mubr.bf16.vlgmr.msra.gmra.mrb[12].mxu0 %v1791_v33  ;;  %5063 = vmatprep.subr.bf16.mxu1 %v5955_v34 }
 0x235   :  { %5064 = vmatpush3.bf16.msra.mxu1 %v5956_v35 }
 0x236   :  { %5065 = vmatprep.subr.bf16.mxu1 %v5957_v36 }
 0x239   :  { %5066 = vmatpush3.bf16.msra.mxu1 %v5958_v37 }
 0x23a   :  { %5067 = vmatprep.subr.bf16.mxu1 %v5959_v39 }
 0x23d   :  { %5068 = vmatpush3.bf16.msra.mxu1 %v5960_v46 }
 0x23e   :  { %5069 = vmatprep.subr.bf16.mxu1 %v5961_v40 }
 0x241   :  { %5070 = vmatpush3.bf16.msra.mxu1 %v5962_v41 }
 0x242   :  { %5071 = vmatprep.subr.bf16.mxu1 %v5963_v43 }
 0x245   :  { %5072 = vmatpush3.bf16.msra.mxu1 %v5964_v44 }
 0x246   :  { %5073 = vmatprep.subr.bf16.mxu1 %v5965_v45 }
 0x249   :  { %5074 = vmatpush3.bf16.msra.mxu1 %v5966_v38 }
 0x24a   :  { %5075 = vmatprep.subr.bf16.mxu1 %v5967_v48 }
 0x24d   :  { %5076 = vmatpush3.bf16.msra.mxu1 %v5968_v50 }
 0x24e   :  { %5083 = vmatprep.subr.bf16.mxu1 %v5969_v52 }
 0x303   :  { %v3933_v56 = vpop.f32.mrb[8].mxu1 }
 0x304   :  { %v5115_v59 = vadd.f32 %v3933_v56, %v2118_v54  ;;  %v3935_v60 = vpop.f32.mrb[9].mxu1 }
 0x305   :  { %v5116_v61 = vadd.f32 %v3935_v60, %v2122_v55  ;;  %v3937_v62 = vpop.f32.mrb[10].mxu1  ;;  %v4138_v63 = vpop.f32.mrb[12].mxu0 }
 0x306   :  { %v4145_v0 = vmax.f32 %v5115_v59, 0.0  ;;  %v3938_v1 = vpop.f32.mrb[11].mxu1  ;;  %v4140_v3 = vpop.f32.mrb[13].mxu0  ;;  %v5117_v21 = vadd.f32 %v4138_v63, %v2126_v18 }
 0x307   :  { %v4146_v4 = vmax.f32 %v5116_v61, 0.0  ;;  %v5118_v6 = vadd.f32 %v4140_v3, %v2130_v58  ;;  %v4142_v7 = vpop.f32.mrb[14].mxu0 }
 0x308   :  { %v4143_v8 = vpop.f32.mrb[15].mxu0  ;;  %v4149_v5 = vpack.c.bf16 %v4145_v0, %v4145_v0  ;;  %v4147_v2 = vmax.f32 %v5117_v21, 0.0 }
 0x309   :  { %v4150_v9 = vpack.c.bf16 %v4146_v4, %v4146_v4  ;;  %v4148_v47 = vmax.f32 %v5118_v6, 0.0 }
 0x30a   :  { %v4151_v22 = vpack.c.bf16 %v4147_v2, %v4147_v2 }
 0x30b   :  { %v4152_v10 = vpack.c.bf16 %v4148_v47, %v4148_v47  ;;  %4448 = vmatprep.mubr.bf16.mxu1 %v4150_v9 }
 0x30c   :  { %4449 = vmatmul.mubr.bf16.vlgmr.msra.gmra.mrb[12].mxu1 %v4149_v5 }
 0x30d   :  { %5084 = vmatpush3.bf16.msra.mxu1 %v5970_v49  ;;  %4488 = vmatprep.mubr.bf16.mxu1 %v4152_v10 }
 0x30e   :  { %5085 = vmatprep.subr.bf16.mxu1 %v5971_v11 }
 0x311   :  { %5086 = vmatpush3.bf16.msra.mxu1 %v5972_v51 }
 0x312   :  { %5087 = vmatprep.subr.bf16.mxu1 %v5973_v17 }
 0x315   :  { %5088 = vmatpush3.bf16.msra.mxu1 %v5974_v12 }
 0x316   :  { %5089 = vmatprep.subr.bf16.mxu1 %v5975_v13 }
 0x319   :  { %5090 = vmatpush3.bf16.msra.mxu1 %v5976_v24 }
 0x31a   :  { %5091 = vmatprep.subr.bf16.mxu1 %v5977_v14 }
 0x31d   :  { %5092 = vmatpush3.bf16.msra.mxu1 %v5978_v15 }
 0x31e   :  { %5093 = vmatprep.subr.bf16.mxu1 %v5979_v16 }
 0x321   :  { %5094 = vmatpush3.bf16.msra.mxu1 %v5980_v57 }
 0x322   :  { %5095 = vmatprep.subr.bf16.mxu1 %v5981_v19 }
 0x325   :  { %5096 = vmatpush3.bf16.msra.mxu1 %v5982_v20 }
 0x326   :  { %5097 = vmatprep.subr.bf16.mxu1 %v5983_v28 }
 0x329   :  { %5098 = vmatpush3.bf16.msra.mxu1 %v5984_v25 }
 0x32c   :  { %4489 = vmatmul.mubr.bf16.vlgmr.msra.gmra.mrb[16].mxu1 %v4151_v22 }
 0x3df   :  { %v5077_v23 = vpop.f32.mrb[12].mxu1 }
 0x3e0   :  { %v5078_v26 = vpop.f32.mrb[13].mxu1 }
 0x3e1   :  { %v5079_v42 = vadd.f32 %v5078_v26, %v5077_v23  ;;  %v5080_v27 = vpop.f32.mrb[14].mxu1 }
 0x3e2   :  { %v5081_v29 = vpop.f32.mrb[15].mxu1 }
 0x3e3   :  { %v4451_v33 = vadd.f32 %v5079_v42, %v5028_v30 }
 0x3ff   :  { %v5099_v31 = vpop.f32.mrb[16].mxu1 }
 0x400   :  { %v5100_v32 = vpop.f32.mrb[17].mxu1 }
 0x401   :  { %v5101_v34 = vadd.f32 %v5100_v32, %v5099_v31  ;;  %v5102_v35 = vpop.f32.mrb[18].mxu1 }
 0x402   :  { %v5103_v36 = vpop.f32.mrb[19].mxu1 }
 0x403   :  { %v4491_v37 = vadd.f32 %v5101_v34, %v4451_v33 }
 0x405   :  { %4496 = vst [vmem:[%s7806_s7] sm:$0x3] %v4491_v37 }

</bundles_post_ra>
